<compile_context>
chip_gen: v6e
topology: v6e:2x2x1
jax: 0.10.0
libtpu: 0.0.40
codegen_flags: <defaults>
</compile_context>

<pallas_src>
import functools

import jax
import jax.numpy as jnp
from jax.experimental import pallas as pl
from jax.experimental.pallas import tpu as pltpu


_VMEM_LIMIT = 32 * 1024 * 1024   # safe on v5e/v6e (128 MiB) and v7x (64 MiB)


def _num_tensorcores():
    """2 on v7x (dual TensorCore per chip); 1 on v5e / v6e."""
    try:
        kind = jax.devices()[0].device_kind.lower()
    except Exception:
        return 1
    return 2 if "v7" in kind else 1


# ---------------------------------------------------------------------------
# Pallas kernel #1: fused transposed conv-GEMM + (BN-folded) shift + ReLU
#   out(Cout, M_tile) = W(Cout, K) @ patchesT(K, M_tile) + shift
# ---------------------------------------------------------------------------
def _convT_gemm_kernel(w_ref, p_ref, shift_ref, o_ref):
    acc = jnp.dot(w_ref[...], p_ref[...], preferred_element_type=jnp.float32)
    y = jnp.maximum(acc + shift_ref[...], 0.0)        # f32 epilogue (v5e-safe)
    o_ref[...] = y.astype(o_ref.dtype)


def fused_convT_gemm(w_lhs, patches_t, shift):
    cout, k = w_lhs.shape
    k2, m = patches_t.shape
    assert k == k2

    # Single grid block on single-TC chips; 2-way M split only on v7x and only
    # for the large-M layers so both TensorCores get meaningful work.
    n_m = 1
    if _num_tensorcores() >= 2 and m >= 1024 and (m // 2) % 128 == 0:
        n_m = 2
    tm = m // n_m

    cost = pl.CostEstimate(
        flops=2 * cout * k * m,
        transcendentals=0,
        bytes_accessed=2 * (k * m + cout * k + cout * m) + 4 * cout,
    )

    return pl.pallas_call(
        _convT_gemm_kernel,
        out_shape=jax.ShapeDtypeStruct((cout, m), jnp.bfloat16),
        grid_spec=pltpu.PrefetchScalarGridSpec(
            num_scalar_prefetch=0,
            grid=(n_m,),
            in_specs=[
                pl.BlockSpec((cout, k), lambda mi: (0, 0)),
                pl.BlockSpec((k, tm), lambda mi: (0, mi)),
                pl.BlockSpec((cout, 1), lambda mi: (0, 0)),
            ],
            out_specs=pl.BlockSpec((cout, tm), lambda mi: (0, mi)),
        ),
        compiler_params=pltpu.CompilerParams(
            dimension_semantics=("parallel",),
            vmem_limit_bytes=_VMEM_LIMIT,
        ),
        cost_estimate=cost,
    )(w_lhs, patches_t, shift)


# ---------------------------------------------------------------------------
# Pallas kernel #2: fused tail = layer 5 (3x3x3 conv + BN + ReLU) + layer 6
# ((1,4,4)/(1,4,4) conv + bias + sigmoid).  Layer 5's activation stays in VMEM.
#   y5(C5, M5)   = relu(W5 @ P5 + s5)
#   logits(1,NT) = sum_c[(y5 * w6e)] @ sel      (head covers its 4x4 input)
# ---------------------------------------------------------------------------
def _tail_kernel(w5_ref, p5_ref, s5_ref, w6_ref, sel_ref, b6_ref, o_ref):
    y5 = jnp.dot(w5_ref[...], p5_ref[...], preferred_element_type=jnp.float32)
    y5 = jnp.maximum(y5 + s5_ref[...], 0.0)                     # (C5, M5) f32
    prod = y5 * w6_ref[...]                                     # (C5, M5) f32
    colsum = jnp.sum(prod, axis=0, keepdims=True)               # (1, M5)
    logits = jnp.dot(colsum, sel_ref[...],
                     preferred_element_type=jnp.float32)        # (1, N*T)
    o_ref[...] = jax.nn.sigmoid(logits + b6_ref[...])           # f32 epilogue


def fused_tail(w5, p5, s5, w6e, sel, b6):
    c5, k5 = w5.shape
    _, m5 = p5.shape
    nt = sel.shape[1]
    cost = pl.CostEstimate(
        flops=2 * c5 * k5 * m5 + 3 * c5 * m5 + 2 * m5 * nt,
        transcendentals=nt,
        bytes_accessed=2 * (c5 * k5 + k5 * m5)
        + 4 * (c5 + c5 * m5 + m5 * nt + 1 + nt),
    )
    return pl.pallas_call(
        _tail_kernel,
        out_shape=jax.ShapeDtypeStruct((1, nt), jnp.float32),
        compiler_params=pltpu.CompilerParams(vmem_limit_bytes=_VMEM_LIMIT),
        cost_estimate=cost,
    )(w5, p5, s5, w6e, sel, b6)


# ---------------------------------------------------------------------------
# Plain-JAX glue: transposed im2col from channel-major (C, N, T, H, W) input
# (pad + strided slices + stack only — no transposes, bf16 throughout)
# ---------------------------------------------------------------------------
def im2col_t_3d(x_cm, ksize, stride, padding):
    kt, kh, kw = ksize
    st, sh, sw = stride
    pt, ph, pw = padding
    c, n, t, h, w = x_cm.shape
    xp = jnp.pad(x_cm, ((0, 0), (0, 0), (pt, pt), (ph, ph), (pw, pw)))
    to = (t + 2 * pt - kt) // st + 1
    ho = (h + 2 * ph - kh) // sh + 1
    wo = (w + 2 * pw - kw) // sw + 1

    taps = []
    for dt in range(kt):
        for dh in range(kh):
            for dw in range(kw):
                taps.append(xp[:, :,
                               dt:dt + to * st:st,
                               dh:dh + ho * sh:sh,
                               dw:dw + wo * sw:sw])      # (C, N, To, Ho, Wo)
    p = jnp.stack(taps, axis=0)                          # (taps, C, N, To, Ho, Wo)
    return p.reshape(kt * kh * kw * c, n * to * ho * wo), (n, to, ho, wo)


# ---------------------------------------------------------------------------
# Deterministic parameter init (mirrors module __init__ shapes, ndf=16)
# ---------------------------------------------------------------------------
NDF = 16
CONV_CFG = [
    # (cin, cout, ksize, padding, stride, act, has_norm)
    (3, NDF, (3, 3, 3), (1, 1, 1), (1, 2, 2), "relu", True),
    (NDF, NDF * 2, (3, 3, 3), (1, 1, 1), (1, 2, 2), "relu", True),
    (NDF * 2, NDF * 4, (3, 3, 3), (1, 1, 1), (1, 2, 2), "relu", True),
    (NDF * 4, NDF * 8, (3, 3, 3), (1, 1, 1), (1, 2, 2), "relu", True),
    (NDF * 8, NDF * 8, (3, 3, 3), (1, 1, 1), (1, 2, 2), "relu", True),
]
FINAL_CFG = (NDF * 8, 1, (1, 4, 4), (0, 0, 0), (1, 4, 4), "sigmoid", False)


def make_layer_params(key, cin, cout, ksize, has_norm, eps=1e-5):
    kt, kh, kw = ksize
    kw_, kb_, kg_, kbt_, km_, kv_ = jax.random.split(key, 6)
    fan_in = cin * kt * kh * kw
    # PyTorch Conv3d weight layout (Cout, Cin, kT, kH, kW)
    w = jax.random.normal(kw_, (cout, cin, kt, kh, kw), jnp.float32) * (fan_in ** -0.5)
    b = jax.random.normal(kb_, (cout,), jnp.float32) * 0.05
    if has_norm:
        gamma = 1.0 + 0.1 * jax.random.normal(kg_, (cout,), jnp.float32)
        beta = 0.1 * jax.random.normal(kbt_, (cout,), jnp.float32)
        mean = 0.1 * jax.random.normal(km_, (cout,), jnp.float32)
        var = 0.5 + jax.random.uniform(kv_, (cout,), jnp.float32)
        scale = gamma / jnp.sqrt(var + eps)
        shift = beta + (b - mean) * scale
    else:
        scale = jnp.ones((cout,), jnp.float32)
        shift = b
    # (Cout, K) with K tap-major-then-Cin (matches im2col_t_3d); BN scale folded.
    w_lhs = jnp.transpose(w, (0, 2, 3, 4, 1)).reshape(cout, kt * kh * kw * cin)
    w_lhs = (w_lhs * scale[:, None]).astype(jnp.bfloat16)
    return {"w": w_lhs, "shift": shift.reshape(cout, 1)}


def make_final_params(key, cin, cout, ksize):
    kt, kh, kw = ksize
    kw_, kb_ = jax.random.split(key)
    fan_in = cin * kt * kh * kw
    w = jax.random.normal(kw_, (cout, cin, kt, kh, kw), jnp.float32) * (fan_in ** -0.5)
    b = jax.random.normal(kb_, (cout,), jnp.float32) * 0.05
    return {"w": w, "b": b}


def build_d2_params(key):
    keys = jax.random.split(key, len(CONV_CFG) + 1)
    conv = [make_layer_params(k, cin, cout, ks, norm)
            for k, (cin, cout, ks, _, _, _, norm) in zip(keys[:-1], CONV_CFG)]
    cin, cout, ks, _, _, _, _ = FINAL_CFG
    final = make_final_params(keys[-1], cin, cout, ks)
    return {"conv": conv, "final": final}


# ---------------------------------------------------------------------------
# Forward pass
# ---------------------------------------------------------------------------
def d2_forward(x_ncdhw, params):
    # NCDHW -> internal channel-major (C, N, T, H, W) bf16, converted once.
    y = jnp.transpose(x_ncdhw, (1, 0, 2, 3, 4)).astype(jnp.bfloat16)

    # Layers 1-4: one fused conv-GEMM + shift + ReLU Pallas call each.
    for p, (_, _, ks, pad, st, _, _) in zip(params["conv"][:4], CONV_CFG[:4]):
        patches_t, (nb, to, ho, wo) = im2col_t_3d(y, ks, st, pad)
        cout = p["w"].shape[0]
        y = fused_convT_gemm(p["w"], patches_t, p["shift"])
        y = y.reshape(cout, nb, to, ho, wo)     # channel-major: no transpose

    # Layers 5 + 6 fused in a single Pallas call.
    p5 = params["conv"][4]
    _, _, ks5, pad5, st5, _, _ = CONV_CFG[4]
    patches5, (nb, to, ho, wo) = im2col_t_3d(y, ks5, st5, pad5)
    _, _, (kt6, kh6, kw6), _, _, _, _ = FINAL_CFG
    # Head kernel covers its whole spatial input -> a plain contraction.
    assert kt6 == 1 and ho == kh6 and wo == kw6, (ho, wo)
    nt = nb * to
    hw = ho * wo
    w6_flat = params["final"]["w"][0, :, 0].reshape(-1, hw).astype(jnp.float32)
    w6e = jnp.tile(w6_flat, (1, nt))                                # (C5, M5)
    sel = (jnp.arange(nt * hw)[:, None] // hw
           == jnp.arange(nt)[None, :]).astype(jnp.float32)          # (M5, NT)
    b6 = params["final"]["b"].reshape(1, 1).astype(jnp.float32)
    logits = fused_tail(p5["w"], patches5, p5["shift"], w6e, sel, b6)  # (1, NT)
    return logits.reshape(nb, to)[:, None, :, None, None]           # (N,1,T,1,1)


# ---------------------------------------------------------------------------
if __name__ == "__main__":
    key = jax.random.PRNGKey(0)
    k_param, k_x = jax.random.split(key)

    # Smallest spatial size for which all six stride steps are valid:
    # 128 -> 64 -> 32 -> 16 -> 8 -> 4 -> (1,4,4)/(1,4,4) -> 1
    N, C, T, H, W = 1, 3, 2, 128, 128
    x = jax.random.normal(k_x, (N, C, T, H, W), jnp.float32)

    params = build_d2_params(k_param)
    fwd = jax.jit(d2_forward)
    y = jax.block_until_ready(fwd(x, params))

    assert y.shape == (N, 1, T, 1, 1), y.shape
    assert bool(jnp.all(jnp.isfinite(y)))
    assert bool(jnp.all((y >= 0.0) & (y <= 1.0)))
    print("KERNEL_OK")
</pallas_src>

<mosaic_0001>
module attributes {stable_mosaic.version = 11 : i64} {
  func.func @_convT_gemm_kernel(%arg0: i32, %arg1: memref<16x81xbf16, #tpu.memory_space<vmem>>, %arg2: memref<81x8192xbf16, #tpu.memory_space<vmem>>, %arg3: memref<16x1xf32, #tpu.memory_space<vmem>>, %arg4: memref<16x8192xbf16, #tpu.memory_space<vmem>>) attributes {dimension_semantics = [#tpu.dimension_semantics<parallel>], iteration_bounds = array<i64: 1>, scalar_prefetch = 0 : i64, scratch_operands = 0 : i64, tpu.core_type = #tpu.core_type<tc>, window_params = [{pipeline_mode = #tpu.pipeline_mode<synchronous>, transform_indices = @transform_0, window_bounds = array<i64: 16, 81>}, {transform_indices = @transform_1, window_bounds = array<i64: 81, 8192>}, {pipeline_mode = #tpu.pipeline_mode<synchronous>, transform_indices = @transform_2, window_bounds = array<i64: 16, 1>}, {transform_indices = @transform_3, window_bounds = array<i64: 16, 8192>}]} {
    %c0 = arith.constant 0 : index
    %c0_0 = arith.constant 0 : index
    %0 = vector.load %arg1[%c0, %c0_0] : memref<16x81xbf16, #tpu.memory_space<vmem>>, vector<16x81xbf16>
    %c0_1 = arith.constant 0 : index
    %c0_2 = arith.constant 0 : index
    %1 = vector.load %arg2[%c0_1, %c0_2] : memref<81x8192xbf16, #tpu.memory_space<vmem>>, vector<81x8192xbf16>
    %cst = arith.constant dense<0.000000e+00> : vector<16x8192xf32>
    %2 = tpu.matmul %0, %1, %cst {dimension_numbers = #tpu.dot_dimension_numbers<[1], [0], [0], [1], [0, 0, 1, 1], [], []>} : vector<16x81xbf16>, vector<81x8192xbf16>, vector<16x8192xf32> -> vector<16x8192xf32>
    %c0_3 = arith.constant 0 : index
    %c0_4 = arith.constant 0 : index
    %3 = vector.load %arg3[%c0_3, %c0_4] : memref<16x1xf32, #tpu.memory_space<vmem>>, vector<16x1xf32>
    %4 = vector.broadcast %3 : vector<16x1xf32> to vector<16x8192xf32>
    %5 = arith.addf %2, %4 : vector<16x8192xf32>
    %cst_5 = arith.constant 0.000000e+00 : f32
    %6 = vector.broadcast %cst_5 : f32 to vector<16x8192xf32>
    %7 = arith.maximumf %5, %6 : vector<16x8192xf32>
    %8 = arith.truncf %7 : vector<16x8192xf32> to vector<16x8192xbf16>
    %c0_6 = arith.constant 0 : index
    %c0_7 = arith.constant 0 : index
    %9 = vector.load %arg4[%c0_6, %c0_7] : memref<16x8192xbf16, #tpu.memory_space<vmem>>, vector<16x8192xbf16>
    tpu.vector_store %arg4[%c0_6, %c0_7], %8 {strides = array<i32>} : memref<16x8192xbf16, #tpu.memory_space<vmem>>, vector<16x8192xbf16>,
    return
  }
  func.func @transform_0(%arg0: i32) -> (i32, i32) {
    %c0_i32 = arith.constant 0 : i32
    %c0_i32_0 = arith.constant 0 : i32
    %c0_i32_1 = arith.constant 0 : i32
    return %c0_i32, %c0_i32_0 : i32, i32
  }
  func.func @transform_1(%arg0: i32) -> (i32, i32) {
    %c0_i32 = arith.constant 0 : i32
    %c0_i32_0 = arith.constant 0 : i32
    return %c0_i32, %arg0 : i32, i32
  }
  func.func @transform_2(%arg0: i32) -> (i32, i32) {
    %c0_i32 = arith.constant 0 : i32
    %c0_i32_0 = arith.constant 0 : i32
    %c0_i32_1 = arith.constant 0 : i32
    return %c0_i32, %c0_i32_0 : i32, i32
  }
  func.func @transform_3(%arg0: i32) -> (i32, i32) {
    %c0_i32 = arith.constant 0 : i32
    %c0_i32_0 = arith.constant 0 : i32
    return %c0_i32, %arg0 : i32, i32
  }
}

module attributes {stable_mosaic.version = 11 : i64} {
  func.func @_convT_gemm_kernel(%arg0: i32, %arg1: memref<32x432xbf16, #tpu.memory_space<vmem>>, %arg2: memref<432x2048xbf16, #tpu.memory_space<vmem>>, %arg3: memref<32x1xf32, #tpu.memory_space<vmem>>, %arg4: memref<32x2048xbf16, #tpu.memory_space<vmem>>) attributes {dimension_semantics = [#tpu.dimension_semantics<parallel>], iteration_bounds = array<i64: 1>, scalar_prefetch = 0 : i64, scratch_operands = 0 : i64, tpu.core_type = #tpu.core_type<tc>, window_params = [{pipeline_mode = #tpu.pipeline_mode<synchronous>, transform_indices = @transform_0, window_bounds = array<i64: 32, 432>}, {transform_indices = @transform_1, window_bounds = array<i64: 432, 2048>}, {pipeline_mode = #tpu.pipeline_mode<synchronous>, transform_indices = @transform_2, window_bounds = array<i64: 32, 1>}, {transform_indices = @transform_3, window_bounds = array<i64: 32, 2048>}]} {
    %c0 = arith.constant 0 : index
    %c0_0 = arith.constant 0 : index
    %0 = vector.load %arg1[%c0, %c0_0] : memref<32x432xbf16, #tpu.memory_space<vmem>>, vector<32x432xbf16>
    %c0_1 = arith.constant 0 : index
    %c0_2 = arith.constant 0 : index
    %1 = vector.load %arg2[%c0_1, %c0_2] : memref<432x2048xbf16, #tpu.memory_space<vmem>>, vector<432x2048xbf16>
    %cst = arith.constant dense<0.000000e+00> : vector<32x2048xf32>
    %2 = tpu.matmul %0, %1, %cst {dimension_numbers = #tpu.dot_dimension_numbers<[1], [0], [0], [1], [0, 0, 1, 1], [], []>} : vector<32x432xbf16>, vector<432x2048xbf16>, vector<32x2048xf32> -> vector<32x2048xf32>
    %c0_3 = arith.constant 0 : index
    %c0_4 = arith.constant 0 : index
    %3 = vector.load %arg3[%c0_3, %c0_4] : memref<32x1xf32, #tpu.memory_space<vmem>>, vector<32x1xf32>
    %4 = vector.broadcast %3 : vector<32x1xf32> to vector<32x2048xf32>
    %5 = arith.addf %2, %4 : vector<32x2048xf32>
    %cst_5 = arith.constant 0.000000e+00 : f32
    %6 = vector.broadcast %cst_5 : f32 to vector<32x2048xf32>
    %7 = arith.maximumf %5, %6 : vector<32x2048xf32>
    %8 = arith.truncf %7 : vector<32x2048xf32> to vector<32x2048xbf16>
    %c0_6 = arith.constant 0 : index
    %c0_7 = arith.constant 0 : index
    %9 = vector.load %arg4[%c0_6, %c0_7] : memref<32x2048xbf16, #tpu.memory_space<vmem>>, vector<32x2048xbf16>
    tpu.vector_store %arg4[%c0_6, %c0_7], %8 {strides = array<i32>} : memref<32x2048xbf16, #tpu.memory_space<vmem>>, vector<32x2048xbf16>,
    return
  }
  func.func @transform_0(%arg0: i32) -> (i32, i32) {
    %c0_i32 = arith.constant 0 : i32
    %c0_i32_0 = arith.constant 0 : i32
    %c0_i32_1 = arith.constant 0 : i32
    return %c0_i32, %c0_i32_0 : i32, i32
  }
  func.func @transform_1(%arg0: i32) -> (i32, i32) {
    %c0_i32 = arith.constant 0 : i32
    %c0_i32_0 = arith.constant 0 : i32
    return %c0_i32, %arg0 : i32, i32
  }
  func.func @transform_2(%arg0: i32) -> (i32, i32) {
    %c0_i32 = arith.constant 0 : i32
    %c0_i32_0 = arith.constant 0 : i32
    %c0_i32_1 = arith.constant 0 : i32
    return %c0_i32, %c0_i32_0 : i32, i32
  }
  func.func @transform_3(%arg0: i32) -> (i32, i32) {
    %c0_i32 = arith.constant 0 : i32
    %c0_i32_0 = arith.constant 0 : i32
    return %c0_i32, %arg0 : i32, i32
  }
}

module attributes {stable_mosaic.version = 11 : i64} {
  func.func @_convT_gemm_kernel(%arg0: i32, %arg1: memref<64x864xbf16, #tpu.memory_space<vmem>>, %arg2: memref<864x512xbf16, #tpu.memory_space<vmem>>, %arg3: memref<64x1xf32, #tpu.memory_space<vmem>>, %arg4: memref<64x512xbf16, #tpu.memory_space<vmem>>) attributes {dimension_semantics = [#tpu.dimension_semantics<parallel>], iteration_bounds = array<i64: 1>, scalar_prefetch = 0 : i64, scratch_operands = 0 : i64, tpu.core_type = #tpu.core_type<tc>, window_params = [{pipeline_mode = #tpu.pipeline_mode<synchronous>, transform_indices = @transform_0, window_bounds = array<i64: 64, 864>}, {transform_indices = @transform_1, window_bounds = array<i64: 864, 512>}, {pipeline_mode = #tpu.pipeline_mode<synchronous>, transform_indices = @transform_2, window_bounds = array<i64: 64, 1>}, {transform_indices = @transform_3, window_bounds = array<i64: 64, 512>}]} {
    %c0 = arith.constant 0 : index
    %c0_0 = arith.constant 0 : index
    %0 = vector.load %arg1[%c0, %c0_0] : memref<64x864xbf16, #tpu.memory_space<vmem>>, vector<64x864xbf16>
    %c0_1 = arith.constant 0 : index
    %c0_2 = arith.constant 0 : index
    %1 = vector.load %arg2[%c0_1, %c0_2] : memref<864x512xbf16, #tpu.memory_space<vmem>>, vector<864x512xbf16>
    %cst = arith.constant dense<0.000000e+00> : vector<64x512xf32>
    %2 = tpu.matmul %0, %1, %cst {dimension_numbers = #tpu.dot_dimension_numbers<[1], [0], [0], [1], [0, 0, 1, 1], [], []>} : vector<64x864xbf16>, vector<864x512xbf16>, vector<64x512xf32> -> vector<64x512xf32>
    %c0_3 = arith.constant 0 : index
    %c0_4 = arith.constant 0 : index
    %3 = vector.load %arg3[%c0_3, %c0_4] : memref<64x1xf32, #tpu.memory_space<vmem>>, vector<64x1xf32>
    %4 = vector.broadcast %3 : vector<64x1xf32> to vector<64x512xf32>
    %5 = arith.addf %2, %4 : vector<64x512xf32>
    %cst_5 = arith.constant 0.000000e+00 : f32
    %6 = vector.broadcast %cst_5 : f32 to vector<64x512xf32>
    %7 = arith.maximumf %5, %6 : vector<64x512xf32>
    %8 = arith.truncf %7 : vector<64x512xf32> to vector<64x512xbf16>
    %c0_6 = arith.constant 0 : index
    %c0_7 = arith.constant 0 : index
    %9 = vector.load %arg4[%c0_6, %c0_7] : memref<64x512xbf16, #tpu.memory_space<vmem>>, vector<64x512xbf16>
    tpu.vector_store %arg4[%c0_6, %c0_7], %8 {strides = array<i32>} : memref<64x512xbf16, #tpu.memory_space<vmem>>, vector<64x512xbf16>,
    return
  }
  func.func @transform_0(%arg0: i32) -> (i32, i32) {
    %c0_i32 = arith.constant 0 : i32
    %c0_i32_0 = arith.constant 0 : i32
    %c0_i32_1 = arith.constant 0 : i32
    return %c0_i32, %c0_i32_0 : i32, i32
  }
  func.func @transform_1(%arg0: i32) -> (i32, i32) {
    %c0_i32 = arith.constant 0 : i32
    %c0_i32_0 = arith.constant 0 : i32
    return %c0_i32, %arg0 : i32, i32
  }
  func.func @transform_2(%arg0: i32) -> (i32, i32) {
    %c0_i32 = arith.constant 0 : i32
    %c0_i32_0 = arith.constant 0 : i32
    %c0_i32_1 = arith.constant 0 : i32
    return %c0_i32, %c0_i32_0 : i32, i32
  }
  func.func @transform_3(%arg0: i32) -> (i32, i32) {
    %c0_i32 = arith.constant 0 : i32
    %c0_i32_0 = arith.constant 0 : i32
    return %c0_i32, %arg0 : i32, i32
  }
}

module attributes {stable_mosaic.version = 11 : i64} {
  func.func @_convT_gemm_kernel(%arg0: i32, %arg1: memref<128x1728xbf16, #tpu.memory_space<vmem>>, %arg2: memref<1728x128xbf16, #tpu.memory_space<vmem>>, %arg3: memref<128x1xf32, #tpu.memory_space<vmem>>, %arg4: memref<128x128xbf16, #tpu.memory_space<vmem>>) attributes {dimension_semantics = [#tpu.dimension_semantics<parallel>], iteration_bounds = array<i64: 1>, scalar_prefetch = 0 : i64, scratch_operands = 0 : i64, tpu.core_type = #tpu.core_type<tc>, window_params = [{pipeline_mode = #tpu.pipeline_mode<synchronous>, transform_indices = @transform_0, window_bounds = array<i64: 128, 1728>}, {transform_indices = @transform_1, window_bounds = array<i64: 1728, 128>}, {pipeline_mode = #tpu.pipeline_mode<synchronous>, transform_indices = @transform_2, window_bounds = array<i64: 128, 1>}, {transform_indices = @transform_3, window_bounds = array<i64: 128, 128>}]} {
    %c0 = arith.constant 0 : index
    %c0_0 = arith.constant 0 : index
    %0 = vector.load %arg1[%c0, %c0_0] : memref<128x1728xbf16, #tpu.memory_space<vmem>>, vector<128x1728xbf16>
    %c0_1 = arith.constant 0 : index
    %c0_2 = arith.constant 0 : index
    %1 = vector.load %arg2[%c0_1, %c0_2] : memref<1728x128xbf16, #tpu.memory_space<vmem>>, vector<1728x128xbf16>
    %cst = arith.constant dense<0.000000e+00> : vector<128x128xf32>
    %2 = tpu.matmul %0, %1, %cst {dimension_numbers = #tpu.dot_dimension_numbers<[1], [0], [0], [1], [0, 0, 1, 1], [], []>} : vector<128x1728xbf16>, vector<1728x128xbf16>, vector<128x128xf32> -> vector<128x128xf32>
    %c0_3 = arith.constant 0 : index
    %c0_4 = arith.constant 0 : index
    %3 = vector.load %arg3[%c0_3, %c0_4] : memref<128x1xf32, #tpu.memory_space<vmem>>, vector<128x1xf32>
    %4 = vector.broadcast %3 : vector<128x1xf32> to vector<128x128xf32>
    %5 = arith.addf %2, %4 : vector<128x128xf32>
    %cst_5 = arith.constant 0.000000e+00 : f32
    %6 = vector.broadcast %cst_5 : f32 to vector<128x128xf32>
    %7 = arith.maximumf %5, %6 : vector<128x128xf32>
    %8 = arith.truncf %7 : vector<128x128xf32> to vector<128x128xbf16>
    %c0_6 = arith.constant 0 : index
    %c0_7 = arith.constant 0 : index
    %9 = vector.load %arg4[%c0_6, %c0_7] : memref<128x128xbf16, #tpu.memory_space<vmem>>, vector<128x128xbf16>
    tpu.vector_store %arg4[%c0_6, %c0_7], %8 {strides = array<i32>} : memref<128x128xbf16, #tpu.memory_space<vmem>>, vector<128x128xbf16>,
    return
  }
  func.func @transform_0(%arg0: i32) -> (i32, i32) {
    %c0_i32 = arith.constant 0 : i32
    %c0_i32_0 = arith.constant 0 : i32
    %c0_i32_1 = arith.constant 0 : i32
    return %c0_i32, %c0_i32_0 : i32, i32
  }
  func.func @transform_1(%arg0: i32) -> (i32, i32) {
    %c0_i32 = arith.constant 0 : i32
    %c0_i32_0 = arith.constant 0 : i32
    return %c0_i32, %arg0 : i32, i32
  }
  func.func @transform_2(%arg0: i32) -> (i32, i32) {
    %c0_i32 = arith.constant 0 : i32
    %c0_i32_0 = arith.constant 0 : i32
    %c0_i32_1 = arith.constant 0 : i32
    return %c0_i32, %c0_i32_0 : i32, i32
  }
  func.func @transform_3(%arg0: i32) -> (i32, i32) {
    %c0_i32 = arith.constant 0 : i32
    %c0_i32_0 = arith.constant 0 : i32
    return %c0_i32, %arg0 : i32, i32
  }
}

module attributes {stable_mosaic.version = 11 : i64} {
  func.func @_tail_kernel(%arg0: memref<128x3456xbf16, #tpu.memory_space<vmem>>, %arg1: memref<3456x32xbf16, #tpu.memory_space<vmem>>, %arg2: memref<128x1xf32, #tpu.memory_space<vmem>>, %arg3: memref<128x32xf32, #tpu.memory_space<vmem>>, %arg4: memref<32x2xf32, #tpu.memory_space<vmem>>, %arg5: memref<1x1xf32, #tpu.memory_space<vmem>>, %arg6: memref<1x2xf32, #tpu.memory_space<vmem>>) attributes {dimension_semantics = [], scalar_prefetch = 0 : i64, scratch_operands = 0 : i64, tpu.core_type = #tpu.core_type<tc>} {
    %c0 = arith.constant 0 : index
    %c0_0 = arith.constant 0 : index
    %0 = vector.load %arg0[%c0, %c0_0] : memref<128x3456xbf16, #tpu.memory_space<vmem>>, vector<128x3456xbf16>
    %c0_1 = arith.constant 0 : index
    %c0_2 = arith.constant 0 : index
    %1 = vector.load %arg1[%c0_1, %c0_2] : memref<3456x32xbf16, #tpu.memory_space<vmem>>, vector<3456x32xbf16>
    %cst = arith.constant dense<0.000000e+00> : vector<128x32xf32>
    %2 = tpu.matmul %0, %1, %cst {dimension_numbers = #tpu.dot_dimension_numbers<[1], [0], [0], [1], [0, 0, 1, 1], [], []>} : vector<128x3456xbf16>, vector<3456x32xbf16>, vector<128x32xf32> -> vector<128x32xf32>
    %c0_3 = arith.constant 0 : index
    %c0_4 = arith.constant 0 : index
    %3 = vector.load %arg2[%c0_3, %c0_4] : memref<128x1xf32, #tpu.memory_space<vmem>>, vector<128x1xf32>
    %4 = vector.broadcast %3 : vector<128x1xf32> to vector<128x32xf32>
    %5 = arith.addf %2, %4 : vector<128x32xf32>
    %cst_5 = arith.constant 0.000000e+00 : f32
    %6 = vector.broadcast %cst_5 : f32 to vector<128x32xf32>
    %7 = arith.maximumf %5, %6 : vector<128x32xf32>
    %c0_6 = arith.constant 0 : index
    %c0_7 = arith.constant 0 : index
    %8 = vector.load %arg3[%c0_6, %c0_7] : memref<128x32xf32, #tpu.memory_space<vmem>>, vector<128x32xf32>
    %9 = arith.mulf %7, %8 : vector<128x32xf32>
    %cst_8 = arith.constant dense<0.000000e+00> : vector<32xf32>
    %10 = vector.multi_reduction <add>, %9, %cst_8 [0] : vector<128x32xf32> to vector<32xf32>
    %11 = vector.shape_cast %10 : vector<32xf32> to vector<1x32xf32>
    %c0_9 = arith.constant 0 : index
    %c0_10 = arith.constant 0 : index
    %12 = vector.load %arg4[%c0_9, %c0_10] : memref<32x2xf32, #tpu.memory_space<vmem>>, vector<32x2xf32>
    %cst_11 = arith.constant dense<0.000000e+00> : vector<1x2xf32>
    %13 = tpu.matmul %11, %12, %cst_11 {dimension_numbers = #tpu.dot_dimension_numbers<[1], [0], [0], [1], [0, 0, 1, 1], [], []>} : vector<1x32xf32>, vector<32x2xf32>, vector<1x2xf32> -> vector<1x2xf32>
    %c0_12 = arith.constant 0 : index
    %c0_13 = arith.constant 0 : index
    %14 = vector.load %arg5[%c0_12, %c0_13] : memref<1x1xf32, #tpu.memory_space<vmem>>, vector<1x1xf32>
    %15 = vector.broadcast %14 : vector<1x1xf32> to vector<1x2xf32>
    %16 = arith.addf %13, %15 : vector<1x2xf32>
    %17 = arith.negf %16 : vector<1x2xf32>
    %18 = math.exp %17 : vector<1x2xf32>
    %cst_14 = arith.constant 1.000000e+00 : f32
    %19 = vector.broadcast %cst_14 : f32 to vector<1x2xf32>
    %20 = arith.addf %19, %18 : vector<1x2xf32>
    %21 = arith.divf %19, %20 : vector<1x2xf32>
    %c0_15 = arith.constant 0 : index
    %c0_16 = arith.constant 0 : index
    %22 = vector.load %arg6[%c0_15, %c0_16] : memref<1x2xf32, #tpu.memory_space<vmem>>, vector<1x2xf32>
    tpu.vector_store %arg6[%c0_15, %c0_16], %21 {strides = array<i32>} : memref<1x2xf32, #tpu.memory_space<vmem>>, vector<1x2xf32>,
    return
  }
}

</mosaic_0001>

<bundles_post_ra>
// kernel: d2_forward.5
= control target key start
LH: loop header
LB: loop body
LE: loop exit
PB: predicated region body
PF: predicated region fallthrough
CT: control target
= control target key end

     0   :  { %vm2150_vm0 = vcmask 1040384   ;;  %v4915_v1 = vmov 0   ;;  %vm2146_vm1 = vcmask 662528   ;;  %s6501_s1 = inlined_call_operand.vmem [shape: bf16[81,8192], index: 1, kind: input, shape index: {}]   ;;  %s6502_s0 = inlined_call_operand.vmem [shape: bf16[16,81], index: 0, kind: input, shape index: {}]   ;;  %s6503_s2 = inlined_call_operand.vmem [shape: f32[16,1], index: 2, kind: input, shape index: {}]   ;;  %s6504_s3 = inlined_call_operand.vmem [shape: bf16[16,8192], index: 3, kind: output, shape index: {}]  }
   0x1   :  { %v337_v0 = vld [vmem:[%s6501_s1 + $0xa00] sm:$0x11]  ;;  %v4940_v2 = vsel %vm2150_vm0, 65535, %v4915_v1  ;;  %v338_v3 = vld [vmem:[%s6501_s1 + $0xa08] sm:$0x11]  ;;  %2377 = vmatprep.mubr.bf16.mxu0 %v4915_v1  ;;  %2420 = vmatprep.mubr.bf16.mxu1 %v4915_v1  ;;  %v275_v60 = vld [vmem:[%s6501_s1 + $0x810] sm:$0xff] }
   0x2   :  { %v273_v4 = vld [vmem:[%s6501_s1 + $0x800] sm:$0xff]  ;;  %v4623_v5 = vcombine.high %v337_v0, %v337_v0  ;;  %v4625_v6 = vcombine.high %v338_v3, %v338_v3  ;;  %v4622_v7 = vcombine.low %v337_v0, %v337_v0  ;;  %v4624_v8 = vcombine.low %v338_v3, %v338_v3  ;;  %v274_v10 = vld [vmem:[%s6501_s1 + $0x808] sm:$0xff]  ;;  %4847 = vset.pattern.permute.xlu0 %v4915_v1  ;;  %v339_v46 = vld [vmem:[%s6501_s1 + $0xa10] sm:$0x11] }
   0x3   :  { %v305_v9 = vld [vmem:[%s6501_s1 + $0x900] sm:$0xff]  ;;  %v306_v11 = vld [vmem:[%s6501_s1 + $0x908] sm:$0xff]  ;;  %v340_v47 = vld [vmem:[%s6501_s1 + $0xa18] sm:$0x11]  ;;  %v4627_v52 = vcombine.high %v339_v46, %v339_v46  ;;  %v4626_v56 = vcombine.low %v339_v46, %v339_v46 }
   0x4   :  { %v4559_v12 = vcombine.high %v273_v4, %v305_v9  ;;  %v4561_v13 = vcombine.high %v274_v10, %v306_v11  ;;  %v2157_v14 = vand.u32 %v4623_v5, %v4940_v2  ;;  %v2163_v15 = vand.u32 %v4625_v6, %v4940_v2  ;;  %v209_v18 = vld [vmem:[%s6501_s1 + $0x600] sm:$0xff]  ;;  %v210_v20 = vld [vmem:[%s6501_s1 + $0x608] sm:$0xff]  ;;  %v307_v61 = vld [vmem:[%s6501_s1 + $0x910] sm:$0xff] }
   0x5   :  { %v2154_v16 = vand.u32 %v4622_v7, %v4940_v2  ;;  %v2160_v17 = vand.u32 %v4624_v8, %v4940_v2  ;;  %v241_v19 = vld [vmem:[%s6501_s1 + $0x700] sm:$0xff]  ;;  %v242_v21 = vld [vmem:[%s6501_s1 + $0x708] sm:$0xff]  ;;  %v4558_v22 = vcombine.low %v273_v4, %v305_v9  ;;  %v4560_v23 = vcombine.low %v274_v10, %v306_v11  ;;  %v276_v62 = vld [vmem:[%s6501_s1 + $0x818] sm:$0xff] }
   0x6   :  { %2349 = vmatprep.subr.bf16.mxu0 %v2157_v14  ;;  %2392 = vmatprep.subr.bf16.mxu1 %v2163_v15  ;;  %v4495_v24 = vcombine.high %v209_v18, %v241_v19  ;;  %v4497_v25 = vcombine.high %v210_v20, %v242_v21  ;;  %v145_v26 = vld [vmem:[%s6501_s1 + $0x400] sm:$0xff]  ;;  %v146_v28 = vld [vmem:[%s6501_s1 + $0x408] sm:$0xff]  ;;  %v4494_v30 = vcombine.low %v209_v18, %v241_v19  ;;  %v308_v63 = vld [vmem:[%s6501_s1 + $0x918] sm:$0xff] }
   0x7   :  { %2350 = vmatpush1.bf16.msra.mxu0 %v2154_v16  ;;  %2393 = vmatpush1.bf16.msra.mxu1 %v2160_v17  ;;  %v177_v27 = vld [vmem:[%s6501_s1 + $0x500] sm:$0xff]  ;;  %v178_v29 = vld [vmem:[%s6501_s1 + $0x508] sm:$0xff]  ;;  %v4496_v31 = vcombine.low %v210_v20, %v242_v21  ;;  %v4629_v53 = vcombine.high %v340_v47, %v340_v47  ;;  %v4628_v57 = vcombine.low %v340_v47, %v340_v47  ;;  %v211_v7 = vld [vmem:[%s6501_s1 + $0x610] sm:$0xff] }
   0x8   :  { %2351 = vmatprep.subr.bf16.mxu0 %v4559_v12  ;;  %2394 = vmatprep.subr.bf16.mxu1 %v4561_v13  ;;  %v4431_v32 = vcombine.high %v145_v26, %v177_v27  ;;  %v4433_v33 = vcombine.high %v146_v28, %v178_v29  ;;  %v81_v34 = vld [vmem:[%s6501_s1 + $0x200] sm:$0xff]  ;;  %v82_v36 = vld [vmem:[%s6501_s1 + $0x208] sm:$0xff]  ;;  %v4430_v38 = vcombine.low %v145_v26, %v177_v27  ;;  %v243_v8 = vld [vmem:[%s6501_s1 + $0x710] sm:$0xff] }
   0x9   :  { %v113_v35 = vld [vmem:[%s6501_s1 + $0x300] sm:$0xff]  ;;  %v114_v37 = vld [vmem:[%s6501_s1 + $0x308] sm:$0xff]  ;;  %v4432_v39 = vcombine.low %v146_v28, %v178_v29  ;;  %v2169_v58 = vand.u32 %v4627_v52, %v4940_v2  ;;  %v2175_v59 = vand.u32 %v4629_v53, %v4940_v2  ;;  %v2166_v3 = vand.u32 %v4626_v56, %v4940_v2  ;;  %v212_v9 = vld [vmem:[%s6501_s1 + $0x618] sm:$0xff] }
   0xa   :  { %v4367_v40 = vcombine.high %v81_v34, %v113_v35  ;;  %v4369_v41 = vcombine.high %v82_v36, %v114_v37  ;;  %v17_v42 = vld [vmem:[%s6501_s1] sm:$0xff]  ;;  %v18_v44 = vld [vmem:[%s6501_s1 + $0x8] sm:$0xff]  ;;  %v4366_v48 = vcombine.low %v81_v34, %v113_v35  ;;  %v4368_v49 = vcombine.low %v82_v36, %v114_v37  ;;  %v244_v10 = vld [vmem:[%s6501_s1 + $0x718] sm:$0xff] }
   0xb   :  { %2352 = vmatpush1.bf16.msra.mxu0 %v4558_v22  ;;  %2395 = vmatpush1.bf16.msra.mxu1 %v4560_v23  ;;  %v49_v43 = vld [vmem:[%s6501_s1 + $0x100] sm:$0xff]  ;;  %v50_v45 = vld [vmem:[%s6501_s1 + $0x108] sm:$0xff]  ;;  %v2172_v4 = vand.u32 %v4628_v57, %v4940_v2  ;;  %v4563_v5 = vcombine.high %v275_v60, %v307_v61  ;;  %v4565_v6 = vcombine.high %v276_v62, %v308_v63  ;;  %v147_v16 = vld [vmem:[%s6501_s1 + $0x410] sm:$0xff] }
   0xc   :  { %2353 = vmatprep.subr.bf16.mxu0 %v4495_v24  ;;  %2396 = vmatprep.subr.bf16.mxu1 %v4497_v25  ;;  %v4303_v50 = vcombine.high %v17_v42, %v49_v43  ;;  %v4305_v51 = vcombine.high %v18_v44, %v50_v45  ;;  %v4302_v54 = vcombine.low %v17_v42, %v49_v43  ;;  %v5035_v0 = vld [vmem:[%s6502_s0] sm:$0xff]   ;;  %v179_v17 = vld [vmem:[%s6501_s1 + $0x510] sm:$0xff]  ;;  %v148_v18 = vld [vmem:[%s6501_s1 + $0x418] sm:$0xff] }
   0xd   :  { %v4304_v55 = vcombine.low %v18_v44, %v50_v45  ;;  %v4562_v11 = vcombine.low %v275_v60, %v307_v61  ;;  %v4564_v12 = vcombine.low %v276_v62, %v308_v63  ;;  %v369_v13 = vld [vmem:[%s6503_s2] sm:$0xff]  ;;  %v4499_v14 = vcombine.high %v211_v7, %v243_v8  ;;  %v180_v19 = vld [vmem:[%s6501_s1 + $0x518] sm:$0xff]  ;;  %v370_v22 = vld [vmem:[%s6503_s2 + $0x8] sm:$0xff] }
   0xe   :  { %v4501_v15 = vcombine.high %v212_v9, %v244_v10  ;;  %373 = vperm.xlu0 %4847, %v369_v13   ;;  %v4498_v20 = vcombine.low %v211_v7, %v243_v8  ;;  %v4500_v21 = vcombine.low %v212_v9, %v244_v10  ;;  %v4435_v23 = vcombine.high %v147_v16, %v179_v17  ;;  %v83_v25 = vld [vmem:[%s6501_s1 + $0x210] sm:$0xff]  ;;  %v84_v27 = vld [vmem:[%s6501_s1 + $0x218] sm:$0xff]  ;;  %v341_v37 = vld [vmem:[%s6501_s1 + $0xa20] sm:$0x11] }
   0xf   :  { %2354 = vmatpush1.bf16.msra.mxu0 %v4494_v30  ;;  %2397 = vmatpush1.bf16.msra.mxu1 %v4496_v31  ;;  %v4437_v24 = vcombine.high %v148_v18, %v180_v19  ;;  %v115_v26 = vld [vmem:[%s6501_s1 + $0x310] sm:$0xff]  ;;  %v116_v28 = vld [vmem:[%s6501_s1 + $0x318] sm:$0xff]  ;;  %v4434_v29 = vcombine.low %v147_v16, %v179_v17  ;;  %v4436_v30 = vcombine.low %v148_v18, %v180_v19  ;;  %v309_v52 = vld [vmem:[%s6501_s1 + $0x920] sm:$0xff] }
  0x10   :  { %2355 = vmatprep.subr.bf16.mxu0 %v4431_v32  ;;  %2398 = vmatprep.subr.bf16.mxu1 %v4433_v33  ;;  %v4371_v31 = vcombine.high %v83_v25, %v115_v26  ;;  %v4373_v32 = vcombine.high %v84_v27, %v116_v28  ;;  %v19_v33 = vld [vmem:[%s6501_s1 + $0x10] sm:$0xff]  ;;  %v20_v35 = vld [vmem:[%s6501_s1 + $0x18] sm:$0xff]  ;;  %v4631_v43 = vcombine.high %v341_v37, %v341_v37  ;;  %v278_v53 = vld [vmem:[%s6501_s1 + $0x828] sm:$0xff] }
  0x11   :  { %v51_v34 = vld [vmem:[%s6501_s1 + $0x110] sm:$0xff]  ;;  %v52_v36 = vld [vmem:[%s6501_s1 + $0x118] sm:$0xff]  ;;  %v4630_v47 = vcombine.low %v341_v37, %v341_v37  ;;  %v245_v60 = vld [vmem:[%s6501_s1 + $0x720] sm:$0xff] }
  0x12   :  { %378 = vperm.xlu0 %4847, %v370_v22   ;;  %v4309_v42 = vcombine.high %v20_v35, %v52_v36  ;;  %v4306_v45 = vcombine.low %v19_v33, %v51_v34  ;;  %v4308_v46 = vcombine.low %v20_v35, %v52_v36  ;;  %v214_v61 = vld [vmem:[%s6501_s1 + $0x628] sm:$0xff]  ;;  %v181_v7 = vld [vmem:[%s6501_s1 + $0x520] sm:$0xff] }
  0x13   :  { %2356 = vmatpush1.bf16.msra.mxu0 %v4430_v38  ;;  %2399 = vmatpush1.bf16.msra.mxu1 %v4432_v39  ;;  %v342_v38 = vld [vmem:[%s6501_s1 + $0xa28] sm:$0x11]  ;;  %v4370_v39 = vcombine.low %v83_v25, %v115_v26  ;;  %v21_v22 = vld [vmem:[%s6501_s1 + $0x20] sm:$0xff]  ;;  %v343_v26 = vld [vmem:[%s6501_s1 + $0xa30] sm:$0x11] }
  0x14   :  { %2357 = vmatprep.subr.bf16.mxu0 %v4367_v40  ;;  %2400 = vmatprep.subr.bf16.mxu1 %v4369_v41  ;;  %v4372_v40 = vcombine.low %v84_v27, %v116_v28  ;;  %v4307_v41 = vcombine.high %v19_v33, %v51_v34  ;;  %v4633_v44 = vcombine.high %v342_v38, %v342_v38  ;;  %v246_v62 = vld [vmem:[%s6501_s1 + $0x728] sm:$0xff]  ;;  %v344_v27 = vld [vmem:[%s6501_s1 + $0xa38] sm:$0x11] }
  0x15   :  { %v150_v8 = vld [vmem:[%s6501_s1 + $0x428] sm:$0xff]  ;;  %v4637_v33 = vcombine.high %v344_v27, %v344_v27  ;;  %v4634_v36 = vcombine.low %v343_v26, %v343_v26  ;;  %v4636_v37 = vcombine.low %v344_v27, %v344_v27 }
  0x16   :  { %v182_v9 = vld [vmem:[%s6501_s1 + $0x528] sm:$0xff] }
  0x17   :  { %2358 = vmatpush1.bf16.msra.mxu0 %v4366_v48  ;;  %2401 = vmatpush1.bf16.msra.mxu1 %v4368_v49  ;;  %v4632_v48 = vcombine.low %v342_v38, %v342_v38  ;;  %v2181_v49 = vand.u32 %v4631_v43, %v4940_v2  ;;  %v4441_v13 = vcombine.high %v150_v8, %v182_v9  ;;  %v86_v16 = vld [vmem:[%s6501_s1 + $0x228] sm:$0xff]  ;;  %v312_v43 = vld [vmem:[%s6501_s1 + $0x938] sm:$0xff] }
  0x18   :  { %2359 = vmatprep.subr.bf16.mxu0 %v4303_v50  ;;  %2402 = vmatprep.subr.bf16.mxu1 %v4305_v51  ;;  %v2187_v50 = vand.u32 %v4633_v44, %v4940_v2  ;;  %v277_v51 = vld [vmem:[%s6501_s1 + $0x820] sm:$0xff]  ;;  %v118_v17 = vld [vmem:[%s6501_s1 + $0x328] sm:$0xff]  ;;  %v4440_v19 = vcombine.low %v150_v8, %v182_v9  ;;  %v2190_v44 = vand.u32 %v4634_v36, %v4940_v2 }
  0x19   :  { %v2184_v56 = vand.u32 %v4632_v48, %v4940_v2  ;;  %v4567_v57 = vcombine.high %v277_v51, %v309_v52  ;;  %v4566_v63 = vcombine.low %v277_v51, %v309_v52  ;;  %v54_v25 = vld [vmem:[%s6501_s1 + $0x128] sm:$0xff]  ;;  %v215_v48 = vld [vmem:[%s6501_s1 + $0x630] sm:$0xff]  ;;  %v248_v51 = vld [vmem:[%s6501_s1 + $0x738] sm:$0xff] }
  0x1b   :  { %2360 = vmatpush1.bf16.msra.mxu0 %v4302_v54  ;;  %2403 = vmatpush1.bf16.msra.mxu1 %v4304_v55  ;;  %v310_v54 = vld [vmem:[%s6501_s1 + $0x928] sm:$0xff]  ;;  %v2178_v55 = vand.u32 %v4630_v47, %v4940_v2 }
  0x1c   :  { %2435 = vmatprep.subr.bf16.mxu0 %v2169_v58  ;;  %2478 = vmatprep.subr.bf16.mxu1 %v2175_v59  ;;  %v4569_v58 = vcombine.high %v278_v53, %v310_v54  ;;  %v213_v59 = vld [vmem:[%s6501_s1 + $0x620] sm:$0xff] }
  0x1d   :  { %v4502_v10 = vcombine.low %v213_v59, %v245_v60 }
  0x1e   :  { %4686 = vmatmul.mubr.msk.bf16.vlgmr.msra.gmra.mxu0 %vm2146_vm1, %v5035_v0  ;;  %4687 = vmatmul.mubr.msk.bf16.vlgmr.msra.gmra.mxu1 %vm2146_vm1, %v5035_v0 }
  0x1f   :  { %2436 = vmatpush1.bf16.msra.mxu0 %v2166_v3  ;;  %2479 = vmatpush1.bf16.msra.mxu1 %v2172_v4  ;;  %v4568_v3 = vcombine.low %v278_v53, %v310_v54  ;;  %v4503_v4 = vcombine.high %v213_v59, %v245_v60  ;;  %v184_v59 = vld [vmem:[%s6501_s1 + $0x538] sm:$0xff] }
  0x20   :  { %2437 = vmatprep.subr.bf16.mxu0 %v4563_v5  ;;  %2480 = vmatprep.subr.bf16.mxu1 %v4565_v6  ;;  %v4505_v5 = vcombine.high %v214_v61, %v246_v62  ;;  %v149_v6 = vld [vmem:[%s6501_s1 + $0x420] sm:$0xff] }
  0x21   :  { %2463 = vmatprep.mubr.bf16.mxu0 %v4915_v1  ;;  %2506 = vmatprep.mubr.bf16.mxu1 %v4915_v1  ;;  %v4438_v18 = vcombine.low %v149_v6, %v181_v7 }
  0x23   :  { %2438 = vmatpush1.bf16.msra.mxu0 %v4562_v11  ;;  %2481 = vmatpush1.bf16.msra.mxu1 %v4564_v12  ;;  %v4504_v11 = vcombine.low %v214_v61, %v246_v62  ;;  %v4439_v12 = vcombine.high %v149_v6, %v181_v7  ;;  %v120_v6 = vld [vmem:[%s6501_s1 + $0x338] sm:$0xff] }
  0x24   :  { %2439 = vmatprep.subr.bf16.mxu0 %v4499_v14  ;;  %2482 = vmatprep.subr.bf16.mxu1 %v4501_v15  ;;  %v85_v14 = vld [vmem:[%s6501_s1 + $0x220] sm:$0xff] }
  0x25   :  { %v117_v15 = vld [vmem:[%s6501_s1 + $0x320] sm:$0xff] }
  0x26   :  { %v4374_v28 = vcombine.low %v85_v14, %v117_v15 }
  0x27   :  { %2440 = vmatpush1.bf16.msra.mxu0 %v4498_v20  ;;  %2483 = vmatpush1.bf16.msra.mxu1 %v4500_v21  ;;  %v4375_v20 = vcombine.high %v85_v14, %v117_v15  ;;  %v4377_v21 = vcombine.high %v86_v16, %v118_v17  ;;  %v56_v14 = vld [vmem:[%s6501_s1 + $0x138] sm:$0xff]  ;;  %v345_v15 = vld [vmem:[%s6501_s1 + $0xa40] sm:$0x11] }
  0x28   :  { %2441 = vmatprep.subr.bf16.mxu0 %v4435_v23  ;;  %2484 = vmatprep.subr.bf16.mxu1 %v4437_v24  ;;  %v53_v23 = vld [vmem:[%s6501_s1 + $0x120] sm:$0xff]  ;;  %v22_v24 = vld [vmem:[%s6501_s1 + $0x28] sm:$0xff] }
  0x29   :  { %v4310_v34 = vcombine.low %v21_v22, %v53_v23  ;;  %v4312_v35 = vcombine.low %v22_v24, %v54_v25 }
  0x2b   :  { %2442 = vmatpush1.bf16.msra.mxu0 %v4434_v29  ;;  %2485 = vmatpush1.bf16.msra.mxu1 %v4436_v30  ;;  %v4376_v29 = vcombine.low %v86_v16, %v118_v17  ;;  %v4311_v30 = vcombine.high %v21_v22, %v53_v23  ;;  %v346_v16 = vld [vmem:[%s6501_s1 + $0xa48] sm:$0x11] }
  0x2c   :  { %2443 = vmatprep.subr.bf16.mxu0 %v4371_v31  ;;  %2486 = vmatprep.subr.bf16.mxu1 %v4373_v32  ;;  %v4313_v31 = vcombine.high %v22_v24, %v54_v25  ;;  %v4635_v32 = vcombine.high %v343_v26, %v343_v26  ;;  %v4641_v22 = vcombine.high %v346_v16, %v346_v16 }
  0x2d   :  { %v4638_v25 = vcombine.low %v345_v15, %v345_v15  ;;  %v4640_v26 = vcombine.low %v346_v16, %v346_v16 }
  0x2e   :  { %v2193_v38 = vand.u32 %v4635_v32, %v4940_v2  ;;  %v314_v32 = vld [vmem:[%s6501_s1 + $0x948] sm:$0xff] }
  0x2f   :  { %2444 = vmatpush1.bf16.msra.mxu0 %v4370_v39  ;;  %2487 = vmatpush1.bf16.msra.mxu1 %v4372_v40  ;;  %v2199_v39 = vand.u32 %v4637_v33, %v4940_v2  ;;  %v279_v40 = vld [vmem:[%s6501_s1 + $0x830] sm:$0xff]  ;;  %v2202_v33 = vand.u32 %v4638_v25, %v4940_v2 }
  0x30   :  { %2445 = vmatprep.subr.bf16.mxu0 %v4307_v41  ;;  %2488 = vmatprep.subr.bf16.mxu1 %v4309_v42  ;;  %v311_v41 = vld [vmem:[%s6501_s1 + $0x930] sm:$0xff]  ;;  %v280_v42 = vld [vmem:[%s6501_s1 + $0x838] sm:$0xff] }
  0x31   :  { %v4573_v47 = vcombine.high %v280_v42, %v312_v43  ;;  %v4570_v52 = vcombine.low %v279_v40, %v311_v41  ;;  %v4572_v53 = vcombine.low %v280_v42, %v312_v43 }
  0x33   :  { %2446 = vmatpush1.bf16.msra.mxu0 %v4306_v45  ;;  %2489 = vmatpush1.bf16.msra.mxu1 %v4308_v46  ;;  %v2196_v45 = vand.u32 %v4636_v37, %v4940_v2  ;;  %v4571_v46 = vcombine.high %v279_v40, %v311_v41  ;;  %v217_v37 = vld [vmem:[%s6501_s1 + $0x640] sm:$0xff]  ;;  %v250_v40 = vld [vmem:[%s6501_s1 + $0x748] sm:$0xff] }
  0x34   :  { %2521 = vmatprep.subr.bf16.mxu0 %v2181_v49  ;;  %2564 = vmatprep.subr.bf16.mxu1 %v2187_v50  ;;  %v247_v49 = vld [vmem:[%s6501_s1 + $0x730] sm:$0xff]  ;;  %v216_v50 = vld [vmem:[%s6501_s1 + $0x638] sm:$0xff] }
  0x35   :  { %v4507_v54 = vcombine.high %v215_v48, %v247_v49  ;;  %v4506_v60 = vcombine.low %v215_v48, %v247_v49  ;;  %v4508_v61 = vcombine.low %v216_v50, %v248_v51  ;;  %v186_v48 = vld [vmem:[%s6501_s1 + $0x548] sm:$0xff] }
  0x36   :  { %4688 = vmatmul.mubr.msk.bf16.vlgmr.msra.gmra.mxu0 %vm2146_vm1, %v5035_v0  ;;  %4689 = vmatmul.mubr.msk.bf16.vlgmr.msra.gmra.mxu1 %vm2146_vm1, %v5035_v0 }
  0x37   :  { %2522 = vmatpush1.bf16.msra.mxu0 %v2178_v55  ;;  %2565 = vmatpush1.bf16.msra.mxu1 %v2184_v56  ;;  %v4509_v55 = vcombine.high %v216_v50, %v248_v51  ;;  %v151_v56 = vld [vmem:[%s6501_s1 + $0x430] sm:$0xff] }
  0x38   :  { %2523 = vmatprep.subr.bf16.mxu0 %v4567_v57  ;;  %2566 = vmatprep.subr.bf16.mxu1 %v4569_v58  ;;  %v183_v57 = vld [vmem:[%s6501_s1 + $0x530] sm:$0xff]  ;;  %v152_v58 = vld [vmem:[%s6501_s1 + $0x438] sm:$0xff] }
  0x39   :  { %2549 = vmatprep.mubr.bf16.mxu0 %v4915_v1  ;;  %2592 = vmatprep.mubr.bf16.mxu1 %v4915_v1  ;;  %v4443_v62 = vcombine.high %v151_v56, %v183_v57  ;;  %v4442_v7 = vcombine.low %v151_v56, %v183_v57  ;;  %v4444_v8 = vcombine.low %v152_v58, %v184_v59  ;;  %v122_v56 = vld [vmem:[%s6501_s1 + $0x348] sm:$0xff] }
  0x3b   :  { %2524 = vmatpush1.bf16.msra.mxu0 %v4566_v63  ;;  %2567 = vmatpush1.bf16.msra.mxu1 %v4568_v3  ;;  %v4445_v63 = vcombine.high %v152_v58, %v184_v59  ;;  %v87_v3 = vld [vmem:[%s6501_s1 + $0x230] sm:$0xff] }
  0x3c   :  { %2525 = vmatprep.subr.bf16.mxu0 %v4503_v4  ;;  %2568 = vmatprep.subr.bf16.mxu1 %v4505_v5  ;;  %v119_v4 = vld [vmem:[%s6501_s1 + $0x330] sm:$0xff]  ;;  %v88_v5 = vld [vmem:[%s6501_s1 + $0x238] sm:$0xff] }
  0x3d   :  { %v4379_v9 = vcombine.high %v87_v3, %v119_v4  ;;  %v4378_v17 = vcombine.low %v87_v3, %v119_v4  ;;  %v58_v3 = vld [vmem:[%s6501_s1 + $0x148] sm:$0xff]  ;;  %v347_v4 = vld [vmem:[%s6501_s1 + $0xa50] sm:$0x11] }
  0x3f   :  { %2526 = vmatpush1.bf16.msra.mxu0 %v4502_v10  ;;  %2569 = vmatpush1.bf16.msra.mxu1 %v4504_v11  ;;  %v4381_v10 = vcombine.high %v88_v5, %v120_v6  ;;  %v23_v11 = vld [vmem:[%s6501_s1 + $0x30] sm:$0xff] }
  0x40   :  { %2527 = vmatprep.subr.bf16.mxu0 %v4439_v12  ;;  %2570 = vmatprep.subr.bf16.mxu1 %v4441_v13  ;;  %v55_v12 = vld [vmem:[%s6501_s1 + $0x130] sm:$0xff]  ;;  %v24_v13 = vld [vmem:[%s6501_s1 + $0x38] sm:$0xff] }
  0x41   :  { %v4314_v23 = vcombine.low %v23_v11, %v55_v12  ;;  %v4316_v24 = vcombine.low %v24_v13, %v56_v14 }
  0x43   :  { %2528 = vmatpush1.bf16.msra.mxu0 %v4438_v18  ;;  %2571 = vmatpush1.bf16.msra.mxu1 %v4440_v19  ;;  %v4380_v18 = vcombine.low %v88_v5, %v120_v6  ;;  %v4315_v19 = vcombine.high %v23_v11, %v55_v12  ;;  %v348_v5 = vld [vmem:[%s6501_s1 + $0xa58] sm:$0x11] }
  0x44   :  { %2529 = vmatprep.subr.bf16.mxu0 %v4375_v20  ;;  %2572 = vmatprep.subr.bf16.mxu1 %v4377_v21  ;;  %v4317_v20 = vcombine.high %v24_v13, %v56_v14  ;;  %v4639_v21 = vcombine.high %v345_v15, %v345_v15  ;;  %v4645_v11 = vcombine.high %v348_v5, %v348_v5 }
  0x45   :  { %v4642_v14 = vcombine.low %v347_v4, %v347_v4  ;;  %v4644_v15 = vcombine.low %v348_v5, %v348_v5 }
  0x46   :  { %v2205_v27 = vand.u32 %v4639_v21, %v4940_v2  ;;  %v316_v21 = vld [vmem:[%s6501_s1 + $0x958] sm:$0xff] }
  0x47   :  { %2530 = vmatpush1.bf16.msra.mxu0 %v4374_v28  ;;  %2573 = vmatpush1.bf16.msra.mxu1 %v4376_v29  ;;  %v2211_v28 = vand.u32 %v4641_v22, %v4940_v2  ;;  %v281_v29 = vld [vmem:[%s6501_s1 + $0x840] sm:$0xff]  ;;  %v2214_v22 = vand.u32 %v4642_v14, %v4940_v2 }
  0x48   :  { %2531 = vmatprep.subr.bf16.mxu0 %v4311_v30  ;;  %2574 = vmatprep.subr.bf16.mxu1 %v4313_v31  ;;  %v313_v30 = vld [vmem:[%s6501_s1 + $0x940] sm:$0xff]  ;;  %v282_v31 = vld [vmem:[%s6501_s1 + $0x848] sm:$0xff] }
  0x49   :  { %v4577_v36 = vcombine.high %v282_v31, %v314_v32  ;;  %v4574_v41 = vcombine.low %v281_v29, %v313_v30  ;;  %v4576_v42 = vcombine.low %v282_v31, %v314_v32 }
  0x4b   :  { %2532 = vmatpush1.bf16.msra.mxu0 %v4310_v34  ;;  %2575 = vmatpush1.bf16.msra.mxu1 %v4312_v35  ;;  %v2208_v34 = vand.u32 %v4640_v26, %v4940_v2  ;;  %v4575_v35 = vcombine.high %v281_v29, %v313_v30  ;;  %v219_v26 = vld [vmem:[%s6501_s1 + $0x650] sm:$0xff]  ;;  %v252_v29 = vld [vmem:[%s6501_s1 + $0x758] sm:$0xff] }
  0x4c   :  { %2607 = vmatprep.subr.bf16.mxu0 %v2193_v38  ;;  %2650 = vmatprep.subr.bf16.mxu1 %v2199_v39  ;;  %v249_v38 = vld [vmem:[%s6501_s1 + $0x740] sm:$0xff]  ;;  %v218_v39 = vld [vmem:[%s6501_s1 + $0x648] sm:$0xff] }
  0x4d   :  { %v4511_v43 = vcombine.high %v217_v37, %v249_v38  ;;  %v4510_v49 = vcombine.low %v217_v37, %v249_v38  ;;  %v4512_v50 = vcombine.low %v218_v39, %v250_v40  ;;  %v188_v37 = vld [vmem:[%s6501_s1 + $0x558] sm:$0xff] }
  0x4e   :  { %4690 = vmatmul.mubr.msk.bf16.vlgmr.msra.gmra.mxu0 %vm2146_vm1, %v5035_v0  ;;  %4691 = vmatmul.mubr.msk.bf16.vlgmr.msra.gmra.mxu1 %vm2146_vm1, %v5035_v0 }
  0x4f   :  { %2608 = vmatpush1.bf16.msra.mxu0 %v2190_v44  ;;  %2651 = vmatpush1.bf16.msra.mxu1 %v2196_v45  ;;  %v4513_v44 = vcombine.high %v218_v39, %v250_v40  ;;  %v153_v45 = vld [vmem:[%s6501_s1 + $0x440] sm:$0xff] }
  0x50   :  { %2609 = vmatprep.subr.bf16.mxu0 %v4571_v46  ;;  %2652 = vmatprep.subr.bf16.mxu1 %v4573_v47  ;;  %v185_v46 = vld [vmem:[%s6501_s1 + $0x540] sm:$0xff]  ;;  %v154_v47 = vld [vmem:[%s6501_s1 + $0x448] sm:$0xff] }
  0x51   :  { %2635 = vmatprep.mubr.bf16.mxu0 %v4915_v1  ;;  %2678 = vmatprep.mubr.bf16.mxu1 %v4915_v1  ;;  %v4447_v51 = vcombine.high %v153_v45, %v185_v46  ;;  %v4446_v57 = vcombine.low %v153_v45, %v185_v46  ;;  %v4448_v58 = vcombine.low %v154_v47, %v186_v48  ;;  %v124_v45 = vld [vmem:[%s6501_s1 + $0x358] sm:$0xff] }
  0x53   :  { %2610 = vmatpush1.bf16.msra.mxu0 %v4570_v52  ;;  %2653 = vmatpush1.bf16.msra.mxu1 %v4572_v53  ;;  %v4449_v52 = vcombine.high %v154_v47, %v186_v48  ;;  %v89_v53 = vld [vmem:[%s6501_s1 + $0x240] sm:$0xff] }
  0x54   :  { %2611 = vmatprep.subr.bf16.mxu0 %v4507_v54  ;;  %2654 = vmatprep.subr.bf16.mxu1 %v4509_v55  ;;  %v121_v54 = vld [vmem:[%s6501_s1 + $0x340] sm:$0xff]  ;;  %v90_v55 = vld [vmem:[%s6501_s1 + $0x248] sm:$0xff] }
  0x55   :  { %v4383_v59 = vcombine.high %v89_v53, %v121_v54  ;;  %v4382_v6 = vcombine.low %v89_v53, %v121_v54  ;;  %v60_v53 = vld [vmem:[%s6501_s1 + $0x158] sm:$0xff]  ;;  %v349_v54 = vld [vmem:[%s6501_s1 + $0xa60] sm:$0x11] }
  0x57   :  { %2612 = vmatpush1.bf16.msra.mxu0 %v4506_v60  ;;  %2655 = vmatpush1.bf16.msra.mxu1 %v4508_v61  ;;  %v4385_v60 = vcombine.high %v90_v55, %v122_v56  ;;  %v25_v61 = vld [vmem:[%s6501_s1 + $0x40] sm:$0xff] }
  0x58   :  { %2613 = vmatprep.subr.bf16.mxu0 %v4443_v62  ;;  %2656 = vmatprep.subr.bf16.mxu1 %v4445_v63  ;;  %v57_v62 = vld [vmem:[%s6501_s1 + $0x140] sm:$0xff]  ;;  %v26_v63 = vld [vmem:[%s6501_s1 + $0x48] sm:$0xff] }
  0x59   :  { %v4318_v12 = vcombine.low %v25_v61, %v57_v62  ;;  %v4320_v13 = vcombine.low %v26_v63, %v58_v3 }
  0x5b   :  { %2614 = vmatpush1.bf16.msra.mxu0 %v4442_v7  ;;  %2657 = vmatpush1.bf16.msra.mxu1 %v4444_v8  ;;  %v4384_v7 = vcombine.low %v90_v55, %v122_v56  ;;  %v4319_v8 = vcombine.high %v25_v61, %v57_v62  ;;  %v350_v55 = vld [vmem:[%s6501_s1 + $0xa68] sm:$0x11] }
  0x5c   :  { %2615 = vmatprep.subr.bf16.mxu0 %v4379_v9  ;;  %2658 = vmatprep.subr.bf16.mxu1 %v4381_v10  ;;  %v4321_v9 = vcombine.high %v26_v63, %v58_v3  ;;  %v4643_v10 = vcombine.high %v347_v4, %v347_v4  ;;  %v4649_v61 = vcombine.high %v350_v55, %v350_v55 }
  0x5d   :  { %v4646_v3 = vcombine.low %v349_v54, %v349_v54  ;;  %v4648_v4 = vcombine.low %v350_v55, %v350_v55 }
  0x5e   :  { %v2217_v16 = vand.u32 %v4643_v10, %v4940_v2  ;;  %v318_v10 = vld [vmem:[%s6501_s1 + $0x968] sm:$0xff] }
  0x5f   :  { %2616 = vmatpush1.bf16.msra.mxu0 %v4378_v17  ;;  %2659 = vmatpush1.bf16.msra.mxu1 %v4380_v18  ;;  %v2223_v17 = vand.u32 %v4645_v11, %v4940_v2  ;;  %v283_v18 = vld [vmem:[%s6501_s1 + $0x850] sm:$0xff]  ;;  %v2226_v11 = vand.u32 %v4646_v3, %v4940_v2 }
  0x60   :  { %2617 = vmatprep.subr.bf16.mxu0 %v4315_v19  ;;  %2660 = vmatprep.subr.bf16.mxu1 %v4317_v20  ;;  %v315_v19 = vld [vmem:[%s6501_s1 + $0x950] sm:$0xff]  ;;  %v284_v20 = vld [vmem:[%s6501_s1 + $0x858] sm:$0xff] }
  0x61   :  { %v4581_v25 = vcombine.high %v284_v20, %v316_v21  ;;  %v4578_v30 = vcombine.low %v283_v18, %v315_v19  ;;  %v4580_v31 = vcombine.low %v284_v20, %v316_v21 }
  0x63   :  { %2618 = vmatpush1.bf16.msra.mxu0 %v4314_v23  ;;  %2661 = vmatpush1.bf16.msra.mxu1 %v4316_v24  ;;  %v2220_v23 = vand.u32 %v4644_v15, %v4940_v2  ;;  %v4579_v24 = vcombine.high %v283_v18, %v315_v19  ;;  %v221_v15 = vld [vmem:[%s6501_s1 + $0x660] sm:$0xff]  ;;  %v254_v18 = vld [vmem:[%s6501_s1 + $0x768] sm:$0xff] }
  0x64   :  { %2693 = vmatprep.subr.bf16.mxu0 %v2205_v27  ;;  %2736 = vmatprep.subr.bf16.mxu1 %v2211_v28  ;;  %v251_v27 = vld [vmem:[%s6501_s1 + $0x750] sm:$0xff]  ;;  %v220_v28 = vld [vmem:[%s6501_s1 + $0x658] sm:$0xff] }
  0x65   :  { %v4515_v32 = vcombine.high %v219_v26, %v251_v27  ;;  %v4514_v38 = vcombine.low %v219_v26, %v251_v27  ;;  %v4516_v39 = vcombine.low %v220_v28, %v252_v29  ;;  %v190_v26 = vld [vmem:[%s6501_s1 + $0x568] sm:$0xff] }
  0x66   :  { %4692 = vmatmul.mubr.msk.bf16.vlgmr.msra.gmra.mxu0 %vm2146_vm1, %v5035_v0  ;;  %4693 = vmatmul.mubr.msk.bf16.vlgmr.msra.gmra.mxu1 %vm2146_vm1, %v5035_v0 }
  0x67   :  { %2694 = vmatpush1.bf16.msra.mxu0 %v2202_v33  ;;  %2737 = vmatpush1.bf16.msra.mxu1 %v2208_v34  ;;  %v4517_v33 = vcombine.high %v220_v28, %v252_v29  ;;  %v155_v34 = vld [vmem:[%s6501_s1 + $0x450] sm:$0xff] }
  0x68   :  { %2695 = vmatprep.subr.bf16.mxu0 %v4575_v35  ;;  %2738 = vmatprep.subr.bf16.mxu1 %v4577_v36  ;;  %v187_v35 = vld [vmem:[%s6501_s1 + $0x550] sm:$0xff]  ;;  %v156_v36 = vld [vmem:[%s6501_s1 + $0x458] sm:$0xff] }
  0x69   :  { %2721 = vmatprep.mubr.bf16.mxu0 %v4915_v1  ;;  %2764 = vmatprep.mubr.bf16.mxu1 %v4915_v1  ;;  %v4451_v40 = vcombine.high %v155_v34, %v187_v35  ;;  %v4450_v46 = vcombine.low %v155_v34, %v187_v35  ;;  %v4452_v47 = vcombine.low %v156_v36, %v188_v37  ;;  %v126_v34 = vld [vmem:[%s6501_s1 + $0x368] sm:$0xff] }
  0x6b   :  { %2696 = vmatpush1.bf16.msra.mxu0 %v4574_v41  ;;  %2739 = vmatpush1.bf16.msra.mxu1 %v4576_v42  ;;  %v4453_v41 = vcombine.high %v156_v36, %v188_v37  ;;  %v91_v42 = vld [vmem:[%s6501_s1 + $0x250] sm:$0xff] }
  0x6c   :  { %2697 = vmatprep.subr.bf16.mxu0 %v4511_v43  ;;  %2740 = vmatprep.subr.bf16.mxu1 %v4513_v44  ;;  %v123_v43 = vld [vmem:[%s6501_s1 + $0x350] sm:$0xff]  ;;  %v92_v44 = vld [vmem:[%s6501_s1 + $0x258] sm:$0xff] }
  0x6d   :  { %v4387_v48 = vcombine.high %v91_v42, %v123_v43  ;;  %v4386_v56 = vcombine.low %v91_v42, %v123_v43  ;;  %v62_v42 = vld [vmem:[%s6501_s1 + $0x168] sm:$0xff]  ;;  %v351_v43 = vld [vmem:[%s6501_s1 + $0xa70] sm:$0x11] }
  0x6f   :  { %2698 = vmatpush1.bf16.msra.mxu0 %v4510_v49  ;;  %2741 = vmatpush1.bf16.msra.mxu1 %v4512_v50  ;;  %v4389_v49 = vcombine.high %v92_v44, %v124_v45  ;;  %v27_v50 = vld [vmem:[%s6501_s1 + $0x50] sm:$0xff] }
  0x70   :  { %2699 = vmatprep.subr.bf16.mxu0 %v4447_v51  ;;  %2742 = vmatprep.subr.bf16.mxu1 %v4449_v52  ;;  %v59_v51 = vld [vmem:[%s6501_s1 + $0x150] sm:$0xff]  ;;  %v28_v52 = vld [vmem:[%s6501_s1 + $0x58] sm:$0xff] }
  0x71   :  { %v4322_v62 = vcombine.low %v27_v50, %v59_v51  ;;  %v4324_v63 = vcombine.low %v28_v52, %v60_v53 }
  0x73   :  { %2700 = vmatpush1.bf16.msra.mxu0 %v4446_v57  ;;  %2743 = vmatpush1.bf16.msra.mxu1 %v4448_v58  ;;  %v4388_v57 = vcombine.low %v92_v44, %v124_v45  ;;  %v4323_v58 = vcombine.high %v27_v50, %v59_v51  ;;  %v352_v44 = vld [vmem:[%s6501_s1 + $0xa78] sm:$0x11] }
  0x74   :  { %2701 = vmatprep.subr.bf16.mxu0 %v4383_v59  ;;  %2744 = vmatprep.subr.bf16.mxu1 %v4385_v60  ;;  %v4325_v59 = vcombine.high %v28_v52, %v60_v53  ;;  %v4647_v60 = vcombine.high %v349_v54, %v349_v54  ;;  %v4653_v50 = vcombine.high %v352_v44, %v352_v44 }
  0x75   :  { %v4650_v53 = vcombine.low %v351_v43, %v351_v43  ;;  %v4652_v54 = vcombine.low %v352_v44, %v352_v44 }
  0x76   :  { %v2229_v5 = vand.u32 %v4647_v60, %v4940_v2  ;;  %v320_v60 = vld [vmem:[%s6501_s1 + $0x978] sm:$0xff] }
  0x77   :  { %2702 = vmatpush1.bf16.msra.mxu0 %v4382_v6  ;;  %2745 = vmatpush1.bf16.msra.mxu1 %v4384_v7  ;;  %v2235_v6 = vand.u32 %v4649_v61, %v4940_v2  ;;  %v285_v7 = vld [vmem:[%s6501_s1 + $0x860] sm:$0xff]  ;;  %v2238_v61 = vand.u32 %v4650_v53, %v4940_v2 }
  0x78   :  { %2703 = vmatprep.subr.bf16.mxu0 %v4319_v8  ;;  %2746 = vmatprep.subr.bf16.mxu1 %v4321_v9  ;;  %v317_v8 = vld [vmem:[%s6501_s1 + $0x960] sm:$0xff]  ;;  %v286_v9 = vld [vmem:[%s6501_s1 + $0x868] sm:$0xff] }
  0x79   :  { %v4585_v14 = vcombine.high %v286_v9, %v318_v10  ;;  %v4582_v19 = vcombine.low %v285_v7, %v317_v8  ;;  %v4584_v20 = vcombine.low %v286_v9, %v318_v10  ;;  %v225_v53 = vld [vmem:[%s6501_s1 + $0x680] sm:$0xff] }
  0x7b   :  { %2704 = vmatpush1.bf16.msra.mxu0 %v4318_v12  ;;  %2747 = vmatpush1.bf16.msra.mxu1 %v4320_v13  ;;  %v2232_v12 = vand.u32 %v4648_v4, %v4940_v2  ;;  %v4583_v13 = vcombine.high %v285_v7, %v317_v8  ;;  %v223_v4 = vld [vmem:[%s6501_s1 + $0x670] sm:$0xff]  ;;  %v256_v7 = vld [vmem:[%s6501_s1 + $0x778] sm:$0xff] }
  0x7c   :  { %2779 = vmatprep.subr.bf16.mxu0 %v2217_v16  ;;  %2822 = vmatprep.subr.bf16.mxu1 %v2223_v17  ;;  %v253_v16 = vld [vmem:[%s6501_s1 + $0x760] sm:$0xff]  ;;  %v222_v17 = vld [vmem:[%s6501_s1 + $0x668] sm:$0xff] }
  0x7d   :  { %v4519_v21 = vcombine.high %v221_v15, %v253_v16  ;;  %v4518_v27 = vcombine.low %v221_v15, %v253_v16  ;;  %v4520_v28 = vcombine.low %v222_v17, %v254_v18 }
  0x7e   :  { %4694 = vmatmul.mubr.msk.bf16.vlgmr.msra.gmra.mxu0 %vm2146_vm1, %v5035_v0  ;;  %4695 = vmatmul.mubr.msk.bf16.vlgmr.msra.gmra.mxu1 %vm2146_vm1, %v5035_v0 }
  0x7f   :  { %2780 = vmatpush1.bf16.msra.mxu0 %v2214_v22  ;;  %2823 = vmatpush1.bf16.msra.mxu1 %v2220_v23  ;;  %v4521_v22 = vcombine.high %v222_v17, %v254_v18  ;;  %v157_v23 = vld [vmem:[%s6501_s1 + $0x460] sm:$0xff] }
  0x80   :  { %2781 = vmatprep.subr.bf16.mxu0 %v4579_v24  ;;  %2824 = vmatprep.subr.bf16.mxu1 %v4581_v25  ;;  %v189_v24 = vld [vmem:[%s6501_s1 + $0x560] sm:$0xff]  ;;  %v158_v25 = vld [vmem:[%s6501_s1 + $0x468] sm:$0xff] }
  0x81   :  { %2807 = vmatprep.mubr.bf16.mxu0 %v4915_v1  ;;  %2850 = vmatprep.mubr.bf16.mxu1 %v4915_v1  ;;  %v4455_v29 = vcombine.high %v157_v23, %v189_v24  ;;  %v4454_v35 = vcombine.low %v157_v23, %v189_v24  ;;  %v4456_v36 = vcombine.low %v158_v25, %v190_v26 }
  0x83   :  { %2782 = vmatpush1.bf16.msra.mxu0 %v4578_v30  ;;  %2825 = vmatpush1.bf16.msra.mxu1 %v4580_v31  ;;  %v4457_v30 = vcombine.high %v158_v25, %v190_v26  ;;  %v93_v31 = vld [vmem:[%s6501_s1 + $0x260] sm:$0xff] }
  0x84   :  { %2783 = vmatprep.subr.bf16.mxu0 %v4515_v32  ;;  %2826 = vmatprep.subr.bf16.mxu1 %v4517_v33  ;;  %v125_v32 = vld [vmem:[%s6501_s1 + $0x360] sm:$0xff]  ;;  %v94_v33 = vld [vmem:[%s6501_s1 + $0x268] sm:$0xff] }
  0x85   :  { %v4391_v37 = vcombine.high %v93_v31, %v125_v32  ;;  %v4390_v45 = vcombine.low %v93_v31, %v125_v32  ;;  %v353_v31 = vld [vmem:[%s6501_s1 + $0xa80] sm:$0x11]  ;;  %v354_v32 = vld [vmem:[%s6501_s1 + $0xa88] sm:$0x11] }
  0x87   :  { %2784 = vmatpush1.bf16.msra.mxu0 %v4514_v38  ;;  %2827 = vmatpush1.bf16.msra.mxu1 %v4516_v39  ;;  %v4393_v38 = vcombine.high %v94_v33, %v126_v34  ;;  %v29_v39 = vld [vmem:[%s6501_s1 + $0x60] sm:$0xff] }
  0x88   :  { %2785 = vmatprep.subr.bf16.mxu0 %v4451_v40  ;;  %2828 = vmatprep.subr.bf16.mxu1 %v4453_v41  ;;  %v61_v40 = vld [vmem:[%s6501_s1 + $0x160] sm:$0xff]  ;;  %v30_v41 = vld [vmem:[%s6501_s1 + $0x68] sm:$0xff] }
  0x89   :  { %v4326_v51 = vcombine.low %v29_v39, %v61_v40  ;;  %v4328_v52 = vcombine.low %v30_v41, %v62_v42 }
  0x8b   :  { %2786 = vmatpush1.bf16.msra.mxu0 %v4450_v46  ;;  %2829 = vmatpush1.bf16.msra.mxu1 %v4452_v47  ;;  %v4392_v46 = vcombine.low %v94_v33, %v126_v34  ;;  %v4327_v47 = vcombine.high %v29_v39, %v61_v40 }
  0x8c   :  { %2787 = vmatprep.subr.bf16.mxu0 %v4387_v48  ;;  %2830 = vmatprep.subr.bf16.mxu1 %v4389_v49  ;;  %v4329_v48 = vcombine.high %v30_v41, %v62_v42  ;;  %v4651_v49 = vcombine.high %v351_v43, %v351_v43  ;;  %v4654_v41 = vcombine.low %v353_v31, %v353_v31 }
  0x8d   :  { %v4656_v42 = vcombine.low %v354_v32, %v354_v32 }
  0x8e   :  { %v2241_v55 = vand.u32 %v4651_v49, %v4940_v2  ;;  %v2250_v49 = vand.u32 %v4654_v41, %v4940_v2 }
  0x8f   :  { %2788 = vmatpush1.bf16.msra.mxu0 %v4386_v56  ;;  %2831 = vmatpush1.bf16.msra.mxu1 %v4388_v57  ;;  %v2247_v56 = vand.u32 %v4653_v50, %v4940_v2  ;;  %v287_v57 = vld [vmem:[%s6501_s1 + $0x870] sm:$0xff]  ;;  %v2256_v50 = vand.u32 %v4656_v42, %v4940_v2 }
  0x90   :  { %2789 = vmatprep.subr.bf16.mxu0 %v4323_v58  ;;  %2832 = vmatprep.subr.bf16.mxu1 %v4325_v59  ;;  %v319_v58 = vld [vmem:[%s6501_s1 + $0x970] sm:$0xff]  ;;  %v288_v59 = vld [vmem:[%s6501_s1 + $0x878] sm:$0xff] }
  0x91   :  { %v4589_v3 = vcombine.high %v288_v59, %v320_v60  ;;  %v4586_v8 = vcombine.low %v287_v57, %v319_v58  ;;  %v4588_v9 = vcombine.low %v288_v59, %v320_v60 }
  0x93   :  { %2790 = vmatpush1.bf16.msra.mxu0 %v4322_v62  ;;  %2833 = vmatpush1.bf16.msra.mxu1 %v4324_v63  ;;  %v2244_v62 = vand.u32 %v4652_v54, %v4940_v2  ;;  %v4587_v63 = vcombine.high %v287_v57, %v319_v58  ;;  %v257_v54 = vld [vmem:[%s6501_s1 + $0x780] sm:$0xff] }
  0x94   :  { %2865 = vmatprep.subr.bf16.mxu0 %v2229_v5  ;;  %2908 = vmatprep.subr.bf16.mxu1 %v2235_v6  ;;  %v255_v5 = vld [vmem:[%s6501_s1 + $0x770] sm:$0xff]  ;;  %v224_v6 = vld [vmem:[%s6501_s1 + $0x678] sm:$0xff]  ;;  %v5592_v57 = vld [vmem:[%s6502_s0] sm:$0xff]   ;;  %v4527_v60 = vcombine.high %v225_v53, %v257_v54 }
  0x95   :  { %v4523_v10 = vcombine.high %v223_v4, %v255_v5  ;;  %v4522_v15 = vcombine.low %v223_v4, %v255_v5  ;;  %v4524_v16 = vcombine.low %v224_v6, %v256_v7  ;;  %v194_v4 = vld [vmem:[%s6501_s1 + $0x588] sm:$0xff]  ;;  %v4526_v5 = vcombine.low %v225_v53, %v257_v54 }
  0x96   :  { %4696 = vmatmul.mubr.msk.bf16.vlgmr.msra.gmra.mxu0 %vm2146_vm1, %v5035_v0  ;;  %4697 = vmatmul.mubr.msk.bf16.vlgmr.msra.gmra.mxu1 %vm2146_vm1, %v5035_v0 }
  0x97   :  { %2866 = vmatpush1.bf16.msra.mxu0 %v2226_v11  ;;  %2909 = vmatpush1.bf16.msra.mxu1 %v2232_v12  ;;  %v4525_v11 = vcombine.high %v224_v6, %v256_v7  ;;  %v159_v12 = vld [vmem:[%s6501_s1 + $0x470] sm:$0xff] }
  0x98   :  { %2867 = vmatprep.subr.bf16.mxu0 %v4583_v13  ;;  %2910 = vmatprep.subr.bf16.mxu1 %v4585_v14  ;;  %v191_v13 = vld [vmem:[%s6501_s1 + $0x570] sm:$0xff]  ;;  %v192_v14 = vld [vmem:[%s6501_s1 + $0x578] sm:$0xff] }
  0x99   :  { %2893 = vmatprep.mubr.bf16.mxu0 %v4915_v1  ;;  %2936 = vmatprep.mubr.bf16.mxu1 %v4915_v1  ;;  %v4459_v17 = vcombine.high %v159_v12, %v191_v13  ;;  %v4458_v23 = vcombine.low %v159_v12, %v191_v13  ;;  %v130_v12 = vld [vmem:[%s6501_s1 + $0x388] sm:$0xff] }
  0x9b   :  { %2868 = vmatpush1.bf16.msra.mxu0 %v4582_v19  ;;  %2911 = vmatpush1.bf16.msra.mxu1 %v4584_v20  ;;  %v95_v19 = vld [vmem:[%s6501_s1 + $0x270] sm:$0xff] }
  0x9c   :  { %2869 = vmatprep.subr.bf16.mxu0 %v4519_v21  ;;  %2912 = vmatprep.subr.bf16.mxu1 %v4521_v22  ;;  %v127_v20 = vld [vmem:[%s6501_s1 + $0x370] sm:$0xff]  ;;  %v96_v21 = vld [vmem:[%s6501_s1 + $0x278] sm:$0xff] }
  0x9d   :  { %v128_v22 = vld [vmem:[%s6501_s1 + $0x378] sm:$0xff]  ;;  %v4395_v25 = vcombine.high %v95_v19, %v127_v20  ;;  %v4394_v33 = vcombine.low %v95_v19, %v127_v20  ;;  %v66_v19 = vld [vmem:[%s6501_s1 + $0x188] sm:$0xff]  ;;  %v355_v20 = vld [vmem:[%s6501_s1 + $0xa90] sm:$0x11] }
  0x9e   :  { %v4397_v26 = vcombine.high %v96_v21, %v128_v22  ;;  %v4396_v34 = vcombine.low %v96_v21, %v128_v22  ;;  %v356_v21 = vld [vmem:[%s6501_s1 + $0xa98] sm:$0x11] }
  0x9f   :  { %2870 = vmatpush1.bf16.msra.mxu0 %v4518_v27  ;;  %2913 = vmatpush1.bf16.msra.mxu1 %v4520_v28  ;;  %v31_v27 = vld [vmem:[%s6501_s1 + $0x70] sm:$0xff] }
  0xa0   :  { %2871 = vmatprep.subr.bf16.mxu0 %v4455_v29  ;;  %2914 = vmatprep.subr.bf16.mxu1 %v4457_v30  ;;  %v63_v28 = vld [vmem:[%s6501_s1 + $0x170] sm:$0xff]  ;;  %v32_v29 = vld [vmem:[%s6501_s1 + $0x78] sm:$0xff] }
  0xa1   :  { %v64_v30 = vld [vmem:[%s6501_s1 + $0x178] sm:$0xff]  ;;  %v4330_v39 = vcombine.low %v31_v27, %v63_v28 }
  0xa2   :  { %v4332_v40 = vcombine.low %v32_v29, %v64_v30 }
  0xa3   :  { %2872 = vmatpush1.bf16.msra.mxu0 %v4454_v35  ;;  %2915 = vmatpush1.bf16.msra.mxu1 %v4456_v36  ;;  %v4331_v35 = vcombine.high %v31_v27, %v63_v28  ;;  %v4333_v36 = vcombine.high %v32_v29, %v64_v30  ;;  %v4661_v27 = vcombine.high %v356_v21, %v356_v21 }
  0xa4   :  { %2873 = vmatprep.subr.bf16.mxu0 %v4391_v37  ;;  %2916 = vmatprep.subr.bf16.mxu1 %v4393_v38  ;;  %v4655_v37 = vcombine.high %v353_v31, %v353_v31  ;;  %v4657_v38 = vcombine.high %v354_v32, %v354_v32  ;;  %v4658_v30 = vcombine.low %v355_v20, %v355_v20 }
  0xa5   :  { %v4660_v31 = vcombine.low %v356_v21, %v356_v21 }
  0xa6   :  { %v2253_v43 = vand.u32 %v4655_v37, %v4940_v2  ;;  %v2259_v44 = vand.u32 %v4657_v38, %v4940_v2  ;;  %v324_v37 = vld [vmem:[%s6501_s1 + $0x998] sm:$0xff]  ;;  %v5656_v38 = vpop.permute.xlu0 %373 }
  0xa7   :  { %2874 = vmatpush1.bf16.msra.mxu0 %v4390_v45  ;;  %2917 = vmatpush1.bf16.msra.mxu1 %v4392_v46  ;;  %v289_v45 = vld [vmem:[%s6501_s1 + $0x880] sm:$0xff] }
  0xa8   :  { %2875 = vmatprep.subr.bf16.mxu0 %v4327_v47  ;;  %2918 = vmatprep.subr.bf16.mxu1 %v4329_v48  ;;  %v321_v46 = vld [vmem:[%s6501_s1 + $0x980] sm:$0xff]  ;;  %v290_v47 = vld [vmem:[%s6501_s1 + $0x888] sm:$0xff] }
  0xa9   :  { %v322_v48 = vld [vmem:[%s6501_s1 + $0x988] sm:$0xff]  ;;  %v4590_v58 = vcombine.low %v289_v45, %v321_v46 }
  0xaa   :  { %v4592_v59 = vcombine.low %v290_v47, %v322_v48 }
  0xab   :  { %2876 = vmatpush1.bf16.msra.mxu0 %v4326_v51  ;;  %2919 = vmatpush1.bf16.msra.mxu1 %v4328_v52  ;;  %v4591_v51 = vcombine.high %v289_v45, %v321_v46  ;;  %v4593_v52 = vcombine.high %v290_v47, %v322_v48  ;;  %v228_v45 = vld [vmem:[%s6501_s1 + $0x698] sm:$0xff] }
  0xac   :  { %2951 = vmatprep.subr.bf16.mxu0 %v2241_v55  ;;  %2994 = vmatprep.subr.bf16.mxu1 %v2247_v56  ;;  %v226_v55 = vld [vmem:[%s6501_s1 + $0x688] sm:$0xff]  ;;  %v260_v46 = vld [vmem:[%s6501_s1 + $0x798] sm:$0xff] }
  0xad   :  { %v258_v56 = vld [vmem:[%s6501_s1 + $0x788] sm:$0xff] }
  0xae   :  { %4698 = vmatmul.mubr.msk.bf16.vlgmr.msra.gmra.mxu0 %vm2146_vm1, %v5035_v0  ;;  %4699 = vmatmul.mubr.msk.bf16.vlgmr.msra.gmra.mxu1 %vm2146_vm1, %v5035_v0  ;;  %v160_v0 = vld [vmem:[%s6501_s1 + $0x478] sm:$0xff]  ;;  %v4528_v6 = vcombine.low %v226_v55, %v258_v56 }
  0xaf   :  { %2952 = vmatpush1.bf16.msra.mxu0 %v2238_v61  ;;  %2995 = vmatpush1.bf16.msra.mxu1 %v2244_v62  ;;  %v4461_v18 = vcombine.high %v160_v0, %v192_v14  ;;  %v4460_v24 = vcombine.low %v160_v0, %v192_v14  ;;  %v4529_v61 = vcombine.high %v226_v55, %v258_v56  ;;  %v161_v62 = vld [vmem:[%s6501_s1 + $0x480] sm:$0xff] }
  0xb0   :  { %2953 = vmatprep.subr.bf16.mxu0 %v4587_v63  ;;  %2996 = vmatprep.subr.bf16.mxu1 %v4589_v3  ;;  %v193_v63 = vld [vmem:[%s6501_s1 + $0x580] sm:$0xff]  ;;  %v162_v3 = vld [vmem:[%s6501_s1 + $0x488] sm:$0xff]  ;;  %v4533_v56 = vcombine.high %v228_v45, %v260_v46 }
  0xb1   :  { %2979 = vmatprep.mubr.bf16.mxu0 %v4915_v1  ;;  %3022 = vmatprep.mubr.bf16.mxu1 %v4915_v1  ;;  %v4463_v7 = vcombine.high %v161_v62, %v193_v63  ;;  %v4462_v13 = vcombine.low %v161_v62, %v193_v63  ;;  %v4464_v0 = vcombine.low %v162_v3, %v194_v4 }
  0xb3   :  { %2954 = vmatpush1.bf16.msra.mxu0 %v4586_v8  ;;  %2997 = vmatpush1.bf16.msra.mxu1 %v4588_v9  ;;  %v4465_v8 = vcombine.high %v162_v3, %v194_v4  ;;  %v97_v9 = vld [vmem:[%s6501_s1 + $0x280] sm:$0xff]  ;;  %v5686_v3 = vpop.permute.xlu0 %378  ;;  %v164_v4 = vld [vmem:[%s6501_s1 + $0x498] sm:$0xff] }
  0xb4   :  { %2955 = vmatprep.subr.bf16.mxu0 %v4523_v10  ;;  %2998 = vmatprep.subr.bf16.mxu1 %v4525_v11  ;;  %v129_v10 = vld [vmem:[%s6501_s1 + $0x380] sm:$0xff]  ;;  %v98_v11 = vld [vmem:[%s6501_s1 + $0x288] sm:$0xff] }
  0xb5   :  { %v4399_v14 = vcombine.high %v97_v9, %v129_v10  ;;  %v4398_v22 = vcombine.low %v97_v9, %v129_v10 }
  0xb7   :  { %2956 = vmatpush1.bf16.msra.mxu0 %v4522_v15  ;;  %2999 = vmatpush1.bf16.msra.mxu1 %v4524_v16  ;;  %v4401_v15 = vcombine.high %v98_v11, %v130_v12  ;;  %v33_v16 = vld [vmem:[%s6501_s1 + $0x80] sm:$0xff] }
  0xb8   :  { %2957 = vmatprep.subr.bf16.mxu0 %v4459_v17  ;;  %3000 = vmatprep.subr.bf16.mxu1 %v4461_v18  ;;  %v65_v17 = vld [vmem:[%s6501_s1 + $0x180] sm:$0xff]  ;;  %v34_v18 = vld [vmem:[%s6501_s1 + $0x88] sm:$0xff] }
  0xb9   :  { %v4334_v28 = vcombine.low %v33_v16, %v65_v17  ;;  %v4336_v29 = vcombine.low %v34_v18, %v66_v19 }
  0xbb   :  { %2958 = vmatpush1.bf16.msra.mxu0 %v4458_v23  ;;  %3001 = vmatpush1.bf16.msra.mxu1 %v4460_v24  ;;  %v4400_v23 = vcombine.low %v98_v11, %v130_v12  ;;  %v4335_v24 = vcombine.high %v33_v16, %v65_v17  ;;  %v4532_v11 = vcombine.low %v228_v45, %v260_v46 }
  0xbc   :  { %2959 = vmatprep.subr.bf16.mxu0 %v4395_v25  ;;  %3002 = vmatprep.subr.bf16.mxu1 %v4397_v26  ;;  %v4337_v25 = vcombine.high %v34_v18, %v66_v19  ;;  %v4659_v26 = vcombine.high %v355_v20, %v355_v20  ;;  %v131_v18 = vld [vmem:[%s6501_s1 + $0x390] sm:$0xff]  ;;  %v100_v19 = vld [vmem:[%s6501_s1 + $0x298] sm:$0xff] }
  0xbd   :  { %v132_v20 = vld [vmem:[%s6501_s1 + $0x398] sm:$0xff] }
  0xbe   :  { %v2265_v32 = vand.u32 %v4659_v26, %v4940_v2 }
  0xbf   :  { %2960 = vmatpush1.bf16.msra.mxu0 %v4394_v33  ;;  %3003 = vmatpush1.bf16.msra.mxu1 %v4396_v34  ;;  %v2271_v33 = vand.u32 %v4661_v27, %v4940_v2  ;;  %v291_v34 = vld [vmem:[%s6501_s1 + $0x890] sm:$0xff] }
  0xc0   :  { %2961 = vmatprep.subr.bf16.mxu0 %v4331_v35  ;;  %3004 = vmatprep.subr.bf16.mxu1 %v4333_v36  ;;  %v323_v35 = vld [vmem:[%s6501_s1 + $0x990] sm:$0xff]  ;;  %v292_v36 = vld [vmem:[%s6501_s1 + $0x898] sm:$0xff] }
  0xc1   :  { %v4595_v41 = vcombine.high %v291_v34, %v323_v35  ;;  %v4597_v42 = vcombine.high %v292_v36, %v324_v37 }
  0xc3   :  { %2962 = vmatpush1.bf16.msra.mxu0 %v4330_v39  ;;  %3005 = vmatpush1.bf16.msra.mxu1 %v4332_v40  ;;  %v2262_v39 = vand.u32 %v4658_v30, %v4940_v2  ;;  %v2268_v40 = vand.u32 %v4660_v31, %v4940_v2 }
  0xc4   :  { %3037 = vmatprep.subr.bf16.mxu0 %v2253_v43  ;;  %3080 = vmatprep.subr.bf16.mxu1 %v2259_v44  ;;  %v227_v43 = vld [vmem:[%s6501_s1 + $0x690] sm:$0xff] }
  0xc5   :  { %v259_v44 = vld [vmem:[%s6501_s1 + $0x790] sm:$0xff] }
  0xc6   :  { %4700 = vmatmul.mubr.msk.bf16.vlgmr.msra.gmra.mxu0 %vm2146_vm1, %v5592_v57  ;;  %4701 = vmatmul.mubr.msk.bf16.vlgmr.msra.gmra.mxu1 %vm2146_vm1, %v5592_v57  ;;  %v4531_v55 = vcombine.high %v227_v43, %v259_v44 }
  0xc7   :  { %3038 = vmatpush1.bf16.msra.mxu0 %v2250_v49  ;;  %3081 = vmatpush1.bf16.msra.mxu1 %v2256_v50  ;;  %v4594_v49 = vcombine.low %v291_v34, %v323_v35  ;;  %v67_v34 = vld [vmem:[%s6501_s1 + $0x190] sm:$0xff]  ;;  %v36_v35 = vld [vmem:[%s6501_s1 + $0x98] sm:$0xff] }
  0xc8   :  { %3039 = vmatprep.subr.bf16.mxu0 %v4591_v51  ;;  %3082 = vmatprep.subr.bf16.mxu1 %v4593_v52  ;;  %v4596_v52 = vcombine.low %v292_v36, %v324_v37  ;;  %v68_v36 = vld [vmem:[%s6501_s1 + $0x198] sm:$0xff]  ;;  %v357_v37 = vld [vmem:[%s6501_s1 + $0xaa0] sm:$0x11] }
  0xc9   :  { %3065 = vmatprep.mubr.bf16.mxu0 %v4915_v1  ;;  %3108 = vmatprep.mubr.bf16.mxu1 %v4915_v1  ;;  %v4341_v45 = vcombine.high %v36_v35, %v68_v36  ;;  %v4663_v46 = vcombine.high %v357_v37, %v357_v37 }
  0xcb   :  { %3040 = vmatpush1.bf16.msra.mxu0 %v4590_v58  ;;  %3083 = vmatpush1.bf16.msra.mxu1 %v4592_v59  ;;  %v163_v58 = vld [vmem:[%s6501_s1 + $0x490] sm:$0xff] }
  0xcc   :  { %3041 = vmatprep.subr.bf16.mxu0 %v4527_v60  ;;  %3084 = vmatprep.subr.bf16.mxu1 %v4529_v61  ;;  %v195_v59 = vld [vmem:[%s6501_s1 + $0x590] sm:$0xff] }
  0xcd   :  { %v4467_v12 = vcombine.high %v163_v58, %v195_v59 }
  0xcf   :  { %3042 = vmatpush1.bf16.msra.mxu0 %v4526_v5  ;;  %3085 = vmatpush1.bf16.msra.mxu1 %v4528_v6  ;;  %v196_v5 = vld [vmem:[%s6501_s1 + $0x598] sm:$0xff] }
  0xd0   :  { %3043 = vmatprep.subr.bf16.mxu0 %v4463_v7  ;;  %3086 = vmatprep.subr.bf16.mxu1 %v4465_v8  ;;  %v4530_v8 = vcombine.low %v227_v43, %v259_v44  ;;  %v4469_v17 = vcombine.high %v164_v4, %v196_v5  ;;  %v4468_v26 = vcombine.low %v164_v4, %v196_v5  ;;  %v261_v4 = vld [vmem:[%s6501_s1 + $0x7a0] sm:$0xff]  ;;  %v230_v5 = vld [vmem:[%s6501_s1 + $0x6a8] sm:$0xff] }
  0xd1   :  { %v4404_v43 = vcombine.low %v100_v19, %v132_v20 }
  0xd3   :  { %3044 = vmatpush1.bf16.msra.mxu0 %v4462_v13  ;;  %3087 = vmatpush1.bf16.msra.mxu1 %v4464_v0  ;;  %v99_v13 = vld [vmem:[%s6501_s1 + $0x290] sm:$0xff] }
  0xd4   :  { %3045 = vmatprep.subr.bf16.mxu0 %v4399_v14  ;;  %3088 = vmatprep.subr.bf16.mxu1 %v4401_v15  ;;  %v4403_v27 = vcombine.high %v99_v13, %v131_v18 }
  0xd7   :  { %3046 = vmatpush1.bf16.msra.mxu0 %v4398_v22  ;;  %3089 = vmatpush1.bf16.msra.mxu1 %v4400_v23 }
  0xd8   :  { %3047 = vmatprep.subr.bf16.mxu0 %v4335_v24  ;;  %3090 = vmatprep.subr.bf16.mxu1 %v4337_v25  ;;  %v4466_v25 = vcombine.low %v163_v58, %v195_v59  ;;  %v326_v58 = vld [vmem:[%s6501_s1 + $0x9a8] sm:$0xff] }
  0xdb   :  { %3048 = vmatpush1.bf16.msra.mxu0 %v4334_v28  ;;  %3091 = vmatpush1.bf16.msra.mxu1 %v4336_v29  ;;  %v4405_v28 = vcombine.high %v100_v19, %v132_v20  ;;  %v35_v29 = vld [vmem:[%s6501_s1 + $0x90] sm:$0xff] }
  0xdc   :  { %3123 = vmatprep.subr.bf16.mxu0 %v2265_v32  ;;  %3166 = vmatprep.subr.bf16.mxu1 %v2271_v33  ;;  %v4339_v44 = vcombine.high %v35_v29, %v67_v34 }
  0xde   :  { %v2379_v47 = vpop.f32.mrf.mxu0  ;;  %v2422_v48 = vpop.f32.mrf.mxu1  ;;  %4702 = vmatmul.mubr.msk.bf16.vlgmr.msra.gmra.mxu0 %vm2146_vm1, %v5592_v57  ;;  %4703 = vmatmul.mubr.msk.bf16.vlgmr.msra.gmra.mxu1 %vm2146_vm1, %v5592_v57 }
  0xdf   :  { %v2380_v50 = vadd.f32 %v2379_v47, %v5656_v38  ;;  %v2423_v51 = vadd.f32 %v2422_v48, %v5656_v38  ;;  %3124 = vmatpush1.bf16.msra.mxu0 %v2262_v39  ;;  %3167 = vmatpush1.bf16.msra.mxu1 %v2268_v40  ;;  %v358_v39 = vld [vmem:[%s6501_s1 + $0xaa8] sm:$0x11]  ;;  %v4338_v48 = vcombine.low %v35_v29, %v67_v34 }
  0xe0   :  { %v2381_v53 = vpop.f32.mrf.mxu0  ;;  %v2424_v54 = vpop.f32.mrf.mxu1  ;;  %3125 = vmatprep.subr.bf16.mxu0 %v4595_v41  ;;  %3168 = vmatprep.subr.bf16.mxu1 %v4597_v42  ;;  %v4402_v42 = vcombine.low %v99_v13, %v131_v18  ;;  %v4665_v47 = vcombine.high %v358_v39, %v358_v39 }
  0xe1   :  { %v3721_v60 = vmax.f32 %v2380_v50, 0.0  ;;  %v3723_v61 = vmax.f32 %v2423_v51, 0.0  ;;  %v2382_v62 = vadd.f32 %v2381_v53, %v5656_v38  ;;  %v2425_v63 = vadd.f32 %v2424_v54, %v5656_v38  ;;  %3151 = vmatprep.mubr.bf16.mxu0 %v4915_v1  ;;  %3194 = vmatprep.mubr.bf16.mxu1 %v4915_v1  ;;  %v293_v54 = vld [vmem:[%s6501_s1 + $0x8a0] sm:$0xff] }
  0xe2   :  { %v2383_v6 = vpop.f32.mrf.mxu0  ;;  %v2426_v7 = vpop.f32.mrf.mxu1  ;;  %v4662_v50 = vcombine.low %v357_v37, %v357_v37  ;;  %v4664_v51 = vcombine.low %v358_v39, %v358_v39  ;;  %v2283_v53 = vand.u32 %v4665_v47, %v4940_v2  ;;  %v133_v37 = vld [vmem:[%s6501_s1 + $0x3a0] sm:$0xff]  ;;  %v102_v39 = vld [vmem:[%s6501_s1 + $0x2a8] sm:$0xff] }
  0xe3   :  { %v3722_v9 = vmax.f32 %v2382_v62, 0.0  ;;  %v3724_v10 = vmax.f32 %v2425_v63, 0.0  ;;  %3126 = vmatpush1.bf16.msra.mxu0 %v4594_v49  ;;  %3169 = vmatpush1.bf16.msra.mxu1 %v4596_v52  ;;  %v2384_v0 = vadd.f32 %v2383_v6, %v5686_v3  ;;  %v2427_v14 = vadd.f32 %v2426_v7, %v5686_v3  ;;  %v229_v63 = vld [vmem:[%s6501_s1 + $0x6a0] sm:$0xff]  ;;  %v262_v6 = vld [vmem:[%s6501_s1 + $0x7a8] sm:$0xff] }
  0xe4   :  { %v2385_v15 = vpop.f32.mrf.mxu0  ;;  %v2428_v16 = vpop.f32.mrf.mxu1  ;;  %3127 = vmatprep.subr.bf16.mxu0 %v4531_v55  ;;  %3170 = vmatprep.subr.bf16.mxu1 %v4533_v56  ;;  %v4340_v49 = vcombine.low %v36_v35, %v68_v36  ;;  %v2277_v52 = vand.u32 %v4663_v46, %v4940_v2  ;;  %v325_v55 = vld [vmem:[%s6501_s1 + $0x9a0] sm:$0xff]  ;;  %v294_v56 = vld [vmem:[%s6501_s1 + $0x8a8] sm:$0xff]  ;;  %v2274_v59 = vand.u32 %v4662_v50, %v4940_v2 }
  0xe5   :  { %v4782_v21 = vpack.c.bf16 %v3722_v9, %v3721_v60  ;;  %v4783_v22 = vpack.c.bf16 %v3724_v10, %v3723_v61  ;;  %v2386_v23 = vadd.f32 %v2385_v15, %v5686_v3  ;;  %v2429_v24 = vadd.f32 %v2428_v16, %v5686_v3  ;;  %v165_v16 = vld [vmem:[%s6501_s1 + $0x4a0] sm:$0xff] }
  0xe6   :  { %v3785_v30 = vmax.f32 %v2384_v0, 0.0  ;;  %v3787_v31 = vmax.f32 %v2427_v14, 0.0  ;;  %v2280_v60 = vand.u32 %v4664_v51, %v4940_v2  ;;  %v4599_v61 = vcombine.high %v293_v54, %v325_v55 }
  0xe7   :  { %4233 = vst [vmem:[%s6504_s3] sm:$0xff] %v4782_v21  ;;  %4234 = vst [vmem:[%s6504_s3 + $0x8] sm:$0xff] %v4783_v22  ;;  %3128 = vmatpush1.bf16.msra.mxu0 %v4530_v8  ;;  %3171 = vmatpush1.bf16.msra.mxu1 %v4532_v11  ;;  %v3786_v32 = vmax.f32 %v2386_v23, 0.0  ;;  %v3788_v33 = vmax.f32 %v2429_v24, 0.0  ;;  %v4601_v62 = vcombine.high %v294_v56, %v326_v58  ;;  %v166_v22 = vld [vmem:[%s6501_s1 + $0x4a8] sm:$0xff] }
  0xe8   :  { %3129 = vmatprep.subr.bf16.mxu0 %v4467_v12  ;;  %3172 = vmatprep.subr.bf16.mxu1 %v4469_v17  ;;  %v4598_v9 = vcombine.low %v293_v54, %v325_v55  ;;  %v4600_v12 = vcombine.low %v294_v56, %v326_v58  ;;  %v4535_v14 = vcombine.high %v229_v63, %v261_v4  ;;  %v197_v17 = vld [vmem:[%s6501_s1 + $0x5a0] sm:$0xff]  ;;  %v198_v23 = vld [vmem:[%s6501_s1 + $0x5a8] sm:$0xff]  ;;  %v359_v58 = vld [vmem:[%s6501_s1 + $0xab0] sm:$0x11] }
  0xe9   :  { %v4814_v40 = vpack.c.bf16 %v3786_v32, %v3785_v30  ;;  %v4815_v41 = vpack.c.bf16 %v3788_v33, %v3787_v31  ;;  %v4537_v15 = vcombine.high %v230_v5, %v262_v6  ;;  %v4536_v29 = vcombine.low %v230_v5, %v262_v6  ;;  %v101_v31 = vld [vmem:[%s6501_s1 + $0x2a0] sm:$0xff]  ;;  %v38_v55 = vld [vmem:[%s6501_s1 + $0xa8] sm:$0xff] }
  0xea   :  { %v4471_v30 = vcombine.high %v165_v16, %v197_v17  ;;  %v4473_v36 = vcombine.high %v166_v22, %v198_v23  ;;  %v4472_v46 = vcombine.low %v166_v22, %v198_v23  ;;  %v4407_v47 = vcombine.high %v101_v31, %v133_v37  ;;  %v69_v54 = vld [vmem:[%s6501_s1 + $0x1a0] sm:$0xff]  ;;  %v70_v56 = vld [vmem:[%s6501_s1 + $0x1a8] sm:$0xff]  ;;  %v263_v22 = vld [vmem:[%s6501_s1 + $0x7b0] sm:$0xff] }
  0xeb   :  { %3130 = vmatpush1.bf16.msra.mxu0 %v4466_v25  ;;  %3173 = vmatpush1.bf16.msra.mxu1 %v4468_v26  ;;  %4265 = vst [vmem:[%s6504_s3 + $0x100] sm:$0xff] %v4814_v40  ;;  %4266 = vst [vmem:[%s6504_s3 + $0x108] sm:$0xff] %v4815_v41  ;;  %v4534_v26 = vcombine.low %v229_v63, %v261_v4  ;;  %v134_v40 = vld [vmem:[%s6501_s1 + $0x3a8] sm:$0xff]  ;;  %v4345_v5 = vcombine.high %v38_v55, %v70_v56  ;;  %v232_v23 = vld [vmem:[%s6501_s1 + $0x6b8] sm:$0xff] }
  0xec   :  { %3131 = vmatprep.subr.bf16.mxu0 %v4403_v27  ;;  %3174 = vmatprep.subr.bf16.mxu1 %v4405_v28  ;;  %v4408_v63 = vcombine.low %v102_v39, %v134_v40  ;;  %v4667_v6 = vcombine.high %v359_v58, %v359_v58 }
  0xef   :  { %3132 = vmatpush1.bf16.msra.mxu0 %v4402_v42  ;;  %3175 = vmatpush1.bf16.msra.mxu1 %v4404_v43 }
  0xf0   :  { %3133 = vmatprep.subr.bf16.mxu0 %v4339_v44  ;;  %3176 = vmatprep.subr.bf16.mxu1 %v4341_v45  ;;  %v4470_v45 = vcombine.low %v165_v16, %v197_v17  ;;  %v328_v16 = vld [vmem:[%s6501_s1 + $0x9b8] sm:$0xff] }
  0xf3   :  { %3134 = vmatpush1.bf16.msra.mxu0 %v4338_v48  ;;  %3177 = vmatpush1.bf16.msra.mxu1 %v4340_v49  ;;  %v4409_v48 = vcombine.high %v102_v39, %v134_v40  ;;  %v37_v49 = vld [vmem:[%s6501_s1 + $0xa0] sm:$0xff] }
  0xf4   :  { %3209 = vmatprep.subr.bf16.mxu0 %v2277_v52  ;;  %3252 = vmatprep.subr.bf16.mxu1 %v2283_v53  ;;  %v4343_v4 = vcombine.high %v37_v49, %v69_v54 }
  0xf6   :  { %v2465_v7 = vpop.f32.mrf.mxu0  ;;  %v2508_v8 = vpop.f32.mrf.mxu1  ;;  %4704 = vmatmul.mubr.msk.bf16.vlgmr.msra.gmra.mxu0 %vm2146_vm1, %v5592_v57  ;;  %4705 = vmatmul.mubr.msk.bf16.vlgmr.msra.gmra.mxu1 %vm2146_vm1, %v5592_v57 }
  0xf7   :  { %v2466_v10 = vadd.f32 %v2465_v7, %v5656_v38  ;;  %v2509_v11 = vadd.f32 %v2508_v8, %v5656_v38  ;;  %3210 = vmatpush1.bf16.msra.mxu0 %v2274_v59  ;;  %3253 = vmatpush1.bf16.msra.mxu1 %v2280_v60  ;;  %v360_v59 = vld [vmem:[%s6501_s1 + $0xab8] sm:$0x11]  ;;  %v4342_v8 = vcombine.low %v37_v49, %v69_v54 }
  0xf8   :  { %v2467_v13 = vpop.f32.mrf.mxu0  ;;  %v2510_v0 = vpop.f32.mrf.mxu1  ;;  %3211 = vmatprep.subr.bf16.mxu0 %v4599_v61  ;;  %3254 = vmatprep.subr.bf16.mxu1 %v4601_v62  ;;  %v4406_v62 = vcombine.low %v101_v31, %v133_v37  ;;  %v4669_v7 = vcombine.high %v360_v59, %v360_v59 }
  0xf9   :  { %v3725_v18 = vmax.f32 %v2466_v10, 0.0  ;;  %v3727_v19 = vmax.f32 %v2509_v11, 0.0  ;;  %v2468_v20 = vadd.f32 %v2467_v13, %v5656_v38  ;;  %v2511_v21 = vadd.f32 %v2510_v0, %v5656_v38  ;;  %3237 = vmatprep.mubr.bf16.mxu0 %v4915_v1  ;;  %3280 = vmatprep.mubr.bf16.mxu1 %v4915_v1  ;;  %v295_v0 = vld [vmem:[%s6501_s1 + $0x8b0] sm:$0xff] }
  0xfa   :  { %v2469_v24 = vpop.f32.mrf.mxu0  ;;  %v2512_v25 = vpop.f32.mrf.mxu1  ;;  %v4666_v10 = vcombine.low %v359_v58, %v359_v58  ;;  %v4668_v11 = vcombine.low %v360_v59, %v360_v59  ;;  %v2295_v13 = vand.u32 %v4669_v7, %v4940_v2  ;;  %v135_v58 = vld [vmem:[%s6501_s1 + $0x3b0] sm:$0xff]  ;;  %v104_v59 = vld [vmem:[%s6501_s1 + $0x2b8] sm:$0xff] }
  0xfb   :  { %v3726_v27 = vmax.f32 %v2468_v20, 0.0  ;;  %v3728_v28 = vmax.f32 %v2511_v21, 0.0  ;;  %3212 = vmatpush1.bf16.msra.mxu0 %v4598_v9  ;;  %3255 = vmatpush1.bf16.msra.mxu1 %v4600_v12  ;;  %v2470_v32 = vadd.f32 %v2469_v24, %v5686_v3  ;;  %v2513_v33 = vadd.f32 %v2512_v25, %v5686_v3  ;;  %v231_v21 = vld [vmem:[%s6501_s1 + $0x6b0] sm:$0xff]  ;;  %v264_v24 = vld [vmem:[%s6501_s1 + $0x7b8] sm:$0xff] }
  0xfc   :  { %v2471_v34 = vpop.f32.mrf.mxu0  ;;  %v2514_v35 = vpop.f32.mrf.mxu1  ;;  %3213 = vmatprep.subr.bf16.mxu0 %v4535_v14  ;;  %3256 = vmatprep.subr.bf16.mxu1 %v4537_v15  ;;  %v4344_v9 = vcombine.low %v38_v55, %v70_v56  ;;  %v2289_v12 = vand.u32 %v4667_v6, %v4940_v2  ;;  %v327_v14 = vld [vmem:[%s6501_s1 + $0x9b0] sm:$0xff]  ;;  %v296_v15 = vld [vmem:[%s6501_s1 + $0x8b8] sm:$0xff]  ;;  %v2286_v17 = vand.u32 %v4666_v10, %v4940_v2 }
  0xfd   :  { %v4784_v41 = vpack.c.bf16 %v3726_v27, %v3725_v18  ;;  %v4785_v42 = vpack.c.bf16 %v3728_v28, %v3727_v19  ;;  %v2472_v43 = vadd.f32 %v2471_v34, %v5686_v3  ;;  %v2515_v44 = vadd.f32 %v2514_v35, %v5686_v3  ;;  %v167_v35 = vld [vmem:[%s6501_s1 + $0x4b0] sm:$0xff] }
  0xfe   :  { %v3789_v50 = vmax.f32 %v2470_v32, 0.0  ;;  %v3791_v51 = vmax.f32 %v2513_v33, 0.0  ;;  %v2292_v18 = vand.u32 %v4668_v11, %v4940_v2  ;;  %v4603_v19 = vcombine.high %v295_v0, %v327_v14 }
  0xff   :  { %4235 = vst [vmem:[%s6504_s3 + $0x10] sm:$0xff] %v4784_v41  ;;  %4236 = vst [vmem:[%s6504_s3 + $0x18] sm:$0xff] %v4785_v42  ;;  %3214 = vmatpush1.bf16.msra.mxu0 %v4534_v26  ;;  %3257 = vmatpush1.bf16.msra.mxu1 %v4536_v29  ;;  %v3790_v52 = vmax.f32 %v2472_v43, 0.0  ;;  %v3792_v53 = vmax.f32 %v2515_v44, 0.0  ;;  %v4605_v20 = vcombine.high %v296_v15, %v328_v16  ;;  %v168_v42 = vld [vmem:[%s6501_s1 + $0x4b8] sm:$0xff] }
 0x100   :  { %3215 = vmatprep.subr.bf16.mxu0 %v4471_v30  ;;  %3258 = vmatprep.subr.bf16.mxu1 %v4473_v36  ;;  %v4602_v27 = vcombine.low %v295_v0, %v327_v14  ;;  %v4604_v30 = vcombine.low %v296_v15, %v328_v16  ;;  %v4539_v33 = vcombine.high %v231_v21, %v263_v22  ;;  %v199_v36 = vld [vmem:[%s6501_s1 + $0x5b0] sm:$0xff]  ;;  %v200_v43 = vld [vmem:[%s6501_s1 + $0x5b8] sm:$0xff]  ;;  %v361_v16 = vld [vmem:[%s6501_s1 + $0xac0] sm:$0x11] }
 0x101   :  { %v4816_v60 = vpack.c.bf16 %v3790_v52, %v3789_v50  ;;  %v4817_v61 = vpack.c.bf16 %v3792_v53, %v3791_v51  ;;  %v4541_v34 = vcombine.high %v232_v23, %v264_v24  ;;  %v4540_v49 = vcombine.low %v232_v23, %v264_v24  ;;  %v103_v51 = vld [vmem:[%s6501_s1 + $0x2b0] sm:$0xff]  ;;  %v40_v14 = vld [vmem:[%s6501_s1 + $0xb8] sm:$0xff] }
 0x102   :  { %v4475_v50 = vcombine.high %v167_v35, %v199_v36  ;;  %v4477_v56 = vcombine.high %v168_v42, %v200_v43  ;;  %v4476_v6 = vcombine.low %v168_v42, %v200_v43  ;;  %v4411_v7 = vcombine.high %v103_v51, %v135_v58  ;;  %v71_v0 = vld [vmem:[%s6501_s1 + $0x1b0] sm:$0xff]  ;;  %v72_v15 = vld [vmem:[%s6501_s1 + $0x1b8] sm:$0xff]  ;;  %v265_v42 = vld [vmem:[%s6501_s1 + $0x7c0] sm:$0xff] }
 0x103   :  { %3216 = vmatpush1.bf16.msra.mxu0 %v4470_v45  ;;  %3259 = vmatpush1.bf16.msra.mxu1 %v4472_v46  ;;  %4267 = vst [vmem:[%s6504_s3 + $0x110] sm:$0xff] %v4816_v60  ;;  %4268 = vst [vmem:[%s6504_s3 + $0x118] sm:$0xff] %v4817_v61  ;;  %v4538_v46 = vcombine.low %v231_v21, %v263_v22  ;;  %v136_v60 = vld [vmem:[%s6501_s1 + $0x3b8] sm:$0xff]  ;;  %v4349_v23 = vcombine.high %v40_v14, %v72_v15  ;;  %v234_v43 = vld [vmem:[%s6501_s1 + $0x6c8] sm:$0xff] }
 0x104   :  { %3217 = vmatprep.subr.bf16.mxu0 %v4407_v47  ;;  %3260 = vmatprep.subr.bf16.mxu1 %v4409_v48  ;;  %v4412_v21 = vcombine.low %v104_v59, %v136_v60  ;;  %v4671_v24 = vcombine.high %v361_v16, %v361_v16 }
 0x107   :  { %3218 = vmatpush1.bf16.msra.mxu0 %v4406_v62  ;;  %3261 = vmatpush1.bf16.msra.mxu1 %v4408_v63 }
 0x108   :  { %3219 = vmatprep.subr.bf16.mxu0 %v4343_v4  ;;  %3262 = vmatprep.subr.bf16.mxu1 %v4345_v5  ;;  %v4474_v5 = vcombine.low %v167_v35, %v199_v36  ;;  %v330_v35 = vld [vmem:[%s6501_s1 + $0x9c8] sm:$0xff] }
 0x10b   :  { %3220 = vmatpush1.bf16.msra.mxu0 %v4342_v8  ;;  %3263 = vmatpush1.bf16.msra.mxu1 %v4344_v9  ;;  %v4413_v8 = vcombine.high %v104_v59, %v136_v60  ;;  %v39_v9 = vld [vmem:[%s6501_s1 + $0xb0] sm:$0xff] }
 0x10c   :  { %3295 = vmatprep.subr.bf16.mxu0 %v2289_v12  ;;  %3338 = vmatprep.subr.bf16.mxu1 %v2295_v13  ;;  %v4347_v22 = vcombine.high %v39_v9, %v71_v0 }
 0x10e   :  { %v2551_v25 = vpop.f32.mrf.mxu0  ;;  %v2594_v26 = vpop.f32.mrf.mxu1  ;;  %4706 = vmatmul.mubr.msk.bf16.vlgmr.msra.gmra.mxu0 %vm2146_vm1, %v5592_v57  ;;  %4707 = vmatmul.mubr.msk.bf16.vlgmr.msra.gmra.mxu1 %vm2146_vm1, %v5592_v57 }
 0x10f   :  { %v2552_v28 = vadd.f32 %v2551_v25, %v5656_v38  ;;  %v2595_v29 = vadd.f32 %v2594_v26, %v5656_v38  ;;  %3296 = vmatpush1.bf16.msra.mxu0 %v2286_v17  ;;  %3339 = vmatpush1.bf16.msra.mxu1 %v2292_v18  ;;  %v362_v17 = vld [vmem:[%s6501_s1 + $0xac8] sm:$0x11]  ;;  %v4346_v26 = vcombine.low %v39_v9, %v71_v0 }
 0x110   :  { %v2553_v31 = vpop.f32.mrf.mxu0  ;;  %v2596_v32 = vpop.f32.mrf.mxu1  ;;  %3297 = vmatprep.subr.bf16.mxu0 %v4603_v19  ;;  %3340 = vmatprep.subr.bf16.mxu1 %v4605_v20  ;;  %v4410_v20 = vcombine.low %v103_v51, %v135_v58  ;;  %v4673_v25 = vcombine.high %v362_v17, %v362_v17 }
 0x111   :  { %v3729_v37 = vmax.f32 %v2552_v28, 0.0  ;;  %v3731_v39 = vmax.f32 %v2595_v29, 0.0  ;;  %v2554_v40 = vadd.f32 %v2553_v31, %v5656_v38  ;;  %v2597_v41 = vadd.f32 %v2596_v32, %v5656_v38  ;;  %3323 = vmatprep.mubr.bf16.mxu0 %v4915_v1  ;;  %3366 = vmatprep.mubr.bf16.mxu1 %v4915_v1  ;;  %v297_v32 = vld [vmem:[%s6501_s1 + $0x8c0] sm:$0xff] }
 0x112   :  { %v2555_v44 = vpop.f32.mrf.mxu0  ;;  %v2598_v45 = vpop.f32.mrf.mxu1  ;;  %v4670_v28 = vcombine.low %v361_v16, %v361_v16  ;;  %v4672_v29 = vcombine.low %v362_v17, %v362_v17  ;;  %v2307_v31 = vand.u32 %v4673_v25, %v4940_v2  ;;  %v106_v16 = vld [vmem:[%s6501_s1 + $0x2c8] sm:$0xff] }
 0x113   :  { %v3730_v47 = vmax.f32 %v2554_v40, 0.0  ;;  %v3732_v48 = vmax.f32 %v2597_v41, 0.0  ;;  %3298 = vmatpush1.bf16.msra.mxu0 %v4602_v27  ;;  %3341 = vmatpush1.bf16.msra.mxu1 %v4604_v30  ;;  %v2556_v52 = vadd.f32 %v2555_v44, %v5686_v3  ;;  %v2599_v53 = vadd.f32 %v2598_v45, %v5686_v3  ;;  %v233_v41 = vld [vmem:[%s6501_s1 + $0x6c0] sm:$0xff]  ;;  %v266_v44 = vld [vmem:[%s6501_s1 + $0x7c8] sm:$0xff] }
 0x114   :  { %v2557_v54 = vpop.f32.mrf.mxu0  ;;  %v2600_v55 = vpop.f32.mrf.mxu1  ;;  %3299 = vmatprep.subr.bf16.mxu0 %v4539_v33  ;;  %3342 = vmatprep.subr.bf16.mxu1 %v4541_v34  ;;  %v4348_v27 = vcombine.low %v40_v14, %v72_v15  ;;  %v2301_v30 = vand.u32 %v4671_v24, %v4940_v2  ;;  %v329_v33 = vld [vmem:[%s6501_s1 + $0x9c0] sm:$0xff]  ;;  %v298_v34 = vld [vmem:[%s6501_s1 + $0x8c8] sm:$0xff]  ;;  %v2298_v36 = vand.u32 %v4670_v28, %v4940_v2 }
 0x115   :  { %v4786_v61 = vpack.c.bf16 %v3730_v47, %v3729_v37  ;;  %v4787_v62 = vpack.c.bf16 %v3732_v48, %v3731_v39  ;;  %v2558_v63 = vadd.f32 %v2557_v54, %v5686_v3  ;;  %v2601_v4 = vadd.f32 %v2600_v55, %v5686_v3  ;;  %v169_v55 = vld [vmem:[%s6501_s1 + $0x4c0] sm:$0xff]  ;;  %v138_v17 = vld [vmem:[%s6501_s1 + $0x3c8] sm:$0xff] }
 0x116   :  { %v3793_v10 = vmax.f32 %v2556_v52, 0.0  ;;  %v3795_v11 = vmax.f32 %v2599_v53, 0.0  ;;  %v2304_v37 = vand.u32 %v4672_v29, %v4940_v2  ;;  %v4607_v39 = vcombine.high %v297_v32, %v329_v33  ;;  %v137_v15 = vld [vmem:[%s6501_s1 + $0x3c0] sm:$0xff] }
 0x117   :  { %4237 = vst [vmem:[%s6504_s3 + $0x20] sm:$0xff] %v4786_v61  ;;  %4238 = vst [vmem:[%s6504_s3 + $0x28] sm:$0xff] %v4787_v62  ;;  %3300 = vmatpush1.bf16.msra.mxu0 %v4538_v46  ;;  %3343 = vmatpush1.bf16.msra.mxu1 %v4540_v49  ;;  %v3794_v12 = vmax.f32 %v2558_v63, 0.0  ;;  %v3796_v13 = vmax.f32 %v2601_v4, 0.0  ;;  %v4609_v40 = vcombine.high %v298_v34, %v330_v35  ;;  %v170_v61 = vld [vmem:[%s6501_s1 + $0x4c8] sm:$0xff] }
 0x118   :  { %3301 = vmatprep.subr.bf16.mxu0 %v4475_v50  ;;  %3344 = vmatprep.subr.bf16.mxu1 %v4477_v56  ;;  %v4606_v47 = vcombine.low %v297_v32, %v329_v33  ;;  %v4608_v50 = vcombine.low %v298_v34, %v330_v35  ;;  %v4543_v53 = vcombine.high %v233_v41, %v265_v42  ;;  %v202_v62 = vld [vmem:[%s6501_s1 + $0x5c8] sm:$0xff]  ;;  %v363_v34 = vld [vmem:[%s6501_s1 + $0xad0] sm:$0x11]  ;;  %v364_v35 = vld [vmem:[%s6501_s1 + $0xad8] sm:$0x11] }
 0x119   :  { %v4818_v18 = vpack.c.bf16 %v3794_v12, %v3793_v10  ;;  %v4819_v19 = vpack.c.bf16 %v3796_v13, %v3795_v11  ;;  %v4545_v54 = vcombine.high %v234_v43, %v266_v44  ;;  %v105_v10 = vld [vmem:[%s6501_s1 + $0x2c0] sm:$0xff]  ;;  %v4481_v14 = vcombine.high %v170_v61, %v202_v62  ;;  %v42_v32 = vld [vmem:[%s6501_s1 + $0xc8] sm:$0xff] }
 0x11a   :  { %v4415_v24 = vcombine.high %v105_v10, %v137_v15  ;;  %v4417_v25 = vcombine.high %v106_v16, %v138_v17  ;;  %v74_v33 = vld [vmem:[%s6501_s1 + $0x1c8] sm:$0xff] }
 0x11b   :  { %3302 = vmatpush1.bf16.msra.mxu0 %v4474_v5  ;;  %3345 = vmatpush1.bf16.msra.mxu1 %v4476_v6  ;;  %4269 = vst [vmem:[%s6504_s3 + $0x120] sm:$0xff] %v4818_v18  ;;  %4270 = vst [vmem:[%s6504_s3 + $0x128] sm:$0xff] %v4819_v19  ;;  %v4542_v5 = vcombine.low %v233_v41, %v265_v42  ;;  %v4353_v42 = vcombine.high %v42_v32, %v74_v33 }
 0x11c   :  { %3303 = vmatprep.subr.bf16.mxu0 %v4411_v7  ;;  %3346 = vmatprep.subr.bf16.mxu1 %v4413_v8  ;;  %v4544_v8 = vcombine.low %v234_v43, %v266_v44  ;;  %v4675_v43 = vcombine.high %v363_v34, %v363_v34  ;;  %v4677_v44 = vcombine.high %v364_v35, %v364_v35 }
 0x11f   :  { %3304 = vmatpush1.bf16.msra.mxu0 %v4410_v20  ;;  %3347 = vmatpush1.bf16.msra.mxu1 %v4412_v21 }
 0x120   :  { %3305 = vmatprep.subr.bf16.mxu0 %v4347_v22  ;;  %3348 = vmatprep.subr.bf16.mxu1 %v4349_v23  ;;  %v4480_v23 = vcombine.low %v170_v61, %v202_v62  ;;  %v236_v61 = vld [vmem:[%s6501_s1 + $0x6d8] sm:$0xff] }
 0x121   :  { %v268_v62 = vld [vmem:[%s6501_s1 + $0x7d8] sm:$0xff] }
 0x123   :  { %3306 = vmatpush1.bf16.msra.mxu0 %v4346_v26  ;;  %3349 = vmatpush1.bf16.msra.mxu1 %v4348_v27  ;;  %v41_v26 = vld [vmem:[%s6501_s1 + $0xc0] sm:$0xff] }
 0x124   :  { %3381 = vmatprep.subr.bf16.mxu0 %v2301_v30  ;;  %3424 = vmatprep.subr.bf16.mxu1 %v2307_v31  ;;  %v73_v31 = vld [vmem:[%s6501_s1 + $0x1c0] sm:$0xff] }
 0x125   :  { %v4351_v41 = vcombine.high %v41_v26, %v73_v31 }
 0x126   :  { %v2637_v45 = vpop.f32.mrf.mxu0  ;;  %v2680_v46 = vpop.f32.mrf.mxu1  ;;  %4708 = vmatmul.mubr.msk.bf16.vlgmr.msra.gmra.mxu0 %vm2146_vm1, %v5592_v57  ;;  %4709 = vmatmul.mubr.msk.bf16.vlgmr.msra.gmra.mxu1 %vm2146_vm1, %v5592_v57  ;;  %v201_v57 = vld [vmem:[%s6501_s1 + $0x5c0] sm:$0xff] }
 0x127   :  { %v2638_v48 = vadd.f32 %v2637_v45, %v5656_v38  ;;  %v2681_v49 = vadd.f32 %v2680_v46, %v5656_v38  ;;  %3382 = vmatpush1.bf16.msra.mxu0 %v2298_v36  ;;  %3425 = vmatpush1.bf16.msra.mxu1 %v2304_v37  ;;  %v4479_v9 = vcombine.high %v169_v55, %v201_v57 }
 0x128   :  { %v2639_v51 = vpop.f32.mrf.mxu0  ;;  %v2682_v52 = vpop.f32.mrf.mxu1  ;;  %3383 = vmatprep.subr.bf16.mxu0 %v4607_v39  ;;  %3426 = vmatprep.subr.bf16.mxu1 %v4609_v40  ;;  %v4478_v22 = vcombine.low %v169_v55, %v201_v57  ;;  %v4414_v39 = vcombine.low %v105_v10, %v137_v15  ;;  %v4416_v40 = vcombine.low %v106_v16, %v138_v17 }
 0x129   :  { %v3733_v56 = vmax.f32 %v2638_v48, 0.0  ;;  %v3735_v58 = vmax.f32 %v2681_v49, 0.0  ;;  %v2640_v59 = vadd.f32 %v2639_v51, %v5656_v38  ;;  %v2683_v60 = vadd.f32 %v2682_v52, %v5656_v38  ;;  %3409 = vmatprep.mubr.bf16.mxu0 %v4915_v1  ;;  %3452 = vmatprep.mubr.bf16.mxu1 %v4915_v1  ;;  %v299_v51 = vld [vmem:[%s6501_s1 + $0x8d0] sm:$0xff] }
 0x12a   :  { %v2641_v63 = vpop.f32.mrf.mxu0  ;;  %v2684_v4 = vpop.f32.mrf.mxu1  ;;  %v4350_v45 = vcombine.low %v41_v26, %v73_v31  ;;  %v4352_v46 = vcombine.low %v42_v32, %v74_v33  ;;  %v4676_v48 = vcombine.low %v364_v35, %v364_v35  ;;  %v2313_v49 = vand.u32 %v4675_v43, %v4940_v2  ;;  %v331_v52 = vld [vmem:[%s6501_s1 + $0x9d0] sm:$0xff]  ;;  %v108_v35 = vld [vmem:[%s6501_s1 + $0x2d8] sm:$0xff] }
 0x12b   :  { %v3734_v6 = vmax.f32 %v2640_v59, 0.0  ;;  %v3736_v7 = vmax.f32 %v2683_v60, 0.0  ;;  %3384 = vmatpush1.bf16.msra.mxu0 %v4606_v47  ;;  %3427 = vmatpush1.bf16.msra.mxu1 %v4608_v50  ;;  %v2642_v11 = vadd.f32 %v2641_v63, %v5686_v3  ;;  %v2685_v12 = vadd.f32 %v2684_v4, %v5686_v3  ;;  %v235_v59 = vld [vmem:[%s6501_s1 + $0x6d0] sm:$0xff] }
 0x12c   :  { %v2643_v13 = vpop.f32.mrf.mxu0  ;;  %v2686_v0 = vpop.f32.mrf.mxu1  ;;  %3385 = vmatprep.subr.bf16.mxu0 %v4543_v53  ;;  %3428 = vmatprep.subr.bf16.mxu1 %v4545_v54  ;;  %v4674_v47 = vcombine.low %v363_v34, %v363_v34  ;;  %v2319_v50 = vand.u32 %v4677_v44, %v4940_v2  ;;  %v300_v53 = vld [vmem:[%s6501_s1 + $0x8d8] sm:$0xff]  ;;  %v2316_v57 = vand.u32 %v4676_v48, %v4940_v2  ;;  %v267_v60 = vld [vmem:[%s6501_s1 + $0x7d0] sm:$0xff] }
 0x12d   :  { %v4788_v18 = vpack.c.bf16 %v3734_v6, %v3733_v56  ;;  %v4789_v19 = vpack.c.bf16 %v3736_v7, %v3735_v58  ;;  %v2644_v20 = vadd.f32 %v2643_v13, %v5686_v3  ;;  %v2687_v21 = vadd.f32 %v2686_v0, %v5686_v3  ;;  %v332_v54 = vld [vmem:[%s6501_s1 + $0x9d8] sm:$0xff]  ;;  %v171_v0 = vld [vmem:[%s6501_s1 + $0x4d0] sm:$0xff] }
 0x12e   :  { %v3797_v27 = vmax.f32 %v2642_v11, 0.0  ;;  %v3799_v28 = vmax.f32 %v2685_v12, 0.0  ;;  %v2310_v55 = vand.u32 %v4674_v47, %v4940_v2  ;;  %v4611_v56 = vcombine.high %v299_v51, %v331_v52  ;;  %v139_v34 = vld [vmem:[%s6501_s1 + $0x3d0] sm:$0xff] }
 0x12f   :  { %4239 = vst [vmem:[%s6504_s3 + $0x30] sm:$0xff] %v4788_v18  ;;  %4240 = vst [vmem:[%s6504_s3 + $0x38] sm:$0xff] %v4789_v19  ;;  %3386 = vmatpush1.bf16.msra.mxu0 %v4542_v5  ;;  %3429 = vmatpush1.bf16.msra.mxu1 %v4544_v8  ;;  %v3798_v29 = vmax.f32 %v2644_v20, 0.0  ;;  %v3800_v30 = vmax.f32 %v2687_v21, 0.0  ;;  %v4613_v58 = vcombine.high %v300_v53, %v332_v54  ;;  %v6061_v5 = vld [vmem:[%s6502_s0] sm:$0xff]   ;;  %v172_v19 = vld [vmem:[%s6501_s1 + $0x4d8] sm:$0xff] }
 0x130   :  { %3387 = vmatprep.subr.bf16.mxu0 %v4479_v9  ;;  %3430 = vmatprep.subr.bf16.mxu1 %v4481_v14  ;;  %v4610_v6 = vcombine.low %v299_v51, %v331_v52  ;;  %v4612_v9 = vcombine.low %v300_v53, %v332_v54  ;;  %v4547_v12 = vcombine.high %v235_v59, %v267_v60  ;;  %v203_v14 = vld [vmem:[%s6501_s1 + $0x5d0] sm:$0xff]  ;;  %v204_v20 = vld [vmem:[%s6501_s1 + $0x5d8] sm:$0xff]  ;;  %v365_v54 = vld [vmem:[%s6501_s1 + $0xae0] sm:$0x11] }
 0x131   :  { %v4820_v36 = vpack.c.bf16 %v3798_v29, %v3797_v27  ;;  %v4821_v37 = vpack.c.bf16 %v3800_v30, %v3799_v28  ;;  %v4549_v13 = vcombine.high %v236_v61, %v268_v62  ;;  %v4548_v26 = vcombine.low %v236_v61, %v268_v62  ;;  %v107_v28 = vld [vmem:[%s6501_s1 + $0x2d0] sm:$0xff]  ;;  %v44_v52 = vld [vmem:[%s6501_s1 + $0xd8] sm:$0xff] }
 0x132   :  { %v4483_v27 = vcombine.high %v171_v0, %v203_v14  ;;  %v4485_v33 = vcombine.high %v172_v19, %v204_v20  ;;  %v4484_v43 = vcombine.low %v172_v19, %v204_v20  ;;  %v4419_v44 = vcombine.high %v107_v28, %v139_v34  ;;  %v75_v51 = vld [vmem:[%s6501_s1 + $0x1d0] sm:$0xff]  ;;  %v76_v53 = vld [vmem:[%s6501_s1 + $0x1d8] sm:$0xff]  ;;  %v269_v19 = vld [vmem:[%s6501_s1 + $0x7e0] sm:$0xff] }
 0x133   :  { %3388 = vmatpush1.bf16.msra.mxu0 %v4478_v22  ;;  %3431 = vmatpush1.bf16.msra.mxu1 %v4480_v23  ;;  %4271 = vst [vmem:[%s6504_s3 + $0x130] sm:$0xff] %v4820_v36  ;;  %4272 = vst [vmem:[%s6504_s3 + $0x138] sm:$0xff] %v4821_v37  ;;  %v4546_v23 = vcombine.low %v235_v59, %v267_v60  ;;  %v140_v36 = vld [vmem:[%s6501_s1 + $0x3d8] sm:$0xff]  ;;  %v4357_v61 = vcombine.high %v44_v52, %v76_v53  ;;  %v238_v20 = vld [vmem:[%s6501_s1 + $0x6e8] sm:$0xff] }
 0x134   :  { %3389 = vmatprep.subr.bf16.mxu0 %v4415_v24  ;;  %3432 = vmatprep.subr.bf16.mxu1 %v4417_v25  ;;  %v4420_v59 = vcombine.low %v108_v35, %v140_v36  ;;  %v4679_v62 = vcombine.high %v365_v54, %v365_v54 }
 0x137   :  { %3390 = vmatpush1.bf16.msra.mxu0 %v4414_v39  ;;  %3433 = vmatpush1.bf16.msra.mxu1 %v4416_v40 }
 0x138   :  { %3391 = vmatprep.subr.bf16.mxu0 %v4351_v41  ;;  %3434 = vmatprep.subr.bf16.mxu1 %v4353_v42  ;;  %v4482_v42 = vcombine.low %v171_v0, %v203_v14  ;;  %v334_v0 = vld [vmem:[%s6501_s1 + $0x9e8] sm:$0xff] }
 0x13b   :  { %3392 = vmatpush1.bf16.msra.mxu0 %v4350_v45  ;;  %3435 = vmatpush1.bf16.msra.mxu1 %v4352_v46  ;;  %v4421_v45 = vcombine.high %v108_v35, %v140_v36  ;;  %v43_v46 = vld [vmem:[%s6501_s1 + $0xd0] sm:$0xff] }
 0x13c   :  { %3467 = vmatprep.subr.bf16.mxu0 %v2313_v49  ;;  %3510 = vmatprep.subr.bf16.mxu1 %v2319_v50  ;;  %v4355_v60 = vcombine.high %v43_v46, %v75_v51 }
 0x13e   :  { %v2723_v63 = vpop.f32.mrf.mxu0  ;;  %v2766_v4 = vpop.f32.mrf.mxu1  ;;  %4710 = vmatmul.mubr.msk.bf16.vlgmr.msra.gmra.mxu0 %vm2146_vm1, %v6061_v5  ;;  %4711 = vmatmul.mubr.msk.bf16.vlgmr.msra.gmra.mxu1 %vm2146_vm1, %v6061_v5 }
 0x13f   :  { %v2724_v7 = vadd.f32 %v2723_v63, %v5656_v38  ;;  %v2767_v8 = vadd.f32 %v2766_v4, %v5656_v38  ;;  %3468 = vmatpush1.bf16.msra.mxu0 %v2310_v55  ;;  %3511 = vmatpush1.bf16.msra.mxu1 %v2316_v57  ;;  %v366_v55 = vld [vmem:[%s6501_s1 + $0xae8] sm:$0x11]  ;;  %v4354_v4 = vcombine.low %v43_v46, %v75_v51 }
 0x140   :  { %v2725_v10 = vpop.f32.mrf.mxu0  ;;  %v2768_v11 = vpop.f32.mrf.mxu1  ;;  %3469 = vmatprep.subr.bf16.mxu0 %v4611_v56  ;;  %3512 = vmatprep.subr.bf16.mxu1 %v4613_v58  ;;  %v4418_v58 = vcombine.low %v107_v28, %v139_v34  ;;  %v4681_v63 = vcombine.high %v366_v55, %v366_v55 }
 0x141   :  { %v3737_v15 = vmax.f32 %v2724_v7, 0.0  ;;  %v3739_v16 = vmax.f32 %v2767_v8, 0.0  ;;  %v2726_v17 = vadd.f32 %v2725_v10, %v5656_v38  ;;  %v2769_v18 = vadd.f32 %v2768_v11, %v5656_v38  ;;  %3495 = vmatprep.mubr.bf16.mxu0 %v4915_v1  ;;  %3538 = vmatprep.mubr.bf16.mxu1 %v4915_v1  ;;  %v301_v11 = vld [vmem:[%s6501_s1 + $0x8e0] sm:$0xff] }
 0x142   :  { %v2727_v21 = vpop.f32.mrf.mxu0  ;;  %v2770_v22 = vpop.f32.mrf.mxu1  ;;  %v4678_v7 = vcombine.low %v365_v54, %v365_v54  ;;  %v4680_v8 = vcombine.low %v366_v55, %v366_v55  ;;  %v2331_v10 = vand.u32 %v4681_v63, %v4940_v2  ;;  %v141_v54 = vld [vmem:[%s6501_s1 + $0x3e0] sm:$0xff]  ;;  %v110_v55 = vld [vmem:[%s6501_s1 + $0x2e8] sm:$0xff] }
 0x143   :  { %v3738_v24 = vmax.f32 %v2726_v17, 0.0  ;;  %v3740_v25 = vmax.f32 %v2769_v18, 0.0  ;;  %3470 = vmatpush1.bf16.msra.mxu0 %v4610_v6  ;;  %3513 = vmatpush1.bf16.msra.mxu1 %v4612_v9  ;;  %v2728_v29 = vadd.f32 %v2727_v21, %v5686_v3  ;;  %v2771_v30 = vadd.f32 %v2770_v22, %v5686_v3  ;;  %v237_v18 = vld [vmem:[%s6501_s1 + $0x6e0] sm:$0xff]  ;;  %v270_v21 = vld [vmem:[%s6501_s1 + $0x7e8] sm:$0xff] }
 0x144   :  { %v2729_v31 = vpop.f32.mrf.mxu0  ;;  %v2772_v32 = vpop.f32.mrf.mxu1  ;;  %3471 = vmatprep.subr.bf16.mxu0 %v4547_v12  ;;  %3514 = vmatprep.subr.bf16.mxu1 %v4549_v13  ;;  %v4356_v6 = vcombine.low %v44_v52, %v76_v53  ;;  %v2325_v9 = vand.u32 %v4679_v62, %v4940_v2  ;;  %v333_v12 = vld [vmem:[%s6501_s1 + $0x9e0] sm:$0xff]  ;;  %v302_v13 = vld [vmem:[%s6501_s1 + $0x8e8] sm:$0xff]  ;;  %v2322_v14 = vand.u32 %v4678_v7, %v4940_v2 }
 0x145   :  { %v4790_v37 = vpack.c.bf16 %v3738_v24, %v3737_v15  ;;  %v4791_v39 = vpack.c.bf16 %v3740_v25, %v3739_v16  ;;  %v2730_v40 = vadd.f32 %v2729_v31, %v5686_v3  ;;  %v2773_v41 = vadd.f32 %v2772_v32, %v5686_v3  ;;  %v173_v32 = vld [vmem:[%s6501_s1 + $0x4e0] sm:$0xff] }
 0x146   :  { %v3801_v47 = vmax.f32 %v2728_v29, 0.0  ;;  %v3803_v48 = vmax.f32 %v2771_v30, 0.0  ;;  %v2328_v15 = vand.u32 %v4680_v8, %v4940_v2  ;;  %v4615_v16 = vcombine.high %v301_v11, %v333_v12 }
 0x147   :  { %4241 = vst [vmem:[%s6504_s3 + $0x40] sm:$0xff] %v4790_v37  ;;  %4242 = vst [vmem:[%s6504_s3 + $0x48] sm:$0xff] %v4791_v39  ;;  %3472 = vmatpush1.bf16.msra.mxu0 %v4546_v23  ;;  %3515 = vmatpush1.bf16.msra.mxu1 %v4548_v26  ;;  %v3802_v49 = vmax.f32 %v2730_v40, 0.0  ;;  %v3804_v50 = vmax.f32 %v2773_v41, 0.0  ;;  %v4617_v17 = vcombine.high %v302_v13, %v334_v0  ;;  %v174_v39 = vld [vmem:[%s6501_s1 + $0x4e8] sm:$0xff] }
 0x148   :  { %3473 = vmatprep.subr.bf16.mxu0 %v4483_v27  ;;  %3516 = vmatprep.subr.bf16.mxu1 %v4485_v33  ;;  %v4614_v24 = vcombine.low %v301_v11, %v333_v12  ;;  %v4616_v27 = vcombine.low %v302_v13, %v334_v0  ;;  %v4551_v30 = vcombine.high %v237_v18, %v269_v19  ;;  %v205_v33 = vld [vmem:[%s6501_s1 + $0x5e0] sm:$0xff]  ;;  %v206_v40 = vld [vmem:[%s6501_s1 + $0x5e8] sm:$0xff]  ;;  %v367_v0 = vld [vmem:[%s6501_s1 + $0xaf0] sm:$0x11] }
 0x149   :  { %v4822_v57 = vpack.c.bf16 %v3802_v49, %v3801_v47  ;;  %v4823_v56 = vpack.c.bf16 %v3804_v50, %v3803_v48  ;;  %v4553_v31 = vcombine.high %v238_v20, %v270_v21  ;;  %v4552_v46 = vcombine.low %v238_v20, %v270_v21  ;;  %v109_v48 = vld [vmem:[%s6501_s1 + $0x2e0] sm:$0xff]  ;;  %v46_v12 = vld [vmem:[%s6501_s1 + $0xe8] sm:$0xff] }
 0x14a   :  { %v4487_v47 = vcombine.high %v173_v32, %v205_v33  ;;  %v4489_v53 = vcombine.high %v174_v39, %v206_v40  ;;  %v4488_v62 = vcombine.low %v174_v39, %v206_v40  ;;  %v4423_v63 = vcombine.high %v109_v48, %v141_v54  ;;  %v77_v11 = vld [vmem:[%s6501_s1 + $0x1e0] sm:$0xff]  ;;  %v78_v13 = vld [vmem:[%s6501_s1 + $0x1e8] sm:$0xff]  ;;  %v271_v39 = vld [vmem:[%s6501_s1 + $0x7f0] sm:$0xff] }
 0x14b   :  { %3474 = vmatpush1.bf16.msra.mxu0 %v4482_v42  ;;  %3517 = vmatpush1.bf16.msra.mxu1 %v4484_v43  ;;  %4273 = vst [vmem:[%s6504_s3 + $0x140] sm:$0xff] %v4822_v57  ;;  %4274 = vst [vmem:[%s6504_s3 + $0x148] sm:$0xff] %v4823_v56  ;;  %v4550_v43 = vcombine.low %v237_v18, %v269_v19  ;;  %v142_v57 = vld [vmem:[%s6501_s1 + $0x3e8] sm:$0xff]  ;;  %v4361_v20 = vcombine.high %v46_v12, %v78_v13  ;;  %v240_v40 = vld [vmem:[%s6501_s1 + $0x6f8] sm:$0xff] }
 0x14c   :  { %3475 = vmatprep.subr.bf16.mxu0 %v4419_v44  ;;  %3518 = vmatprep.subr.bf16.mxu1 %v4421_v45  ;;  %v4424_v18 = vcombine.low %v110_v55, %v142_v57  ;;  %v4683_v21 = vcombine.high %v367_v0, %v367_v0 }
 0x14f   :  { %3476 = vmatpush1.bf16.msra.mxu0 %v4418_v58  ;;  %3519 = vmatpush1.bf16.msra.mxu1 %v4420_v59 }
 0x150   :  { %3477 = vmatprep.subr.bf16.mxu0 %v4355_v60  ;;  %3520 = vmatprep.subr.bf16.mxu1 %v4357_v61  ;;  %v4486_v61 = vcombine.low %v173_v32, %v205_v33  ;;  %v336_v32 = vld [vmem:[%s6501_s1 + $0x9f8] sm:$0xff] }
 0x153   :  { %3478 = vmatpush1.bf16.msra.mxu0 %v4354_v4  ;;  %3521 = vmatpush1.bf16.msra.mxu1 %v4356_v6  ;;  %v4425_v4 = vcombine.high %v110_v55, %v142_v57  ;;  %v45_v6 = vld [vmem:[%s6501_s1 + $0xe0] sm:$0xff] }
 0x154   :  { %3553 = vmatprep.subr.bf16.mxu0 %v2325_v9  ;;  %3596 = vmatprep.subr.bf16.mxu1 %v2331_v10  ;;  %v4359_v19 = vcombine.high %v45_v6, %v77_v11 }
 0x156   :  { %v2809_v22 = vpop.f32.mrf.mxu0  ;;  %v2852_v23 = vpop.f32.mrf.mxu1  ;;  %4712 = vmatmul.mubr.msk.bf16.vlgmr.msra.gmra.mxu0 %vm2146_vm1, %v6061_v5  ;;  %4713 = vmatmul.mubr.msk.bf16.vlgmr.msra.gmra.mxu1 %vm2146_vm1, %v6061_v5 }
 0x157   :  { %v2810_v25 = vadd.f32 %v2809_v22, %v5656_v38  ;;  %v2853_v26 = vadd.f32 %v2852_v23, %v5656_v38  ;;  %3554 = vmatpush1.bf16.msra.mxu0 %v2322_v14  ;;  %3597 = vmatpush1.bf16.msra.mxu1 %v2328_v15  ;;  %v368_v14 = vld [vmem:[%s6501_s1 + $0xaf8] sm:$0x11]  ;;  %v4358_v23 = vcombine.low %v45_v6, %v77_v11 }
 0x158   :  { %v2811_v28 = vpop.f32.mrf.mxu0  ;;  %v2854_v29 = vpop.f32.mrf.mxu1  ;;  %3555 = vmatprep.subr.bf16.mxu0 %v4615_v16  ;;  %3598 = vmatprep.subr.bf16.mxu1 %v4617_v17  ;;  %v4422_v17 = vcombine.low %v109_v48, %v141_v54  ;;  %v4685_v22 = vcombine.high %v368_v14, %v368_v14 }
 0x159   :  { %v3741_v34 = vmax.f32 %v2810_v25, 0.0  ;;  %v3743_v35 = vmax.f32 %v2853_v26, 0.0  ;;  %v2812_v36 = vadd.f32 %v2811_v28, %v5656_v38  ;;  %v2855_v37 = vadd.f32 %v2854_v29, %v5656_v38  ;;  %3581 = vmatprep.mubr.bf16.mxu0 %v4915_v1  ;;  %3624 = vmatprep.mubr.bf16.mxu1 %v4915_v1  ;;  %v303_v29 = vld [vmem:[%s6501_s1 + $0x8f0] sm:$0xff] }
 0x15a   :  { %v2813_v41 = vpop.f32.mrf.mxu0  ;;  %v2856_v42 = vpop.f32.mrf.mxu1  ;;  %v4682_v25 = vcombine.low %v367_v0, %v367_v0  ;;  %v4684_v26 = vcombine.low %v368_v14, %v368_v14  ;;  %v2343_v28 = vand.u32 %v4685_v22, %v4940_v2  ;;  %v144_v0 = vld [vmem:[%s6501_s1 + $0x3f8] sm:$0xff] }
 0x15b   :  { %v3742_v44 = vmax.f32 %v2812_v36, 0.0  ;;  %v3744_v45 = vmax.f32 %v2855_v37, 0.0  ;;  %3556 = vmatpush1.bf16.msra.mxu0 %v4614_v24  ;;  %3599 = vmatpush1.bf16.msra.mxu1 %v4616_v27  ;;  %v2814_v49 = vadd.f32 %v2813_v41, %v5686_v3  ;;  %v2857_v50 = vadd.f32 %v2856_v42, %v5686_v3  ;;  %v239_v37 = vld [vmem:[%s6501_s1 + $0x6f0] sm:$0xff] }
 0x15c   :  { %v2815_v51 = vpop.f32.mrf.mxu0  ;;  %v2858_v52 = vpop.f32.mrf.mxu1  ;;  %3557 = vmatprep.subr.bf16.mxu0 %v4551_v30  ;;  %3600 = vmatprep.subr.bf16.mxu1 %v4553_v31  ;;  %v4360_v24 = vcombine.low %v46_v12, %v78_v13  ;;  %v2337_v27 = vand.u32 %v4683_v21, %v4940_v2  ;;  %v335_v30 = vld [vmem:[%s6501_s1 + $0x9f0] sm:$0xff]  ;;  %v304_v31 = vld [vmem:[%s6501_s1 + $0x8f8] sm:$0xff]  ;;  %v2334_v33 = vand.u32 %v4682_v25, %v4940_v2 }
 0x15d   :  { %v4792_v56 = vpack.c.bf16 %v3742_v44, %v3741_v34  ;;  %v4793_v58 = vpack.c.bf16 %v3744_v45, %v3743_v35  ;;  %v2816_v59 = vadd.f32 %v2815_v51, %v5686_v3  ;;  %v2859_v60 = vadd.f32 %v2858_v52, %v5686_v3  ;;  %v175_v51 = vld [vmem:[%s6501_s1 + $0x4f0] sm:$0xff]  ;;  %v112_v13 = vld [vmem:[%s6501_s1 + $0x2f8] sm:$0xff] }
 0x15e   :  { %v3805_v7 = vmax.f32 %v2814_v49, 0.0  ;;  %v3807_v8 = vmax.f32 %v2857_v50, 0.0  ;;  %v2340_v34 = vand.u32 %v4684_v26, %v4940_v2  ;;  %v4619_v35 = vcombine.high %v303_v29, %v335_v30  ;;  %v272_v2 = vld [vmem:[%s6501_s1 + $0x7f8] sm:$0xff]  ;;  %v207_v52 = vld [vmem:[%s6501_s1 + $0x5f0] sm:$0xff] }
 0x15f   :  { %4243 = vst [vmem:[%s6504_s3 + $0x50] sm:$0xff] %v4792_v56  ;;  %4244 = vst [vmem:[%s6504_s3 + $0x58] sm:$0xff] %v4793_v58  ;;  %3558 = vmatpush1.bf16.msra.mxu0 %v4550_v43  ;;  %3601 = vmatpush1.bf16.msra.mxu1 %v4552_v46  ;;  %v3806_v9 = vmax.f32 %v2816_v59, 0.0  ;;  %v3808_v10 = vmax.f32 %v2859_v60, 0.0  ;;  %v4621_v36 = vcombine.high %v304_v31, %v336_v32  ;;  %v176_v56 = vld [vmem:[%s6501_s1 + $0x4f8] sm:$0xff]  ;;  %v143_v12 = vld [vmem:[%s6501_s1 + $0x3f0] sm:$0xff] }
 0x160   :  { %3559 = vmatprep.subr.bf16.mxu0 %v4487_v47  ;;  %3602 = vmatprep.subr.bf16.mxu1 %v4489_v53  ;;  %v4618_v43 = vcombine.low %v303_v29, %v335_v30  ;;  %v4620_v46 = vcombine.low %v304_v31, %v336_v32  ;;  %v4555_v49 = vcombine.high %v239_v37, %v271_v39  ;;  %v208_v58 = vld [vmem:[%s6501_s1 + $0x5f8] sm:$0xff]  ;;  %v47_v26 = vld [vmem:[%s6501_s1 + $0xf0] sm:$0xff] }
 0x161   :  { %v4824_v15 = vpack.c.bf16 %v3806_v9, %v3805_v7  ;;  %v4825_v16 = vpack.c.bf16 %v3808_v10, %v3807_v8  ;;  %v4557_v50 = vcombine.high %v240_v40, %v272_v2  ;;  %v4491_v6 = vcombine.high %v175_v51, %v207_v52  ;;  %v111_v7 = vld [vmem:[%s6501_s1 + $0x2f0] sm:$0xff]  ;;  %v80_v29 = vld [vmem:[%s6501_s1 + $0x1f8] sm:$0xff] }
 0x162   :  { %v4429_v21 = vcombine.high %v112_v13, %v144_v0  ;;  %v4426_v32 = vcombine.low %v111_v7, %v143_v12 }
 0x163   :  { %3560 = vmatpush1.bf16.msra.mxu0 %v4486_v61  ;;  %3603 = vmatpush1.bf16.msra.mxu1 %v4488_v62  ;;  %4275 = vst [vmem:[%s6504_s3 + $0x150] sm:$0xff] %v4824_v15  ;;  %4276 = vst [vmem:[%s6504_s3 + $0x158] sm:$0xff] %v4825_v16  ;;  %v4554_v61 = vcombine.low %v239_v37, %v271_v39 }
 0x164   :  { %3561 = vmatprep.subr.bf16.mxu0 %v4423_v63  ;;  %3604 = vmatprep.subr.bf16.mxu1 %v4425_v4  ;;  %v4556_v4 = vcombine.low %v240_v40, %v272_v2 }
 0x167   :  { %3562 = vmatpush1.bf16.msra.mxu0 %v4422_v17  ;;  %3605 = vmatpush1.bf16.msra.mxu1 %v4424_v18  ;;  %v4490_v18 = vcombine.low %v175_v51, %v207_v52 }
 0x168   :  { %3563 = vmatprep.subr.bf16.mxu0 %v4359_v19  ;;  %3606 = vmatprep.subr.bf16.mxu1 %v4361_v20  ;;  %v4492_v19 = vcombine.low %v176_v56, %v208_v58  ;;  %v4427_v20 = vcombine.high %v111_v7, %v143_v12 }
 0x16b   :  { %3564 = vmatpush1.bf16.msra.mxu0 %v4358_v23  ;;  %3607 = vmatpush1.bf16.msra.mxu1 %v4360_v24 }
 0x16c   :  { %3639 = vmatprep.subr.bf16.mxu0 %v2337_v27  ;;  %3682 = vmatprep.subr.bf16.mxu1 %v2343_v28  ;;  %v79_v27 = vld [vmem:[%s6501_s1 + $0x1f0] sm:$0xff]  ;;  %v48_v28 = vld [vmem:[%s6501_s1 + $0xf8] sm:$0xff] }
 0x16d   :  { %v4364_v37 = vcombine.low %v48_v28, %v80_v29 }
 0x16e   :  { %v2895_v41 = vpop.f32.mrf.mxu0  ;;  %v2938_v42 = vpop.f32.mrf.mxu1  ;;  %4714 = vmatmul.mubr.msk.bf16.vlgmr.msra.gmra.mxu0 %vm2146_vm1, %v6061_v5  ;;  %4715 = vmatmul.mubr.msk.bf16.vlgmr.msra.gmra.mxu1 %vm2146_vm1, %v6061_v5 }
 0x16f   :  { %v2896_v44 = vadd.f32 %v2895_v41, %v5656_v38  ;;  %v2939_v45 = vadd.f32 %v2938_v42, %v5656_v38  ;;  %3640 = vmatpush1.bf16.msra.mxu0 %v2334_v33  ;;  %3683 = vmatpush1.bf16.msra.mxu1 %v2340_v34  ;;  %v4428_v33 = vcombine.low %v112_v13, %v144_v0 }
 0x170   :  { %v2897_v47 = vpop.f32.mrf.mxu0  ;;  %v2940_v48 = vpop.f32.mrf.mxu1  ;;  %3641 = vmatprep.subr.bf16.mxu0 %v4619_v35  ;;  %3684 = vmatprep.subr.bf16.mxu1 %v4621_v36  ;;  %v4363_v34 = vcombine.high %v47_v26, %v79_v27  ;;  %v4365_v35 = vcombine.high %v48_v28, %v80_v29  ;;  %v4362_v36 = vcombine.low %v47_v26, %v79_v27 }
 0x171   :  { %v3745_v53 = vmax.f32 %v2896_v44, 0.0  ;;  %v3747_v54 = vmax.f32 %v2939_v45, 0.0  ;;  %v2898_v55 = vadd.f32 %v2897_v47, %v5656_v38  ;;  %v2941_v57 = vadd.f32 %v2940_v48, %v5656_v38  ;;  %3667 = vmatprep.mubr.bf16.mxu0 %v4915_v1  ;;  %3710 = vmatprep.mubr.bf16.mxu1 %v4915_v1 }
 0x172   :  { %v2899_v59 = vpop.f32.mrf.mxu0  ;;  %v2942_v60 = vpop.f32.mrf.mxu1  ;;  %v4493_v1 = vcombine.high %v176_v56, %v208_v58 }
 0x173   :  { %v3746_v62 = vmax.f32 %v2898_v55, 0.0  ;;  %v3748_v63 = vmax.f32 %v2941_v57, 0.0  ;;  %3642 = vmatpush1.bf16.msra.mxu0 %v4618_v43  ;;  %3685 = vmatpush1.bf16.msra.mxu1 %v4620_v46  ;;  %v2900_v8 = vadd.f32 %v2899_v59, %v5686_v3  ;;  %v2943_v9 = vadd.f32 %v2942_v60, %v5686_v3 }
 0x174   :  { %v2901_v10 = vpop.f32.mrf.mxu0  ;;  %v2944_v11 = vpop.f32.mrf.mxu1  ;;  %3643 = vmatprep.subr.bf16.mxu0 %v4555_v49  ;;  %3686 = vmatprep.subr.bf16.mxu1 %v4557_v50 }
 0x175   :  { %v4794_v14 = vpack.c.bf16 %v3746_v62, %v3745_v53  ;;  %v4795_v15 = vpack.c.bf16 %v3748_v63, %v3747_v54  ;;  %v2902_v16 = vadd.f32 %v2901_v10, %v5686_v3  ;;  %v2945_v17 = vadd.f32 %v2944_v11, %v5686_v3 }
 0x176   :  { %v3809_v22 = vmax.f32 %v2900_v8, 0.0  ;;  %v3811_v23 = vmax.f32 %v2943_v9, 0.0 }
 0x177   :  { %4245 = vst [vmem:[%s6504_s3 + $0x60] sm:$0xff] %v4794_v14  ;;  %4246 = vst [vmem:[%s6504_s3 + $0x68] sm:$0xff] %v4795_v15  ;;  %3644 = vmatpush1.bf16.msra.mxu0 %v4554_v61  ;;  %3687 = vmatpush1.bf16.msra.mxu1 %v4556_v4  ;;  %v3810_v24 = vmax.f32 %v2902_v16, 0.0  ;;  %v3812_v25 = vmax.f32 %v2945_v17, 0.0 }
 0x178   :  { %3645 = vmatprep.subr.bf16.mxu0 %v4491_v6  ;;  %3688 = vmatprep.subr.bf16.mxu1 %v4493_v1 }
 0x179   :  { %v4826_v30 = vpack.c.bf16 %v3810_v24, %v3809_v22  ;;  %v4827_v31 = vpack.c.bf16 %v3812_v25, %v3811_v23 }
 0x17b   :  { %3646 = vmatpush1.bf16.msra.mxu0 %v4490_v18  ;;  %3689 = vmatpush1.bf16.msra.mxu1 %v4492_v19  ;;  %4277 = vst [vmem:[%s6504_s3 + $0x160] sm:$0xff] %v4826_v30  ;;  %4278 = vst [vmem:[%s6504_s3 + $0x168] sm:$0xff] %v4827_v31 }
 0x17c   :  { %3647 = vmatprep.subr.bf16.mxu0 %v4427_v20  ;;  %3690 = vmatprep.subr.bf16.mxu1 %v4429_v21 }
 0x17f   :  { %3648 = vmatpush1.bf16.msra.mxu0 %v4426_v32  ;;  %3691 = vmatpush1.bf16.msra.mxu1 %v4428_v33 }
 0x180   :  { %3649 = vmatprep.subr.bf16.mxu0 %v4363_v34  ;;  %3692 = vmatprep.subr.bf16.mxu1 %v4365_v35 }
 0x183   :  { %3650 = vmatpush1.bf16.msra.mxu0 %v4362_v36  ;;  %3693 = vmatpush1.bf16.msra.mxu1 %v4364_v37 }
 0x186   :  { %v2981_v39 = vpop.f32.mrf.mxu0  ;;  %v3024_v40 = vpop.f32.mrf.mxu1  ;;  %4716 = vmatmul.mubr.msk.bf16.vlgmr.msra.gmra.mxu0 %vm2146_vm1, %v6061_v5  ;;  %4717 = vmatmul.mubr.msk.bf16.vlgmr.msra.gmra.mxu1 %vm2146_vm1, %v6061_v5 }
 0x187   :  { %v2982_v2 = vadd.f32 %v2981_v39, %v5656_v38  ;;  %v3025_v41 = vadd.f32 %v3024_v40, %v5656_v38 }
 0x188   :  { %v2983_v42 = vpop.f32.mrf.mxu0  ;;  %v3026_v43 = vpop.f32.mrf.mxu1 }
 0x189   :  { %v3749_v44 = vmax.f32 %v2982_v2, 0.0  ;;  %v3751_v45 = vmax.f32 %v3025_v41, 0.0  ;;  %v2984_v46 = vadd.f32 %v2983_v42, %v5656_v38  ;;  %v3027_v47 = vadd.f32 %v3026_v43, %v5656_v38 }
 0x18a   :  { %v2985_v48 = vpop.f32.mrf.mxu0  ;;  %v3028_v49 = vpop.f32.mrf.mxu1 }
 0x18b   :  { %v3750_v50 = vmax.f32 %v2984_v46, 0.0  ;;  %v3752_v51 = vmax.f32 %v3027_v47, 0.0  ;;  %v2986_v52 = vadd.f32 %v2985_v48, %v5686_v3  ;;  %v3029_v5 = vadd.f32 %v3028_v49, %v5686_v3 }
 0x18c   :  { %v2987_v53 = vpop.f32.mrf.mxu0  ;;  %v3030_v54 = vpop.f32.mrf.mxu1 }
 0x18d   :  { %v4796_v55 = vpack.c.bf16 %v3750_v50, %v3749_v44  ;;  %v4797_v57 = vpack.c.bf16 %v3752_v51, %v3751_v45  ;;  %v2988_v56 = vadd.f32 %v2987_v53, %v5686_v3  ;;  %v3031_v58 = vadd.f32 %v3030_v54, %v5686_v3 }
 0x18e   :  { %v3813_v59 = vmax.f32 %v2986_v52, 0.0  ;;  %v3815_v60 = vmax.f32 %v3029_v5, 0.0 }
 0x18f   :  { %4247 = vst [vmem:[%s6504_s3 + $0x70] sm:$0xff] %v4796_v55  ;;  %4248 = vst [vmem:[%s6504_s3 + $0x78] sm:$0xff] %v4797_v57  ;;  %v3814_v61 = vmax.f32 %v2988_v56, 0.0  ;;  %v3816_v62 = vmax.f32 %v3031_v58, 0.0 }
 0x191   :  { %v4828_v63 = vpack.c.bf16 %v3814_v61, %v3813_v59  ;;  %v4829_v4 = vpack.c.bf16 %v3816_v62, %v3815_v60 }
 0x193   :  { %4279 = vst [vmem:[%s6504_s3 + $0x170] sm:$0xff] %v4828_v63  ;;  %4280 = vst [vmem:[%s6504_s3 + $0x178] sm:$0xff] %v4829_v4 }
 0x19e   :  { %v3067_v6 = vpop.f32.mrf.mxu0  ;;  %v3110_v7 = vpop.f32.mrf.mxu1 }
 0x19f   :  { %v3068_v8 = vadd.f32 %v3067_v6, %v5656_v38  ;;  %v3111_v9 = vadd.f32 %v3110_v7, %v5656_v38 }
 0x1a0   :  { %v3069_v10 = vpop.f32.mrf.mxu0  ;;  %v3112_v11 = vpop.f32.mrf.mxu1 }
 0x1a1   :  { %v3753_v1 = vmax.f32 %v3068_v8, 0.0  ;;  %v3755_v12 = vmax.f32 %v3111_v9, 0.0  ;;  %v3070_v13 = vadd.f32 %v3069_v10, %v5656_v38  ;;  %v3113_v0 = vadd.f32 %v3112_v11, %v5656_v38 }
 0x1a2   :  { %v3071_v14 = vpop.f32.mrf.mxu0  ;;  %v3114_v15 = vpop.f32.mrf.mxu1 }
 0x1a3   :  { %v3754_v16 = vmax.f32 %v3070_v13, 0.0  ;;  %v3756_v17 = vmax.f32 %v3113_v0, 0.0  ;;  %v3072_v18 = vadd.f32 %v3071_v14, %v5686_v3  ;;  %v3115_v19 = vadd.f32 %v3114_v15, %v5686_v3 }
 0x1a4   :  { %v3073_v20 = vpop.f32.mrf.mxu0  ;;  %v3116_v21 = vpop.f32.mrf.mxu1 }
 0x1a5   :  { %v4798_v22 = vpack.c.bf16 %v3754_v16, %v3753_v1  ;;  %v4799_v23 = vpack.c.bf16 %v3756_v17, %v3755_v12  ;;  %v3074_v24 = vadd.f32 %v3073_v20, %v5686_v3  ;;  %v3117_v25 = vadd.f32 %v3116_v21, %v5686_v3 }
 0x1a6   :  { %v3817_v26 = vmax.f32 %v3072_v18, 0.0  ;;  %v3819_v27 = vmax.f32 %v3115_v19, 0.0 }
 0x1a7   :  { %4249 = vst [vmem:[%s6504_s3 + $0x80] sm:$0xff] %v4798_v22  ;;  %4250 = vst [vmem:[%s6504_s3 + $0x88] sm:$0xff] %v4799_v23  ;;  %v3818_v28 = vmax.f32 %v3074_v24, 0.0  ;;  %v3820_v29 = vmax.f32 %v3117_v25, 0.0 }
 0x1a9   :  { %v4830_v30 = vpack.c.bf16 %v3818_v28, %v3817_v26  ;;  %v4831_v31 = vpack.c.bf16 %v3820_v29, %v3819_v27 }
 0x1ab   :  { %4281 = vst [vmem:[%s6504_s3 + $0x180] sm:$0xff] %v4830_v30  ;;  %4282 = vst [vmem:[%s6504_s3 + $0x188] sm:$0xff] %v4831_v31 }
 0x1b6   :  { %v3153_v32 = vpop.f32.mrf.mxu0  ;;  %v3196_v33 = vpop.f32.mrf.mxu1 }
 0x1b7   :  { %v3154_v34 = vadd.f32 %v3153_v32, %v5656_v38  ;;  %v3197_v35 = vadd.f32 %v3196_v33, %v5656_v38 }
 0x1b8   :  { %v3155_v36 = vpop.f32.mrf.mxu0  ;;  %v3198_v37 = vpop.f32.mrf.mxu1 }
 0x1b9   :  { %v3757_v39 = vmax.f32 %v3154_v34, 0.0  ;;  %v3759_v40 = vmax.f32 %v3197_v35, 0.0  ;;  %v3156_v2 = vadd.f32 %v3155_v36, %v5656_v38  ;;  %v3199_v41 = vadd.f32 %v3198_v37, %v5656_v38 }
 0x1ba   :  { %v3157_v42 = vpop.f32.mrf.mxu0  ;;  %v3200_v43 = vpop.f32.mrf.mxu1 }
 0x1bb   :  { %v3758_v44 = vmax.f32 %v3156_v2, 0.0  ;;  %v3760_v45 = vmax.f32 %v3199_v41, 0.0  ;;  %v3158_v46 = vadd.f32 %v3157_v42, %v5686_v3  ;;  %v3201_v47 = vadd.f32 %v3200_v43, %v5686_v3 }
 0x1bc   :  { %v3159_v48 = vpop.f32.mrf.mxu0  ;;  %v3202_v49 = vpop.f32.mrf.mxu1 }
 0x1bd   :  { %v4800_v50 = vpack.c.bf16 %v3758_v44, %v3757_v39  ;;  %v4801_v51 = vpack.c.bf16 %v3760_v45, %v3759_v40  ;;  %v3160_v52 = vadd.f32 %v3159_v48, %v5686_v3  ;;  %v3203_v5 = vadd.f32 %v3202_v49, %v5686_v3 }
 0x1be   :  { %v3821_v53 = vmax.f32 %v3158_v46, 0.0  ;;  %v3823_v54 = vmax.f32 %v3201_v47, 0.0 }
 0x1bf   :  { %4251 = vst [vmem:[%s6504_s3 + $0x90] sm:$0xff] %v4800_v50  ;;  %4252 = vst [vmem:[%s6504_s3 + $0x98] sm:$0xff] %v4801_v51  ;;  %v3822_v55 = vmax.f32 %v3160_v52, 0.0  ;;  %v3824_v57 = vmax.f32 %v3203_v5, 0.0 }
 0x1c1   :  { %v4832_v56 = vpack.c.bf16 %v3822_v55, %v3821_v53  ;;  %v4833_v58 = vpack.c.bf16 %v3824_v57, %v3823_v54 }
 0x1c3   :  { %4283 = vst [vmem:[%s6504_s3 + $0x190] sm:$0xff] %v4832_v56  ;;  %4284 = vst [vmem:[%s6504_s3 + $0x198] sm:$0xff] %v4833_v58 }
 0x1ce   :  { %v3239_v59 = vpop.f32.mrf.mxu0  ;;  %v3282_v60 = vpop.f32.mrf.mxu1 }
 0x1cf   :  { %v3240_v61 = vadd.f32 %v3239_v59, %v5656_v38  ;;  %v3283_v62 = vadd.f32 %v3282_v60, %v5656_v38 }
 0x1d0   :  { %v3241_v63 = vpop.f32.mrf.mxu0  ;;  %v3284_v4 = vpop.f32.mrf.mxu1 }
 0x1d1   :  { %v3761_v6 = vmax.f32 %v3240_v61, 0.0  ;;  %v3763_v7 = vmax.f32 %v3283_v62, 0.0  ;;  %v3242_v8 = vadd.f32 %v3241_v63, %v5656_v38  ;;  %v3285_v9 = vadd.f32 %v3284_v4, %v5656_v38 }
 0x1d2   :  { %v3243_v10 = vpop.f32.mrf.mxu0  ;;  %v3286_v11 = vpop.f32.mrf.mxu1 }
 0x1d3   :  { %v3762_v1 = vmax.f32 %v3242_v8, 0.0  ;;  %v3764_v12 = vmax.f32 %v3285_v9, 0.0  ;;  %v3244_v13 = vadd.f32 %v3243_v10, %v5686_v3  ;;  %v3287_v0 = vadd.f32 %v3286_v11, %v5686_v3 }
 0x1d4   :  { %v3245_v14 = vpop.f32.mrf.mxu0  ;;  %v3288_v15 = vpop.f32.mrf.mxu1 }
 0x1d5   :  { %v4802_v16 = vpack.c.bf16 %v3762_v1, %v3761_v6  ;;  %v4803_v17 = vpack.c.bf16 %v3764_v12, %v3763_v7  ;;  %v3246_v18 = vadd.f32 %v3245_v14, %v5686_v3  ;;  %v3289_v19 = vadd.f32 %v3288_v15, %v5686_v3 }
 0x1d6   :  { %v3825_v20 = vmax.f32 %v3244_v13, 0.0  ;;  %v3827_v21 = vmax.f32 %v3287_v0, 0.0 }
 0x1d7   :  { %4253 = vst [vmem:[%s6504_s3 + $0xa0] sm:$0xff] %v4802_v16  ;;  %4254 = vst [vmem:[%s6504_s3 + $0xa8] sm:$0xff] %v4803_v17  ;;  %v3826_v22 = vmax.f32 %v3246_v18, 0.0  ;;  %v3828_v23 = vmax.f32 %v3289_v19, 0.0 }
 0x1d9   :  { %v4834_v24 = vpack.c.bf16 %v3826_v22, %v3825_v20  ;;  %v4835_v25 = vpack.c.bf16 %v3828_v23, %v3827_v21 }
 0x1db   :  { %4285 = vst [vmem:[%s6504_s3 + $0x1a0] sm:$0xff] %v4834_v24  ;;  %4286 = vst [vmem:[%s6504_s3 + $0x1a8] sm:$0xff] %v4835_v25 }
 0x1e6   :  { %v3325_v26 = vpop.f32.mrf.mxu0  ;;  %v3368_v27 = vpop.f32.mrf.mxu1 }
 0x1e7   :  { %v3326_v28 = vadd.f32 %v3325_v26, %v5656_v38  ;;  %v3369_v29 = vadd.f32 %v3368_v27, %v5656_v38 }
 0x1e8   :  { %v3327_v30 = vpop.f32.mrf.mxu0  ;;  %v3370_v31 = vpop.f32.mrf.mxu1 }
 0x1e9   :  { %v3765_v32 = vmax.f32 %v3326_v28, 0.0  ;;  %v3767_v33 = vmax.f32 %v3369_v29, 0.0  ;;  %v3328_v34 = vadd.f32 %v3327_v30, %v5656_v38  ;;  %v3371_v35 = vadd.f32 %v3370_v31, %v5656_v38 }
 0x1ea   :  { %v3329_v36 = vpop.f32.mrf.mxu0  ;;  %v3372_v37 = vpop.f32.mrf.mxu1 }
 0x1eb   :  { %v3766_v39 = vmax.f32 %v3328_v34, 0.0  ;;  %v3768_v40 = vmax.f32 %v3371_v35, 0.0  ;;  %v3330_v2 = vadd.f32 %v3329_v36, %v5686_v3  ;;  %v3373_v41 = vadd.f32 %v3372_v37, %v5686_v3 }
 0x1ec   :  { %v3331_v42 = vpop.f32.mrf.mxu0  ;;  %v3374_v43 = vpop.f32.mrf.mxu1 }
 0x1ed   :  { %v4804_v44 = vpack.c.bf16 %v3766_v39, %v3765_v32  ;;  %v4805_v45 = vpack.c.bf16 %v3768_v40, %v3767_v33  ;;  %v3332_v46 = vadd.f32 %v3331_v42, %v5686_v3  ;;  %v3375_v47 = vadd.f32 %v3374_v43, %v5686_v3 }
 0x1ee   :  { %v3829_v48 = vmax.f32 %v3330_v2, 0.0  ;;  %v3831_v49 = vmax.f32 %v3373_v41, 0.0 }
 0x1ef   :  { %4255 = vst [vmem:[%s6504_s3 + $0xb0] sm:$0xff] %v4804_v44  ;;  %4256 = vst [vmem:[%s6504_s3 + $0xb8] sm:$0xff] %v4805_v45  ;;  %v3830_v50 = vmax.f32 %v3332_v46, 0.0  ;;  %v3832_v51 = vmax.f32 %v3375_v47, 0.0 }
 0x1f1   :  { %v4836_v52 = vpack.c.bf16 %v3830_v50, %v3829_v48  ;;  %v4837_v5 = vpack.c.bf16 %v3832_v51, %v3831_v49 }
 0x1f3   :  { %4287 = vst [vmem:[%s6504_s3 + $0x1b0] sm:$0xff] %v4836_v52  ;;  %4288 = vst [vmem:[%s6504_s3 + $0x1b8] sm:$0xff] %v4837_v5 }
 0x1fe   :  { %v3411_v53 = vpop.f32.mrf.mxu0  ;;  %v3454_v54 = vpop.f32.mrf.mxu1 }
 0x1ff   :  { %v3412_v55 = vadd.f32 %v3411_v53, %v5656_v38  ;;  %v3455_v57 = vadd.f32 %v3454_v54, %v5656_v38 }
 0x200   :  { %v3413_v56 = vpop.f32.mrf.mxu0  ;;  %v3456_v58 = vpop.f32.mrf.mxu1 }
 0x201   :  { %v3769_v59 = vmax.f32 %v3412_v55, 0.0  ;;  %v3771_v60 = vmax.f32 %v3455_v57, 0.0  ;;  %v3414_v61 = vadd.f32 %v3413_v56, %v5656_v38  ;;  %v3457_v62 = vadd.f32 %v3456_v58, %v5656_v38 }
 0x202   :  { %v3415_v63 = vpop.f32.mrf.mxu0  ;;  %v3458_v4 = vpop.f32.mrf.mxu1 }
 0x203   :  { %v3770_v6 = vmax.f32 %v3414_v61, 0.0  ;;  %v3772_v7 = vmax.f32 %v3457_v62, 0.0  ;;  %v3416_v8 = vadd.f32 %v3415_v63, %v5686_v3  ;;  %v3459_v9 = vadd.f32 %v3458_v4, %v5686_v3 }
 0x204   :  { %v3417_v10 = vpop.f32.mrf.mxu0  ;;  %v3460_v11 = vpop.f32.mrf.mxu1 }
 0x205   :  { %v4806_v1 = vpack.c.bf16 %v3770_v6, %v3769_v59  ;;  %v4807_v12 = vpack.c.bf16 %v3772_v7, %v3771_v60  ;;  %v3418_v13 = vadd.f32 %v3417_v10, %v5686_v3  ;;  %v3461_v0 = vadd.f32 %v3460_v11, %v5686_v3 }
 0x206   :  { %v3833_v14 = vmax.f32 %v3416_v8, 0.0  ;;  %v3835_v15 = vmax.f32 %v3459_v9, 0.0 }
 0x207   :  { %4257 = vst [vmem:[%s6504_s3 + $0xc0] sm:$0xff] %v4806_v1  ;;  %4258 = vst [vmem:[%s6504_s3 + $0xc8] sm:$0xff] %v4807_v12  ;;  %v3834_v16 = vmax.f32 %v3418_v13, 0.0  ;;  %v3836_v17 = vmax.f32 %v3461_v0, 0.0 }
 0x209   :  { %v4838_v18 = vpack.c.bf16 %v3834_v16, %v3833_v14  ;;  %v4839_v19 = vpack.c.bf16 %v3836_v17, %v3835_v15 }
 0x20b   :  { %4289 = vst [vmem:[%s6504_s3 + $0x1c0] sm:$0xff] %v4838_v18  ;;  %4290 = vst [vmem:[%s6504_s3 + $0x1c8] sm:$0xff] %v4839_v19 }
 0x216   :  { %v3497_v20 = vpop.f32.mrf.mxu0  ;;  %v3540_v21 = vpop.f32.mrf.mxu1 }
 0x217   :  { %v3498_v22 = vadd.f32 %v3497_v20, %v5656_v38  ;;  %v3541_v23 = vadd.f32 %v3540_v21, %v5656_v38 }
 0x218   :  { %v3499_v24 = vpop.f32.mrf.mxu0  ;;  %v3542_v25 = vpop.f32.mrf.mxu1 }
 0x219   :  { %v3773_v26 = vmax.f32 %v3498_v22, 0.0  ;;  %v3775_v27 = vmax.f32 %v3541_v23, 0.0  ;;  %v3500_v28 = vadd.f32 %v3499_v24, %v5656_v38  ;;  %v3543_v29 = vadd.f32 %v3542_v25, %v5656_v38 }
 0x21a   :  { %v3501_v30 = vpop.f32.mrf.mxu0  ;;  %v3544_v31 = vpop.f32.mrf.mxu1 }
 0x21b   :  { %v3774_v32 = vmax.f32 %v3500_v28, 0.0  ;;  %v3776_v33 = vmax.f32 %v3543_v29, 0.0  ;;  %v3502_v34 = vadd.f32 %v3501_v30, %v5686_v3  ;;  %v3545_v35 = vadd.f32 %v3544_v31, %v5686_v3 }
 0x21c   :  { %v3503_v36 = vpop.f32.mrf.mxu0  ;;  %v3546_v37 = vpop.f32.mrf.mxu1 }
 0x21d   :  { %v4808_v39 = vpack.c.bf16 %v3774_v32, %v3773_v26  ;;  %v4809_v40 = vpack.c.bf16 %v3776_v33, %v3775_v27  ;;  %v3504_v2 = vadd.f32 %v3503_v36, %v5686_v3  ;;  %v3547_v41 = vadd.f32 %v3546_v37, %v5686_v3 }
 0x21e   :  { %v3837_v42 = vmax.f32 %v3502_v34, 0.0  ;;  %v3839_v43 = vmax.f32 %v3545_v35, 0.0 }
 0x21f   :  { %4259 = vst [vmem:[%s6504_s3 + $0xd0] sm:$0xff] %v4808_v39  ;;  %4260 = vst [vmem:[%s6504_s3 + $0xd8] sm:$0xff] %v4809_v40  ;;  %v3838_v44 = vmax.f32 %v3504_v2, 0.0  ;;  %v3840_v45 = vmax.f32 %v3547_v41, 0.0 }
 0x221   :  { %v4840_v46 = vpack.c.bf16 %v3838_v44, %v3837_v42  ;;  %v4841_v47 = vpack.c.bf16 %v3840_v45, %v3839_v43 }
 0x223   :  { %4291 = vst [vmem:[%s6504_s3 + $0x1d0] sm:$0xff] %v4840_v46  ;;  %4292 = vst [vmem:[%s6504_s3 + $0x1d8] sm:$0xff] %v4841_v47 }
 0x22e   :  { %v3583_v48 = vpop.f32.mrf.mxu0  ;;  %v3626_v49 = vpop.f32.mrf.mxu1 }
 0x22f   :  { %v3584_v50 = vadd.f32 %v3583_v48, %v5656_v38  ;;  %v3627_v51 = vadd.f32 %v3626_v49, %v5656_v38 }
 0x230   :  { %v3585_v52 = vpop.f32.mrf.mxu0  ;;  %v3628_v5 = vpop.f32.mrf.mxu1 }
 0x231   :  { %v3777_v53 = vmax.f32 %v3584_v50, 0.0  ;;  %v3779_v54 = vmax.f32 %v3627_v51, 0.0  ;;  %v3586_v55 = vadd.f32 %v3585_v52, %v5656_v38  ;;  %v3629_v57 = vadd.f32 %v3628_v5, %v5656_v38 }
 0x232   :  { %v3587_v56 = vpop.f32.mrf.mxu0  ;;  %v3630_v58 = vpop.f32.mrf.mxu1 }
 0x233   :  { %v3778_v59 = vmax.f32 %v3586_v55, 0.0  ;;  %v3780_v60 = vmax.f32 %v3629_v57, 0.0  ;;  %v3588_v61 = vadd.f32 %v3587_v56, %v5686_v3  ;;  %v3631_v62 = vadd.f32 %v3630_v58, %v5686_v3 }
 0x234   :  { %v3589_v63 = vpop.f32.mrf.mxu0  ;;  %v3632_v4 = vpop.f32.mrf.mxu1 }
 0x235   :  { %v4810_v6 = vpack.c.bf16 %v3778_v59, %v3777_v53  ;;  %v4811_v7 = vpack.c.bf16 %v3780_v60, %v3779_v54  ;;  %v3590_v8 = vadd.f32 %v3589_v63, %v5686_v3  ;;  %v3633_v9 = vadd.f32 %v3632_v4, %v5686_v3 }
 0x236   :  { %v3841_v10 = vmax.f32 %v3588_v61, 0.0  ;;  %v3843_v11 = vmax.f32 %v3631_v62, 0.0 }
 0x237   :  { %4261 = vst [vmem:[%s6504_s3 + $0xe0] sm:$0xff] %v4810_v6  ;;  %4262 = vst [vmem:[%s6504_s3 + $0xe8] sm:$0xff] %v4811_v7  ;;  %v3842_v1 = vmax.f32 %v3590_v8, 0.0  ;;  %v3844_v12 = vmax.f32 %v3633_v9, 0.0 }
 0x239   :  { %v4842_v13 = vpack.c.bf16 %v3842_v1, %v3841_v10  ;;  %v4843_v0 = vpack.c.bf16 %v3844_v12, %v3843_v11 }
 0x23b   :  { %4293 = vst [vmem:[%s6504_s3 + $0x1e0] sm:$0xff] %v4842_v13  ;;  %4294 = vst [vmem:[%s6504_s3 + $0x1e8] sm:$0xff] %v4843_v0 }
 0x246   :  { %v3669_v14 = vpop.f32.mrf.mxu0  ;;  %v3712_v15 = vpop.f32.mrf.mxu1 }
 0x247   :  { %v3670_v16 = vadd.f32 %v3669_v14, %v5656_v38  ;;  %v3713_v17 = vadd.f32 %v3712_v15, %v5656_v38 }
 0x248   :  { %v3671_v18 = vpop.f32.mrf.mxu0  ;;  %v3714_v19 = vpop.f32.mrf.mxu1 }
 0x249   :  { %v3672_v20 = vadd.f32 %v3671_v18, %v5656_v38  ;;  %v3715_v21 = vadd.f32 %v3714_v19, %v5656_v38  ;;  %v3781_v24 = vmax.f32 %v3670_v16, 0.0  ;;  %v3783_v25 = vmax.f32 %v3713_v17, 0.0 }
 0x24a   :  { %v3673_v22 = vpop.f32.mrf.mxu0  ;;  %v3716_v23 = vpop.f32.mrf.mxu1 }
 0x24b   :  { %v3782_v26 = vmax.f32 %v3672_v20, 0.0  ;;  %v3784_v27 = vmax.f32 %v3715_v21, 0.0  ;;  %v3674_v28 = vadd.f32 %v3673_v22, %v5686_v3  ;;  %v3717_v29 = vadd.f32 %v3716_v23, %v5686_v3 }
 0x24c   :  { %v3675_v30 = vpop.f32.mrf.mxu0  ;;  %v3718_v31 = vpop.f32.mrf.mxu1 }
 0x24d   :  { %v4812_v32 = vpack.c.bf16 %v3782_v26, %v3781_v24  ;;  %v4813_v33 = vpack.c.bf16 %v3784_v27, %v3783_v25  ;;  %v3676_v34 = vadd.f32 %v3675_v30, %v5686_v3  ;;  %v3719_v35 = vadd.f32 %v3718_v31, %v5686_v3 }
 0x24e   :  { %v3845_v38 = vmax.f32 %v3674_v28, 0.0  ;;  %v3847_v36 = vmax.f32 %v3717_v29, 0.0 }
 0x24f   :  { %4263 = vst [vmem:[%s6504_s3 + $0xf0] sm:$0xff] %v4812_v32  ;;  %4264 = vst [vmem:[%s6504_s3 + $0xf8] sm:$0xff] %v4813_v33  ;;  %v3846_v37 = vmax.f32 %v3676_v34, 0.0  ;;  %v3848_v39 = vmax.f32 %v3719_v35, 0.0 }
 0x251   :  { %v4844_v40 = vpack.c.bf16 %v3846_v37, %v3845_v38  ;;  %v4845_v2 = vpack.c.bf16 %v3848_v39, %v3847_v36 }
 0x253   :  { %4295 = vst [vmem:[%s6504_s3 + $0x1f0] sm:$0xff] %v4844_v40  ;;  %4296 = vst [vmem:[%s6504_s3 + $0x1f8] sm:$0xff] %v4845_v2 }

// kernel: d2_forward.6
= control target key start
LH: loop header
LB: loop body
LE: loop exit
PB: predicated region body
PF: predicated region fallthrough
CT: control target
= control target key end

     0   :  { %v4375_v26 = vmov 0   ;;  %vm2677_vm0 = vcmask 392192   ;;  %s6060_s1 = inlined_call_operand.vmem [shape: bf16[432,2048], index: 1, kind: input, shape index: {}]   ;;  %s6061_s0 = inlined_call_operand.vmem [shape: bf16[32,432], index: 0, kind: input, shape index: {}]   ;;  %s6062_s2 = inlined_call_operand.vmem [shape: f32[32,1], index: 2, kind: input, shape index: {}]   ;;  %s6063_s3 = inlined_call_operand.vmem [shape: bf16[32,2048], index: 3, kind: output, shape index: {}]  }
   0x1   :  { %v135_v0 = vld [vmem:[%s6060_s1 + $0x380] sm:$0xff]  ;;  %4345 = vset.pattern.permute.xlu0 %v4375_v26  ;;  %4346 = vset.pattern.permute.xlu1 %v4375_v26  ;;  %v4471_v43 = vld [vmem:[%s6061_s0 + $0xc] ss:$16 sps:$4 sm:$0xff]  }
   0x2   :  { %v143_v1 = vld [vmem:[%s6060_s1 + $0x3c0] sm:$0xff]  ;;  %4264 = vmatprep.mubr.msk.bf16.mxu1 %vm2677_vm0, %v4471_v43 }
   0x3   :  { %v391_v2 = vld [vmem:[%s6060_s1 + $0xb80] sm:$0xff]  ;;  %v3945_v3 = vcombine.high %v135_v0, %v143_v1  ;;  %v3944_v5 = vcombine.low %v135_v0, %v143_v1 }
   0x4   :  { %v399_v4 = vld [vmem:[%s6060_s1 + $0xbc0] sm:$0xff] }
   0x5   :  { %v119_v6 = vld [vmem:[%s6060_s1 + $0x300] sm:$0xff]  ;;  %v4201_v8 = vcombine.high %v391_v2, %v399_v4  ;;  %v4200_v9 = vcombine.low %v391_v2, %v399_v4  ;;  %2684 = vmatprep.subr.bf16.mxu0 %v3945_v3 }
   0x6   :  { %v127_v7 = vld [vmem:[%s6060_s1 + $0x340] sm:$0xff]  ;;  %2685 = vmatpush1.bf16.msra.mxu0 %v3944_v5 }
   0x7   :  { %v3929_v10 = vcombine.high %v119_v6, %v127_v7  ;;  %v375_v11 = vld [vmem:[%s6060_s1 + $0xb00] sm:$0xff]  ;;  %2737 = vmatprep.subr.bf16.mxu1 %v4201_v8  ;;  %v3928_v18 = vcombine.low %v119_v6, %v127_v7 }
   0x8   :  { %v383_v12 = vld [vmem:[%s6060_s1 + $0xb40] sm:$0xff]  ;;  %2738 = vmatpush1.bf16.msra.mxu1 %v4200_v9 }
   0x9   :  { %v103_v13 = vld [vmem:[%s6060_s1 + $0x280] sm:$0xff]  ;;  %v4185_v14 = vcombine.high %v375_v11, %v383_v12  ;;  %2686 = vmatprep.subr.bf16.mxu0 %v3929_v10  ;;  %v4184_v19 = vcombine.low %v375_v11, %v383_v12 }
   0xa   :  { %v111_v15 = vld [vmem:[%s6060_s1 + $0x2c0] sm:$0xff]  ;;  %2687 = vmatpush1.bf16.msra.mxu0 %v3928_v18 }
   0xb   :  { %v359_v16 = vld [vmem:[%s6060_s1 + $0xa80] sm:$0xff]  ;;  %v3913_v20 = vcombine.high %v103_v13, %v111_v15  ;;  %2739 = vmatprep.subr.bf16.mxu1 %v4185_v14  ;;  %v3912_v27 = vcombine.low %v103_v13, %v111_v15 }
   0xc   :  { %v367_v17 = vld [vmem:[%s6060_s1 + $0xac0] sm:$0xff]  ;;  %2740 = vmatpush1.bf16.msra.mxu1 %v4184_v19 }
   0xd   :  { %v4169_v21 = vcombine.high %v359_v16, %v367_v17  ;;  %v87_v22 = vld [vmem:[%s6060_s1 + $0x200] sm:$0xff]  ;;  %2688 = vmatprep.subr.bf16.mxu0 %v3913_v20  ;;  %v4168_v28 = vcombine.low %v359_v16, %v367_v17 }
   0xe   :  { %v95_v23 = vld [vmem:[%s6060_s1 + $0x240] sm:$0xff]  ;;  %2689 = vmatpush1.bf16.msra.mxu0 %v3912_v27  ;;  %v136_v27 = vld [vmem:[%s6060_s1 + $0x388] sm:$0xff] }
   0xf   :  { %v343_v24 = vld [vmem:[%s6060_s1 + $0xa00] sm:$0xff]  ;;  %v3897_v29 = vcombine.high %v87_v22, %v95_v23  ;;  %2741 = vmatprep.subr.bf16.mxu1 %v4169_v21  ;;  %v3896_v35 = vcombine.low %v87_v22, %v95_v23 }
  0x10   :  { %v351_v25 = vld [vmem:[%s6060_s1 + $0xa40] sm:$0xff]  ;;  %2742 = vmatpush1.bf16.msra.mxu1 %v4168_v28  ;;  %v144_v28 = vld [vmem:[%s6060_s1 + $0x3c8] sm:$0xff] }
  0x11   :  { %v4153_v30 = vcombine.high %v343_v24, %v351_v25  ;;  %v71_v31 = vld [vmem:[%s6060_s1 + $0x180] sm:$0xff]  ;;  %2690 = vmatprep.subr.bf16.mxu0 %v3897_v29  ;;  %v4152_v36 = vcombine.low %v343_v24, %v351_v25 }
  0x12   :  { %v79_v32 = vld [vmem:[%s6060_s1 + $0x1c0] sm:$0xff]  ;;  %2691 = vmatpush1.bf16.msra.mxu0 %v3896_v35  ;;  %v120_v35 = vld [vmem:[%s6060_s1 + $0x308] sm:$0xff] }
  0x13   :  { %v327_v33 = vld [vmem:[%s6060_s1 + $0x980] sm:$0xff]  ;;  %v3881_v37 = vcombine.high %v71_v31, %v79_v32  ;;  %2743 = vmatprep.subr.bf16.mxu1 %v4153_v30  ;;  %v3880_v44 = vcombine.low %v71_v31, %v79_v32  ;;  %v3947_v32 = vcombine.high %v136_v27, %v144_v28 }
  0x14   :  { %v335_v34 = vld [vmem:[%s6060_s1 + $0x9c0] sm:$0xff]  ;;  %2744 = vmatpush1.bf16.msra.mxu1 %v4152_v36  ;;  %v128_v36 = vld [vmem:[%s6060_s1 + $0x348] sm:$0xff] }
  0x15   :  { %v55_v38 = vld [vmem:[%s6060_s1 + $0x100] sm:$0xff]  ;;  %v4137_v39 = vcombine.high %v327_v33, %v335_v34  ;;  %2692 = vmatprep.subr.bf16.mxu0 %v3881_v37  ;;  %v4136_v45 = vcombine.low %v327_v33, %v335_v34  ;;  %v4568_v37 = vld [vmem:[%s6061_s0 + $0x8] ss:$16 sps:$4 sm:$0xff]  }
  0x16   :  { %v63_v40 = vld [vmem:[%s6060_s1 + $0x140] sm:$0xff]  ;;  %2693 = vmatpush1.bf16.msra.mxu0 %v3880_v44 }
  0x17   :  { %v311_v41 = vld [vmem:[%s6060_s1 + $0x900] sm:$0xff]  ;;  %v3865_v46 = vcombine.high %v55_v38, %v63_v40  ;;  %2745 = vmatprep.subr.bf16.mxu1 %v4137_v39  ;;  %v3864_v52 = vcombine.low %v55_v38, %v63_v40  ;;  %v3946_v39 = vcombine.low %v136_v27, %v144_v28  ;;  %v360_v28 = vld [vmem:[%s6060_s1 + $0xa88] sm:$0xff] }
  0x18   :  { %v319_v42 = vld [vmem:[%s6060_s1 + $0x940] sm:$0xff]  ;;  %2746 = vmatpush1.bf16.msra.mxu1 %v4136_v45  ;;  %v4579_v45 = vld [vmem:[%s6061_s0 + $0x2c] ss:$16 sps:$4 sm:$0xff]  }
  0x19   :  { %v4121_v47 = vcombine.high %v311_v41, %v319_v42  ;;  %v39_v48 = vld [vmem:[%s6060_s1 + $0x80] sm:$0xff]  ;;  %2694 = vmatprep.subr.bf16.mxu0 %v3865_v46  ;;  %v4120_v53 = vcombine.low %v311_v41, %v319_v42  ;;  %v3931_v41 = vcombine.high %v120_v35, %v128_v36  ;;  %v104_v46 = vld [vmem:[%s6060_s1 + $0x288] sm:$0xff] }
  0x1a   :  { %v47_v49 = vld [vmem:[%s6060_s1 + $0xc0] sm:$0xff]  ;;  %2695 = vmatpush1.bf16.msra.mxu0 %v3864_v52 }
  0x1b   :  { %v295_v50 = vld [vmem:[%s6060_s1 + $0x880] sm:$0xff]  ;;  %v3849_v54 = vcombine.high %v39_v48, %v47_v49  ;;  %2747 = vmatprep.subr.bf16.mxu1 %v4121_v47  ;;  %v3848_v61 = vcombine.low %v39_v48, %v47_v49  ;;  %v112_v47 = vld [vmem:[%s6060_s1 + $0x2c8] sm:$0xff]  ;;  %v3930_v49 = vcombine.low %v120_v35, %v128_v36 }
  0x1c   :  { %v303_v51 = vld [vmem:[%s6060_s1 + $0x8c0] sm:$0xff]  ;;  %2748 = vmatpush1.bf16.msra.mxu1 %v4120_v53  ;;  %v344_v36 = vld [vmem:[%s6060_s1 + $0xa08] sm:$0xff] }
  0x1d   :  { %v23_v55 = vld [vmem:[%s6060_s1] sm:$0xff]  ;;  %v4105_v56 = vcombine.high %v295_v50, %v303_v51  ;;  %2696 = vmatprep.subr.bf16.mxu0 %v3849_v54  ;;  %v4104_v62 = vcombine.low %v295_v50, %v303_v51  ;;  %v3915_v51 = vcombine.high %v104_v46, %v112_v47 }
  0x1e   :  { %v31_v57 = vld [vmem:[%s6060_s1 + $0x40] sm:$0xff]  ;;  %2697 = vmatpush1.bf16.msra.mxu0 %v3848_v61  ;;  %v3914_v61 = vcombine.low %v104_v46, %v112_v47 }
  0x1f   :  { %v279_v58 = vld [vmem:[%s6060_s1 + $0x800] sm:$0xff]  ;;  %v3833_v63 = vcombine.high %v23_v55, %v31_v57  ;;  %2749 = vmatprep.subr.bf16.mxu1 %v4105_v56  ;;  %v3832_v5 = vcombine.low %v23_v55, %v31_v57  ;;  %v88_v55 = vld [vmem:[%s6060_s1 + $0x208] sm:$0xff] }
  0x20   :  { %v287_v59 = vld [vmem:[%s6060_s1 + $0x840] sm:$0xff]  ;;  %2750 = vmatpush1.bf16.msra.mxu1 %v4104_v62  ;;  %v96_v56 = vld [vmem:[%s6060_s1 + $0x248] sm:$0xff] }
  0x21   :  { %v4502_v60 = vld [vmem:[%s6061_s0 + $0x4] ss:$16 sps:$4 sm:$0xff]   ;;  %v4089_v0 = vcombine.high %v279_v58, %v287_v59  ;;  %2698 = vmatprep.subr.bf16.mxu0 %v3833_v63  ;;  %v4088_v6 = vcombine.low %v279_v58, %v287_v59  ;;  %v4608_v58 = vld [vmem:[%s6061_s0 + $0x28] ss:$16 sps:$4 sm:$0xff]   ;;  %v3899_v63 = vcombine.high %v88_v55, %v96_v56 }
  0x22   :  { %v263_v1 = vld [vmem:[%s6060_s1 + $0x780] sm:$0xff]  ;;  %2716 = vmatprep.mubr.bf16.mxu0 %v4502_v60  ;;  %2699 = vmatpush1.bf16.msra.mxu0 %v3832_v5  ;;  %v456_v59 = vld [vmem:[%s6062_s2 + $0x8] sm:$0xff]  ;;  %v3898_v5 = vcombine.low %v88_v55, %v96_v56 }
  0x23   :  { %v271_v2 = vld [vmem:[%s6060_s1 + $0x7c0] sm:$0xff]  ;;  %2751 = vmatprep.subr.bf16.mxu1 %v4089_v0  ;;  %v312_v56 = vld [vmem:[%s6060_s1 + $0x908] sm:$0xff] }
  0x24   :  { %v439_v3 = vld [vmem:[%s6060_s1 + $0xd00] sm:$0xff]  ;;  %v4073_v7 = vcombine.high %v263_v1, %v271_v2  ;;  %v4072_v13 = vcombine.low %v263_v1, %v271_v2  ;;  %2752 = vmatpush1.bf16.msra.mxu1 %v4088_v6  ;;  %v72_v2 = vld [vmem:[%s6060_s1 + $0x188] sm:$0xff] }
  0x25   :  { %v447_v4 = vld [vmem:[%s6060_s1 + $0xd40] sm:$0xff] }
  0x26   :  { %v4249_v8 = vcombine.high %v439_v3, %v447_v4  ;;  %v247_v9 = vld [vmem:[%s6060_s1 + $0x700] sm:$0xff]  ;;  %2700 = vmatprep.subr.bf16.mxu0 %v4073_v7  ;;  %v4248_v14 = vcombine.low %v439_v3, %v447_v4  ;;  %v80_v3 = vld [vmem:[%s6060_s1 + $0x1c8] sm:$0xff] }
  0x27   :  { %v255_v10 = vld [vmem:[%s6060_s1 + $0x740] sm:$0xff]  ;;  %2701 = vmatpush2.bf16.msra.mxu0 %v4072_v13  ;;  %v3883_v7 = vcombine.high %v72_v2, %v80_v3  ;;  %v457_v13 = vld [vmem:[%s6062_s2 + $0x10] sm:$0xff] }
  0x28   :  { %v423_v11 = vld [vmem:[%s6060_s1 + $0xc80] sm:$0xff]  ;;  %v4057_v15 = vcombine.high %v247_v9, %v255_v10  ;;  %2763 = vmatprep.subr.bf16.mxu1 %v4249_v8  ;;  %v4056_v21 = vcombine.low %v247_v9, %v255_v10  ;;  %v392_v8 = vld [vmem:[%s6060_s1 + $0xb88] sm:$0xff]  ;;  %471 = vperm.xlu1 %4346, %v457_v13  }
  0x29   :  { %v431_v12 = vld [vmem:[%s6060_s1 + $0xcc0] sm:$0xff]  ;;  %2764 = vmatpush2.bf16.msra.mxu1 %v4248_v14  ;;  %v400_v9 = vld [vmem:[%s6060_s1 + $0xbc8] sm:$0xff]  ;;  %v3882_v14 = vcombine.low %v72_v2, %v80_v3 }
  0x2a   :  { %v4233_v16 = vcombine.high %v423_v11, %v431_v12  ;;  %v231_v17 = vld [vmem:[%s6060_s1 + $0x680] sm:$0xff]  ;;  %2702 = vmatprep.subr.bf16.mxu0 %v4057_v15  ;;  %v4232_v22 = vcombine.low %v423_v11, %v431_v12  ;;  %v56_v10 = vld [vmem:[%s6060_s1 + $0x108] sm:$0xff]  ;;  %v4203_v15 = vcombine.high %v392_v8, %v400_v9 }
  0x2b   :  { %v239_v18 = vld [vmem:[%s6060_s1 + $0x6c0] sm:$0xff]  ;;  %2703 = vmatpush2.bf16.msra.mxu0 %v4056_v21  ;;  %v64_v11 = vld [vmem:[%s6060_s1 + $0x148] sm:$0xff] }
  0x2c   :  { %v407_v19 = vld [vmem:[%s6060_s1 + $0xc00] sm:$0xff]  ;;  %v4041_v23 = vcombine.high %v231_v17, %v239_v18  ;;  %2765 = vmatprep.subr.bf16.mxu1 %v4233_v16  ;;  %v4040_v29 = vcombine.low %v231_v17, %v239_v18  ;;  %v3867_v17 = vcombine.high %v56_v10, %v64_v11  ;;  %v376_v18 = vld [vmem:[%s6060_s1 + $0xb08] sm:$0xff] }
  0x2d   :  { %v415_v20 = vld [vmem:[%s6060_s1 + $0xc40] sm:$0xff]  ;;  %2766 = vmatpush2.bf16.msra.mxu1 %v4232_v22  ;;  %v48_v21 = vld [vmem:[%s6060_s1 + $0xc8] sm:$0xff]  ;;  %v458_v22 = vld [vmem:[%s6062_s2 + $0x18] sm:$0xff] }
  0x2e   :  { %v4217_v24 = vcombine.high %v407_v19, %v415_v20  ;;  %v215_v25 = vld [vmem:[%s6060_s1 + $0x600] sm:$0xff]  ;;  %2704 = vmatprep.subr.bf16.mxu0 %v4041_v23  ;;  %v4216_v30 = vcombine.low %v407_v19, %v415_v20  ;;  %v384_v19 = vld [vmem:[%s6060_s1 + $0xb48] sm:$0xff]  ;;  %v4202_v23 = vcombine.low %v392_v8, %v400_v9  ;;  %476 = vperm.xlu1 %4346, %v458_v22  }
  0x2f   :  { %v223_v26 = vld [vmem:[%s6060_s1 + $0x640] sm:$0xff]  ;;  %2705 = vmatpush2.bf16.msra.mxu0 %v4040_v29  ;;  %v40_v20 = vld [vmem:[%s6060_s1 + $0x88] sm:$0xff] }
  0x30   :  { %v4025_v31 = vcombine.high %v215_v25, %v223_v26  ;;  %2767 = vmatprep.subr.bf16.mxu1 %v4217_v24  ;;  %v199_v33 = vld [vmem:[%s6060_s1 + $0x580] sm:$0xff]  ;;  %v4024_v38 = vcombine.low %v215_v25, %v223_v26  ;;  %v3866_v25 = vcombine.low %v56_v10, %v64_v11  ;;  %v4187_v26 = vcombine.high %v376_v18, %v384_v19  ;;  %v368_v29 = vld [vmem:[%s6060_s1 + $0xac8] sm:$0xff] }
  0x31   :  { %v207_v34 = vld [vmem:[%s6060_s1 + $0x5c0] sm:$0xff]  ;;  %2768 = vmatpush2.bf16.msra.mxu1 %v4216_v30  ;;  %v3851_v27 = vcombine.high %v40_v20, %v48_v21  ;;  %v24_v30 = vld [vmem:[%s6060_s1 + $0x8] sm:$0xff] }
  0x32   :  { %2706 = vmatprep.subr.bf16.mxu0 %v4025_v31  ;;  %v4009_v40 = vcombine.high %v199_v33, %v207_v34  ;;  %2790 = vmatprep.subr.bf16.mxu1 %v3947_v32  ;;  %v183_v42 = vld [vmem:[%s6060_s1 + $0x500] sm:$0xff]  ;;  %v4008_v48 = vcombine.low %v199_v33, %v207_v34  ;;  %v32_v31 = vld [vmem:[%s6060_s1 + $0x48] sm:$0xff]  ;;  %v4186_v32 = vcombine.low %v376_v18, %v384_v19 }
  0x33   :  { %v191_v44 = vld [vmem:[%s6060_s1 + $0x540] sm:$0xff]  ;;  %2707 = vmatpush2.bf16.msra.mxu0 %v4024_v38  ;;  %v3850_v33 = vcombine.low %v40_v20, %v48_v21  ;;  %v4171_v34 = vcombine.high %v360_v28, %v368_v29  ;;  %v3835_v35 = vcombine.high %v24_v30, %v32_v31  ;;  %v352_v38 = vld [vmem:[%s6060_s1 + $0xa48] sm:$0xff] }
  0x34   :  { %2770 = vmatmul.mubr.bf16.vlgmr.msra.gmra.mxu1 %v4568_v37  ;;  %2708 = vmatprep.subr.bf16.mxu0 %v4009_v40  ;;  %v3993_v50 = vcombine.high %v183_v42, %v191_v44  ;;  %v167_v52 = vld [vmem:[%s6060_s1 + $0x480] sm:$0xff]  ;;  %v3992_v57 = vcombine.low %v183_v42, %v191_v44  ;;  %v272_v40 = vld [vmem:[%s6060_s1 + $0x7c8] sm:$0xff]  ;;  %v4170_v42 = vcombine.low %v360_v28, %v368_v29 }
  0x35   :  { %2791 = vmatpush1.bf16.msra.mxu1 %v3946_v39  ;;  %v175_v53 = vld [vmem:[%s6060_s1 + $0x4c0] sm:$0xff]  ;;  %4265 = vmatprep.mubr.msk.bf16.mxu1 %vm2677_vm0, %v4579_v45  ;;  %v264_v39 = vld [vmem:[%s6060_s1 + $0x788] sm:$0xff]  ;;  %v3834_v44 = vcombine.low %v24_v30, %v32_v31  ;;  %v4155_v46 = vcombine.high %v344_v36, %v352_v38 }
  0x36   :  { %2792 = vmatprep.subr.bf16.mxu1 %v3931_v41  ;;  %v455_v54 = vld [vmem:[%s6062_s2] sm:$0xff]  ;;  %v3977_v62 = vcombine.high %v167_v52, %v175_v53  ;;  %v3976_v4 = vcombine.low %v167_v52, %v175_v53  ;;  %v4075_v47 = vcombine.high %v264_v39, %v272_v40  ;;  %v4154_v52 = vcombine.low %v344_v36, %v352_v38  ;;  %v296_v2 = vld [vmem:[%s6060_s1 + $0x888] sm:$0xff] }
  0x37   :  { %461 = vperm.xlu0 %4345, %v455_v54   ;;  %2709 = vmatpush2.bf16.msra.mxu0 %v4008_v48  ;;  %v151_v0 = vld [vmem:[%s6060_s1 + $0x400] sm:$0xff]  ;;  %v328_v48 = vld [vmem:[%s6060_s1 + $0x988] sm:$0xff]  ;;  %v4074_v53 = vcombine.low %v264_v39, %v272_v40 }
  0x38   :  { %2710 = vmatprep.subr.bf16.mxu0 %v3993_v50  ;;  %v159_v1 = vld [vmem:[%s6060_s1 + $0x440] sm:$0xff]  ;;  %v248_v50 = vld [vmem:[%s6060_s1 + $0x708] sm:$0xff] }
  0x39   :  { %2793 = vmatpush1.bf16.msra.mxu1 %v3930_v49  ;;  %v3961_v6 = vcombine.high %v151_v0, %v159_v1  ;;  %v3960_v12 = vcombine.low %v151_v0, %v159_v1  ;;  %v4645_v16 = vld [vmem:[%s6061_s0] ss:$16 sps:$4 sm:$0xff]   ;;  %v4665_v24 = vld [vmem:[%s6061_s0 + $0x24] ss:$16 sps:$4 sm:$0xff]   ;;  %v336_v49 = vld [vmem:[%s6060_s1 + $0x9c8] sm:$0xff] }
  0x3a   :  { %2794 = vmatprep.subr.bf16.mxu1 %v3915_v51  ;;  %v4696_v41 = vld [vmem:[%s6061_s0 + $0x20] ss:$16 sps:$4 sm:$0xff]   ;;  %v256_v51 = vld [vmem:[%s6060_s1 + $0x748] sm:$0xff]  ;;  %v4139_v54 = vcombine.high %v328_v48, %v336_v49 }
  0x3b   :  { %466 = vperm.xlu0 %4345, %v456_v59   ;;  %2711 = vmatpush2.bf16.msra.mxu0 %v3992_v57  ;;  %v4059_v55 = vcombine.high %v248_v50, %v256_v51  ;;  %v320_v57 = vld [vmem:[%s6060_s1 + $0x948] sm:$0xff] }
  0x3c   :  { %2780 = vmatmul.mubr.bf16.gmra.mxu1 %v4608_v58  ;;  %2712 = vmatprep.subr.bf16.mxu0 %v3977_v62  ;;  %v232_v59 = vld [vmem:[%s6060_s1 + $0x688] sm:$0xff]  ;;  %v4138_v62 = vcombine.low %v328_v48, %v336_v49  ;;  %v4123_v0 = vcombine.high %v312_v56, %v320_v57  ;;  %v137_v48 = vld [vmem:[%s6060_s1 + $0x390] sm:$0xff] }
  0x3d   :  { %2795 = vmatpush1.bf16.msra.mxu1 %v3914_v61  ;;  %2822 = vmatprep.mubr.bf16.mxu1 %v4502_v60  ;;  %v240_v61 = vld [vmem:[%s6060_s1 + $0x6c8] sm:$0xff]  ;;  %v145_v49 = vld [vmem:[%s6060_s1 + $0x3d0] sm:$0xff] }
  0x3e   :  { %2796 = vmatprep.subr.bf16.mxu1 %v3899_v63  ;;  %v4058_v63 = vcombine.low %v248_v50, %v256_v51  ;;  %v4043_v1 = vcombine.high %v232_v59, %v240_v61  ;;  %v304_v3 = vld [vmem:[%s6060_s1 + $0x8c8] sm:$0xff]  ;;  %v393_v50 = vld [vmem:[%s6060_s1 + $0xb90] sm:$0xff] }
  0x3f   :  { %2713 = vmatpush2.bf16.msra.mxu0 %v3976_v4  ;;  %v216_v4 = vld [vmem:[%s6060_s1 + $0x608] sm:$0xff]  ;;  %v4107_v8 = vcombine.high %v296_v2, %v304_v3  ;;  %v401_v51 = vld [vmem:[%s6060_s1 + $0xbd0] sm:$0xff] }
  0x40   :  { %2714 = vmatprep.subr.bf16.mxu0 %v3961_v6  ;;  %v4122_v6 = vcombine.low %v312_v56, %v320_v57  ;;  %v280_v10 = vld [vmem:[%s6060_s1 + $0x808] sm:$0xff]  ;;  %v121_v56 = vld [vmem:[%s6060_s1 + $0x310] sm:$0xff] }
  0x41   :  { %2797 = vmatpush1.bf16.msra.mxu1 %v3898_v5  ;;  %v224_v5 = vld [vmem:[%s6060_s1 + $0x648] sm:$0xff]  ;;  %v129_v57 = vld [vmem:[%s6060_s1 + $0x350] sm:$0xff] }
  0x42   :  { %2798 = vmatprep.subr.bf16.mxu1 %v3883_v7  ;;  %v4042_v7 = vcombine.low %v232_v59, %v240_v61  ;;  %v4027_v9 = vcombine.high %v216_v4, %v224_v5  ;;  %v288_v11 = vld [vmem:[%s6060_s1 + $0x848] sm:$0xff]  ;;  %v377_v59 = vld [vmem:[%s6060_s1 + $0xb10] sm:$0xff] }
  0x43   :  { %2715 = vmatpush2.bf16.msra.mxu0 %v3960_v12  ;;  %v200_v12 = vld [vmem:[%s6060_s1 + $0x588] sm:$0xff]  ;;  %v385_v61 = vld [vmem:[%s6060_s1 + $0xb50] sm:$0xff] }
  0x44   :  { %2843 = vmatprep.subr.bf16.mxu0 %v4203_v15  ;;  %v208_v13 = vld [vmem:[%s6060_s1 + $0x5c8] sm:$0xff]  ;;  %v4026_v15 = vcombine.low %v216_v4, %v224_v5  ;;  %v361_v4 = vld [vmem:[%s6060_s1 + $0xa90] sm:$0xff] }
  0x45   :  { %2799 = vmatpush1.bf16.msra.mxu1 %v3882_v14  ;;  %v4106_v14 = vcombine.low %v296_v2, %v304_v3  ;;  %v4011_v18 = vcombine.high %v200_v12, %v208_v13  ;;  %v440_v19 = vld [vmem:[%s6060_s1 + $0xd08] sm:$0xff]  ;;  %v105_v2 = vld [vmem:[%s6060_s1 + $0x290] sm:$0xff] }
  0x46   :  { %2800 = vmatprep.subr.bf16.mxu1 %v3867_v17  ;;  %2717 = vmatmul.mubr.bf16.vlgmr.msra.gmra.mxu0 %v4645_v16  ;;  %v4091_v17 = vcombine.high %v280_v10, %v288_v11  ;;  %v448_v20 = vld [vmem:[%s6060_s1 + $0xd48] sm:$0xff]  ;;  %v113_v3 = vld [vmem:[%s6060_s1 + $0x2d0] sm:$0xff] }
  0x47   :  { %2844 = vmatpush1.bf16.msra.mxu0 %v4202_v23  ;;  %2726 = vmatprep.mubr.bf16.mxu0 %v4665_v24  ;;  %v184_v21 = vld [vmem:[%s6060_s1 + $0x508] sm:$0xff]  ;;  %v4090_v23 = vcombine.low %v280_v10, %v288_v11  ;;  %v369_v5 = vld [vmem:[%s6060_s1 + $0xad0] sm:$0xff] }
  0x48   :  { %2845 = vmatprep.subr.bf16.mxu0 %v4187_v26  ;;  %v192_v22 = vld [vmem:[%s6060_s1 + $0x548] sm:$0xff]  ;;  %v4251_v26 = vcombine.high %v440_v19, %v448_v20  ;;  %v89_v10 = vld [vmem:[%s6060_s1 + $0x210] sm:$0xff] }
  0x49   :  { %2801 = vmatpush1.bf16.msra.mxu1 %v3866_v25  ;;  %v4010_v25 = vcombine.low %v200_v12, %v208_v13  ;;  %v424_v28 = vld [vmem:[%s6060_s1 + $0xc88] sm:$0xff]  ;;  %v97_v11 = vld [vmem:[%s6060_s1 + $0x250] sm:$0xff] }
  0x4a   :  { %2802 = vmatprep.subr.bf16.mxu1 %v3851_v27  ;;  %v3995_v27 = vcombine.high %v184_v21, %v192_v22  ;;  %v432_v29 = vld [vmem:[%s6060_s1 + $0xcc8] sm:$0xff]  ;;  %v345_v12 = vld [vmem:[%s6060_s1 + $0xa10] sm:$0xff] }
  0x4b   :  { %2846 = vmatpush1.bf16.msra.mxu0 %v4186_v32  ;;  %v168_v30 = vld [vmem:[%s6060_s1 + $0x488] sm:$0xff]  ;;  %v4250_v32 = vcombine.low %v440_v19, %v448_v20  ;;  %v353_v13 = vld [vmem:[%s6060_s1 + $0xa50] sm:$0xff] }
  0x4c   :  { %2847 = vmatprep.subr.bf16.mxu0 %v4171_v34  ;;  %v176_v31 = vld [vmem:[%s6060_s1 + $0x4c8] sm:$0xff]  ;;  %v4235_v34 = vcombine.high %v424_v28, %v432_v29  ;;  %v73_v19 = vld [vmem:[%s6060_s1 + $0x190] sm:$0xff] }
  0x4d   :  { %2803 = vmatpush1.bf16.msra.mxu1 %v3850_v33  ;;  %v3994_v33 = vcombine.low %v184_v21, %v192_v22  ;;  %v408_v36 = vld [vmem:[%s6060_s1 + $0xc08] sm:$0xff]  ;;  %v81_v20 = vld [vmem:[%s6060_s1 + $0x1d0] sm:$0xff] }
  0x4e   :  { %2804 = vmatprep.subr.bf16.mxu1 %v3835_v35  ;;  %2727 = vmatmul.mubr.bf16.gmra.mxu0 %v4696_v41  ;;  %v3979_v35 = vcombine.high %v168_v30, %v176_v31  ;;  %v416_v38 = vld [vmem:[%s6060_s1 + $0xc48] sm:$0xff]  ;;  %v329_v21 = vld [vmem:[%s6060_s1 + $0x990] sm:$0xff] }
  0x4f   :  { %2848 = vmatpush1.bf16.msra.mxu0 %v4170_v42  ;;  %4266 = vmatprep.mubr.msk.bf16.mxu0 %vm2677_vm0, %v4471_v43  ;;  %v152_v39 = vld [vmem:[%s6060_s1 + $0x408] sm:$0xff]  ;;  %v4234_v42 = vcombine.low %v424_v28, %v432_v29  ;;  %v337_v22 = vld [vmem:[%s6060_s1 + $0x9d0] sm:$0xff] }
  0x50   :  { %2849 = vmatprep.subr.bf16.mxu0 %v4155_v46  ;;  %v160_v40 = vld [vmem:[%s6060_s1 + $0x448] sm:$0xff]  ;;  %v4219_v46 = vcombine.high %v408_v36, %v416_v38  ;;  %v57_v28 = vld [vmem:[%s6060_s1 + $0x110] sm:$0xff] }
  0x51   :  { %2805 = vmatpush1.bf16.msra.mxu1 %v3834_v44  ;;  %v3978_v44 = vcombine.low %v168_v30, %v176_v31  ;;  %v65_v29 = vld [vmem:[%s6060_s1 + $0x150] sm:$0xff] }
  0x52   :  { %2806 = vmatprep.subr.bf16.mxu1 %v4075_v47  ;;  %v3963_v47 = vcombine.high %v152_v39, %v160_v40  ;;  %v313_v30 = vld [vmem:[%s6060_s1 + $0x910] sm:$0xff] }
  0x53   :  { %2850 = vmatpush1.bf16.msra.mxu0 %v4154_v52  ;;  %v4218_v52 = vcombine.low %v408_v36, %v416_v38  ;;  %v321_v31 = vld [vmem:[%s6060_s1 + $0x950] sm:$0xff] }
  0x54   :  { %2851 = vmatprep.subr.bf16.mxu0 %v4139_v54  ;;  %v3949_v54 = vcombine.high %v137_v48, %v145_v49  ;;  %v49_v36 = vld [vmem:[%s6060_s1 + $0xd0] sm:$0xff] }
  0x55   :  { %2807 = vmatpush2.bf16.msra.mxu1 %v4074_v53  ;;  %v3962_v53 = vcombine.low %v152_v39, %v160_v40  ;;  %v297_v38 = vld [vmem:[%s6060_s1 + $0x890] sm:$0xff]  ;;  %v3868_v40 = vcombine.low %v57_v28, %v65_v29 }
  0x56   :  { %2808 = vmatprep.subr.bf16.mxu1 %v4059_v55  ;;  %v4205_v55 = vcombine.high %v393_v50, %v401_v51  ;;  %v305_v39 = vld [vmem:[%s6060_s1 + $0x8d0] sm:$0xff] }
  0x57   :  { %2852 = vmatpush1.bf16.msra.mxu0 %v4138_v62  ;;  %v3948_v62 = vcombine.low %v137_v48, %v145_v49  ;;  %v33_v48 = vld [vmem:[%s6060_s1 + $0x50] sm:$0xff] }
  0x58   :  { %2853 = vmatprep.subr.bf16.mxu0 %v4123_v0  ;;  %v3933_v0 = vcombine.high %v121_v56, %v129_v57  ;;  %v281_v49 = vld [vmem:[%s6060_s1 + $0x810] sm:$0xff] }
  0x59   :  { %2809 = vmatpush2.bf16.msra.mxu1 %v4058_v63  ;;  %v4204_v63 = vcombine.low %v393_v50, %v401_v51  ;;  %v289_v50 = vld [vmem:[%s6060_s1 + $0x850] sm:$0xff] }
  0x5a   :  { %2810 = vmatprep.subr.bf16.mxu1 %v4043_v1  ;;  %v4189_v1 = vcombine.high %v377_v59, %v385_v61 }
  0x5b   :  { %2854 = vmatpush1.bf16.msra.mxu0 %v4122_v6  ;;  %v3932_v6 = vcombine.low %v121_v56, %v129_v57  ;;  %v273_v56 = vld [vmem:[%s6060_s1 + $0x7d0] sm:$0xff] }
  0x5c   :  { %2855 = vmatprep.subr.bf16.mxu0 %v4107_v8  ;;  %v3917_v8 = vcombine.high %v105_v2, %v113_v3  ;;  %v441_v57 = vld [vmem:[%s6060_s1 + $0xd10] sm:$0xff] }
  0x5d   :  { %2811 = vmatpush2.bf16.msra.mxu1 %v4042_v7  ;;  %v4188_v7 = vcombine.low %v377_v59, %v385_v61  ;;  %v449_v59 = vld [vmem:[%s6060_s1 + $0xd50] sm:$0xff] }
  0x5e   :  { %2812 = vmatprep.subr.bf16.mxu1 %v4027_v9  ;;  %v4173_v9 = vcombine.high %v361_v4, %v369_v5 }
  0x5f   :  { %2856 = vmatpush1.bf16.msra.mxu0 %v4106_v14  ;;  %v3916_v14 = vcombine.low %v105_v2, %v113_v3  ;;  %v257_v2 = vld [vmem:[%s6060_s1 + $0x750] sm:$0xff] }
  0x60   :  { %2857 = vmatprep.subr.bf16.mxu0 %v4091_v17  ;;  %v3901_v17 = vcombine.high %v89_v10, %v97_v11  ;;  %v425_v3 = vld [vmem:[%s6060_s1 + $0xc90] sm:$0xff] }
  0x61   :  { %2813 = vmatpush2.bf16.msra.mxu1 %v4026_v15  ;;  %v4172_v15 = vcombine.low %v361_v4, %v369_v5  ;;  %v433_v4 = vld [vmem:[%s6060_s1 + $0xcd0] sm:$0xff] }
  0x62   :  { %2814 = vmatprep.subr.bf16.mxu1 %v4011_v18  ;;  %v4157_v18 = vcombine.high %v345_v12, %v353_v13 }
  0x63   :  { %2858 = vmatpush1.bf16.msra.mxu0 %v4090_v23  ;;  %v3900_v23 = vcombine.low %v89_v10, %v97_v11  ;;  %v241_v10 = vld [vmem:[%s6060_s1 + $0x6d0] sm:$0xff] }
  0x64   :  { %2869 = vmatprep.subr.bf16.mxu0 %v4251_v26  ;;  %v3885_v26 = vcombine.high %v73_v19, %v81_v20  ;;  %v409_v11 = vld [vmem:[%s6060_s1 + $0xc10] sm:$0xff] }
  0x65   :  { %2815 = vmatpush2.bf16.msra.mxu1 %v4010_v25  ;;  %v4156_v25 = vcombine.low %v345_v12, %v353_v13  ;;  %v417_v12 = vld [vmem:[%s6060_s1 + $0xc50] sm:$0xff] }
  0x66   :  { %2816 = vmatprep.subr.bf16.mxu1 %v3995_v27  ;;  %v4141_v27 = vcombine.high %v329_v21, %v337_v22 }
  0x67   :  { %2870 = vmatpush2.bf16.msra.mxu0 %v4250_v32  ;;  %v3884_v32 = vcombine.low %v73_v19, %v81_v20  ;;  %v225_v19 = vld [vmem:[%s6060_s1 + $0x650] sm:$0xff]  ;;  %v138_v20 = vld [vmem:[%s6060_s1 + $0x398] sm:$0xff] }
  0x68   :  { %2871 = vmatprep.subr.bf16.mxu0 %v4235_v34  ;;  %v3869_v34 = vcombine.high %v57_v28, %v65_v29  ;;  %v209_v28 = vld [vmem:[%s6060_s1 + $0x5d0] sm:$0xff]  ;;  %v122_v29 = vld [vmem:[%s6060_s1 + $0x318] sm:$0xff] }
  0x69   :  { %2817 = vmatpush2.bf16.msra.mxu1 %v3994_v33  ;;  %v4140_v33 = vcombine.low %v329_v21, %v337_v22  ;;  %v146_v21 = vld [vmem:[%s6060_s1 + $0x3d8] sm:$0xff] }
  0x6a   :  { %2818 = vmatprep.subr.bf16.mxu1 %v3979_v35  ;;  %v4125_v35 = vcombine.high %v313_v30, %v321_v31 }
  0x6b   :  { %2872 = vmatpush2.bf16.msra.mxu0 %v4234_v42  ;;  %v4124_v42 = vcombine.low %v313_v30, %v321_v31  ;;  %v130_v30 = vld [vmem:[%s6060_s1 + $0x358] sm:$0xff] }
  0x6c   :  { %2873 = vmatprep.subr.bf16.mxu0 %v4219_v46  ;;  %v4109_v46 = vcombine.high %v297_v38, %v305_v39 }
  0x6d   :  { %2819 = vmatpush2.bf16.msra.mxu1 %v3978_v44 }
  0x6e   :  { %2820 = vmatprep.subr.bf16.mxu1 %v3963_v47  ;;  %v25_v47 = vld [vmem:[%s6060_s1 + $0x10] sm:$0xff] }
  0x6f   :  { %2874 = vmatpush2.bf16.msra.mxu0 %v4218_v52  ;;  %v4108_v52 = vcombine.low %v297_v38, %v305_v39  ;;  %v3836_v61 = vcombine.low %v25_v47, %v33_v48  ;;  %v114_v38 = vld [vmem:[%s6060_s1 + $0x2d8] sm:$0xff] }
  0x70   :  { %2896 = vmatprep.subr.bf16.mxu0 %v3949_v54  ;;  %v4093_v54 = vcombine.high %v281_v49, %v289_v50 }
  0x71   :  { %2821 = vmatpush2.bf16.msra.mxu1 %v3962_v53  ;;  %v3837_v53 = vcombine.high %v25_v47, %v33_v48  ;;  %v177_v47 = vld [vmem:[%s6060_s1 + $0x4d0] sm:$0xff]  ;;  %v98_v48 = vld [vmem:[%s6060_s1 + $0x258] sm:$0xff] }
  0x72   :  { %2949 = vmatprep.subr.bf16.mxu1 %v4205_v55  ;;  %2876 = vmatmul.mubr.bf16.vlgmr.msra.gmra.mxu0 %v4568_v37  ;;  %v265_v55 = vld [vmem:[%s6060_s1 + $0x790] sm:$0xff] }
  0x73   :  { %2897 = vmatpush1.bf16.msra.mxu0 %v3948_v62  ;;  %4267 = vmatprep.mubr.msk.bf16.mxu0 %vm2677_vm0, %v4579_v45  ;;  %v4092_v62 = vcombine.low %v281_v49, %v289_v50  ;;  %v4076_v5 = vcombine.low %v265_v55, %v273_v56 }
  0x74   :  { %2823 = vmatmul.mubr.bf16.vlgmr.msra.gmra.mxu1 %v4645_v16  ;;  %2898 = vmatprep.subr.bf16.mxu0 %v3933_v0  ;;  %v4253_v0 = vcombine.high %v441_v57, %v449_v59 }
  0x75   :  { %2950 = vmatpush1.bf16.msra.mxu1 %v4204_v63  ;;  %2832 = vmatprep.mubr.bf16.mxu1 %v4665_v24  ;;  %v4077_v63 = vcombine.high %v265_v55, %v273_v56  ;;  %v82_v55 = vld [vmem:[%s6060_s1 + $0x1d8] sm:$0xff] }
  0x76   :  { %2951 = vmatprep.subr.bf16.mxu1 %v4189_v1  ;;  %v249_v1 = vld [vmem:[%s6060_s1 + $0x710] sm:$0xff] }
  0x77   :  { %2899 = vmatpush1.bf16.msra.mxu0 %v3932_v6  ;;  %v4252_v6 = vcombine.low %v441_v57, %v449_v59  ;;  %v4060_v13 = vcombine.low %v249_v1, %v257_v2 }
  0x78   :  { %2900 = vmatprep.subr.bf16.mxu0 %v3917_v8  ;;  %v4237_v8 = vcombine.high %v425_v3, %v433_v4 }
  0x79   :  { %2952 = vmatpush1.bf16.msra.mxu1 %v4188_v7  ;;  %v4061_v7 = vcombine.high %v249_v1, %v257_v2 }
  0x7a   :  { %2953 = vmatprep.subr.bf16.mxu1 %v4173_v9  ;;  %2886 = vmatmul.mubr.bf16.gmra.mxu0 %v4608_v58  ;;  %v233_v9 = vld [vmem:[%s6060_s1 + $0x690] sm:$0xff] }
  0x7b   :  { %2901 = vmatpush1.bf16.msra.mxu0 %v3916_v14  ;;  %2928 = vmatprep.mubr.bf16.mxu0 %v4502_v60  ;;  %v4236_v14 = vcombine.low %v425_v3, %v433_v4  ;;  %v4044_v22 = vcombine.low %v233_v9, %v241_v10 }
  0x7c   :  { %2833 = vmatmul.mubr.bf16.gmra.mxu1 %v4696_v41  ;;  %2902 = vmatprep.subr.bf16.mxu0 %v3901_v17  ;;  %v4221_v17 = vcombine.high %v409_v11, %v417_v12 }
  0x7d   :  { %2954 = vmatpush1.bf16.msra.mxu1 %v4172_v15  ;;  %4268 = vmatprep.mubr.msk.bf16.mxu1 %vm2677_vm0, %v4471_v43  ;;  %v41_v43 = vld [vmem:[%s6060_s1 + $0x90] sm:$0xff]  ;;  %v4045_v15 = vcombine.high %v233_v9, %v241_v10 }
  0x7e   :  { %2955 = vmatprep.subr.bf16.mxu1 %v4157_v18  ;;  %v3853_v44 = vcombine.high %v41_v43, %v49_v36  ;;  %v3852_v51 = vcombine.low %v41_v43, %v49_v36  ;;  %v217_v18 = vld [vmem:[%s6060_s1 + $0x610] sm:$0xff]  ;;  %v106_v36 = vld [vmem:[%s6060_s1 + $0x298] sm:$0xff] }
  0x7f   :  { %2903 = vmatpush1.bf16.msra.mxu0 %v3900_v23  ;;  %v4220_v23 = vcombine.low %v409_v11, %v417_v12  ;;  %v4028_v31 = vcombine.low %v217_v18, %v225_v19  ;;  %v193_v43 = vld [vmem:[%s6060_s1 + $0x550] sm:$0xff]  ;;  %v3918_v50 = vcombine.low %v106_v36, %v114_v38  ;;  %v362_v12 = vld [vmem:[%s6060_s1 + $0xa98] sm:$0xff] }
  0x80   :  { %2904 = vmatprep.subr.bf16.mxu0 %v3885_v26  ;;  %v3951_v26 = vcombine.high %v138_v20, %v146_v21 }
  0x81   :  { %2956 = vmatpush1.bf16.msra.mxu1 %v4156_v25  ;;  %v4029_v25 = vcombine.high %v217_v18, %v225_v19 }
  0x82   :  { %2957 = vmatprep.subr.bf16.mxu1 %v4141_v27  ;;  %v201_v27 = vld [vmem:[%s6060_s1 + $0x590] sm:$0xff] }
  0x83   :  { %2905 = vmatpush1.bf16.msra.mxu0 %v3884_v32  ;;  %v3950_v32 = vcombine.low %v138_v20, %v146_v21  ;;  %v4012_v39 = vcombine.low %v201_v27, %v209_v28  ;;  %v346_v21 = vld [vmem:[%s6060_s1 + $0xa18] sm:$0xff] }
  0x84   :  { %2906 = vmatprep.subr.bf16.mxu0 %v3869_v34  ;;  %v3935_v34 = vcombine.high %v122_v29, %v130_v30 }
  0x85   :  { %2958 = vmatpush1.bf16.msra.mxu1 %v4140_v33  ;;  %v4013_v33 = vcombine.high %v201_v27, %v209_v28 }
  0x86   :  { %2959 = vmatprep.subr.bf16.mxu1 %v4125_v35  ;;  %v185_v35 = vld [vmem:[%s6060_s1 + $0x510] sm:$0xff] }
  0x87   :  { %2907 = vmatpush1.bf16.msra.mxu0 %v3868_v40  ;;  %v3934_v40 = vcombine.low %v122_v29, %v130_v30  ;;  %v3996_v49 = vcombine.low %v185_v35, %v193_v43  ;;  %v330_v30 = vld [vmem:[%s6060_s1 + $0x998] sm:$0xff] }
  0x88   :  { %2908 = vmatprep.subr.bf16.mxu0 %v3853_v44  ;;  %v3919_v44 = vcombine.high %v106_v36, %v114_v38 }
  0x89   :  { %2960 = vmatpush1.bf16.msra.mxu1 %v4124_v42  ;;  %v3997_v42 = vcombine.high %v185_v35, %v193_v43  ;;  %v5058_v35 = vld [vmem:[%s6061_s0 + $0xc] ss:$16 sps:$4 sm:$0xff]  }
  0x8a   :  { %2961 = vmatprep.subr.bf16.mxu1 %v4109_v46  ;;  %v169_v46 = vld [vmem:[%s6060_s1 + $0x490] sm:$0xff] }
  0x8b   :  { %2909 = vmatpush1.bf16.msra.mxu0 %v3852_v51  ;;  %v3981_v51 = vcombine.high %v169_v46, %v177_v47  ;;  %v3980_v56 = vcombine.low %v169_v46, %v177_v47 }
  0x8c   :  { %2910 = vmatprep.subr.bf16.mxu0 %v3837_v53  ;;  %v161_v53 = vld [vmem:[%s6060_s1 + $0x450] sm:$0xff] }
  0x8d   :  { %2962 = vmatpush1.bf16.msra.mxu1 %v4108_v52 }
  0x8e   :  { %2963 = vmatprep.subr.bf16.mxu1 %v4093_v54  ;;  %v74_v54 = vld [vmem:[%s6060_s1 + $0x198] sm:$0xff] }
  0x8f   :  { %2911 = vmatpush1.bf16.msra.mxu0 %v3836_v61  ;;  %v3887_v61 = vcombine.high %v74_v54, %v82_v55  ;;  %v3886_v2 = vcombine.low %v74_v54, %v82_v55 }
  0x90   :  { %2912 = vmatprep.subr.bf16.mxu0 %v4077_v63  ;;  %v402_v63 = vld [vmem:[%s6060_s1 + $0xbd8] sm:$0xff] }
  0x91   :  { %2964 = vmatpush1.bf16.msra.mxu1 %v4092_v62  ;;  %v394_v62 = vld [vmem:[%s6060_s1 + $0xb98] sm:$0xff] }
  0x92   :  { %2975 = vmatprep.subr.bf16.mxu1 %v4253_v0  ;;  %v66_v0 = vld [vmem:[%s6060_s1 + $0x158] sm:$0xff]  ;;  %v4207_v3 = vcombine.high %v394_v62, %v402_v63 }
  0x93   :  { %2913 = vmatpush2.bf16.msra.mxu0 %v4076_v5  ;;  %v386_v5 = vld [vmem:[%s6060_s1 + $0xb58] sm:$0xff] }
  0x94   :  { %2914 = vmatprep.subr.bf16.mxu0 %v4061_v7  ;;  %v50_v7 = vld [vmem:[%s6060_s1 + $0xd8] sm:$0xff] }
  0x95   :  { %2976 = vmatpush2.bf16.msra.mxu1 %v4252_v6  ;;  %v42_v6 = vld [vmem:[%s6060_s1 + $0x98] sm:$0xff] }
  0x96   :  { %2977 = vmatprep.subr.bf16.mxu1 %v4237_v8  ;;  %v4206_v8 = vcombine.low %v394_v62, %v402_v63  ;;  %v3855_v11 = vcombine.high %v42_v6, %v50_v7  ;;  %v3854_v18 = vcombine.low %v42_v6, %v50_v7 }
  0x97   :  { %2915 = vmatpush2.bf16.msra.mxu0 %v4060_v13  ;;  %v370_v13 = vld [vmem:[%s6060_s1 + $0xad8] sm:$0xff] }
  0x98   :  { %2916 = vmatprep.subr.bf16.mxu0 %v4045_v15  ;;  %v34_v15 = vld [vmem:[%s6060_s1 + $0x58] sm:$0xff]  ;;  %v4175_v19 = vcombine.high %v362_v12, %v370_v13 }
  0x99   :  { %2978 = vmatpush2.bf16.msra.mxu1 %v4236_v14  ;;  %v26_v14 = vld [vmem:[%s6060_s1 + $0x18] sm:$0xff] }
  0x9a   :  { %2979 = vmatprep.subr.bf16.mxu1 %v4221_v17  ;;  %v3839_v20 = vcombine.high %v26_v14, %v34_v15  ;;  %v3838_v27 = vcombine.low %v26_v14, %v34_v15 }
  0x9b   :  { %2917 = vmatpush2.bf16.msra.mxu0 %v4044_v22  ;;  %v354_v22 = vld [vmem:[%s6060_s1 + $0xa58] sm:$0xff] }
  0x9c   :  { %2918 = vmatprep.subr.bf16.mxu0 %v4029_v25  ;;  %v274_v25 = vld [vmem:[%s6060_s1 + $0x7d8] sm:$0xff]  ;;  %v4159_v28 = vcombine.high %v346_v21, %v354_v22 }
  0x9d   :  { %2980 = vmatpush2.bf16.msra.mxu1 %v4220_v23  ;;  %v266_v23 = vld [vmem:[%s6060_s1 + $0x798] sm:$0xff] }
  0x9e   :  { %3002 = vmatprep.subr.bf16.mxu1 %v3951_v26  ;;  %v4174_v26 = vcombine.low %v362_v12, %v370_v13  ;;  %v4079_v29 = vcombine.high %v266_v23, %v274_v25  ;;  %v4078_v43 = vcombine.low %v266_v23, %v274_v25 }
  0x9f   :  { %2919 = vmatpush2.bf16.msra.mxu0 %v4028_v31  ;;  %v338_v31 = vld [vmem:[%s6060_s1 + $0x9d8] sm:$0xff] }
  0xa0   :  { %2982 = vmatmul.mubr.bf16.vlgmr.msra.gmra.mxu1 %v4568_v37  ;;  %2920 = vmatprep.subr.bf16.mxu0 %v4013_v33  ;;  %v90_v37 = vld [vmem:[%s6060_s1 + $0x218] sm:$0xff]  ;;  %v4143_v36 = vcombine.high %v330_v30, %v338_v31  ;;  %v4142_v46 = vcombine.low %v330_v30, %v338_v31 }
  0xa1   :  { %3003 = vmatpush1.bf16.msra.mxu1 %v3950_v32  ;;  %4269 = vmatprep.mubr.msk.bf16.mxu1 %vm2677_vm0, %v4579_v45  ;;  %v3903_v52 = vcombine.high %v90_v37, %v98_v48  ;;  %v153_v45 = vld [vmem:[%s6060_s1 + $0x410] sm:$0xff]  ;;  %v3902_v57 = vcombine.low %v90_v37, %v98_v48  ;;  %v250_v32 = vld [vmem:[%s6060_s1 + $0x718] sm:$0xff] }
  0xa2   :  { %3004 = vmatprep.subr.bf16.mxu1 %v3935_v34  ;;  %v3965_v59 = vcombine.high %v153_v45, %v161_v53  ;;  %v3964_v1 = vcombine.low %v153_v45, %v161_v53  ;;  %v258_v33 = vld [vmem:[%s6060_s1 + $0x758] sm:$0xff]  ;;  %v4158_v34 = vcombine.low %v346_v21, %v354_v22 }
  0xa3   :  { %2921 = vmatpush2.bf16.msra.mxu0 %v4012_v39  ;;  %v4063_v38 = vcombine.high %v250_v32, %v258_v33  ;;  %v314_v39 = vld [vmem:[%s6060_s1 + $0x918] sm:$0xff]  ;;  %v4062_v47 = vcombine.low %v250_v32, %v258_v33 }
  0xa4   :  { %2922 = vmatprep.subr.bf16.mxu0 %v3997_v42  ;;  %v234_v42 = vld [vmem:[%s6060_s1 + $0x698] sm:$0xff] }
  0xa5   :  { %3005 = vmatpush1.bf16.msra.mxu1 %v3934_v40  ;;  %v322_v40 = vld [vmem:[%s6060_s1 + $0x958] sm:$0xff] }
  0xa6   :  { %3006 = vmatprep.subr.bf16.mxu1 %v3919_v44  ;;  %v242_v44 = vld [vmem:[%s6060_s1 + $0x6d8] sm:$0xff]  ;;  %v4127_v37 = vcombine.high %v314_v39, %v322_v40  ;;  %v4126_v45 = vcombine.low %v314_v39, %v322_v40 }
  0xa7   :  { %2923 = vmatpush2.bf16.msra.mxu0 %v3996_v49  ;;  %v4047_v48 = vcombine.high %v234_v42, %v242_v44  ;;  %v298_v49 = vld [vmem:[%s6060_s1 + $0x898] sm:$0xff]  ;;  %v4046_v53 = vcombine.low %v234_v42, %v242_v44 }
  0xa8   :  { %2992 = vmatmul.mubr.bf16.gmra.mxu1 %v4608_v58  ;;  %2924 = vmatprep.subr.bf16.mxu0 %v3981_v51  ;;  %v58_v58 = vld [vmem:[%s6060_s1 + $0x118] sm:$0xff] }
  0xa9   :  { %3007 = vmatpush1.bf16.msra.mxu1 %v3918_v50  ;;  %3034 = vmatprep.mubr.bf16.mxu1 %v4502_v60  ;;  %v3871_v4 = vcombine.high %v58_v58, %v66_v0  ;;  %v378_v60 = vld [vmem:[%s6060_s1 + $0xb18] sm:$0xff]  ;;  %v3870_v9 = vcombine.low %v58_v58, %v66_v0 }
  0xaa   :  { %3008 = vmatprep.subr.bf16.mxu1 %v3903_v52  ;;  %v4191_v10 = vcombine.high %v378_v60, %v386_v5  ;;  %v4190_v17 = vcombine.low %v378_v60, %v386_v5  ;;  %v306_v50 = vld [vmem:[%s6060_s1 + $0x8d8] sm:$0xff] }
  0xab   :  { %2925 = vmatpush2.bf16.msra.mxu0 %v3980_v56  ;;  %v218_v51 = vld [vmem:[%s6060_s1 + $0x618] sm:$0xff]  ;;  %v4111_v54 = vcombine.high %v298_v49, %v306_v50  ;;  %v4110_v62 = vcombine.low %v298_v49, %v306_v50  ;;  %v371_v49 = vld [vmem:[%s6060_s1 + $0xae0] sm:$0xff] }
  0xac   :  { %2926 = vmatprep.subr.bf16.mxu0 %v3965_v59  ;;  %v226_v52 = vld [vmem:[%s6060_s1 + $0x658] sm:$0xff] }
  0xad   :  { %3009 = vmatpush1.bf16.msra.mxu1 %v3902_v57  ;;  %v4031_v55 = vcombine.high %v218_v51, %v226_v52  ;;  %v282_v56 = vld [vmem:[%s6060_s1 + $0x818] sm:$0xff]  ;;  %v4030_v63 = vcombine.low %v218_v51, %v226_v52 }
  0xae   :  { %3010 = vmatprep.subr.bf16.mxu1 %v3887_v61  ;;  %v290_v57 = vld [vmem:[%s6060_s1 + $0x858] sm:$0xff] }
  0xaf   :  { %2927 = vmatpush2.bf16.msra.mxu0 %v3964_v1  ;;  %v202_v59 = vld [vmem:[%s6060_s1 + $0x598] sm:$0xff]  ;;  %v4095_v58 = vcombine.high %v282_v56, %v290_v57  ;;  %v4094_v60 = vcombine.low %v282_v56, %v290_v57 }
  0xb0   :  { %3055 = vmatprep.subr.bf16.mxu0 %v4207_v3  ;;  %v210_v61 = vld [vmem:[%s6060_s1 + $0x5d8] sm:$0xff] }
  0xb1   :  { %3011 = vmatpush1.bf16.msra.mxu1 %v3886_v2  ;;  %v4015_v0 = vcombine.high %v202_v59, %v210_v61  ;;  %v442_v1 = vld [vmem:[%s6060_s1 + $0xd18] sm:$0xff]  ;;  %v4014_v5 = vcombine.low %v202_v59, %v210_v61 }
  0xb2   :  { %3012 = vmatprep.subr.bf16.mxu1 %v3871_v4  ;;  %2929 = vmatmul.mubr.bf16.vlgmr.msra.gmra.mxu0 %v4645_v16  ;;  %v450_v2 = vld [vmem:[%s6060_s1 + $0xd58] sm:$0xff] }
  0xb3   :  { %3056 = vmatpush1.bf16.msra.mxu0 %v4206_v8  ;;  %2938 = vmatprep.mubr.bf16.mxu0 %v4665_v24  ;;  %v186_v3 = vld [vmem:[%s6060_s1 + $0x518] sm:$0xff]  ;;  %v4255_v6 = vcombine.high %v442_v1, %v450_v2  ;;  %v4254_v12 = vcombine.low %v442_v1, %v450_v2 }
  0xb4   :  { %3057 = vmatprep.subr.bf16.mxu0 %v4191_v10  ;;  %v194_v4 = vld [vmem:[%s6060_s1 + $0x558] sm:$0xff] }
  0xb5   :  { %3013 = vmatpush1.bf16.msra.mxu1 %v3870_v9  ;;  %v3999_v7 = vcombine.high %v186_v3, %v194_v4  ;;  %v426_v8 = vld [vmem:[%s6060_s1 + $0xc98] sm:$0xff]  ;;  %v3998_v13 = vcombine.low %v186_v3, %v194_v4 }
  0xb6   :  { %3014 = vmatprep.subr.bf16.mxu1 %v3855_v11  ;;  %v434_v9 = vld [vmem:[%s6060_s1 + $0xcd8] sm:$0xff] }
  0xb7   :  { %3058 = vmatpush1.bf16.msra.mxu0 %v4190_v17  ;;  %v170_v10 = vld [vmem:[%s6060_s1 + $0x498] sm:$0xff]  ;;  %v4239_v14 = vcombine.high %v426_v8, %v434_v9  ;;  %v4238_v21 = vcombine.low %v426_v8, %v434_v9  ;;  %v5233_v8 = vld [vmem:[%s6061_s0 + $0x4] ss:$16 sps:$4 sm:$0xff]  }
  0xb8   :  { %3059 = vmatprep.subr.bf16.mxu0 %v4175_v19  ;;  %v178_v11 = vld [vmem:[%s6060_s1 + $0x4d8] sm:$0xff] }
  0xb9   :  { %3015 = vmatpush1.bf16.msra.mxu1 %v3854_v18  ;;  %v3983_v15 = vcombine.high %v170_v10, %v178_v11  ;;  %v410_v17 = vld [vmem:[%s6060_s1 + $0xc18] sm:$0xff]  ;;  %v3982_v22 = vcombine.low %v170_v10, %v178_v11 }
  0xba   :  { %3016 = vmatprep.subr.bf16.mxu1 %v3839_v20  ;;  %2939 = vmatmul.mubr.bf16.gmra.mxu0 %v4696_v41  ;;  %v418_v18 = vld [vmem:[%s6060_s1 + $0xc58] sm:$0xff] }
  0xbb   :  { %3060 = vmatpush1.bf16.msra.mxu0 %v4174_v26  ;;  %4270 = vmatprep.mubr.msk.bf16.mxu0 %vm2677_vm0, %v5058_v35  ;;  %v154_v19 = vld [vmem:[%s6060_s1 + $0x418] sm:$0xff]  ;;  %v4223_v23 = vcombine.high %v410_v17, %v418_v18  ;;  %v139_v26 = vld [vmem:[%s6060_s1 + $0x3a0] sm:$0xff]  ;;  %v4222_v30 = vcombine.low %v410_v17, %v418_v18 }
  0xbc   :  { %3061 = vmatprep.subr.bf16.mxu0 %v4159_v28  ;;  %v162_v20 = vld [vmem:[%s6060_s1 + $0x458] sm:$0xff]  ;;  %v395_v28 = vld [vmem:[%s6060_s1 + $0xba0] sm:$0xff] }
  0xbd   :  { %3017 = vmatpush1.bf16.msra.mxu1 %v3838_v27  ;;  %v3967_v25 = vcombine.high %v154_v19, %v162_v20  ;;  %v147_v27 = vld [vmem:[%s6060_s1 + $0x3e0] sm:$0xff]  ;;  %v3966_v31 = vcombine.low %v154_v19, %v162_v20  ;;  %v5193_v56 = vld [vmem:[%s6061_s0 + $0x2c] ss:$16 sps:$4 sm:$0xff]   ;;  %v5212_v1 = vld [vmem:[%s6061_s0 + $0x28] ss:$16 sps:$4 sm:$0xff]  }
  0xbe   :  { %3018 = vmatprep.subr.bf16.mxu1 %v4079_v29  ;;  %v403_v29 = vld [vmem:[%s6060_s1 + $0xbe0] sm:$0xff]  ;;  %v3953_v32 = vcombine.high %v139_v26, %v147_v27  ;;  %v3952_v39 = vcombine.low %v139_v26, %v147_v27 }
  0xbf   :  { %3062 = vmatpush1.bf16.msra.mxu0 %v4158_v34  ;;  %v4209_v33 = vcombine.high %v395_v28, %v403_v29  ;;  %v123_v34 = vld [vmem:[%s6060_s1 + $0x320] sm:$0xff]  ;;  %v4208_v40 = vcombine.low %v395_v28, %v403_v29 }
  0xc0   :  { %3063 = vmatprep.subr.bf16.mxu0 %v4143_v36  ;;  %v379_v36 = vld [vmem:[%s6060_s1 + $0xb20] sm:$0xff] }
  0xc1   :  { %3019 = vmatpush2.bf16.msra.mxu1 %v4078_v43  ;;  %v131_v43 = vld [vmem:[%s6060_s1 + $0x360] sm:$0xff] }
  0xc2   :  { %3020 = vmatprep.subr.bf16.mxu1 %v4063_v38  ;;  %v387_v38 = vld [vmem:[%s6060_s1 + $0xb60] sm:$0xff]  ;;  %v3937_v42 = vcombine.high %v123_v34, %v131_v43  ;;  %v3936_v50 = vcombine.low %v123_v34, %v131_v43 }
  0xc3   :  { %3064 = vmatpush1.bf16.msra.mxu0 %v4142_v46  ;;  %v4193_v44 = vcombine.high %v379_v36, %v387_v38  ;;  %v107_v46 = vld [vmem:[%s6060_s1 + $0x2a0] sm:$0xff]  ;;  %v4192_v51 = vcombine.low %v379_v36, %v387_v38 }
  0xc4   :  { %3065 = vmatprep.subr.bf16.mxu0 %v4127_v37  ;;  %v5167_v37 = vld [vmem:[%s6061_s0 + $0x8] ss:$16 sps:$4 sm:$0xff]   ;;  %v307_v17 = vld [vmem:[%s6060_s1 + $0x8e0] sm:$0xff] }
  0xc5   :  { %3021 = vmatpush2.bf16.msra.mxu1 %v4062_v47  ;;  %v115_v47 = vld [vmem:[%s6060_s1 + $0x2e0] sm:$0xff] }
  0xc6   :  { %3022 = vmatprep.subr.bf16.mxu1 %v4047_v48  ;;  %v363_v48 = vld [vmem:[%s6060_s1 + $0xaa0] sm:$0xff]  ;;  %v3921_v52 = vcombine.high %v107_v46, %v115_v47  ;;  %v3920_v57 = vcombine.low %v107_v46, %v115_v47 }
  0xc7   :  { %3066 = vmatpush1.bf16.msra.mxu0 %v4126_v45  ;;  %v4177_v45 = vcombine.high %v363_v48, %v371_v49  ;;  %v291_v26 = vld [vmem:[%s6060_s1 + $0x860] sm:$0xff] }
  0xc8   :  { %3067 = vmatprep.subr.bf16.mxu0 %v4111_v54  ;;  %v99_v54 = vld [vmem:[%s6060_s1 + $0x260] sm:$0xff] }
  0xc9   :  { %3023 = vmatpush2.bf16.msra.mxu1 %v4046_v53  ;;  %v91_v53 = vld [vmem:[%s6060_s1 + $0x220] sm:$0xff] }
  0xca   :  { %3024 = vmatprep.subr.bf16.mxu1 %v4031_v55  ;;  %v355_v55 = vld [vmem:[%s6060_s1 + $0xa60] sm:$0xff]  ;;  %v3905_v59 = vcombine.high %v91_v53, %v99_v54  ;;  %v3904_v2 = vcombine.low %v91_v53, %v99_v54 }
  0xcb   :  { %3068 = vmatpush1.bf16.msra.mxu0 %v4110_v62  ;;  %v75_v62 = vld [vmem:[%s6060_s1 + $0x1a0] sm:$0xff] }
  0xcc   :  { %3069 = vmatprep.subr.bf16.mxu0 %v4095_v58  ;;  %v331_v58 = vld [vmem:[%s6060_s1 + $0x9a0] sm:$0xff] }
  0xcd   :  { %3025 = vmatpush2.bf16.msra.mxu1 %v4030_v63  ;;  %v83_v63 = vld [vmem:[%s6060_s1 + $0x1e0] sm:$0xff] }
  0xce   :  { %3026 = vmatprep.subr.bf16.mxu1 %v4015_v0  ;;  %v339_v0 = vld [vmem:[%s6060_s1 + $0x9e0] sm:$0xff]  ;;  %v3889_v4 = vcombine.high %v75_v62, %v83_v63  ;;  %v3888_v9 = vcombine.low %v75_v62, %v83_v63 }
  0xcf   :  { %3070 = vmatpush1.bf16.msra.mxu0 %v4094_v60  ;;  %v4145_v60 = vcombine.high %v331_v58, %v339_v0  ;;  %v4144_v10 = vcombine.low %v331_v58, %v339_v0  ;;  %v451_v34 = vld [vmem:[%s6060_s1 + $0xd60] sm:$0xff]  ;;  %v140_v0 = vld [vmem:[%s6060_s1 + $0x3a8] sm:$0xff] }
  0xd0   :  { %3081 = vmatprep.subr.bf16.mxu0 %v4255_v6  ;;  %v67_v6 = vld [vmem:[%s6060_s1 + $0x160] sm:$0xff] }
  0xd1   :  { %3027 = vmatpush2.bf16.msra.mxu1 %v4014_v5  ;;  %v59_v5 = vld [vmem:[%s6060_s1 + $0x120] sm:$0xff] }
  0xd2   :  { %3028 = vmatprep.subr.bf16.mxu1 %v3999_v7  ;;  %v323_v7 = vld [vmem:[%s6060_s1 + $0x960] sm:$0xff]  ;;  %v3873_v11 = vcombine.high %v59_v5, %v67_v6  ;;  %v3872_v18 = vcombine.low %v59_v5, %v67_v6 }
  0xd3   :  { %3082 = vmatpush2.bf16.msra.mxu0 %v4254_v12  ;;  %v427_v46 = vld [vmem:[%s6060_s1 + $0xca0] sm:$0xff] }
  0xd4   :  { %3083 = vmatprep.subr.bf16.mxu0 %v4239_v14  ;;  %v51_v14 = vld [vmem:[%s6060_s1 + $0xe0] sm:$0xff] }
  0xd5   :  { %3029 = vmatpush2.bf16.msra.mxu1 %v3998_v13  ;;  %v43_v13 = vld [vmem:[%s6060_s1 + $0xa0] sm:$0xff] }
  0xd6   :  { %3030 = vmatprep.subr.bf16.mxu1 %v3983_v15  ;;  %v299_v15 = vld [vmem:[%s6060_s1 + $0x8a0] sm:$0xff]  ;;  %v3857_v20 = vcombine.high %v43_v13, %v51_v14  ;;  %v3856_v27 = vcombine.low %v43_v13, %v51_v14 }
  0xd7   :  { %3084 = vmatpush2.bf16.msra.mxu0 %v4238_v21  ;;  %v4113_v21 = vcombine.high %v299_v15, %v307_v17  ;;  %v4112_v28 = vcombine.low %v299_v15, %v307_v17  ;;  %v435_v47 = vld [vmem:[%s6060_s1 + $0xce0] sm:$0xff] }
  0xd8   :  { %3085 = vmatprep.subr.bf16.mxu0 %v4223_v23  ;;  %v35_v23 = vld [vmem:[%s6060_s1 + $0x60] sm:$0xff] }
  0xd9   :  { %3031 = vmatpush2.bf16.msra.mxu1 %v3982_v22  ;;  %v27_v22 = vld [vmem:[%s6060_s1 + $0x20] sm:$0xff] }
  0xda   :  { %3032 = vmatprep.subr.bf16.mxu1 %v3967_v25  ;;  %v283_v25 = vld [vmem:[%s6060_s1 + $0x820] sm:$0xff]  ;;  %v3841_v29 = vcombine.high %v27_v22, %v35_v23  ;;  %v3840_v43 = vcombine.low %v27_v22, %v35_v23 }
  0xdb   :  { %3086 = vmatpush2.bf16.msra.mxu0 %v4222_v30  ;;  %v4097_v30 = vcombine.high %v283_v25, %v291_v26  ;;  %v4096_v36 = vcombine.low %v283_v25, %v291_v26  ;;  %v411_v54 = vld [vmem:[%s6060_s1 + $0xc20] sm:$0xff]  ;;  %v108_v26 = vld [vmem:[%s6060_s1 + $0x2a8] sm:$0xff] }
  0xdc   :  { %3108 = vmatprep.subr.bf16.mxu0 %v3953_v32  ;;  %v275_v32 = vld [vmem:[%s6060_s1 + $0x7e0] sm:$0xff] }
  0xdd   :  { %3033 = vmatpush2.bf16.msra.mxu1 %v3966_v31  ;;  %v267_v31 = vld [vmem:[%s6060_s1 + $0x7a0] sm:$0xff] }
  0xde   :  { %3161 = vmatprep.subr.bf16.mxu1 %v4209_v33  ;;  %3088 = vmatmul.mubr.bf16.vlgmr.msra.gmra.mxu0 %v5167_v37  ;;  %v443_v33 = vld [vmem:[%s6060_s1 + $0xd20] sm:$0xff]  ;;  %v4081_v38 = vcombine.high %v267_v31, %v275_v32 }
  0xdf   :  { %3109 = vmatpush1.bf16.msra.mxu0 %v3952_v39  ;;  %4271 = vmatprep.mubr.msk.bf16.mxu0 %vm2677_vm0, %v5193_v56  ;;  %v4257_v39 = vcombine.high %v443_v33, %v451_v34  ;;  %v219_v62 = vld [vmem:[%s6060_s1 + $0x620] sm:$0xff] }
  0xe0   :  { %3035 = vmatmul.mubr.bf16.vlgmr.msra.gmra.mxu1 %v4645_v16  ;;  %3110 = vmatprep.subr.bf16.mxu0 %v3937_v42  ;;  %v347_v16 = vld [vmem:[%s6060_s1 + $0xa20] sm:$0xff] }
  0xe1   :  { %3162 = vmatpush1.bf16.msra.mxu1 %v4208_v40  ;;  %3044 = vmatprep.mubr.bf16.mxu1 %v4665_v24  ;;  %v4176_v24 = vcombine.low %v363_v48, %v371_v49  ;;  %v4161_v61 = vcombine.high %v347_v16, %v355_v55  ;;  %v4160_v3 = vcombine.low %v347_v16, %v355_v55  ;;  %v251_v40 = vld [vmem:[%s6060_s1 + $0x720] sm:$0xff] }
  0xe2   :  { %3163 = vmatprep.subr.bf16.mxu1 %v4193_v44  ;;  %v259_v42 = vld [vmem:[%s6060_s1 + $0x760] sm:$0xff]  ;;  %v4080_v48 = vcombine.low %v267_v31, %v275_v32  ;;  %v4256_v49 = vcombine.low %v443_v33, %v451_v34 }
  0xe3   :  { %3111 = vmatpush1.bf16.msra.mxu0 %v3936_v50  ;;  %v4065_v50 = vcombine.high %v251_v40, %v259_v42  ;;  %v419_v16 = vld [vmem:[%s6060_s1 + $0xc60] sm:$0xff]  ;;  %v4064_v55 = vcombine.low %v251_v40, %v259_v42 }
  0xe4   :  { %3112 = vmatprep.subr.bf16.mxu0 %v3921_v52  ;;  %v235_v52 = vld [vmem:[%s6060_s1 + $0x6a0] sm:$0xff] }
  0xe5   :  { %3164 = vmatpush1.bf16.msra.mxu1 %v4192_v51  ;;  %v4241_v51 = vcombine.high %v427_v46, %v435_v47  ;;  %v227_v63 = vld [vmem:[%s6060_s1 + $0x660] sm:$0xff] }
  0xe6   :  { %3165 = vmatprep.subr.bf16.mxu1 %v4177_v45  ;;  %3098 = vmatmul.mubr.bf16.gmra.mxu0 %v5212_v1  ;;  %v243_v45 = vld [vmem:[%s6060_s1 + $0x6e0] sm:$0xff]  ;;  %v4032_v14 = vcombine.low %v219_v62, %v227_v63 }
  0xe7   :  { %3113 = vmatpush1.bf16.msra.mxu0 %v3920_v57  ;;  %3140 = vmatprep.mubr.bf16.mxu0 %v5233_v8  ;;  %v4240_v57 = vcombine.low %v427_v46, %v435_v47  ;;  %v203_v6 = vld [vmem:[%s6060_s1 + $0x5a0] sm:$0xff] }
  0xe8   :  { %3045 = vmatmul.mubr.bf16.gmra.mxu1 %v4696_v41  ;;  %3114 = vmatprep.subr.bf16.mxu0 %v3905_v59  ;;  %v315_v41 = vld [vmem:[%s6060_s1 + $0x920] sm:$0xff]  ;;  %v5296_v59 = vpop.permute.xlu0 %461 }
  0xe9   :  { %3166 = vmatpush1.bf16.msra.mxu1 %v4176_v24  ;;  %4272 = vmatprep.mubr.msk.bf16.mxu1 %vm2677_vm0, %v5058_v35  ;;  %v4129_v12 = vcombine.high %v315_v41, %v323_v7  ;;  %v4128_v19 = vcombine.low %v315_v41, %v323_v7  ;;  %v4049_v24 = vcombine.high %v235_v52, %v243_v45  ;;  %v211_v41 = vld [vmem:[%s6060_s1 + $0x5e0] sm:$0xff] }
  0xea   :  { %3167 = vmatprep.subr.bf16.mxu1 %v4161_v61  ;;  %v4225_v61 = vcombine.high %v411_v54, %v419_v16  ;;  %v195_v25 = vld [vmem:[%s6060_s1 + $0x560] sm:$0xff]  ;;  %v4016_v32 = vcombine.low %v203_v6, %v211_v41 }
  0xeb   :  { %3115 = vmatpush1.bf16.msra.mxu0 %v3904_v2  ;;  %v148_v2 = vld [vmem:[%s6060_s1 + $0x3e8] sm:$0xff]  ;;  %v179_v47 = vld [vmem:[%s6060_s1 + $0x4e0] sm:$0xff] }
  0xec   :  { %3116 = vmatprep.subr.bf16.mxu0 %v3889_v4  ;;  %v4224_v4 = vcombine.low %v411_v54, %v419_v16  ;;  %v3955_v5 = vcombine.high %v140_v0, %v148_v2  ;;  %v5323_v13 = vpop.permute.xlu0 %466  ;;  %v3954_v17 = vcombine.low %v140_v0, %v148_v2  ;;  %v163_v0 = vld [vmem:[%s6060_s1 + $0x460] sm:$0xff] }
  0xed   :  { %3168 = vmatpush1.bf16.msra.mxu1 %v4160_v3  ;;  %v4048_v3 = vcombine.low %v235_v52, %v243_v45 }
  0xee   :  { %3169 = vmatprep.subr.bf16.mxu1 %v4145_v60  ;;  %v4033_v60 = vcombine.high %v219_v62, %v227_v63 }
  0xef   :  { %3117 = vmatpush1.bf16.msra.mxu0 %v3888_v9 }
  0xf0   :  { %3118 = vmatprep.subr.bf16.mxu0 %v3873_v11  ;;  %v132_v11 = vld [vmem:[%s6060_s1 + $0x368] sm:$0xff] }
  0xf1   :  { %3170 = vmatpush1.bf16.msra.mxu1 %v4144_v10  ;;  %v124_v10 = vld [vmem:[%s6060_s1 + $0x328] sm:$0xff] }
  0xf2   :  { %3171 = vmatprep.subr.bf16.mxu1 %v4129_v12  ;;  %v3939_v23 = vcombine.high %v124_v10, %v132_v11  ;;  %v3938_v34 = vcombine.low %v124_v10, %v132_v11 }
  0xf3   :  { %3119 = vmatpush1.bf16.msra.mxu0 %v3872_v18  ;;  %v4017_v18 = vcombine.high %v203_v6, %v211_v41 }
  0xf4   :  { %3120 = vmatprep.subr.bf16.mxu0 %v3857_v20  ;;  %v2771_v44 = vpop.f32.mrf.mxu1 }
  0xf5   :  { %3172 = vmatpush1.bf16.msra.mxu1 %v4128_v19  ;;  %v187_v19 = vld [vmem:[%s6060_s1 + $0x520] sm:$0xff] }
  0xf6   :  { %3173 = vmatprep.subr.bf16.mxu1 %v4113_v21  ;;  %v2773_v53 = vpop.f32.mrf.mxu1  ;;  %v4000_v45 = vcombine.low %v187_v19, %v195_v25 }
  0xf7   :  { %3121 = vmatpush1.bf16.msra.mxu0 %v3856_v27  ;;  %v116_v27 = vld [vmem:[%s6060_s1 + $0x2e8] sm:$0xff] }
  0xf8   :  { %3122 = vmatprep.subr.bf16.mxu0 %v3841_v29  ;;  %v2775_v58 = vpop.f32.mrf.mxu1  ;;  %v3922_v16 = vcombine.low %v108_v26, %v116_v27 }
  0xf9   :  { %3174 = vmatpush1.bf16.msra.mxu1 %v4112_v28  ;;  %v5338_v28 = vpop.permute.xlu1 %471 }
  0xfa   :  { %3175 = vmatprep.subr.bf16.mxu1 %v4097_v30  ;;  %v2777_v7 = vpop.f32.mrf.mxu1 }
  0xfb   :  { %3123 = vmatpush1.bf16.msra.mxu0 %v3840_v43  ;;  %v4001_v43 = vcombine.high %v187_v19, %v195_v25  ;;  %v404_v19 = vld [vmem:[%s6060_s1 + $0xbe8] sm:$0xff] }
  0xfc   :  { %3124 = vmatprep.subr.bf16.mxu0 %v4081_v38  ;;  %v2781_v20 = vpop.f32.mrf.mxu1  ;;  %v171_v38 = vld [vmem:[%s6060_s1 + $0x4a0] sm:$0xff]  ;;  %v68_v25 = vld [vmem:[%s6060_s1 + $0x168] sm:$0xff] }
  0xfd   :  { %3176 = vmatpush1.bf16.msra.mxu1 %v4096_v36  ;;  %v3923_v36 = vcombine.high %v108_v26, %v116_v27  ;;  %v5358_v54 = vpop.permute.xlu1 %476 }
  0xfe   :  { %3187 = vmatprep.subr.bf16.mxu1 %v4257_v39  ;;  %v2783_v39 = vpop.f32.mrf.mxu1 }
  0xff   :  { %3125 = vmatpush2.bf16.msra.mxu0 %v4080_v48  ;;  %v92_v48 = vld [vmem:[%s6060_s1 + $0x228] sm:$0xff] }
 0x100   :  { %3126 = vmatprep.subr.bf16.mxu0 %v4065_v50 }
 0x101   :  { %3188 = vmatpush2.bf16.msra.mxu1 %v4256_v49  ;;  %v100_v49 = vld [vmem:[%s6060_s1 + $0x268] sm:$0xff] }
 0x102   :  { %3189 = vmatprep.subr.bf16.mxu1 %v4241_v51  ;;  %v3906_v11 = vcombine.low %v92_v48, %v100_v49 }
 0x103   :  { %3127 = vmatpush2.bf16.msra.mxu0 %v4064_v55  ;;  %v3985_v55 = vcombine.high %v171_v38, %v179_v47 }
 0x104   :  { %3128 = vmatprep.subr.bf16.mxu0 %v4049_v24 }
 0x105   :  { %3190 = vmatpush2.bf16.msra.mxu1 %v4240_v57  ;;  %v3907_v57 = vcombine.high %v92_v48, %v100_v49  ;;  %v364_v48 = vld [vmem:[%s6060_s1 + $0xaa8] sm:$0xff] }
 0x106   :  { %3191 = vmatprep.subr.bf16.mxu1 %v4225_v61  ;;  %v2718_v9 = vpop.f32.mrf.mxu0  ;;  %v2785_v61 = vpop.f32.mrf.mxu1  ;;  %v372_v49 = vld [vmem:[%s6060_s1 + $0xae8] sm:$0xff] }
 0x107   :  { %v2719_v12 = vadd.f32 %v2718_v9, %v5296_v59  ;;  %3129 = vmatpush2.bf16.msra.mxu0 %v4048_v3 }
 0x108   :  { %v2720_v15 = vpop.f32.mrf.mxu0  ;;  %3130 = vmatprep.subr.bf16.mxu0 %v4033_v60  ;;  %v76_v60 = vld [vmem:[%s6060_s1 + $0x1a8] sm:$0xff] }
 0x109   :  { %3192 = vmatpush2.bf16.msra.mxu1 %v4224_v4  ;;  %v2772_v21 = vadd.f32 %v2771_v44, %v2719_v12  ;;  %v2721_v22 = vadd.f32 %v2720_v15, %v5296_v59  ;;  %v3984_v4 = vcombine.low %v171_v38, %v179_v47  ;;  %v2787_v15 = vpop.f32.mrf.mxu1  ;;  %v44_v38 = vld [vmem:[%s6060_s1 + $0xa8] sm:$0xff] }
 0x10a   :  { %3214 = vmatprep.subr.bf16.mxu1 %v3955_v5  ;;  %v2722_v29 = vpop.f32.mrf.mxu0  ;;  %v84_v5 = vld [vmem:[%s6060_s1 + $0x1e8] sm:$0xff] }
 0x10b   :  { %v2774_v30 = vadd.f32 %v2773_v53, %v2721_v22  ;;  %v2723_v31 = vadd.f32 %v2722_v29, %v5323_v13  ;;  %3131 = vmatpush2.bf16.msra.mxu0 %v4032_v14  ;;  %v3532_v40 = vmax.f32 %v2772_v21, 0.0 }
 0x10c   :  { %3194 = vmatmul.mubr.bf16.vlgmr.msra.gmra.mxu1 %v5167_v37  ;;  %v2724_v33 = vpop.f32.mrf.mxu0  ;;  %3132 = vmatprep.subr.bf16.mxu0 %v4017_v18  ;;  %v396_v18 = vld [vmem:[%s6060_s1 + $0xba8] sm:$0xff] }
 0x10d   :  { %3215 = vmatpush1.bf16.msra.mxu1 %v3954_v17  ;;  %v3533_v42 = vmax.f32 %v2774_v30, 0.0  ;;  %v2776_v44 = vadd.f32 %v2775_v58, %v2723_v31  ;;  %v2725_v46 = vadd.f32 %v2724_v33, %v5323_v13  ;;  %4273 = vmatprep.mubr.msk.bf16.mxu1 %vm2677_vm0, %v5193_v56  ;;  %v155_v58 = vld [vmem:[%s6060_s1 + $0x420] sm:$0xff]  ;;  %v3891_v17 = vcombine.high %v76_v60, %v84_v5 }
 0x10e   :  { %3216 = vmatprep.subr.bf16.mxu1 %v3939_v23  ;;  %v2728_v50 = vpop.f32.mrf.mxu0  ;;  %v3969_v12 = vcombine.high %v155_v58, %v163_v0  ;;  %v60_v23 = vld [vmem:[%s6060_s1 + $0x128] sm:$0xff]  ;;  %v3968_v26 = vcombine.low %v155_v58, %v163_v0  ;;  %v3890_v31 = vcombine.low %v76_v60, %v84_v5  ;;  %v4178_v58 = vcombine.low %v364_v48, %v372_v49 }
 0x10f   :  { %v4312_v51 = vpack.c.bf16 %v3533_v42, %v3532_v40  ;;  %v2778_v52 = vadd.f32 %v2777_v7, %v2725_v46  ;;  %3133 = vmatpush2.bf16.msra.mxu0 %v4016_v32  ;;  %v2729_v53 = vadd.f32 %v2728_v50, %v5338_v28  ;;  %v3548_v62 = vmax.f32 %v2776_v44, 0.0  ;;  %v5422_v50 = vld [vmem:[%s6061_s0] ss:$16 sps:$4 sm:$0xff]   ;;  %v340_v60 = vld [vmem:[%s6060_s1 + $0x9e8] sm:$0xff] }
 0x110   :  { %3134 = vmatprep.subr.bf16.mxu0 %v4001_v43  ;;  %v2730_v24 = vpop.f32.mrf.mxu0  ;;  %v4211_v32 = vcombine.high %v396_v18, %v404_v19  ;;  %v3875_v33 = vcombine.high %v60_v23, %v68_v25  ;;  %v388_v43 = vld [vmem:[%s6060_s1 + $0xb68] sm:$0xff]  ;;  %v4210_v40 = vcombine.low %v396_v18, %v404_v19  ;;  %v3874_v44 = vcombine.low %v60_v23, %v68_v25 }
 0x111   :  { %3217 = vmatpush1.bf16.msra.mxu1 %v3938_v34  ;;  %3788 = vst [vmem:[%s6063_s3] sm:$0xff] %v4312_v51  ;;  %v3549_v63 = vmax.f32 %v2778_v52, 0.0  ;;  %v2731_v2 = vadd.f32 %v2730_v24, %v5338_v28  ;;  %v2782_v3 = vadd.f32 %v2781_v20, %v2729_v53  ;;  %v380_v34 = vld [vmem:[%s6060_s1 + $0xb28] sm:$0xff]  ;;  %v5434_v53 = vld [vmem:[%s6061_s0 + $0x24] ss:$16 sps:$4 sm:$0xff]  }
 0x112   :  { %3218 = vmatprep.subr.bf16.mxu1 %v3923_v36  ;;  %v2732_v6 = vpop.f32.mrf.mxu0  ;;  %v4195_v46 = vcombine.high %v380_v34, %v388_v43  ;;  %v28_v51 = vld [vmem:[%s6060_s1 + $0x28] sm:$0xff] }
 0x113   :  { %v4320_v41 = vpack.c.bf16 %v3549_v63, %v3548_v62  ;;  %3135 = vmatpush2.bf16.msra.mxu0 %v4000_v45  ;;  %v3564_v7 = vmax.f32 %v2782_v3, 0.0  ;;  %v2784_v9 = vadd.f32 %v2783_v39, %v2731_v2  ;;  %v2733_v10 = vadd.f32 %v2732_v6, %v5358_v54  ;;  %v52_v39 = vld [vmem:[%s6060_s1 + $0xe8] sm:$0xff] }
 0x114   :  { %3204 = vmatmul.mubr.bf16.gmra.mxu1 %v5212_v1  ;;  %3136 = vmatprep.subr.bf16.mxu0 %v3985_v55  ;;  %v2734_v14 = vpop.f32.mrf.mxu0  ;;  %v3859_v47 = vcombine.high %v44_v38, %v52_v39  ;;  %v36_v52 = vld [vmem:[%s6060_s1 + $0x68] sm:$0xff]  ;;  %v4194_v45 = vcombine.low %v380_v34, %v388_v43  ;;  %v4179_v55 = vcombine.high %v364_v48, %v372_v49 }
 0x115   :  { %3219 = vmatpush1.bf16.msra.mxu1 %v3922_v16  ;;  %3796 = vst [vmem:[%s6063_s3 + $0x40] sm:$0xff] %v4320_v41  ;;  %v3565_v20 = vmax.f32 %v2784_v9, 0.0  ;;  %v2735_v21 = vadd.f32 %v2734_v14, %v5358_v54  ;;  %v2786_v22 = vadd.f32 %v2785_v61, %v2733_v10  ;;  %3246 = vmatprep.mubr.bf16.mxu1 %v5233_v8  ;;  %v348_v24 = vld [vmem:[%s6060_s1 + $0xa28] sm:$0xff]  ;;  %v5464_v41 = vld [vmem:[%s6061_s0 + $0x20] ss:$16 sps:$4 sm:$0xff]  }
 0x116   :  { %3220 = vmatprep.subr.bf16.mxu1 %v3907_v57  ;;  %v3858_v16 = vcombine.low %v44_v38, %v52_v39  ;;  %v3843_v57 = vcombine.high %v28_v51, %v36_v52  ;;  %v356_v61 = vld [vmem:[%s6060_s1 + $0xa68] sm:$0xff]  ;;  %v3842_v0 = vcombine.low %v28_v51, %v36_v52 }
 0x117   :  { %3137 = vmatpush2.bf16.msra.mxu0 %v3984_v4  ;;  %v4328_v27 = vpack.c.bf16 %v3565_v20, %v3564_v7  ;;  %v3580_v29 = vmax.f32 %v2786_v22, 0.0  ;;  %v2788_v30 = vadd.f32 %v2787_v15, %v2735_v21  ;;  %v268_v62 = vld [vmem:[%s6060_s1 + $0x7a8] sm:$0xff]  ;;  %v4163_v2 = vcombine.high %v348_v24, %v356_v61 }
 0x118   :  { %3138 = vmatprep.subr.bf16.mxu0 %v3969_v12  ;;  %v276_v63 = vld [vmem:[%s6060_s1 + $0x7e8] sm:$0xff]  ;;  %v4162_v7 = vcombine.low %v348_v24, %v356_v61 }
 0x119   :  { %3221 = vmatpush1.bf16.msra.mxu1 %v3906_v11  ;;  %3804 = vst [vmem:[%s6063_s3 + $0x80] sm:$0xff] %v4328_v27  ;;  %v3581_v36 = vmax.f32 %v2788_v30, 0.0  ;;  %v4083_v3 = vcombine.high %v268_v62, %v276_v63  ;;  %v332_v4 = vld [vmem:[%s6060_s1 + $0x9a8] sm:$0xff]  ;;  %v4082_v9 = vcombine.low %v268_v62, %v276_v63 }
 0x11a   :  { %3222 = vmatprep.subr.bf16.mxu1 %v3891_v17  ;;  %v252_v5 = vld [vmem:[%s6060_s1 + $0x728] sm:$0xff]  ;;  %v4147_v10 = vcombine.high %v332_v4, %v340_v60  ;;  %v4146_v17 = vcombine.low %v332_v4, %v340_v60 }
 0x11b   :  { %3139 = vmatpush2.bf16.msra.mxu0 %v3968_v26  ;;  %v4336_v42 = vpack.c.bf16 %v3581_v36, %v3580_v29  ;;  %v260_v6 = vld [vmem:[%s6060_s1 + $0x768] sm:$0xff] }
 0x11c   :  { %3267 = vmatprep.subr.bf16.mxu0 %v4211_v32  ;;  %v4067_v11 = vcombine.high %v252_v5, %v260_v6  ;;  %v316_v12 = vld [vmem:[%s6060_s1 + $0x928] sm:$0xff]  ;;  %v4066_v18 = vcombine.low %v252_v5, %v260_v6 }
 0x11d   :  { %3223 = vmatpush1.bf16.msra.mxu1 %v3890_v31  ;;  %3812 = vst [vmem:[%s6063_s3 + $0xc0] sm:$0xff] %v4336_v42  ;;  %v324_v14 = vld [vmem:[%s6060_s1 + $0x968] sm:$0xff] }
 0x11e   :  { %3224 = vmatprep.subr.bf16.mxu1 %v3875_v33  ;;  %3141 = vmatmul.mubr.bf16.vlgmr.msra.gmra.mxu0 %v5422_v50  ;;  %v236_v15 = vld [vmem:[%s6060_s1 + $0x6a8] sm:$0xff]  ;;  %v4131_v19 = vcombine.high %v316_v12, %v324_v14  ;;  %v4130_v26 = vcombine.low %v316_v12, %v324_v14 }
 0x11f   :  { %3268 = vmatpush1.bf16.msra.mxu0 %v4210_v40  ;;  %3150 = vmatprep.mubr.bf16.mxu0 %v5434_v53  ;;  %v300_v21 = vld [vmem:[%s6060_s1 + $0x8a8] sm:$0xff] }
 0x120   :  { %3269 = vmatprep.subr.bf16.mxu0 %v4195_v46  ;;  %v308_v22 = vld [vmem:[%s6060_s1 + $0x8e8] sm:$0xff] }
 0x121   :  { %3225 = vmatpush1.bf16.msra.mxu1 %v3874_v44  ;;  %v220_v23 = vld [vmem:[%s6060_s1 + $0x628] sm:$0xff]  ;;  %v4115_v29 = vcombine.high %v300_v21, %v308_v22  ;;  %v4114_v38 = vcombine.low %v300_v21, %v308_v22 }
 0x122   :  { %3226 = vmatprep.subr.bf16.mxu1 %v3859_v47  ;;  %v228_v25 = vld [vmem:[%s6060_s1 + $0x668] sm:$0xff] }
 0x123   :  { %3270 = vmatpush1.bf16.msra.mxu0 %v4194_v45  ;;  %v4035_v30 = vcombine.high %v220_v23, %v228_v25  ;;  %v284_v31 = vld [vmem:[%s6060_s1 + $0x828] sm:$0xff]  ;;  %v4034_v42 = vcombine.low %v220_v23, %v228_v25 }
 0x124   :  { %3271 = vmatprep.subr.bf16.mxu0 %v4179_v55  ;;  %v292_v32 = vld [vmem:[%s6060_s1 + $0x868] sm:$0xff] }
 0x125   :  { %3227 = vmatpush1.bf16.msra.mxu1 %v3858_v16  ;;  %v204_v34 = vld [vmem:[%s6060_s1 + $0x5a8] sm:$0xff]  ;;  %v4099_v44 = vcombine.high %v284_v31, %v292_v32  ;;  %v4098_v61 = vcombine.low %v284_v31, %v292_v32 }
 0x126   :  { %3228 = vmatprep.subr.bf16.mxu1 %v3843_v57  ;;  %3151 = vmatmul.mubr.bf16.gmra.mxu0 %v5464_v41  ;;  %v212_v43 = vld [vmem:[%s6060_s1 + $0x5e8] sm:$0xff] }
 0x127   :  { %3272 = vmatpush1.bf16.msra.mxu0 %v4178_v58  ;;  %4274 = vmatprep.mubr.msk.bf16.mxu0 %vm2677_vm0, %v5058_v35  ;;  %v244_v35 = vld [vmem:[%s6060_s1 + $0x6e8] sm:$0xff]  ;;  %v4019_v47 = vcombine.high %v204_v34, %v212_v43  ;;  %v4018_v24 = vcombine.low %v204_v34, %v212_v43 }
 0x128   :  { %3273 = vmatprep.subr.bf16.mxu0 %v4163_v2  ;;  %v4051_v20 = vcombine.high %v236_v15, %v244_v35  ;;  %v4050_v27 = vcombine.low %v236_v15, %v244_v35  ;;  %v444_v48 = vld [vmem:[%s6060_s1 + $0xd28] sm:$0xff] }
 0x129   :  { %3229 = vmatpush1.bf16.msra.mxu1 %v3842_v0  ;;  %v452_v49 = vld [vmem:[%s6060_s1 + $0xd68] sm:$0xff] }
 0x12a   :  { %3230 = vmatprep.subr.bf16.mxu1 %v4083_v3  ;;  %v188_v16 = vld [vmem:[%s6060_s1 + $0x528] sm:$0xff]  ;;  %v4259_v2 = vcombine.high %v444_v48, %v452_v49  ;;  %v4258_v15 = vcombine.low %v444_v48, %v452_v49  ;;  %v141_v48 = vld [vmem:[%s6060_s1 + $0x3b0] sm:$0xff] }
 0x12b   :  { %3274 = vmatpush1.bf16.msra.mxu0 %v4162_v7  ;;  %v196_v55 = vld [vmem:[%s6060_s1 + $0x568] sm:$0xff]  ;;  %v149_v49 = vld [vmem:[%s6060_s1 + $0x3f0] sm:$0xff] }
 0x12c   :  { %3275 = vmatprep.subr.bf16.mxu0 %v4147_v10  ;;  %v428_v3 = vld [vmem:[%s6060_s1 + $0xca8] sm:$0xff]  ;;  %v4003_v5 = vcombine.high %v188_v16, %v196_v55  ;;  %v4002_v14 = vcombine.low %v188_v16, %v196_v55  ;;  %v405_v16 = vld [vmem:[%s6060_s1 + $0xbf0] sm:$0xff] }
 0x12d   :  { %3231 = vmatpush2.bf16.msra.mxu1 %v4082_v9  ;;  %v436_v4 = vld [vmem:[%s6060_s1 + $0xce8] sm:$0xff] }
 0x12e   :  { %3232 = vmatprep.subr.bf16.mxu1 %v4067_v11  ;;  %v172_v10 = vld [vmem:[%s6060_s1 + $0x4a8] sm:$0xff]  ;;  %v4243_v35 = vcombine.high %v428_v3, %v436_v4 }
 0x12f   :  { %3276 = vmatpush1.bf16.msra.mxu0 %v4146_v17  ;;  %v180_v11 = vld [vmem:[%s6060_s1 + $0x4e8] sm:$0xff] }
 0x130   :  { %3277 = vmatprep.subr.bf16.mxu0 %v4131_v19  ;;  %v420_v21 = vld [vmem:[%s6060_s1 + $0xc68] sm:$0xff]  ;;  %v3987_v25 = vcombine.high %v172_v10, %v180_v11  ;;  %v3986_v43 = vcombine.low %v172_v10, %v180_v11 }
 0x131   :  { %3233 = vmatpush2.bf16.msra.mxu1 %v4066_v18  ;;  %v164_v31 = vld [vmem:[%s6060_s1 + $0x468] sm:$0xff] }
 0x132   :  { %3234 = vmatprep.subr.bf16.mxu1 %v4051_v20  ;;  %v2877_v33 = vpop.f32.mrf.mxu0  ;;  %v412_v20 = vld [vmem:[%s6060_s1 + $0xc28] sm:$0xff] }
 0x133   :  { %3278 = vmatpush1.bf16.msra.mxu0 %v4130_v26 }
 0x134   :  { %v2824_v36 = vpop.f32.mrf.mxu1  ;;  %v2879_v40 = vpop.f32.mrf.mxu0  ;;  %3279 = vmatprep.subr.bf16.mxu0 %v4115_v29 }
 0x135   :  { %v2825_v39 = vadd.f32 %v2824_v36, %v5296_v59  ;;  %3235 = vmatpush2.bf16.msra.mxu1 %v4050_v27  ;;  %v4242_v36 = vcombine.low %v428_v3, %v436_v4  ;;  %v125_v4 = vld [vmem:[%s6060_s1 + $0x330] sm:$0xff] }
 0x136   :  { %v2826_v46 = vpop.f32.mrf.mxu1  ;;  %3236 = vmatprep.subr.bf16.mxu1 %v4035_v30  ;;  %v2881_v45 = vpop.f32.mrf.mxu0  ;;  %v156_v30 = vld [vmem:[%s6060_s1 + $0x428] sm:$0xff] }
 0x137   :  { %v2878_v51 = vadd.f32 %v2877_v33, %v2825_v39  ;;  %v2827_v52 = vadd.f32 %v2826_v46, %v5296_v59  ;;  %3280 = vmatpush1.bf16.msra.mxu0 %v4114_v38  ;;  %v4227_v38 = vcombine.high %v412_v20, %v420_v21 }
 0x138   :  { %v2828_v57 = vpop.f32.mrf.mxu1  ;;  %v2883_v0 = vpop.f32.mrf.mxu0  ;;  %3281 = vmatprep.subr.bf16.mxu0 %v4099_v44 }
 0x139   :  { %v3534_v62 = vmax.f32 %v2878_v51, 0.0  ;;  %v2880_v63 = vadd.f32 %v2879_v40, %v2827_v52  ;;  %v2829_v58 = vadd.f32 %v2828_v57, %v5323_v13  ;;  %3237 = vmatpush2.bf16.msra.mxu1 %v4034_v42 }
 0x13a   :  { %v2830_v60 = vpop.f32.mrf.mxu1  ;;  %3238 = vmatprep.subr.bf16.mxu1 %v4019_v47  ;;  %v2887_v12 = vpop.f32.mrf.mxu0  ;;  %v3971_v47 = vcombine.high %v156_v30, %v164_v31 }
 0x13b   :  { %v3535_v6 = vmax.f32 %v2880_v63, 0.0  ;;  %v2882_v7 = vadd.f32 %v2881_v45, %v2829_v58  ;;  %v2831_v9 = vadd.f32 %v2830_v60, %v5323_v13  ;;  %3282 = vmatpush1.bf16.msra.mxu0 %v4098_v61  ;;  %v397_v45 = vld [vmem:[%s6060_s1 + $0xbb0] sm:$0xff]  ;;  %v3970_v61 = vcombine.low %v156_v30, %v164_v31 }
 0x13c   :  { %v2834_v17 = vpop.f32.mrf.mxu1  ;;  %3293 = vmatprep.subr.bf16.mxu0 %v4259_v2  ;;  %v2889_v23 = vpop.f32.mrf.mxu0  ;;  %v3957_v63 = vcombine.high %v141_v48, %v149_v49  ;;  %v4213_v3 = vcombine.high %v397_v45, %v405_v16  ;;  %v133_v60 = vld [vmem:[%s6060_s1 + $0x370] sm:$0xff]  ;;  %v4212_v10 = vcombine.low %v397_v45, %v405_v16 }
 0x13d   :  { %v4313_v18 = vpack.c.bf16 %v3535_v6, %v3534_v62  ;;  %v2884_v19 = vadd.f32 %v2883_v0, %v2831_v9  ;;  %3239 = vmatpush2.bf16.msra.mxu1 %v4018_v24  ;;  %v2835_v22 = vadd.f32 %v2834_v17, %v5338_v28  ;;  %v3550_v27 = vmax.f32 %v2882_v7, 0.0  ;;  %v389_v6 = vld [vmem:[%s6060_s1 + $0xb70] sm:$0xff] }
 0x13e   :  { %3240 = vmatprep.subr.bf16.mxu1 %v4003_v5  ;;  %v2836_v26 = vpop.f32.mrf.mxu1  ;;  %v2891_v34 = vpop.f32.mrf.mxu0  ;;  %v4226_v62 = vcombine.low %v412_v20, %v420_v21  ;;  %v381_v5 = vld [vmem:[%s6060_s1 + $0xb30] sm:$0xff]  ;;  %v3956_v9 = vcombine.low %v141_v48, %v149_v49  ;;  %v3941_v11 = vcombine.high %v125_v4, %v133_v60 }
 0x13f   :  { %3789 = vst [vmem:[%s6063_s3 + $0x8] sm:$0xff] %v4313_v18  ;;  %v3551_v29 = vmax.f32 %v2884_v19, 0.0  ;;  %v2837_v32 = vadd.f32 %v2836_v26, %v5338_v28  ;;  %v2888_v33 = vadd.f32 %v2887_v12, %v2835_v22  ;;  %3294 = vmatpush2.bf16.msra.mxu0 %v4258_v15  ;;  %v109_v15 = vld [vmem:[%s6060_s1 + $0x2b0] sm:$0xff]  ;;  %v3940_v19 = vcombine.low %v125_v4, %v133_v60 }
 0x140   :  { %v2838_v39 = vpop.f32.mrf.mxu1  ;;  %3295 = vmatprep.subr.bf16.mxu0 %v4243_v35  ;;  %v2893_v52 = vpop.f32.mrf.mxu0  ;;  %v117_v35 = vld [vmem:[%s6060_s1 + $0x2f0] sm:$0xff]  ;;  %v4196_v20 = vcombine.low %v381_v5, %v389_v6 }
 0x141   :  { %v4321_v40 = vpack.c.bf16 %v3551_v29, %v3550_v27  ;;  %3241 = vmatpush2.bf16.msra.mxu1 %v4002_v14  ;;  %v3566_v42 = vmax.f32 %v2888_v33, 0.0  ;;  %v2839_v44 = vadd.f32 %v2838_v39, %v5358_v54  ;;  %v2890_v46 = vadd.f32 %v2889_v23, %v2837_v32  ;;  %v365_v17 = vld [vmem:[%s6060_s1 + $0xab0] sm:$0xff] }
 0x142   :  { %3242 = vmatprep.subr.bf16.mxu1 %v3987_v25  ;;  %v2840_v51 = vpop.f32.mrf.mxu1  ;;  %v4197_v14 = vcombine.high %v381_v5, %v389_v6  ;;  %v373_v18 = vld [vmem:[%s6060_s1 + $0xaf0] sm:$0xff]  ;;  %v3924_v27 = vcombine.low %v109_v15, %v117_v35 }
 0x143   :  { %3797 = vst [vmem:[%s6063_s3 + $0x48] sm:$0xff] %v4321_v40  ;;  %v3567_v55 = vmax.f32 %v2890_v46, 0.0  ;;  %v2841_v57 = vadd.f32 %v2840_v51, %v5358_v54  ;;  %v2892_v24 = vadd.f32 %v2891_v34, %v2839_v44  ;;  %3296 = vmatpush2.bf16.msra.mxu0 %v4242_v36  ;;  %v4181_v21 = vcombine.high %v365_v17, %v373_v18  ;;  %v93_v22 = vld [vmem:[%s6060_s1 + $0x230] sm:$0xff] }
 0x144   :  { %3297 = vmatprep.subr.bf16.mxu0 %v4227_v38  ;;  %v101_v23 = vld [vmem:[%s6060_s1 + $0x270] sm:$0xff]  ;;  %v4180_v29 = vcombine.low %v365_v17, %v373_v18 }
 0x145   :  { %3243 = vmatpush2.bf16.msra.mxu1 %v3986_v43  ;;  %v4329_v58 = vpack.c.bf16 %v3567_v55, %v3566_v42  ;;  %v3582_v0 = vmax.f32 %v2892_v24, 0.0  ;;  %v2894_v2 = vadd.f32 %v2893_v52, %v2841_v57  ;;  %v349_v25 = vld [vmem:[%s6060_s1 + $0xa30] sm:$0xff]  ;;  %v3909_v30 = vcombine.high %v93_v22, %v101_v23 }
 0x146   :  { %3244 = vmatprep.subr.bf16.mxu1 %v3971_v47  ;;  %v357_v26 = vld [vmem:[%s6060_s1 + $0xa70] sm:$0xff]  ;;  %v3908_v43 = vcombine.low %v93_v22, %v101_v23 }
 0x147   :  { %3805 = vst [vmem:[%s6063_s3 + $0x88] sm:$0xff] %v4329_v58  ;;  %v3583_v7 = vmax.f32 %v2894_v2, 0.0  ;;  %3298 = vmatpush2.bf16.msra.mxu0 %v4226_v62  ;;  %v4165_v31 = vcombine.high %v349_v25, %v357_v26  ;;  %v77_v32 = vld [vmem:[%s6060_s1 + $0x1b0] sm:$0xff]  ;;  %v4164_v36 = vcombine.low %v349_v25, %v357_v26 }
 0x148   :  { %3320 = vmatprep.subr.bf16.mxu0 %v3957_v63  ;;  %v85_v33 = vld [vmem:[%s6060_s1 + $0x1f0] sm:$0xff] }
 0x149   :  { %3245 = vmatpush2.bf16.msra.mxu1 %v3970_v61  ;;  %v4337_v12 = vpack.c.bf16 %v3583_v7, %v3582_v0  ;;  %v341_v34 = vld [vmem:[%s6060_s1 + $0x9f0] sm:$0xff]  ;;  %v3893_v38 = vcombine.high %v77_v32, %v85_v33  ;;  %v3892_v47 = vcombine.low %v77_v32, %v85_v33 }
 0x14a   :  { %3373 = vmatprep.subr.bf16.mxu1 %v4213_v3  ;;  %3300 = vmatmul.mubr.bf16.vlgmr.msra.gmra.mxu0 %v5167_v37  ;;  %v3925_v37 = vcombine.high %v109_v15, %v117_v35  ;;  %v61_v40 = vld [vmem:[%s6060_s1 + $0x130] sm:$0xff] }
 0x14b   :  { %3813 = vst [vmem:[%s6063_s3 + $0xc8] sm:$0xff] %v4337_v12  ;;  %3321 = vmatpush1.bf16.msra.mxu0 %v3956_v9  ;;  %4275 = vmatprep.mubr.msk.bf16.mxu0 %vm2677_vm0, %v5193_v56  ;;  %v333_v56 = vld [vmem:[%s6060_s1 + $0x9b0] sm:$0xff] }
 0x14c   :  { %3247 = vmatmul.mubr.bf16.vlgmr.msra.gmra.mxu1 %v5422_v50  ;;  %3322 = vmatprep.subr.bf16.mxu0 %v3941_v11  ;;  %v4149_v39 = vcombine.high %v333_v56, %v341_v34  ;;  %v69_v42 = vld [vmem:[%s6060_s1 + $0x170] sm:$0xff]  ;;  %v4148_v48 = vcombine.low %v333_v56, %v341_v34 }
 0x14d   :  { %3374 = vmatpush1.bf16.msra.mxu1 %v4212_v10  ;;  %3256 = vmatprep.mubr.bf16.mxu1 %v5434_v53  ;;  %v317_v44 = vld [vmem:[%s6060_s1 + $0x930] sm:$0xff]  ;;  %v3877_v49 = vcombine.high %v61_v40, %v69_v42  ;;  %v3876_v55 = vcombine.low %v61_v40, %v69_v42 }
 0x14e   :  { %3375 = vmatprep.subr.bf16.mxu1 %v4197_v14  ;;  %v325_v46 = vld [vmem:[%s6060_s1 + $0x970] sm:$0xff] }
 0x14f   :  { %3323 = vmatpush1.bf16.msra.mxu0 %v3940_v19  ;;  %v4133_v51 = vcombine.high %v317_v44, %v325_v46  ;;  %v45_v52 = vld [vmem:[%s6060_s1 + $0xb0] sm:$0xff]  ;;  %v4132_v57 = vcombine.low %v317_v44, %v325_v46 }
 0x150   :  { %3324 = vmatprep.subr.bf16.mxu0 %v3925_v37  ;;  %v53_v45 = vld [vmem:[%s6060_s1 + $0xf0] sm:$0xff] }
 0x151   :  { %3376 = vmatpush1.bf16.msra.mxu1 %v4196_v20  ;;  %v309_v16 = vld [vmem:[%s6060_s1 + $0x8f0] sm:$0xff]  ;;  %v3861_v24 = vcombine.high %v45_v52, %v53_v45  ;;  %v3860_v2 = vcombine.low %v45_v52, %v53_v45  ;;  %v134_v52 = vld [vmem:[%s6060_s1 + $0x378] sm:$0xff] }
 0x152   :  { %3377 = vmatprep.subr.bf16.mxu1 %v4181_v21  ;;  %3310 = vmatmul.mubr.bf16.gmra.mxu0 %v5212_v1  ;;  %v5637_v1 = vld [vmem:[%s6061_s0 + $0xc] ss:$16 sps:$4 sm:$0xff]   ;;  %v29_v62 = vld [vmem:[%s6060_s1 + $0x30] sm:$0xff] }
 0x153   :  { %3325 = vmatpush1.bf16.msra.mxu0 %v3924_v27  ;;  %3352 = vmatprep.mubr.bf16.mxu0 %v5233_v8  ;;  %v301_v8 = vld [vmem:[%s6060_s1 + $0x8b0] sm:$0xff] }
 0x154   :  { %3257 = vmatmul.mubr.bf16.gmra.mxu1 %v5464_v41  ;;  %3326 = vmatprep.subr.bf16.mxu0 %v3909_v30  ;;  %v4117_v61 = vcombine.high %v301_v8, %v309_v16  ;;  %v37_v63 = vld [vmem:[%s6060_s1 + $0x70] sm:$0xff]  ;;  %v4116_v3 = vcombine.low %v301_v8, %v309_v16 }
 0x155   :  { %3378 = vmatpush1.bf16.msra.mxu1 %v4180_v29  ;;  %4276 = vmatprep.mubr.msk.bf16.mxu1 %vm2677_vm0, %v5637_v1  ;;  %v285_v58 = vld [vmem:[%s6060_s1 + $0x830] sm:$0xff]  ;;  %v3845_v4 = vcombine.high %v29_v62, %v37_v63  ;;  %v3844_v10 = vcombine.low %v29_v62, %v37_v63 }
 0x156   :  { %3379 = vmatprep.subr.bf16.mxu1 %v4165_v31  ;;  %v293_v0 = vld [vmem:[%s6060_s1 + $0x870] sm:$0xff] }
 0x157   :  { %3327 = vmatpush1.bf16.msra.mxu0 %v3908_v43  ;;  %v4101_v60 = vcombine.high %v285_v58, %v293_v0  ;;  %v269_v5 = vld [vmem:[%s6060_s1 + $0x7b0] sm:$0xff]  ;;  %v4100_v11 = vcombine.low %v285_v58, %v293_v0 }
 0x158   :  { %3328 = vmatprep.subr.bf16.mxu0 %v3893_v38  ;;  %v277_v6 = vld [vmem:[%s6060_s1 + $0x7f0] sm:$0xff]  ;;  %v150_v38 = vld [vmem:[%s6060_s1 + $0x3f8] sm:$0xff] }
 0x159   :  { %3380 = vmatpush1.bf16.msra.mxu1 %v4164_v36  ;;  %v445_v7 = vld [vmem:[%s6060_s1 + $0xd30] sm:$0xff]  ;;  %v4085_v12 = vcombine.high %v269_v5, %v277_v6  ;;  %v4084_v20 = vcombine.low %v269_v5, %v277_v6  ;;  %v142_v36 = vld [vmem:[%s6060_s1 + $0x3b8] sm:$0xff] }
 0x15a   :  { %3381 = vmatprep.subr.bf16.mxu1 %v4149_v39  ;;  %v453_v9 = vld [vmem:[%s6060_s1 + $0xd70] sm:$0xff]  ;;  %v3959_v44 = vcombine.high %v142_v36, %v150_v38  ;;  %v5750_v6 = vld [vmem:[%s6061_s0 + $0x8] ss:$16 sps:$4 sm:$0xff]  }
 0x15b   :  { %3329 = vmatpush1.bf16.msra.mxu0 %v3892_v47  ;;  %v4261_v14 = vcombine.high %v445_v7, %v453_v9  ;;  %v253_v15 = vld [vmem:[%s6060_s1 + $0x730] sm:$0xff]  ;;  %v4260_v37 = vcombine.low %v445_v7, %v453_v9 }
 0x15c   :  { %3330 = vmatprep.subr.bf16.mxu0 %v3877_v49  ;;  %v261_v35 = vld [vmem:[%s6060_s1 + $0x770] sm:$0xff] }
 0x15d   :  { %3382 = vmatpush1.bf16.msra.mxu1 %v4148_v48  ;;  %v429_v18 = vld [vmem:[%s6060_s1 + $0xcb0] sm:$0xff]  ;;  %v4069_v21 = vcombine.high %v253_v15, %v261_v35  ;;  %v4068_v30 = vcombine.low %v253_v15, %v261_v35 }
 0x15e   :  { %3383 = vmatprep.subr.bf16.mxu1 %v4133_v51  ;;  %v437_v19 = vld [vmem:[%s6060_s1 + $0xcf0] sm:$0xff]  ;;  %v126_v51 = vld [vmem:[%s6060_s1 + $0x338] sm:$0xff] }
 0x15f   :  { %3331 = vmatpush1.bf16.msra.mxu0 %v3876_v55  ;;  %v4245_v22 = vcombine.high %v429_v18, %v437_v19  ;;  %v237_v23 = vld [vmem:[%s6060_s1 + $0x6b0] sm:$0xff]  ;;  %v4244_v31 = vcombine.low %v429_v18, %v437_v19  ;;  %v3958_v55 = vcombine.low %v142_v36, %v150_v38  ;;  %v3943_v58 = vcombine.high %v126_v51, %v134_v52 }
 0x160   :  { %3332 = vmatprep.subr.bf16.mxu0 %v3861_v24  ;;  %v2983_v17 = vpop.f32.mrf.mxu1  ;;  %v245_v25 = vld [vmem:[%s6060_s1 + $0x6f0] sm:$0xff] }
 0x161   :  { %3384 = vmatpush1.bf16.msra.mxu1 %v4132_v57  ;;  %v413_v27 = vld [vmem:[%s6060_s1 + $0xc30] sm:$0xff]  ;;  %v4053_v32 = vcombine.high %v237_v23, %v245_v25  ;;  %v4052_v39 = vcombine.low %v237_v23, %v245_v25 }
 0x162   :  { %3385 = vmatprep.subr.bf16.mxu1 %v4117_v61  ;;  %v2985_v26 = vpop.f32.mrf.mxu1  ;;  %v421_v29 = vld [vmem:[%s6060_s1 + $0xc70] sm:$0xff] }
 0x163   :  { %3333 = vmatpush1.bf16.msra.mxu0 %v3860_v2  ;;  %v4229_v33 = vcombine.high %v413_v27, %v421_v29  ;;  %v221_v56 = vld [vmem:[%s6060_s1 + $0x630] sm:$0xff]  ;;  %v4228_v40 = vcombine.low %v413_v27, %v421_v29  ;;  %v110_v2 = vld [vmem:[%s6060_s1 + $0x2b8] sm:$0xff] }
 0x164   :  { %3334 = vmatprep.subr.bf16.mxu0 %v3845_v4  ;;  %v229_v34 = vld [vmem:[%s6060_s1 + $0x670] sm:$0xff]  ;;  %v2987_v43 = vpop.f32.mrf.mxu1 }
 0x165   :  { %3386 = vmatpush1.bf16.msra.mxu1 %v4116_v3  ;;  %v4037_v42 = vcombine.high %v221_v56, %v229_v34  ;;  %v205_v46 = vld [vmem:[%s6060_s1 + $0x5b0] sm:$0xff]  ;;  %v4036_v8 = vcombine.low %v221_v56, %v229_v34  ;;  %v118_v3 = vld [vmem:[%s6060_s1 + $0x2f8] sm:$0xff] }
 0x166   :  { %3387 = vmatprep.subr.bf16.mxu1 %v4101_v60  ;;  %v213_v47 = vld [vmem:[%s6060_s1 + $0x5f0] sm:$0xff]  ;;  %v2989_v48 = vpop.f32.mrf.mxu1 }
 0x167   :  { %3335 = vmatpush1.bf16.msra.mxu0 %v3844_v10  ;;  %v4021_v57 = vcombine.high %v205_v46, %v213_v47  ;;  %v189_v24 = vld [vmem:[%s6060_s1 + $0x530] sm:$0xff]  ;;  %v4020_v7 = vcombine.low %v205_v46, %v213_v47  ;;  %v3942_v10 = vcombine.low %v126_v51, %v134_v52  ;;  %v86_v46 = vld [vmem:[%s6060_s1 + $0x1f8] sm:$0xff] }
 0x168   :  { %3336 = vmatprep.subr.bf16.mxu0 %v4085_v12  ;;  %v2993_v61 = vpop.f32.mrf.mxu1  ;;  %v197_v0 = vld [vmem:[%s6060_s1 + $0x570] sm:$0xff]  ;;  %v3927_v12 = vcombine.high %v110_v2, %v118_v3 }
 0x169   :  { %3388 = vmatpush1.bf16.msra.mxu1 %v4100_v11  ;;  %v4005_v11 = vcombine.high %v189_v24, %v197_v0  ;;  %v4004_v27 = vcombine.low %v189_v24, %v197_v0  ;;  %v157_v36 = vld [vmem:[%s6060_s1 + $0x430] sm:$0xff] }
 0x16a   :  { %3399 = vmatprep.subr.bf16.mxu1 %v4261_v14  ;;  %v173_v14 = vld [vmem:[%s6060_s1 + $0x4b0] sm:$0xff]  ;;  %v2995_v15 = vpop.f32.mrf.mxu1 }
 0x16b   :  { %3337 = vmatpush2.bf16.msra.mxu0 %v4084_v20  ;;  %v181_v20 = vld [vmem:[%s6060_s1 + $0x4f0] sm:$0xff] }
 0x16c   :  { %3338 = vmatprep.subr.bf16.mxu0 %v4069_v21  ;;  %v102_v21 = vld [vmem:[%s6060_s1 + $0x278] sm:$0xff]  ;;  %v2997_v56 = vpop.f32.mrf.mxu1  ;;  %v165_v38 = vld [vmem:[%s6060_s1 + $0x470] sm:$0xff] }
 0x16d   :  { %3400 = vmatpush2.bf16.msra.mxu1 %v4260_v37  ;;  %v94_v37 = vld [vmem:[%s6060_s1 + $0x238] sm:$0xff] }
 0x16e   :  { %3401 = vmatprep.subr.bf16.mxu1 %v4245_v22  ;;  %v5769_v22 = vld [vmem:[%s6061_s0 + $0x2c] ss:$16 sps:$4 sm:$0xff]  }
 0x16f   :  { %3339 = vmatpush2.bf16.msra.mxu0 %v4068_v30  ;;  %v3926_v30 = vcombine.low %v110_v2, %v118_v3  ;;  %v4371_v2 = vld [vmem:[%s6061_s0 + $0x4] ss:$16 sps:$4 sm:$0xff]   ;;  %v62_v3 = vld [vmem:[%s6060_s1 + $0x138] sm:$0xff] }
 0x170   :  { %3340 = vmatprep.subr.bf16.mxu0 %v4053_v32  ;;  %v3911_v32 = vcombine.high %v94_v37, %v102_v21 }
 0x171   :  { %3402 = vmatpush2.bf16.msra.mxu1 %v4244_v31  ;;  %v3989_v31 = vcombine.high %v173_v14, %v181_v20 }
 0x172   :  { %3403 = vmatprep.subr.bf16.mxu1 %v4229_v33  ;;  %v2930_v49 = vpop.f32.mrf.mxu0 }
 0x173   :  { %v2931_v45 = vadd.f32 %v2930_v49, %v5296_v59  ;;  %3341 = vmatpush2.bf16.msra.mxu0 %v4052_v39 }
 0x174   :  { %v2932_v16 = vpop.f32.mrf.mxu0  ;;  %3342 = vmatprep.subr.bf16.mxu0 %v4037_v42  ;;  %v3988_v42 = vcombine.low %v173_v14, %v181_v20  ;;  %v382_v14 = vld [vmem:[%s6060_s1 + $0xb38] sm:$0xff] }
 0x175   :  { %3404 = vmatpush2.bf16.msra.mxu1 %v4228_v40  ;;  %v2984_v62 = vadd.f32 %v2983_v17, %v2931_v45  ;;  %v2933_v63 = vadd.f32 %v2932_v16, %v5296_v59  ;;  %v5794_v45 = vld [vmem:[%s6061_s0 + $0x28] ss:$16 sps:$4 sm:$0xff]   ;;  %v3973_v16 = vcombine.high %v157_v36, %v165_v38 }
 0x176   :  { %3426 = vmatprep.subr.bf16.mxu1 %v3959_v44  ;;  %v2934_v4 = vpop.f32.mrf.mxu0  ;;  %v78_v44 = vld [vmem:[%s6060_s1 + $0x1b8] sm:$0xff] }
 0x177   :  { %v2986_v60 = vadd.f32 %v2985_v26, %v2933_v63  ;;  %v2935_v5 = vadd.f32 %v2934_v4, %v5323_v13  ;;  %3343 = vmatpush2.bf16.msra.mxu0 %v4036_v8  ;;  %v3536_v35 = vmax.f32 %v2984_v62, 0.0  ;;  %v3910_v8 = vcombine.low %v94_v37, %v102_v21  ;;  %v406_v62 = vld [vmem:[%s6060_s1 + $0xbf8] sm:$0xff] }
 0x178   :  { %3406 = vmatmul.mubr.bf16.vlgmr.msra.gmra.mxu1 %v5750_v6  ;;  %v2936_v9 = vpop.f32.mrf.mxu0  ;;  %3344 = vmatprep.subr.bf16.mxu0 %v4021_v57  ;;  %v2999_v57 = vpop.f32.mrf.mxu1  ;;  %v3895_v24 = vcombine.high %v78_v44, %v86_v46  ;;  %v70_v4 = vld [vmem:[%s6060_s1 + $0x178] sm:$0xff] }
 0x179   :  { %3427 = vmatpush1.bf16.msra.mxu1 %v3958_v55  ;;  %v3537_v17 = vmax.f32 %v2986_v60, 0.0  ;;  %v2988_v18 = vadd.f32 %v2987_v43, %v2935_v5  ;;  %v2937_v19 = vadd.f32 %v2936_v9, %v5323_v13  ;;  %4277 = vmatprep.mubr.msk.bf16.mxu1 %vm2677_vm0, %v5769_v22  ;;  %v3972_v60 = vcombine.low %v157_v36, %v165_v38 }
 0x17a   :  { %3428 = vmatprep.subr.bf16.mxu1 %v3943_v58  ;;  %v2940_v23 = vpop.f32.mrf.mxu0  ;;  %v3878_v37 = vcombine.low %v62_v3, %v70_v4 }
 0x17b   :  { %v4314_v25 = vpack.c.bf16 %v3537_v17, %v3536_v35  ;;  %v2990_v26 = vadd.f32 %v2989_v48, %v2937_v19  ;;  %3345 = vmatpush2.bf16.msra.mxu0 %v4020_v7  ;;  %v2941_v29 = vadd.f32 %v2940_v23, %v5338_v28  ;;  %v3552_v34 = vmax.f32 %v2988_v18, 0.0  ;;  %v46_v17 = vld [vmem:[%s6060_s1 + $0xb8] sm:$0xff] }
 0x17c   :  { %3346 = vmatprep.subr.bf16.mxu0 %v4005_v11  ;;  %v2942_v33 = vpop.f32.mrf.mxu0  ;;  %v54_v18 = vld [vmem:[%s6060_s1 + $0xf8] sm:$0xff] }
 0x17d   :  { %3429 = vmatpush1.bf16.msra.mxu1 %v3942_v10  ;;  %3790 = vst [vmem:[%s6063_s3 + $0x10] sm:$0xff] %v4314_v25  ;;  %v3553_v43 = vmax.f32 %v2990_v26, 0.0  ;;  %v2943_v39 = vadd.f32 %v2942_v33, %v5338_v28  ;;  %v2994_v40 = vadd.f32 %v2993_v61, %v2941_v29  ;;  %v398_v61 = vld [vmem:[%s6060_s1 + $0xbb8] sm:$0xff]  ;;  %v3894_v10 = vcombine.low %v78_v44, %v86_v46 }
 0x17e   :  { %3430 = vmatprep.subr.bf16.mxu1 %v3927_v12  ;;  %v2944_v47 = vpop.f32.mrf.mxu0  ;;  %v4215_v11 = vcombine.high %v398_v61, %v406_v62  ;;  %v3879_v12 = vcombine.high %v62_v3, %v70_v4  ;;  %v4214_v19 = vcombine.low %v398_v61, %v406_v62  ;;  %v3863_v23 = vcombine.high %v46_v17, %v54_v18  ;;  %v366_v25 = vld [vmem:[%s6060_s1 + $0xab8] sm:$0xff] }
 0x17f   :  { %v4322_v48 = vpack.c.bf16 %v3553_v43, %v3552_v34  ;;  %3347 = vmatpush2.bf16.msra.mxu0 %v4004_v27  ;;  %v3568_v49 = vmax.f32 %v2994_v40, 0.0  ;;  %v2945_v51 = vadd.f32 %v2944_v47, %v5358_v54  ;;  %v2996_v52 = vadd.f32 %v2995_v15, %v2943_v39  ;;  %v390_v15 = vld [vmem:[%s6060_s1 + $0xb78] sm:$0xff] }
 0x180   :  { %3416 = vmatmul.mubr.bf16.gmra.mxu1 %v5794_v45  ;;  %3348 = vmatprep.subr.bf16.mxu0 %v3989_v31  ;;  %v2946_v55 = vpop.f32.mrf.mxu0  ;;  %v4199_v21 = vcombine.high %v382_v14, %v390_v15  ;;  %v374_v26 = vld [vmem:[%s6060_s1 + $0xaf8] sm:$0xff]  ;;  %v3862_v31 = vcombine.low %v46_v17, %v54_v18 }
 0x181   :  { %3431 = vmatpush1.bf16.msra.mxu1 %v3926_v30  ;;  %3798 = vst [vmem:[%s6063_s3 + $0x50] sm:$0xff] %v4322_v48  ;;  %v3569_v63 = vmax.f32 %v2996_v52, 0.0  ;;  %v2947_v58 = vadd.f32 %v2946_v55, %v5358_v54  ;;  %v2998_v0 = vadd.f32 %v2997_v56, %v2945_v51  ;;  %3458 = vmatprep.mubr.bf16.mxu1 %v4371_v2  ;;  %v30_v27 = vld [vmem:[%s6060_s1 + $0x38] sm:$0xff] }
 0x182   :  { %3432 = vmatprep.subr.bf16.mxu1 %v3911_v32  ;;  %v38_v29 = vld [vmem:[%s6060_s1 + $0x78] sm:$0xff]  ;;  %v4198_v30 = vcombine.low %v382_v14, %v390_v15  ;;  %v4183_v32 = vcombine.high %v366_v25, %v374_v26  ;;  %v4182_v43 = vcombine.low %v366_v25, %v374_v26 }
 0x183   :  { %3349 = vmatpush2.bf16.msra.mxu0 %v3988_v42  ;;  %v4330_v5 = vpack.c.bf16 %v3569_v63, %v3568_v49  ;;  %v3584_v7 = vmax.f32 %v2998_v0, 0.0  ;;  %v3000_v9 = vadd.f32 %v2999_v57, %v2947_v58  ;;  %v3847_v33 = vcombine.high %v30_v27, %v38_v29  ;;  %v358_v56 = vld [vmem:[%s6060_s1 + $0xa78] sm:$0xff] }
 0x184   :  { %3350 = vmatprep.subr.bf16.mxu0 %v3973_v16  ;;  %v270_v34 = vld [vmem:[%s6060_s1 + $0x7b8] sm:$0xff]  ;;  %v3846_v36 = vcombine.low %v30_v27, %v38_v29 }
 0x185   :  { %3433 = vmatpush1.bf16.msra.mxu1 %v3910_v8  ;;  %3806 = vst [vmem:[%s6063_s3 + $0x90] sm:$0xff] %v4330_v5  ;;  %v3585_v35 = vmax.f32 %v3000_v9, 0.0  ;;  %v334_v40 = vld [vmem:[%s6060_s1 + $0x9b8] sm:$0xff] }
 0x186   :  { %3434 = vmatprep.subr.bf16.mxu1 %v3895_v24  ;;  %v342_v42 = vld [vmem:[%s6060_s1 + $0x9f8] sm:$0xff] }
 0x187   :  { %3351 = vmatpush2.bf16.msra.mxu0 %v3972_v60  ;;  %v4338_v20 = vpack.c.bf16 %v3585_v35, %v3584_v7  ;;  %v254_v44 = vld [vmem:[%s6060_s1 + $0x738] sm:$0xff]  ;;  %v4151_v49 = vcombine.high %v334_v40, %v342_v42  ;;  %v4150_v16 = vcombine.low %v334_v40, %v342_v42 }
 0x188   :  { %3479 = vmatprep.subr.bf16.mxu0 %v4215_v11  ;;  %v262_v46 = vld [vmem:[%s6060_s1 + $0x778] sm:$0xff] }
 0x189   :  { %3435 = vmatpush1.bf16.msra.mxu1 %v3894_v10  ;;  %3814 = vst [vmem:[%s6063_s3 + $0xd0] sm:$0xff] %v4338_v20  ;;  %v4071_v51 = vcombine.high %v254_v44, %v262_v46  ;;  %v318_v52 = vld [vmem:[%s6060_s1 + $0x938] sm:$0xff]  ;;  %v4070_v55 = vcombine.low %v254_v44, %v262_v46 }
 0x18a   :  { %3436 = vmatprep.subr.bf16.mxu1 %v3879_v12  ;;  %3353 = vmatmul.mubr.bf16.vlgmr.msra.gmra.mxu0 %v5422_v50  ;;  %v350_v50 = vld [vmem:[%s6060_s1 + $0xa38] sm:$0xff] }
 0x18b   :  { %3480 = vmatpush1.bf16.msra.mxu0 %v4214_v19  ;;  %3362 = vmatprep.mubr.bf16.mxu0 %v5434_v53  ;;  %v278_v53 = vld [vmem:[%s6060_s1 + $0x7f8] sm:$0xff]  ;;  %v4167_v38 = vcombine.high %v350_v50, %v358_v56  ;;  %v4166_v47 = vcombine.low %v350_v50, %v358_v56 }
 0x18c   :  { %3481 = vmatprep.subr.bf16.mxu0 %v4199_v21  ;;  %v4087_v39 = vcombine.high %v270_v34, %v278_v53  ;;  %v4086_v48 = vcombine.low %v270_v34, %v278_v53  ;;  %v326_v8 = vld [vmem:[%s6060_s1 + $0x978] sm:$0xff] }
 0x18d   :  { %3437 = vmatpush1.bf16.msra.mxu1 %v3878_v37  ;;  %v4135_v57 = vcombine.high %v318_v52, %v326_v8  ;;  %v302_v61 = vld [vmem:[%s6060_s1 + $0x8b8] sm:$0xff]  ;;  %v4134_v0 = vcombine.low %v318_v52, %v326_v8 }
 0x18e   :  { %3438 = vmatprep.subr.bf16.mxu1 %v3863_v23  ;;  %v310_v62 = vld [vmem:[%s6060_s1 + $0x8f8] sm:$0xff] }
 0x18f   :  { %3482 = vmatpush1.bf16.msra.mxu0 %v4198_v30  ;;  %v222_v63 = vld [vmem:[%s6060_s1 + $0x638] sm:$0xff]  ;;  %v4119_v3 = vcombine.high %v302_v61, %v310_v62  ;;  %v4118_v12 = vcombine.low %v302_v61, %v310_v62 }
 0x190   :  { %3483 = vmatprep.subr.bf16.mxu0 %v4183_v32  ;;  %v230_v58 = vld [vmem:[%s6060_s1 + $0x678] sm:$0xff] }
 0x191   :  { %3439 = vmatpush1.bf16.msra.mxu1 %v3862_v31  ;;  %v4039_v4 = vcombine.high %v222_v63, %v230_v58  ;;  %v286_v60 = vld [vmem:[%s6060_s1 + $0x838] sm:$0xff]  ;;  %v4038_v35 = vcombine.low %v222_v63, %v230_v58 }
 0x192   :  { %3440 = vmatprep.subr.bf16.mxu1 %v3847_v33  ;;  %3363 = vmatmul.mubr.bf16.gmra.mxu0 %v5464_v41  ;;  %v238_v41 = vld [vmem:[%s6060_s1 + $0x6b8] sm:$0xff] }
 0x193   :  { %3484 = vmatpush1.bf16.msra.mxu0 %v4182_v43  ;;  %4278 = vmatprep.mubr.msk.bf16.mxu0 %vm2677_vm0, %v5637_v1  ;;  %v246_v1 = vld [vmem:[%s6060_s1 + $0x6f8] sm:$0xff] }
 0x194   :  { %3485 = vmatprep.subr.bf16.mxu0 %v4167_v38  ;;  %v4055_v24 = vcombine.high %v238_v41, %v246_v1  ;;  %v4054_v2 = vcombine.low %v238_v41, %v246_v1  ;;  %v294_v5 = vld [vmem:[%s6060_s1 + $0x878] sm:$0xff] }
 0x195   :  { %3441 = vmatpush1.bf16.msra.mxu1 %v3846_v36  ;;  %v206_v9 = vld [vmem:[%s6060_s1 + $0x5b8] sm:$0xff]  ;;  %v4103_v17 = vcombine.high %v286_v60, %v294_v5  ;;  %v4102_v31 = vcombine.low %v286_v60, %v294_v5 }
 0x196   :  { %3442 = vmatprep.subr.bf16.mxu1 %v4087_v39  ;;  %v214_v10 = vld [vmem:[%s6060_s1 + $0x5f8] sm:$0xff] }
 0x197   :  { %3486 = vmatpush1.bf16.msra.mxu0 %v4166_v47  ;;  %v4023_v19 = vcombine.high %v206_v9, %v214_v10  ;;  %v446_v20 = vld [vmem:[%s6060_s1 + $0xd38] sm:$0xff]  ;;  %v4022_v30 = vcombine.low %v206_v9, %v214_v10 }
 0x198   :  { %3487 = vmatprep.subr.bf16.mxu0 %v4151_v49  ;;  %v454_v37 = vld [vmem:[%s6060_s1 + $0xd78] sm:$0xff] }
 0x199   :  { %3443 = vmatpush2.bf16.msra.mxu1 %v4086_v48  ;;  %v190_v26 = vld [vmem:[%s6060_s1 + $0x538] sm:$0xff]  ;;  %v4263_v34 = vcombine.high %v446_v20, %v454_v37  ;;  %v4262_v49 = vcombine.low %v446_v20, %v454_v37 }
 0x19a   :  { %3444 = vmatprep.subr.bf16.mxu1 %v4071_v51  ;;  %v198_v27 = vld [vmem:[%s6060_s1 + $0x578] sm:$0xff] }
 0x19b   :  { %3488 = vmatpush1.bf16.msra.mxu0 %v4150_v16  ;;  %v430_v53 = vld [vmem:[%s6060_s1 + $0xcb8] sm:$0xff]  ;;  %v4007_v38 = vcombine.high %v190_v26, %v198_v27  ;;  %v4006_v48 = vcombine.low %v190_v26, %v198_v27 }
 0x19c   :  { %3489 = vmatprep.subr.bf16.mxu0 %v4135_v57  ;;  %v438_v43 = vld [vmem:[%s6060_s1 + $0xcf8] sm:$0xff] }
 0x19d   :  { %3445 = vmatpush2.bf16.msra.mxu1 %v4070_v55  ;;  %v174_v44 = vld [vmem:[%s6060_s1 + $0x4b8] sm:$0xff]  ;;  %v4247_v51 = vcombine.high %v430_v53, %v438_v43  ;;  %v4246_v5 = vcombine.low %v430_v53, %v438_v43 }
 0x19e   :  { %3446 = vmatprep.subr.bf16.mxu1 %v4055_v24  ;;  %v3089_v7 = vpop.f32.mrf.mxu0  ;;  %v182_v46 = vld [vmem:[%s6060_s1 + $0x4f8] sm:$0xff] }
 0x19f   :  { %3490 = vmatpush1.bf16.msra.mxu0 %v4134_v0  ;;  %v414_v1 = vld [vmem:[%s6060_s1 + $0xc38] sm:$0xff]  ;;  %v3991_v24 = vcombine.high %v174_v44, %v182_v46  ;;  %v3990_v60 = vcombine.low %v174_v44, %v182_v46 }
 0x1a0   :  { %v3036_v11 = vpop.f32.mrf.mxu1  ;;  %v3091_v15 = vpop.f32.mrf.mxu0  ;;  %3491 = vmatprep.subr.bf16.mxu0 %v4119_v3  ;;  %v422_v16 = vld [vmem:[%s6060_s1 + $0xc78] sm:$0xff] }
 0x1a1   :  { %v3037_v14 = vadd.f32 %v3036_v11, %v5296_v59  ;;  %3447 = vmatpush2.bf16.msra.mxu1 %v4054_v2  ;;  %v158_v58 = vld [vmem:[%s6060_s1 + $0x438] sm:$0xff]  ;;  %v4230_v37 = vcombine.low %v414_v1, %v422_v16 }
 0x1a2   :  { %v3038_v18 = vpop.f32.mrf.mxu1  ;;  %3448 = vmatprep.subr.bf16.mxu1 %v4039_v4  ;;  %v3093_v25 = vpop.f32.mrf.mxu0  ;;  %v166_v0 = vld [vmem:[%s6060_s1 + $0x478] sm:$0xff] }
 0x1a3   :  { %v3090_v21 = vadd.f32 %v3089_v7, %v3037_v14  ;;  %v3039_v23 = vadd.f32 %v3038_v18, %v5296_v59  ;;  %3492 = vmatpush1.bf16.msra.mxu0 %v4118_v12  ;;  %v4231_v7 = vcombine.high %v414_v1, %v422_v16 }
 0x1a4   :  { %v3040_v29 = vpop.f32.mrf.mxu1  ;;  %v3095_v56 = vpop.f32.mrf.mxu0  ;;  %3493 = vmatprep.subr.bf16.mxu0 %v4103_v17 }
 0x1a5   :  { %v3538_v32 = vmax.f32 %v3090_v21, 0.0  ;;  %v3092_v33 = vadd.f32 %v3091_v15, %v3039_v23  ;;  %v3041_v50 = vadd.f32 %v3040_v29, %v5323_v13  ;;  %3449 = vmatpush2.bf16.msra.mxu1 %v4038_v35  ;;  %v3975_v15 = vcombine.high %v158_v58, %v166_v0 }
 0x1a6   :  { %v3042_v36 = vpop.f32.mrf.mxu1  ;;  %3450 = vmatprep.subr.bf16.mxu1 %v4023_v19  ;;  %v3099_v47 = vpop.f32.mrf.mxu0  ;;  %v3974_v21 = vcombine.low %v158_v58, %v166_v0 }
 0x1a7   :  { %v3539_v39 = vmax.f32 %v3092_v33, 0.0  ;;  %v3094_v40 = vadd.f32 %v3093_v25, %v3041_v50  ;;  %v3043_v42 = vadd.f32 %v3042_v36, %v5323_v13  ;;  %3494 = vmatpush1.bf16.msra.mxu0 %v4102_v31  ;;  %v4373_v31 = vld [vmem:[%s6061_s0 + $0x24] ss:$16 sps:$4 sm:$0xff]  }
 0x1a8   :  { %v3046_v52 = vpop.f32.mrf.mxu1  ;;  %3505 = vmatprep.subr.bf16.mxu0 %v4263_v34  ;;  %v3101_v57 = vpop.f32.mrf.mxu0 }
 0x1a9   :  { %v4315_v8 = vpack.c.bf16 %v3539_v39, %v3538_v32  ;;  %v3096_v41 = vadd.f32 %v3095_v56, %v3043_v42  ;;  %3451 = vmatpush2.bf16.msra.mxu1 %v4022_v30  ;;  %v3047_v55 = vadd.f32 %v3046_v52, %v5338_v28  ;;  %v3554_v62 = vmax.f32 %v3094_v40, 0.0  ;;  %v4372_v30 = vld [vmem:[%s6061_s0] ss:$16 sps:$4 sm:$0xff]  }
 0x1aa   :  { %3452 = vmatprep.subr.bf16.mxu1 %v4007_v38  ;;  %v3048_v61 = vpop.f32.mrf.mxu1  ;;  %v3103_v4 = vpop.f32.mrf.mxu0 }
 0x1ab   :  { %3791 = vst [vmem:[%s6063_s3 + $0x18] sm:$0xff] %v4315_v8  ;;  %v3555_v63 = vmax.f32 %v3096_v41, 0.0  ;;  %v3049_v2 = vadd.f32 %v3048_v61, %v5338_v28  ;;  %v3100_v3 = vadd.f32 %v3099_v47, %v3047_v55  ;;  %3506 = vmatpush2.bf16.msra.mxu0 %v4262_v49 }
 0x1ac   :  { %v3050_v9 = vpop.f32.mrf.mxu1  ;;  %3507 = vmatprep.subr.bf16.mxu0 %v4247_v51  ;;  %v3105_v17 = vpop.f32.mrf.mxu0 }
 0x1ad   :  { %v4323_v10 = vpack.c.bf16 %v3555_v63, %v3554_v62  ;;  %3453 = vmatpush2.bf16.msra.mxu1 %v4006_v48  ;;  %v3570_v11 = vmax.f32 %v3100_v3, 0.0  ;;  %v3051_v12 = vadd.f32 %v3050_v9, %v5358_v54  ;;  %v3102_v14 = vadd.f32 %v3101_v57, %v3049_v2 }
 0x1ae   :  { %3454 = vmatprep.subr.bf16.mxu1 %v3991_v24  ;;  %v3052_v35 = vpop.f32.mrf.mxu1 }
 0x1af   :  { %3799 = vst [vmem:[%s6063_s3 + $0x58] sm:$0xff] %v4323_v10  ;;  %v3571_v18 = vmax.f32 %v3102_v14, 0.0  ;;  %v3053_v19 = vadd.f32 %v3052_v35, %v5358_v54  ;;  %v3104_v20 = vadd.f32 %v3103_v4, %v3051_v12  ;;  %3508 = vmatpush2.bf16.msra.mxu0 %v4246_v5 }
 0x1b0   :  { %3509 = vmatprep.subr.bf16.mxu0 %v4231_v7 }
 0x1b1   :  { %3455 = vmatpush2.bf16.msra.mxu1 %v3990_v60  ;;  %v4331_v23 = vpack.c.bf16 %v3571_v18, %v3570_v11  ;;  %v3586_v25 = vmax.f32 %v3104_v20, 0.0  ;;  %v3106_v26 = vadd.f32 %v3105_v17, %v3053_v19 }
 0x1b2   :  { %3456 = vmatprep.subr.bf16.mxu1 %v3975_v15 }
 0x1b3   :  { %3807 = vst [vmem:[%s6063_s3 + $0x98] sm:$0xff] %v4331_v23  ;;  %v3587_v27 = vmax.f32 %v3106_v26, 0.0  ;;  %3510 = vmatpush2.bf16.msra.mxu0 %v4230_v37 }
 0x1b5   :  { %3457 = vmatpush2.bf16.msra.mxu1 %v3974_v21  ;;  %v4339_v29 = vpack.c.bf16 %v3587_v27, %v3586_v25 }
 0x1b6   :  { %3512 = vmatmul.mubr.bf16.vlgmr.msra.gmra.mxu0 %v5750_v6  ;;  %v4374_v6 = vld [vmem:[%s6061_s0 + $0x20] ss:$16 sps:$4 sm:$0xff]  }
 0x1b7   :  { %3815 = vst [vmem:[%s6063_s3 + $0xd8] sm:$0xff] %v4339_v29  ;;  %4279 = vmatprep.mubr.msk.bf16.mxu0 %vm2677_vm0, %v5769_v22 }
 0x1b8   :  { %3459 = vmatmul.mubr.bf16.vlgmr.msra.gmra.mxu1 %v4372_v30 }
 0x1b9   :  { %3468 = vmatprep.mubr.bf16.mxu1 %v4373_v31 }
 0x1be   :  { %3522 = vmatmul.mubr.bf16.gmra.mxu0 %v5794_v45 }
 0x1c0   :  { %3469 = vmatmul.mubr.bf16.gmra.mxu1 %v4374_v6 }
 0x1cc   :  { %v3195_v32 = vpop.f32.mrf.mxu1 }
 0x1ce   :  { %v3197_v33 = vpop.f32.mrf.mxu1 }
 0x1d0   :  { %v3199_v50 = vpop.f32.mrf.mxu1 }
 0x1d2   :  { %v3201_v56 = vpop.f32.mrf.mxu1 }
 0x1d4   :  { %v3205_v43 = vpop.f32.mrf.mxu1 }
 0x1d6   :  { %v3207_v44 = vpop.f32.mrf.mxu1 }
 0x1d8   :  { %v3209_v16 = vpop.f32.mrf.mxu1 }
 0x1da   :  { %v3211_v4 = vpop.f32.mrf.mxu1 }
 0x1de   :  { %v3142_v34 = vpop.f32.mrf.mxu0 }
 0x1df   :  { %v3143_v53 = vadd.f32 %v3142_v34, %v5296_v59 }
 0x1e0   :  { %v3144_v22 = vpop.f32.mrf.mxu0 }
 0x1e1   :  { %v3196_v36 = vadd.f32 %v3195_v32, %v3143_v53  ;;  %v3145_v38 = vadd.f32 %v3144_v22, %v5296_v59 }
 0x1e2   :  { %v3146_v39 = vpop.f32.mrf.mxu0 }
 0x1e3   :  { %v3198_v40 = vadd.f32 %v3197_v33, %v3145_v38  ;;  %v3147_v45 = vadd.f32 %v3146_v39, %v5323_v13  ;;  %v3540_v46 = vmax.f32 %v3196_v36, 0.0 }
 0x1e4   :  { %v3148_v42 = vpop.f32.mrf.mxu0 }
 0x1e5   :  { %v3541_v47 = vmax.f32 %v3198_v40, 0.0  ;;  %v3200_v48 = vadd.f32 %v3199_v50, %v3147_v45  ;;  %v3149_v49 = vadd.f32 %v3148_v42, %v5323_v13 }
 0x1e6   :  { %v3152_v51 = vpop.f32.mrf.mxu0 }
 0x1e7   :  { %v4316_v52 = vpack.c.bf16 %v3541_v47, %v3540_v46  ;;  %v3202_v8 = vadd.f32 %v3201_v56, %v3149_v49  ;;  %v3153_v41 = vadd.f32 %v3152_v51, %v5338_v28  ;;  %v3556_v55 = vmax.f32 %v3200_v48, 0.0 }
 0x1e8   :  { %v3154_v1 = vpop.f32.mrf.mxu0 }
 0x1e9   :  { %3792 = vst [vmem:[%s6063_s3 + $0x20] sm:$0xff] %v4316_v52  ;;  %v3557_v57 = vmax.f32 %v3202_v8, 0.0  ;;  %v3155_v24 = vadd.f32 %v3154_v1, %v5338_v28  ;;  %v3206_v61 = vadd.f32 %v3205_v43, %v3153_v41 }
 0x1ea   :  { %v3156_v62 = vpop.f32.mrf.mxu0 }
 0x1eb   :  { %v4324_v63 = vpack.c.bf16 %v3557_v57, %v3556_v55  ;;  %v3572_v58 = vmax.f32 %v3206_v61, 0.0  ;;  %v3157_v0 = vadd.f32 %v3156_v62, %v5358_v54  ;;  %v3208_v2 = vadd.f32 %v3207_v44, %v3155_v24 }
 0x1ec   :  { %v3158_v3 = vpop.f32.mrf.mxu0 }
 0x1ed   :  { %3800 = vst [vmem:[%s6063_s3 + $0x60] sm:$0xff] %v4324_v63  ;;  %v3573_v60 = vmax.f32 %v3208_v2, 0.0  ;;  %v3159_v5 = vadd.f32 %v3158_v3, %v5358_v54  ;;  %v3210_v7 = vadd.f32 %v3209_v16, %v3157_v0 }
 0x1ef   :  { %v4332_v9 = vpack.c.bf16 %v3573_v60, %v3572_v58  ;;  %v3588_v10 = vmax.f32 %v3210_v7, 0.0  ;;  %v3212_v11 = vadd.f32 %v3211_v4, %v3159_v5 }
 0x1f1   :  { %3808 = vst [vmem:[%s6063_s3 + $0xa0] sm:$0xff] %v4332_v9  ;;  %v3589_v12 = vmax.f32 %v3212_v11, 0.0 }
 0x1f3   :  { %v4340_v14 = vpack.c.bf16 %v3589_v12, %v3588_v10 }
 0x1f5   :  { %3816 = vst [vmem:[%s6063_s3 + $0xe0] sm:$0xff] %v4340_v14 }
 0x20a   :  { %v3301_v15 = vpop.f32.mrf.mxu0 }
 0x20c   :  { %v3248_v35 = vpop.f32.mrf.mxu1  ;;  %v3303_v18 = vpop.f32.mrf.mxu0 }
 0x20d   :  { %v3249_v17 = vadd.f32 %v3248_v35, %v5296_v59 }
 0x20e   :  { %v3250_v19 = vpop.f32.mrf.mxu1  ;;  %v3305_v21 = vpop.f32.mrf.mxu0 }
 0x20f   :  { %v3302_v20 = vadd.f32 %v3301_v15, %v3249_v17  ;;  %v3251_v37 = vadd.f32 %v3250_v19, %v5296_v59 }
 0x210   :  { %v3252_v23 = vpop.f32.mrf.mxu1  ;;  %v3307_v29 = vpop.f32.mrf.mxu0 }
 0x211   :  { %v3542_v25 = vmax.f32 %v3302_v20, 0.0  ;;  %v3304_v26 = vadd.f32 %v3303_v18, %v3251_v37  ;;  %v3253_v27 = vadd.f32 %v3252_v23, %v5323_v13 }
 0x212   :  { %v3254_v30 = vpop.f32.mrf.mxu1  ;;  %v3311_v33 = vpop.f32.mrf.mxu0 }
 0x213   :  { %v3543_v31 = vmax.f32 %v3304_v26, 0.0  ;;  %v3306_v6 = vadd.f32 %v3305_v21, %v3253_v27  ;;  %v3255_v32 = vadd.f32 %v3254_v30, %v5323_v13 }
 0x214   :  { %v3258_v50 = vpop.f32.mrf.mxu1  ;;  %v3313_v22 = vpop.f32.mrf.mxu0 }
 0x215   :  { %v4317_v56 = vpack.c.bf16 %v3543_v31, %v3542_v25  ;;  %v3308_v34 = vadd.f32 %v3307_v29, %v3255_v32  ;;  %v3259_v53 = vadd.f32 %v3258_v50, %v5338_v28  ;;  %v3558_v36 = vmax.f32 %v3306_v6, 0.0 }
 0x216   :  { %v3260_v43 = vpop.f32.mrf.mxu1  ;;  %v3315_v45 = vpop.f32.mrf.mxu0 }
 0x217   :  { %3793 = vst [vmem:[%s6063_s3 + $0x28] sm:$0xff] %v4317_v56  ;;  %v3559_v38 = vmax.f32 %v3308_v34, 0.0  ;;  %v3261_v39 = vadd.f32 %v3260_v43, %v5338_v28  ;;  %v3312_v40 = vadd.f32 %v3311_v33, %v3259_v53 }
 0x218   :  { %v3262_v42 = vpop.f32.mrf.mxu1  ;;  %v3317_v51 = vpop.f32.mrf.mxu0 }
 0x219   :  { %v4325_v44 = vpack.c.bf16 %v3559_v38, %v3558_v36  ;;  %v3574_v46 = vmax.f32 %v3312_v40, 0.0  ;;  %v3263_v47 = vadd.f32 %v3262_v42, %v5358_v54  ;;  %v3314_v48 = vadd.f32 %v3313_v22, %v3261_v39 }
 0x21a   :  { %v3264_v49 = vpop.f32.mrf.mxu1 }
 0x21b   :  { %3801 = vst [vmem:[%s6063_s3 + $0x68] sm:$0xff] %v4325_v44  ;;  %v3575_v52 = vmax.f32 %v3314_v48, 0.0  ;;  %v3265_v8 = vadd.f32 %v3264_v49, %v5358_v54  ;;  %v3316_v41 = vadd.f32 %v3315_v45, %v3263_v47 }
 0x21d   :  { %v4333_v1 = vpack.c.bf16 %v3575_v52, %v3574_v46  ;;  %v3590_v16 = vmax.f32 %v3316_v41, 0.0  ;;  %v3318_v55 = vadd.f32 %v3317_v51, %v3265_v8 }
 0x21f   :  { %3809 = vst [vmem:[%s6063_s3 + $0xa8] sm:$0xff] %v4333_v1  ;;  %v3591_v57 = vmax.f32 %v3318_v55, 0.0 }
 0x221   :  { %v4341_v24 = vpack.c.bf16 %v3591_v57, %v3590_v16 }
 0x223   :  { %3817 = vst [vmem:[%s6063_s3 + $0xe8] sm:$0xff] %v4341_v24 }
 0x238   :  { %v3407_v61 = vpop.f32.mrf.mxu1 }
 0x23a   :  { %v3409_v62 = vpop.f32.mrf.mxu1 }
 0x23c   :  { %v3411_v63 = vpop.f32.mrf.mxu1 }
 0x23e   :  { %v3413_v58 = vpop.f32.mrf.mxu1 }
 0x240   :  { %v3417_v4 = vpop.f32.mrf.mxu1 }
 0x242   :  { %v3419_v12 = vpop.f32.mrf.mxu1 }
 0x244   :  { %v3421_v23 = vpop.f32.mrf.mxu1 }
 0x246   :  { %v3423_v56 = vpop.f32.mrf.mxu1 }
 0x24a   :  { %v3354_v0 = vpop.f32.mrf.mxu0 }
 0x24b   :  { %v3355_v2 = vadd.f32 %v3354_v0, %v5296_v59 }
 0x24c   :  { %v3356_v3 = vpop.f32.mrf.mxu0 }
 0x24d   :  { %v3408_v60 = vadd.f32 %v3407_v61, %v3355_v2  ;;  %v3357_v5 = vadd.f32 %v3356_v3, %v5296_v59 }
 0x24e   :  { %v3358_v7 = vpop.f32.mrf.mxu0 }
 0x24f   :  { %v3410_v9 = vadd.f32 %v3409_v62, %v3357_v5  ;;  %v3359_v10 = vadd.f32 %v3358_v7, %v5323_v13  ;;  %v3544_v14 = vmax.f32 %v3408_v60, 0.0 }
 0x250   :  { %v3360_v11 = vpop.f32.mrf.mxu0 }
 0x251   :  { %v3545_v15 = vmax.f32 %v3410_v9, 0.0  ;;  %v3412_v35 = vadd.f32 %v3411_v63, %v3359_v10  ;;  %v3361_v17 = vadd.f32 %v3360_v11, %v5323_v13 }
 0x252   :  { %v3364_v18 = vpop.f32.mrf.mxu0 }
 0x253   :  { %v4318_v19 = vpack.c.bf16 %v3545_v15, %v3544_v14  ;;  %v3414_v20 = vadd.f32 %v3413_v58, %v3361_v17  ;;  %v3365_v37 = vadd.f32 %v3364_v18, %v5338_v28  ;;  %v3560_v25 = vmax.f32 %v3412_v35, 0.0 }
 0x254   :  { %v3366_v21 = vpop.f32.mrf.mxu0 }
 0x255   :  { %3794 = vst [vmem:[%s6063_s3 + $0x30] sm:$0xff] %v4318_v19  ;;  %v3561_v26 = vmax.f32 %v3414_v20, 0.0  ;;  %v3367_v27 = vadd.f32 %v3366_v21, %v5338_v28  ;;  %v3418_v29 = vadd.f32 %v3417_v4, %v3365_v37 }
 0x256   :  { %v3368_v30 = vpop.f32.mrf.mxu0 }
 0x257   :  { %v4326_v31 = vpack.c.bf16 %v3561_v26, %v3560_v25  ;;  %v3576_v6 = vmax.f32 %v3418_v29, 0.0  ;;  %v3369_v32 = vadd.f32 %v3368_v30, %v5358_v54  ;;  %v3420_v33 = vadd.f32 %v3419_v12, %v3367_v27 }
 0x258   :  { %v3370_v50 = vpop.f32.mrf.mxu0 }
 0x259   :  { %3802 = vst [vmem:[%s6063_s3 + $0x70] sm:$0xff] %v4326_v31  ;;  %v3577_v34 = vmax.f32 %v3420_v33, 0.0  ;;  %v3371_v53 = vadd.f32 %v3370_v50, %v5358_v54  ;;  %v3422_v22 = vadd.f32 %v3421_v23, %v3369_v32 }
 0x25b   :  { %v4334_v43 = vpack.c.bf16 %v3577_v34, %v3576_v6  ;;  %v3592_v36 = vmax.f32 %v3422_v22, 0.0  ;;  %v3424_v38 = vadd.f32 %v3423_v56, %v3371_v53 }
 0x25d   :  { %3810 = vst [vmem:[%s6063_s3 + $0xb0] sm:$0xff] %v4334_v43  ;;  %v3593_v39 = vmax.f32 %v3424_v38, 0.0 }
 0x25f   :  { %v4342_v40 = vpack.c.bf16 %v3593_v39, %v3592_v36 }
 0x261   :  { %3818 = vst [vmem:[%s6063_s3 + $0xf0] sm:$0xff] %v4342_v40 }
 0x276   :  { %v3513_v45 = vpop.f32.mrf.mxu0 }
 0x278   :  { %v3460_v42 = vpop.f32.mrf.mxu1  ;;  %v3515_v46 = vpop.f32.mrf.mxu0 }
 0x279   :  { %v3461_v44 = vadd.f32 %v3460_v42, %v5296_v59 }
 0x27a   :  { %v3462_v47 = vpop.f32.mrf.mxu1  ;;  %v3517_v51 = vpop.f32.mrf.mxu0 }
 0x27b   :  { %v3514_v48 = vadd.f32 %v3513_v45, %v3461_v44  ;;  %v3463_v49 = vadd.f32 %v3462_v47, %v5296_v59 }
 0x27c   :  { %v3464_v52 = vpop.f32.mrf.mxu1  ;;  %v3519_v1 = vpop.f32.mrf.mxu0 }
 0x27d   :  { %v3516_v8 = vadd.f32 %v3515_v46, %v3463_v49  ;;  %v3465_v41 = vadd.f32 %v3464_v52, %v5323_v13  ;;  %v3546_v55 = vmax.f32 %v3514_v48, 0.0 }
 0x27e   :  { %v3466_v16 = vpop.f32.mrf.mxu1  ;;  %v3523_v62 = vpop.f32.mrf.mxu0 }
 0x27f   :  { %v3547_v57 = vmax.f32 %v3516_v8, 0.0  ;;  %v3518_v24 = vadd.f32 %v3517_v51, %v3465_v41  ;;  %v3467_v61 = vadd.f32 %v3466_v16, %v5323_v13 }
 0x280   :  { %v3470_v63 = vpop.f32.mrf.mxu1  ;;  %v3525_v3 = vpop.f32.mrf.mxu0 }
 0x281   :  { %v4319_v58 = vpack.c.bf16 %v3547_v57, %v3546_v55  ;;  %v3520_v0 = vadd.f32 %v3519_v1, %v3467_v61  ;;  %v3471_v2 = vadd.f32 %v3470_v63, %v5338_v28  ;;  %v3562_v4 = vmax.f32 %v3518_v24, 0.0 }
 0x282   :  { %v3472_v59 = vpop.f32.mrf.mxu1  ;;  %v3527_v10 = vpop.f32.mrf.mxu0 }
 0x283   :  { %3795 = vst [vmem:[%s6063_s3 + $0x38] sm:$0xff] %v4319_v58  ;;  %v3563_v60 = vmax.f32 %v3520_v0, 0.0  ;;  %v3524_v5 = vadd.f32 %v3523_v62, %v3471_v2  ;;  %v3473_v7 = vadd.f32 %v3472_v59, %v5338_v28 }
 0x284   :  { %v3474_v9 = vpop.f32.mrf.mxu1  ;;  %v3529_v19 = vpop.f32.mrf.mxu0 }
 0x285   :  { %v4327_v13 = vpack.c.bf16 %v3563_v60, %v3562_v4  ;;  %v3526_v11 = vadd.f32 %v3525_v3, %v3473_v7  ;;  %v3475_v12 = vadd.f32 %v3474_v9, %v5358_v54  ;;  %v3578_v15 = vmax.f32 %v3524_v5, 0.0 }
 0x286   :  { %v3476_v14 = vpop.f32.mrf.mxu1 }
 0x287   :  { %3803 = vst [vmem:[%s6063_s3 + $0x78] sm:$0xff] %v4327_v13  ;;  %v3579_v35 = vmax.f32 %v3526_v11, 0.0  ;;  %v3528_v17 = vadd.f32 %v3527_v10, %v3475_v12  ;;  %v3477_v18 = vadd.f32 %v3476_v14, %v5358_v54 }
 0x289   :  { %v4335_v20 = vpack.c.bf16 %v3579_v35, %v3578_v15  ;;  %v3530_v37 = vadd.f32 %v3529_v19, %v3477_v18  ;;  %v3594_v28 = vmax.f32 %v3528_v17, 0.0 }
 0x28b   :  { %3811 = vst [vmem:[%s6063_s3 + $0xb8] sm:$0xff] %v4335_v20  ;;  %v3595_v21 = vmax.f32 %v3530_v37, 0.0 }
 0x28d   :  { %v4343_v23 = vpack.c.bf16 %v3595_v21, %v3594_v28 }
 0x28f   :  { %3819 = vst [vmem:[%s6063_s3 + $0xf8] sm:$0xff] %v4343_v23 }

// kernel: d2_forward.7
= control target key start
LH: loop header
LB: loop body
LE: loop exit
PB: predicated region body
PF: predicated region fallthrough
CT: control target
= control target key end

     0   :  { %v2927_v1 = vmov 0   ;;  %vm1531_vm0 = vcmask 785408   ;;  %s4029_s1 = inlined_call_operand.vmem [shape: bf16[864,512], index: 1, kind: input, shape index: {}]   ;;  %s4030_s0 = inlined_call_operand.vmem [shape: bf16[64,864], index: 0, kind: input, shape index: {}]   ;;  %s4031_s2 = inlined_call_operand.vmem [shape: f32[64,1], index: 2, kind: input, shape index: {}]   ;;  %s4032_s3 = inlined_call_operand.vmem [shape: bf16[64,512], index: 3, kind: output, shape index: {}]  }
   0x1   :  { %v2563_v0 = vld [vmem:[%s4029_s1 + $0xe4] ss:$16 sps:$4 sm:$0xff]   ;;  %2561 = vset.pattern.permute.xlu0 %v2927_v1  ;;  %2562 = vset.pattern.permute.xlu1 %v2927_v1  ;;  %v2567_v3 = vld [vmem:[%s4029_s1 + $0xe0] ss:$16 sps:$4 sm:$0xff]   ;;  %v3108_v52 = vld [vmem:[%s4030_s0 + $0xc] ss:$28 sps:$4 sm:$0xff]  }
   0x2   :  { %v2565_v2 = vld [vmem:[%s4029_s1 + $0x2e4] ss:$16 sps:$4 sm:$0xff]   ;;  %1544 = vmatprep.subr.bf16.mxu0 %v2563_v0  ;;  %v2568_v4 = vld [vmem:[%s4029_s1 + $0x2e0] ss:$16 sps:$4 sm:$0xff]   ;;  %1649 = vmatprep.mubr.bf16.mxu1 %v3108_v52 }
   0x3   :  { %1617 = vmatprep.subr.bf16.mxu1 %v2565_v2  ;;  %v2569_v5 = vld [vmem:[%s4029_s1 + $0xc4] ss:$16 sps:$4 sm:$0xff]   ;;  %1545 = vmatpush1.bf16.msra.mxu0 %v2567_v3  ;;  %v2573_v7 = vld [vmem:[%s4029_s1 + $0xc0] ss:$16 sps:$4 sm:$0xff]  }
   0x4   :  { %1618 = vmatpush1.bf16.msra.mxu1 %v2568_v4  ;;  %v2571_v6 = vld [vmem:[%s4029_s1 + $0x2c4] ss:$16 sps:$4 sm:$0xff]   ;;  %1546 = vmatprep.subr.bf16.mxu0 %v2569_v5  ;;  %v2574_v8 = vld [vmem:[%s4029_s1 + $0x2c0] ss:$16 sps:$4 sm:$0xff]  }
   0x5   :  { %1619 = vmatprep.subr.bf16.mxu1 %v2571_v6  ;;  %v2575_v9 = vld [vmem:[%s4029_s1 + $0xa4] ss:$16 sps:$4 sm:$0xff]   ;;  %v2579_v11 = vld [vmem:[%s4029_s1 + $0xa0] ss:$16 sps:$4 sm:$0xff]  }
   0x6   :  { %v2577_v10 = vld [vmem:[%s4029_s1 + $0x2a4] ss:$16 sps:$4 sm:$0xff]   ;;  %v2580_v12 = vld [vmem:[%s4029_s1 + $0x2a0] ss:$16 sps:$4 sm:$0xff]  }
   0x7   :  { %1547 = vmatpush1.bf16.msra.mxu0 %v2573_v7  ;;  %v2581_v13 = vld [vmem:[%s4029_s1 + $0x84] ss:$16 sps:$4 sm:$0xff]   ;;  %v2585_v15 = vld [vmem:[%s4029_s1 + $0x80] ss:$16 sps:$4 sm:$0xff]  }
   0x8   :  { %1620 = vmatpush1.bf16.msra.mxu1 %v2574_v8  ;;  %1548 = vmatprep.subr.bf16.mxu0 %v2575_v9  ;;  %v2583_v14 = vld [vmem:[%s4029_s1 + $0x284] ss:$16 sps:$4 sm:$0xff]   ;;  %v2586_v16 = vld [vmem:[%s4029_s1 + $0x280] ss:$16 sps:$4 sm:$0xff]  }
   0x9   :  { %1621 = vmatprep.subr.bf16.mxu1 %v2577_v10  ;;  %v2587_v17 = vld [vmem:[%s4029_s1 + $0x64] ss:$16 sps:$4 sm:$0xff]   ;;  %v2591_v19 = vld [vmem:[%s4029_s1 + $0x60] ss:$16 sps:$4 sm:$0xff]  }
   0xa   :  { %v2589_v18 = vld [vmem:[%s4029_s1 + $0x264] ss:$16 sps:$4 sm:$0xff]   ;;  %v2592_v20 = vld [vmem:[%s4029_s1 + $0x260] ss:$16 sps:$4 sm:$0xff]  }
   0xb   :  { %1549 = vmatpush1.bf16.msra.mxu0 %v2579_v11  ;;  %v2593_v21 = vld [vmem:[%s4029_s1 + $0x44] ss:$16 sps:$4 sm:$0xff]   ;;  %v2597_v23 = vld [vmem:[%s4029_s1 + $0x40] ss:$16 sps:$4 sm:$0xff]  }
   0xc   :  { %1622 = vmatpush1.bf16.msra.mxu1 %v2580_v12  ;;  %1550 = vmatprep.subr.bf16.mxu0 %v2581_v13  ;;  %v2595_v22 = vld [vmem:[%s4029_s1 + $0x244] ss:$16 sps:$4 sm:$0xff]   ;;  %v2598_v24 = vld [vmem:[%s4029_s1 + $0x240] ss:$16 sps:$4 sm:$0xff]   ;;  %v3185_v12 = vld [vmem:[%s4030_s0 + $0x3c] ss:$28 sps:$4 sm:$0xff]  }
   0xd   :  { %1623 = vmatprep.subr.bf16.mxu1 %v2583_v14  ;;  %v2599_v25 = vld [vmem:[%s4029_s1 + $0x24] ss:$16 sps:$4 sm:$0xff]   ;;  %v2603_v27 = vld [vmem:[%s4029_s1 + $0x20] ss:$16 sps:$4 sm:$0xff]  }
   0xe   :  { %v2601_v26 = vld [vmem:[%s4029_s1 + $0x224] ss:$16 sps:$4 sm:$0xff]   ;;  %v2604_v28 = vld [vmem:[%s4029_s1 + $0x220] ss:$16 sps:$4 sm:$0xff]  }
   0xf   :  { %1551 = vmatpush1.bf16.msra.mxu0 %v2585_v15  ;;  %v2605_v29 = vld [vmem:[%s4029_s1 + $0x4] ss:$16 sps:$4 sm:$0xff]   ;;  %v2609_v31 = vld [vmem:[%s4029_s1] ss:$16 sps:$4 sm:$0xff]  }
  0x10   :  { %1624 = vmatpush1.bf16.msra.mxu1 %v2586_v16  ;;  %1552 = vmatprep.subr.bf16.mxu0 %v2587_v17  ;;  %v2607_v30 = vld [vmem:[%s4029_s1 + $0x204] ss:$16 sps:$4 sm:$0xff]   ;;  %v2610_v32 = vld [vmem:[%s4029_s1 + $0x200] ss:$16 sps:$4 sm:$0xff]  }
  0x11   :  { %1625 = vmatprep.subr.bf16.mxu1 %v2589_v18  ;;  %v2611_v33 = vld [vmem:[%s4029_s1 + $0x1e4] ss:$16 sps:$4 sm:$0xff]   ;;  %v2615_v35 = vld [vmem:[%s4029_s1 + $0x1e0] ss:$16 sps:$4 sm:$0xff]  }
  0x12   :  { %v2613_v34 = vld [vmem:[%s4029_s1 + $0x3e4] ss:$16 sps:$4 sm:$0xff]   ;;  %v2616_v36 = vld [vmem:[%s4029_s1 + $0x3e0] ss:$16 sps:$4 sm:$0xff]  }
  0x13   :  { %1553 = vmatpush1.bf16.msra.mxu0 %v2591_v19  ;;  %v2617_v37 = vld [vmem:[%s4029_s1 + $0x1c4] ss:$16 sps:$4 sm:$0xff]   ;;  %v2621_v39 = vld [vmem:[%s4029_s1 + $0x1c0] ss:$16 sps:$4 sm:$0xff]  }
  0x14   :  { %1626 = vmatpush1.bf16.msra.mxu1 %v2592_v20  ;;  %1554 = vmatprep.subr.bf16.mxu0 %v2593_v21  ;;  %v2619_v38 = vld [vmem:[%s4029_s1 + $0x3c4] ss:$16 sps:$4 sm:$0xff]   ;;  %v2622_v40 = vld [vmem:[%s4029_s1 + $0x3c0] ss:$16 sps:$4 sm:$0xff]  }
  0x15   :  { %1627 = vmatprep.subr.bf16.mxu1 %v2595_v22  ;;  %v2623_v41 = vld [vmem:[%s4029_s1 + $0x1a4] ss:$16 sps:$4 sm:$0xff]   ;;  %v2627_v43 = vld [vmem:[%s4029_s1 + $0x1a0] ss:$16 sps:$4 sm:$0xff]  }
  0x16   :  { %v2625_v42 = vld [vmem:[%s4029_s1 + $0x3a4] ss:$16 sps:$4 sm:$0xff]   ;;  %v2628_v44 = vld [vmem:[%s4029_s1 + $0x3a0] ss:$16 sps:$4 sm:$0xff]  }
  0x17   :  { %1555 = vmatpush1.bf16.msra.mxu0 %v2597_v23  ;;  %v2629_v45 = vld [vmem:[%s4029_s1 + $0x184] ss:$16 sps:$4 sm:$0xff]   ;;  %v2633_v47 = vld [vmem:[%s4029_s1 + $0x180] ss:$16 sps:$4 sm:$0xff]  }
  0x18   :  { %1628 = vmatpush1.bf16.msra.mxu1 %v2598_v24  ;;  %1556 = vmatprep.subr.bf16.mxu0 %v2599_v25  ;;  %v2631_v46 = vld [vmem:[%s4029_s1 + $0x384] ss:$16 sps:$4 sm:$0xff]   ;;  %v2634_v48 = vld [vmem:[%s4029_s1 + $0x380] ss:$16 sps:$4 sm:$0xff]   ;;  %v3235_v24 = vld [vmem:[%s4030_s0 + $0x7c] ss:$28 sps:$4 sm:$0xff]  }
  0x19   :  { %1629 = vmatprep.subr.bf16.mxu1 %v2601_v26  ;;  %v2635_v49 = vld [vmem:[%s4029_s1 + $0x164] ss:$16 sps:$4 sm:$0xff]   ;;  %v2639_v53 = vld [vmem:[%s4029_s1 + $0x160] ss:$16 sps:$4 sm:$0xff]  }
  0x1a   :  { %v3100_v50 = vld [vmem:[%s4030_s0 + $0x4] ss:$28 sps:$4 sm:$0xff]   ;;  %v3211_v18 = vld [vmem:[%s4030_s0 + $0x38] ss:$28 sps:$4 sm:$0xff]  }
  0x1b   :  { %1557 = vmatpush1.bf16.msra.mxu0 %v2603_v27  ;;  %v2637_v51 = vld [vmem:[%s4029_s1 + $0x364] ss:$16 sps:$4 sm:$0xff]   ;;  %1576 = vmatprep.mubr.bf16.mxu0 %v3100_v50  ;;  %v2640_v54 = vld [vmem:[%s4029_s1 + $0x360] ss:$16 sps:$4 sm:$0xff]  }
  0x1c   :  { %1630 = vmatpush1.bf16.msra.mxu1 %v2604_v28  ;;  %1558 = vmatprep.subr.bf16.mxu0 %v2605_v29  ;;  %v2641_v55 = vld [vmem:[%s4029_s1 + $0x144] ss:$16 sps:$4 sm:$0xff]   ;;  %v2645_v57 = vld [vmem:[%s4029_s1 + $0x140] ss:$16 sps:$4 sm:$0xff]  }
  0x1d   :  { %1631 = vmatprep.subr.bf16.mxu1 %v2607_v30  ;;  %v2643_v56 = vld [vmem:[%s4029_s1 + $0x344] ss:$16 sps:$4 sm:$0xff]   ;;  %v2646_v58 = vld [vmem:[%s4029_s1 + $0x340] ss:$16 sps:$4 sm:$0xff]  }
  0x1e   :  { %v2647_v59 = vld [vmem:[%s4029_s1 + $0x124] ss:$16 sps:$4 sm:$0xff]   ;;  %v2651_v61 = vld [vmem:[%s4029_s1 + $0x120] ss:$16 sps:$4 sm:$0xff]  }
  0x1f   :  { %1559 = vmatpush1.bf16.msra.mxu0 %v2609_v31  ;;  %v2649_v60 = vld [vmem:[%s4029_s1 + $0x324] ss:$16 sps:$4 sm:$0xff]   ;;  %v2652_v62 = vld [vmem:[%s4029_s1 + $0x320] ss:$16 sps:$4 sm:$0xff]  }
  0x20   :  { %1632 = vmatpush1.bf16.msra.mxu1 %v2610_v32  ;;  %1560 = vmatprep.subr.bf16.mxu0 %v2611_v33  ;;  %v2653_v63 = vld [vmem:[%s4029_s1 + $0x104] ss:$16 sps:$4 sm:$0xff]   ;;  %v2657_v2 = vld [vmem:[%s4029_s1 + $0x100] ss:$16 sps:$4 sm:$0xff]  }
  0x21   :  { %1633 = vmatprep.subr.bf16.mxu1 %v2613_v34  ;;  %v2655_v0 = vld [vmem:[%s4029_s1 + $0x304] ss:$16 sps:$4 sm:$0xff]   ;;  %v2658_v3 = vld [vmem:[%s4029_s1 + $0x300] ss:$16 sps:$4 sm:$0xff]   ;;  %v3275_v34 = vld [vmem:[%s4030_s0 + $0xac] ss:$28 sps:$4 sm:$0xff]  }
  0x22   :  { %v2667_v4 = vld [vmem:[%s4029_s1 + $0x4e4] ss:$16 sps:$4 sm:$0xff]   ;;  %v3160_v5 = vld [vmem:[%s4030_s0] ss:$28 sps:$4 sm:$0xff]   ;;  %v3259_v30 = vld [vmem:[%s4030_s0 + $0x70] ss:$28 sps:$4 sm:$0xff]  }
  0x23   :  { %1561 = vmatpush2.bf16.msra.mxu0 %v2615_v35  ;;  %v2670_v6 = vld [vmem:[%s4029_s1 + $0x6a4] ss:$16 sps:$4 sm:$0xff]   ;;  %v2665_v8 = vld [vmem:[%s4029_s1 + $0x4e0] ss:$16 sps:$4 sm:$0xff]  }
  0x24   :  { %1634 = vmatpush2.bf16.msra.mxu1 %v2616_v36  ;;  %1562 = vmatprep.subr.bf16.mxu0 %v2617_v37  ;;  %v3168_v7 = vld [vmem:[%s4030_s0 + $0x8] ss:$28 sps:$4 sm:$0xff]   ;;  %v2668_v9 = vld [vmem:[%s4029_s1 + $0x6a0] ss:$16 sps:$4 sm:$0xff]   ;;  %v3264_v31 = vld [vmem:[%s4030_s0 + $0x78] ss:$28 sps:$4 sm:$0xff]  }
  0x25   :  { %1635 = vmatprep.subr.bf16.mxu1 %v2619_v38  ;;  %v2673_v10 = vld [vmem:[%s4029_s1 + $0x4c4] ss:$16 sps:$4 sm:$0xff]   ;;  %v2671_v14 = vld [vmem:[%s4029_s1 + $0x4c0] ss:$16 sps:$4 sm:$0xff]  }
  0x26   :  { %v2676_v11 = vld [vmem:[%s4029_s1 + $0x684] ss:$16 sps:$4 sm:$0xff]   ;;  %v2674_v15 = vld [vmem:[%s4029_s1 + $0x680] ss:$16 sps:$4 sm:$0xff]  }
  0x27   :  { %1563 = vmatpush2.bf16.msra.mxu0 %v2621_v39  ;;  %v3190_v13 = vld [vmem:[%s4030_s0 + $0x44] ss:$28 sps:$4 sm:$0xff]   ;;  %v3230_v23 = vld [vmem:[%s4030_s0 + $0x74] ss:$28 sps:$4 sm:$0xff]  }
  0x28   :  { %1636 = vmatpush2.bf16.msra.mxu1 %v2622_v40  ;;  %1564 = vmatprep.subr.bf16.mxu0 %v2623_v41  ;;  %v2685_v16 = vld [vmem:[%s4029_s1 + $0x4a4] ss:$16 sps:$4 sm:$0xff]   ;;  %v3216_v19 = vld [vmem:[%s4030_s0 + $0x40] ss:$28 sps:$4 sm:$0xff]  }
  0x29   :  { %1637 = vmatprep.subr.bf16.mxu1 %v2625_v42  ;;  %v2688_v17 = vld [vmem:[%s4029_s1 + $0x664] ss:$16 sps:$4 sm:$0xff]   ;;  %v2683_v20 = vld [vmem:[%s4029_s1 + $0x4a0] ss:$16 sps:$4 sm:$0xff]  }
  0x2a   :  { %v2686_v21 = vld [vmem:[%s4029_s1 + $0x660] ss:$16 sps:$4 sm:$0xff]   ;;  %v2691_v22 = vld [vmem:[%s4029_s1 + $0x484] ss:$16 sps:$4 sm:$0xff]  }
  0x2b   :  { %1565 = vmatpush2.bf16.msra.mxu0 %v2627_v43  ;;  %v2703_v25 = vld [vmem:[%s4029_s1 + $0x644] ss:$16 sps:$4 sm:$0xff]   ;;  %v2689_v26 = vld [vmem:[%s4029_s1 + $0x480] ss:$16 sps:$4 sm:$0xff]  }
  0x2c   :  { %1638 = vmatpush2.bf16.msra.mxu1 %v2628_v44  ;;  %1566 = vmatprep.subr.bf16.mxu0 %v2629_v45  ;;  %v2700_v27 = vld [vmem:[%s4029_s1 + $0x464] ss:$16 sps:$4 sm:$0xff]   ;;  %v2701_v28 = vld [vmem:[%s4029_s1 + $0x640] ss:$16 sps:$4 sm:$0xff]   ;;  %v2727_v45 = vld [vmem:[%s4029_s1 + $0xec] ss:$16 sps:$4 sm:$0xff]  }
  0x2d   :  { %1639 = vmatprep.subr.bf16.mxu1 %v2631_v46  ;;  %v2709_v29 = vld [vmem:[%s4029_s1 + $0x624] ss:$16 sps:$4 sm:$0xff]   ;;  %v2698_v32 = vld [vmem:[%s4029_s1 + $0x460] ss:$16 sps:$4 sm:$0xff]  }
  0x2e   :  { %v2706_v33 = vld [vmem:[%s4029_s1 + $0x444] ss:$16 sps:$4 sm:$0xff]   ;;  %v2707_v36 = vld [vmem:[%s4029_s1 + $0x620] ss:$16 sps:$4 sm:$0xff]  }
  0x2f   :  { %1567 = vmatpush2.bf16.msra.mxu0 %v2633_v47  ;;  %v3280_v35 = vld [vmem:[%s4030_s0 + $0xb4] ss:$28 sps:$4 sm:$0xff]   ;;  %v3304_v41 = vld [vmem:[%s4030_s0 + $0xa8] ss:$28 sps:$4 sm:$0xff]  }
  0x30   :  { %1640 = vmatpush2.bf16.msra.mxu1 %v2634_v48  ;;  %1568 = vmatprep.subr.bf16.mxu0 %v2635_v49  ;;  %v2721_v37 = vld [vmem:[%s4029_s1 + $0x604] ss:$16 sps:$4 sm:$0xff]   ;;  %v2704_v38 = vld [vmem:[%s4029_s1 + $0x440] ss:$16 sps:$4 sm:$0xff]   ;;  %v2725_v48 = vld [vmem:[%s4029_s1 + $0xe8] ss:$16 sps:$4 sm:$0xff]  }
  0x31   :  { %1641 = vmatprep.subr.bf16.mxu1 %v2637_v51  ;;  %v2718_v39 = vld [vmem:[%s4029_s1 + $0x424] ss:$16 sps:$4 sm:$0xff]   ;;  %v2719_v40 = vld [vmem:[%s4029_s1 + $0x600] ss:$16 sps:$4 sm:$0xff]  }
  0x32   :  { %v3309_v42 = vld [vmem:[%s4030_s0 + $0xb0] ss:$28 sps:$4 sm:$0xff]   ;;  %v2724_v44 = vld [vmem:[%s4029_s1 + $0x404] ss:$16 sps:$4 sm:$0xff]  }
  0x33   :  { %1569 = vmatpush2.bf16.msra.mxu0 %v2639_v53  ;;  %v2716_v43 = vld [vmem:[%s4029_s1 + $0x420] ss:$16 sps:$4 sm:$0xff]   ;;  %v2730_v47 = vld [vmem:[%s4029_s1 + $0x5e4] ss:$16 sps:$4 sm:$0xff]  }
  0x34   :  { %1642 = vmatpush2.bf16.msra.mxu1 %v2640_v54  ;;  %1570 = vmatprep.subr.bf16.mxu0 %v2641_v55  ;;  %v2722_v46 = vld [vmem:[%s4029_s1 + $0x400] ss:$16 sps:$4 sm:$0xff]   ;;  %v3335_v49 = vld [vmem:[%s4030_s0 + $0x18] ss:$28 sps:$4 sm:$0xff]   ;;  %v2734_v54 = vld [vmem:[%s4029_s1 + $0xcc] ss:$16 sps:$4 sm:$0xff]  }
  0x35   :  { %1643 = vmatprep.subr.bf16.mxu1 %v2643_v56  ;;  %v3340_v51 = vld [vmem:[%s4030_s0 + $0x14] ss:$28 sps:$4 sm:$0xff]   ;;  %v2732_v56 = vld [vmem:[%s4029_s1 + $0xc8] ss:$16 sps:$4 sm:$0xff]  }
  0x36   :  { %v2728_v53 = vld [vmem:[%s4029_s1 + $0x5e0] ss:$16 sps:$4 sm:$0xff]   ;;  %v2737_v55 = vld [vmem:[%s4029_s1 + $0x5c4] ss:$16 sps:$4 sm:$0xff]  }
  0x37   :  { %1571 = vmatpush2.bf16.msra.mxu0 %v2645_v57  ;;  %v2735_v57 = vld [vmem:[%s4029_s1 + $0x5c0] ss:$16 sps:$4 sm:$0xff]  }
  0x38   :  { %1644 = vmatpush2.bf16.msra.mxu1 %v2646_v58  ;;  %1572 = vmatprep.subr.bf16.mxu0 %v2647_v59  ;;  %v2740_v58 = vld [vmem:[%s4029_s1 + $0xac] ss:$16 sps:$4 sm:$0xff]   ;;  %v2743_v59 = vld [vmem:[%s4029_s1 + $0x5a4] ss:$16 sps:$4 sm:$0xff]  }
  0x39   :  { %1645 = vmatprep.subr.bf16.mxu1 %v2649_v60  ;;  %v263_v60 = vld [vmem:[%s4031_s2] sm:$0xff] }
  0x3a   :  { %273 = vperm.xlu0 %2561, %v263_v60   ;;  %v3529_v60 = vld [vmem:[%s4030_s0 + $0x48] ss:$28 sps:$4 sm:$0xff]  }
  0x3b   :  { %1573 = vmatpush2.bf16.msra.mxu0 %v2651_v61  ;;  %v3373_v61 = vld [vmem:[%s4030_s0 + $0x50] ss:$28 sps:$4 sm:$0xff]  }
  0x3c   :  { %1646 = vmatpush2.bf16.msra.mxu1 %v2652_v62  ;;  %1574 = vmatprep.subr.bf16.mxu0 %v2653_v63  ;;  %v2738_v62 = vld [vmem:[%s4029_s1 + $0xa8] ss:$16 sps:$4 sm:$0xff]   ;;  %v2741_v63 = vld [vmem:[%s4029_s1 + $0x5a0] ss:$16 sps:$4 sm:$0xff]  }
  0x3d   :  { %1647 = vmatprep.subr.bf16.mxu1 %v2655_v0  ;;  %v2746_v0 = vld [vmem:[%s4029_s1 + $0x8c] ss:$16 sps:$4 sm:$0xff]  }
  0x3f   :  { %1575 = vmatpush2.bf16.msra.mxu0 %v2657_v2  ;;  %v2749_v2 = vld [vmem:[%s4029_s1 + $0x584] ss:$16 sps:$4 sm:$0xff]  }
  0x40   :  { %1648 = vmatpush2.bf16.msra.mxu1 %v2658_v3  ;;  %1690 = vmatprep.subr.bf16.mxu0 %v2667_v4  ;;  %v264_v3 = vld [vmem:[%s4031_s2 + $0x8] sm:$0xff] }
  0x41   :  { %1767 = vmatprep.subr.bf16.mxu1 %v2670_v6  ;;  %v2744_v4 = vld [vmem:[%s4029_s1 + $0x88] ss:$16 sps:$4 sm:$0xff]   ;;  %278 = vperm.xlu0 %2561, %v264_v3   ;;  %v2747_v6 = vld [vmem:[%s4029_s1 + $0x580] ss:$16 sps:$4 sm:$0xff]  }
  0x42   :  { %1577 = vmatmul.mubr.bf16.vlgmr.msra.gmra.mxu0 %v3160_v5  ;;  %v2800_v3 = vld [vmem:[%s4029_s1 + $0x188] ss:$16 sps:$4 sm:$0xff]  }
  0x43   :  { %1650 = vmatmul.mubr.bf16.vlgmr.msra.gmra.mxu1 %v3168_v7  ;;  %1691 = vmatpush1.bf16.msra.mxu0 %v2665_v8  ;;  %v2752_v8 = vld [vmem:[%s4029_s1 + $0x6c] ss:$16 sps:$4 sm:$0xff]  }
  0x44   :  { %1768 = vmatpush1.bf16.msra.mxu1 %v2668_v9  ;;  %1692 = vmatprep.subr.bf16.mxu0 %v2673_v10  ;;  %v2755_v9 = vld [vmem:[%s4029_s1 + $0x564] ss:$16 sps:$4 sm:$0xff]   ;;  %v2750_v10 = vld [vmem:[%s4029_s1 + $0x68] ss:$16 sps:$4 sm:$0xff]  }
  0x45   :  { %1769 = vmatprep.subr.bf16.mxu1 %v2676_v11  ;;  %1586 = vmatprep.mubr.bf16.mxu0 %v3185_v12  ;;  %v265_v11 = vld [vmem:[%s4031_s2 + $0x10] sm:$0xff] }
  0x46   :  { %1659 = vmatprep.mubr.bf16.mxu1 %v3190_v13  ;;  %283 = vperm.xlu1 %2562, %v265_v11   ;;  %v2812_v11 = vld [vmem:[%s4029_s1 + $0x268] ss:$16 sps:$4 sm:$0xff]  }
  0x47   :  { %1693 = vmatpush1.bf16.msra.mxu0 %v2671_v14  ;;  %v3414_v14 = vld [vmem:[%s4030_s0 + $0x88] ss:$28 sps:$4 sm:$0xff]  }
  0x48   :  { %1770 = vmatpush1.bf16.msra.mxu1 %v2674_v15  ;;  %1694 = vmatprep.subr.bf16.mxu0 %v2685_v16  ;;  %v2753_v15 = vld [vmem:[%s4029_s1 + $0x560] ss:$16 sps:$4 sm:$0xff]   ;;  %v2758_v16 = vld [vmem:[%s4029_s1 + $0x4c] ss:$16 sps:$4 sm:$0xff]  }
  0x49   :  { %1771 = vmatprep.subr.bf16.mxu1 %v2688_v17  ;;  %v2761_v17 = vld [vmem:[%s4029_s1 + $0x544] ss:$16 sps:$4 sm:$0xff]  }
  0x4a   :  { %1587 = vmatmul.mubr.bf16.gmra.mxu0 %v3211_v18 }
  0x4b   :  { %1660 = vmatmul.mubr.bf16.gmra.mxu1 %v3216_v19  ;;  %1695 = vmatpush1.bf16.msra.mxu0 %v2683_v20  ;;  %v2756_v20 = vld [vmem:[%s4029_s1 + $0x48] ss:$16 sps:$4 sm:$0xff]  }
  0x4c   :  { %1772 = vmatpush1.bf16.msra.mxu1 %v2686_v21  ;;  %1696 = vmatprep.subr.bf16.mxu0 %v2691_v22  ;;  %v266_v21 = vld [vmem:[%s4031_s2 + $0x18] sm:$0xff]  ;;  %v2759_v22 = vld [vmem:[%s4029_s1 + $0x540] ss:$16 sps:$4 sm:$0xff]  }
  0x4d   :  { %1596 = vmatprep.mubr.bf16.mxu0 %v3230_v23  ;;  %1669 = vmatprep.mubr.bf16.mxu1 %v3235_v24 }
  0x4e   :  { %1773 = vmatprep.subr.bf16.mxu1 %v2703_v25  ;;  %288 = vperm.xlu1 %2562, %v266_v21   ;;  %v2764_v25 = vld [vmem:[%s4029_s1 + $0x2c] ss:$16 sps:$4 sm:$0xff]   ;;  %v2819_v21 = vld [vmem:[%s4029_s1 + $0x248] ss:$16 sps:$4 sm:$0xff]  }
  0x4f   :  { %1697 = vmatpush1.bf16.msra.mxu0 %v2689_v26  ;;  %v2767_v26 = vld [vmem:[%s4029_s1 + $0x524] ss:$16 sps:$4 sm:$0xff]  }
  0x50   :  { %1774 = vmatpush1.bf16.msra.mxu1 %v2701_v28  ;;  %1698 = vmatprep.subr.bf16.mxu0 %v2700_v27  ;;  %v2762_v27 = vld [vmem:[%s4029_s1 + $0x28] ss:$16 sps:$4 sm:$0xff]   ;;  %v267_v28 = vld [vmem:[%s4031_s2 + $0x20] sm:$0xff] }
  0x51   :  { %1775 = vmatprep.subr.bf16.mxu1 %v2709_v29  ;;  %v3452_v29 = vld [vmem:[%s4030_s0 + $0xc0] ss:$28 sps:$4 sm:$0xff]   ;;  %293 = vperm.xlu0 %2561, %v267_v28   ;;  %v2828_v28 = vld [vmem:[%s4029_s1 + $0x228] ss:$16 sps:$4 sm:$0xff]  }
  0x52   :  { %1597 = vmatmul.mubr.bf16.gmra.mxu0 %v3259_v30 }
  0x53   :  { %1670 = vmatmul.mubr.bf16.gmra.mxu1 %v3264_v31  ;;  %1699 = vmatpush1.bf16.msra.mxu0 %v2698_v32  ;;  %v2765_v32 = vld [vmem:[%s4029_s1 + $0x520] ss:$16 sps:$4 sm:$0xff]  }
  0x54   :  { %1606 = vmatprep.mubr.bf16.mxu0 %v3275_v34  ;;  %1700 = vmatprep.subr.bf16.mxu0 %v2706_v33  ;;  %v2770_v33 = vld [vmem:[%s4029_s1 + $0xc] ss:$16 sps:$4 sm:$0xff]  }
  0x55   :  { %1679 = vmatprep.mubr.bf16.mxu1 %v3280_v35  ;;  %1776 = vmatpush1.bf16.msra.mxu1 %v2707_v36  ;;  %v2773_v36 = vld [vmem:[%s4029_s1 + $0x504] ss:$16 sps:$4 sm:$0xff]  }
  0x56   :  { %1777 = vmatprep.subr.bf16.mxu1 %v2721_v37  ;;  %v268_v37 = vld [vmem:[%s4031_s2 + $0x28] sm:$0xff] }
  0x57   :  { %1701 = vmatpush1.bf16.msra.mxu0 %v2704_v38  ;;  %v2768_v38 = vld [vmem:[%s4029_s1 + $0x8] ss:$16 sps:$4 sm:$0xff]   ;;  %298 = vperm.xlu1 %2562, %v268_v37  }
  0x58   :  { %1702 = vmatprep.subr.bf16.mxu0 %v2718_v39  ;;  %v2771_v39 = vld [vmem:[%s4029_s1 + $0x500] ss:$16 sps:$4 sm:$0xff]   ;;  %v2834_v37 = vld [vmem:[%s4029_s1 + $0x208] ss:$16 sps:$4 sm:$0xff]  }
  0x59   :  { %1778 = vmatpush1.bf16.msra.mxu1 %v2719_v40  ;;  %v3477_v40 = vld [vmem:[%s4030_s0 + $0x10] ss:$28 sps:$4 sm:$0xff]  }
  0x5a   :  { %1607 = vmatmul.mubr.bf16.gmra.mxu0 %v3304_v41  ;;  %1836 = vmatprep.subr.bf16.mxu1 %v2727_v45  ;;  %v269_v45 = vld [vmem:[%s4031_s2 + $0x30] sm:$0xff] }
  0x5b   :  { %1680 = vmatmul.mubr.bf16.gmra.mxu1 %v3309_v42  ;;  %1703 = vmatpush1.bf16.msra.mxu0 %v2716_v43  ;;  %v2779_v43 = vld [vmem:[%s4029_s1 + $0x1ec] ss:$16 sps:$4 sm:$0xff]  }
  0x5c   :  { %1795 = vmatprep.mubr.bf16.mxu1 %v2927_v1  ;;  %1704 = vmatprep.subr.bf16.mxu0 %v2724_v44  ;;  %v2782_v44 = vld [vmem:[%s4029_s1 + $0x2ec] ss:$16 sps:$4 sm:$0xff]  }
  0x5d   :  { %1722 = vmatprep.mubr.bf16.mxu0 %v3340_v51  ;;  %303 = vperm.xlu0 %2561, %v269_v45   ;;  %v2845_v45 = vld [vmem:[%s4029_s1 + $0x4cc] ss:$16 sps:$4 sm:$0xff]  }
  0x5f   :  { %1705 = vmatpush1.bf16.msra.mxu0 %v2722_v46  ;;  %v2777_v46 = vld [vmem:[%s4029_s1 + $0x1e8] ss:$16 sps:$4 sm:$0xff]  }
  0x60   :  { %1706 = vmatprep.subr.bf16.mxu0 %v2730_v47  ;;  %v2780_v47 = vld [vmem:[%s4029_s1 + $0x2e8] ss:$16 sps:$4 sm:$0xff]  }
  0x63   :  { %2520 = vmatmul.mubr.msk.bf16.vlgmr.msra.gmra.mxu1 %vm1531_vm0, %v3335_v49  ;;  %1707 = vmatpush2.bf16.msra.mxu0 %v2728_v53  ;;  %v2789_v53 = vld [vmem:[%s4029_s1 + $0x2cc] ss:$16 sps:$4 sm:$0xff]  }
  0x64   :  { %1837 = vmatpush1.bf16.msra.mxu1 %v2725_v48  ;;  %1708 = vmatprep.subr.bf16.mxu0 %v2737_v55  ;;  %v2786_v48 = vld [vmem:[%s4029_s1 + $0x1cc] ss:$16 sps:$4 sm:$0xff]   ;;  %v2784_v55 = vld [vmem:[%s4029_s1 + $0x1c8] ss:$16 sps:$4 sm:$0xff]  }
  0x65   :  { %1838 = vmatprep.subr.bf16.mxu1 %v2734_v54  ;;  %1805 = vmatprep.mubr.bf16.mxu1 %v2927_v1  ;;  %v3507_v54 = vld [vmem:[%s4030_s0 + $0x4c] ss:$28 sps:$4 sm:$0xff]  }
  0x67   :  { %1709 = vmatpush2.bf16.msra.mxu0 %v2735_v57  ;;  %v2794_v57 = vld [vmem:[%s4029_s1 + $0x1ac] ss:$16 sps:$4 sm:$0xff]  }
  0x68   :  { %1839 = vmatpush1.bf16.msra.mxu1 %v2732_v56  ;;  %1710 = vmatprep.subr.bf16.mxu0 %v2743_v59  ;;  %v2787_v56 = vld [vmem:[%s4029_s1 + $0x2c8] ss:$16 sps:$4 sm:$0xff]  }
  0x69   :  { %1840 = vmatprep.subr.bf16.mxu1 %v2740_v58  ;;  %v2798_v58 = vld [vmem:[%s4029_s1 + $0x2ac] ss:$16 sps:$4 sm:$0xff]   ;;  %v2792_v59 = vld [vmem:[%s4029_s1 + $0x1a8] ss:$16 sps:$4 sm:$0xff]  }
  0x6b   :  { %2521 = vmatmul.mubr.msk.bf16.gmra.mxu1 %vm1531_vm0, %v3373_v61  ;;  %1711 = vmatpush2.bf16.msra.mxu0 %v2741_v63  ;;  %v2802_v63 = vld [vmem:[%s4029_s1 + $0x18c] ss:$16 sps:$4 sm:$0xff]  }
  0x6c   :  { %1841 = vmatpush1.bf16.msra.mxu1 %v2738_v62  ;;  %1712 = vmatprep.subr.bf16.mxu0 %v2749_v2  ;;  %v2796_v62 = vld [vmem:[%s4029_s1 + $0x2a8] ss:$16 sps:$4 sm:$0xff]   ;;  %v3543_v2 = vld [vmem:[%s4030_s0 + $0x84] ss:$28 sps:$4 sm:$0xff]  }
  0x6d   :  { %1842 = vmatprep.subr.bf16.mxu1 %v2746_v0  ;;  %1815 = vmatprep.mubr.bf16.mxu1 %v2927_v1  ;;  %v2805_v0 = vld [vmem:[%s4029_s1 + $0x28c] ss:$16 sps:$4 sm:$0xff]  }
  0x6f   :  { %1713 = vmatpush2.bf16.msra.mxu0 %v2747_v6  ;;  %v2810_v6 = vld [vmem:[%s4029_s1 + $0x16c] ss:$16 sps:$4 sm:$0xff]  }
  0x70   :  { %1843 = vmatpush1.bf16.msra.mxu1 %v2744_v4  ;;  %1714 = vmatprep.subr.bf16.mxu0 %v2755_v9  ;;  %v2803_v4 = vld [vmem:[%s4029_s1 + $0x288] ss:$16 sps:$4 sm:$0xff]  }
  0x71   :  { %1844 = vmatprep.subr.bf16.mxu1 %v2752_v8  ;;  %v2814_v8 = vld [vmem:[%s4029_s1 + $0x26c] ss:$16 sps:$4 sm:$0xff]   ;;  %v2808_v9 = vld [vmem:[%s4029_s1 + $0x168] ss:$16 sps:$4 sm:$0xff]  }
  0x73   :  { %2522 = vmatmul.mubr.msk.bf16.gmra.mxu1 %vm1531_vm0, %v3414_v14  ;;  %1715 = vmatpush2.bf16.msra.mxu0 %v2753_v15  ;;  %v2818_v15 = vld [vmem:[%s4029_s1 + $0x14c] ss:$16 sps:$4 sm:$0xff]  }
  0x74   :  { %1845 = vmatpush1.bf16.msra.mxu1 %v2750_v10  ;;  %1716 = vmatprep.subr.bf16.mxu0 %v2761_v17  ;;  %v3565_v10 = vld [vmem:[%s4030_s0 + $0x80] ss:$28 sps:$4 sm:$0xff]  }
  0x75   :  { %1846 = vmatprep.subr.bf16.mxu1 %v2758_v16  ;;  %1825 = vmatprep.mubr.bf16.mxu1 %v2927_v1  ;;  %v2821_v16 = vld [vmem:[%s4029_s1 + $0x24c] ss:$16 sps:$4 sm:$0xff]  }
  0x76   :  { %v3579_v17 = vld [vmem:[%s4030_s0 + $0xbc] ss:$28 sps:$4 sm:$0xff]  }
  0x77   :  { %1717 = vmatpush2.bf16.msra.mxu0 %v2759_v22  ;;  %v2826_v22 = vld [vmem:[%s4029_s1 + $0x12c] ss:$16 sps:$4 sm:$0xff]  }
  0x78   :  { %1847 = vmatpush1.bf16.msra.mxu1 %v2756_v20  ;;  %1718 = vmatprep.subr.bf16.mxu0 %v2767_v26  ;;  %v2816_v20 = vld [vmem:[%s4029_s1 + $0x148] ss:$16 sps:$4 sm:$0xff]  }
  0x79   :  { %1848 = vmatprep.subr.bf16.mxu1 %v2764_v25  ;;  %v2830_v25 = vld [vmem:[%s4029_s1 + $0x22c] ss:$16 sps:$4 sm:$0xff]   ;;  %v2824_v26 = vld [vmem:[%s4029_s1 + $0x128] ss:$16 sps:$4 sm:$0xff]  }
  0x7b   :  { %2523 = vmatmul.mubr.msk.bf16.gmra.mxu1 %vm1531_vm0, %v3452_v29  ;;  %1719 = vmatpush2.bf16.msra.mxu0 %v2765_v32  ;;  %v2833_v32 = vld [vmem:[%s4029_s1 + $0x10c] ss:$16 sps:$4 sm:$0xff]  }
  0x7c   :  { %1849 = vmatpush1.bf16.msra.mxu1 %v2762_v27  ;;  %1720 = vmatprep.subr.bf16.mxu0 %v2773_v36  ;;  %v3601_v27 = vld [vmem:[%s4030_s0 + $0xb8] ss:$28 sps:$4 sm:$0xff]  }
  0x7d   :  { %1850 = vmatprep.subr.bf16.mxu1 %v2770_v33  ;;  %1868 = vmatprep.mubr.bf16.mxu1 %v3100_v50  ;;  %v270_v50 = vld [vmem:[%s4031_s2 + $0x38] sm:$0xff] }
  0x7e   :  { %308 = vperm.xlu1 %2562, %v270_v50   ;;  %v2836_v33 = vld [vmem:[%s4029_s1 + $0x20c] ss:$16 sps:$4 sm:$0xff]   ;;  %v2831_v36 = vld [vmem:[%s4029_s1 + $0x108] ss:$16 sps:$4 sm:$0xff]  }
  0x7f   :  { %1721 = vmatpush2.bf16.msra.mxu0 %v2771_v39  ;;  %v2842_v39 = vld [vmem:[%s4029_s1 + $0x3ec] ss:$16 sps:$4 sm:$0xff]   ;;  %v2852_v50 = vld [vmem:[%s4029_s1 + $0x3a8] ss:$16 sps:$4 sm:$0xff]  }
  0x80   :  { %1851 = vmatpush1.bf16.msra.mxu1 %v2768_v38  ;;  %1909 = vmatprep.subr.bf16.mxu0 %v2782_v44  ;;  %v2839_v38 = vld [vmem:[%s4029_s1 + $0x4ec] ss:$16 sps:$4 sm:$0xff]   ;;  %v2840_v44 = vld [vmem:[%s4029_s1 + $0x3e8] ss:$16 sps:$4 sm:$0xff]  }
  0x81   :  { %1852 = vmatprep.subr.bf16.mxu1 %v2779_v43  ;;  %v2837_v43 = vld [vmem:[%s4029_s1 + $0x4e8] ss:$16 sps:$4 sm:$0xff]  }
  0x82   :  { %1723 = vmatmul.mubr.bf16.vlgmr.msra.gmra.mxu0 %v3477_v40 }
  0x83   :  { %1910 = vmatpush1.bf16.msra.mxu0 %v2780_v47  ;;  %1732 = vmatprep.mubr.bf16.mxu0 %v3507_v54  ;;  %v2846_v47 = vld [vmem:[%s4029_s1 + $0x3c8] ss:$16 sps:$4 sm:$0xff]  }
  0x84   :  { %1853 = vmatpush2.bf16.msra.mxu1 %v2777_v46  ;;  %1911 = vmatprep.subr.bf16.mxu0 %v2789_v53  ;;  %v2843_v46 = vld [vmem:[%s4029_s1 + $0x4c8] ss:$16 sps:$4 sm:$0xff]  }
  0x85   :  { %1854 = vmatprep.subr.bf16.mxu1 %v2786_v48  ;;  %v2851_v48 = vld [vmem:[%s4029_s1 + $0x4ac] ss:$16 sps:$4 sm:$0xff]   ;;  %v2849_v53 = vld [vmem:[%s4029_s1 + $0x4a8] ss:$16 sps:$4 sm:$0xff]  }
  0x87   :  { %1912 = vmatpush1.bf16.msra.mxu0 %v2787_v56  ;;  %v2855_v56 = vld [vmem:[%s4029_s1 + $0x488] ss:$16 sps:$4 sm:$0xff]  }
  0x88   :  { %1855 = vmatpush2.bf16.msra.mxu1 %v2784_v55  ;;  %1913 = vmatprep.subr.bf16.mxu0 %v2798_v58  ;;  %v2857_v55 = vld [vmem:[%s4029_s1 + $0x48c] ss:$16 sps:$4 sm:$0xff]  }
  0x89   :  { %1856 = vmatprep.subr.bf16.mxu1 %v2794_v57  ;;  %v2858_v57 = vld [vmem:[%s4029_s1 + $0x388] ss:$16 sps:$4 sm:$0xff]   ;;  %v2863_v58 = vld [vmem:[%s4029_s1 + $0x46c] ss:$16 sps:$4 sm:$0xff]  }
  0x8a   :  { %1733 = vmatmul.mubr.bf16.gmra.mxu0 %v3529_v60 }
  0x8b   :  { %1914 = vmatpush1.bf16.msra.mxu0 %v2796_v62  ;;  %1742 = vmatprep.mubr.bf16.mxu0 %v3543_v2  ;;  %v2864_v62 = vld [vmem:[%s4029_s1 + $0x368] ss:$16 sps:$4 sm:$0xff]  }
  0x8c   :  { %1857 = vmatpush2.bf16.msra.mxu1 %v2792_v59  ;;  %1915 = vmatprep.subr.bf16.mxu0 %v2805_v0  ;;  %v2861_v59 = vld [vmem:[%s4029_s1 + $0x468] ss:$16 sps:$4 sm:$0xff]  }
  0x8d   :  { %1858 = vmatprep.subr.bf16.mxu1 %v2802_v63  ;;  %v2869_v63 = vld [vmem:[%s4029_s1 + $0x44c] ss:$16 sps:$4 sm:$0xff]   ;;  %v2867_v0 = vld [vmem:[%s4029_s1 + $0x448] ss:$16 sps:$4 sm:$0xff]  }
  0x8f   :  { %1916 = vmatpush1.bf16.msra.mxu0 %v2803_v4  ;;  %v2875_v4 = vld [vmem:[%s4029_s1 + $0x42c] ss:$16 sps:$4 sm:$0xff]  }
  0x90   :  { %1859 = vmatpush2.bf16.msra.mxu1 %v2800_v3  ;;  %1917 = vmatprep.subr.bf16.mxu0 %v2814_v8  ;;  %v2870_v3 = vld [vmem:[%s4029_s1 + $0x348] ss:$16 sps:$4 sm:$0xff]  }
  0x91   :  { %1860 = vmatprep.subr.bf16.mxu1 %v2810_v6  ;;  %v2873_v6 = vld [vmem:[%s4029_s1 + $0x428] ss:$16 sps:$4 sm:$0xff]  }
  0x92   :  { %1743 = vmatmul.mubr.bf16.gmra.mxu0 %v3565_v10  ;;  %v2876_v8 = vld [vmem:[%s4029_s1 + $0x328] ss:$16 sps:$4 sm:$0xff]  }
  0x93   :  { %1918 = vmatpush1.bf16.msra.mxu0 %v2812_v11  ;;  %1752 = vmatprep.mubr.bf16.mxu0 %v3579_v17  ;;  %v2879_v11 = vld [vmem:[%s4029_s1 + $0x408] ss:$16 sps:$4 sm:$0xff]  }
  0x94   :  { %1861 = vmatpush2.bf16.msra.mxu1 %v2808_v9  ;;  %1919 = vmatprep.subr.bf16.mxu0 %v2821_v16  ;;  %v2881_v9 = vld [vmem:[%s4029_s1 + $0x40c] ss:$16 sps:$4 sm:$0xff]  }
  0x95   :  { %1862 = vmatprep.subr.bf16.mxu1 %v2818_v15  ;;  %v2882_v15 = vld [vmem:[%s4029_s1 + $0x308] ss:$16 sps:$4 sm:$0xff]   ;;  %v2887_v16 = vld [vmem:[%s4029_s1 + $0x5ec] ss:$16 sps:$4 sm:$0xff]  }
  0x97   :  { %1920 = vmatpush1.bf16.msra.mxu0 %v2819_v21  ;;  %v2888_v21 = vld [vmem:[%s4029_s1 + $0x6a8] ss:$16 sps:$4 sm:$0xff]  }
  0x98   :  { %1863 = vmatpush2.bf16.msra.mxu1 %v2816_v20  ;;  %1921 = vmatprep.subr.bf16.mxu0 %v2830_v25  ;;  %v2885_v20 = vld [vmem:[%s4029_s1 + $0x5e8] ss:$16 sps:$4 sm:$0xff]  }
  0x99   :  { %1864 = vmatprep.subr.bf16.mxu1 %v2826_v22  ;;  %v2893_v22 = vld [vmem:[%s4029_s1 + $0x5cc] ss:$16 sps:$4 sm:$0xff]   ;;  %v2891_v25 = vld [vmem:[%s4029_s1 + $0x5c8] ss:$16 sps:$4 sm:$0xff]  }
  0x9a   :  { %1753 = vmatmul.mubr.bf16.gmra.mxu0 %v3601_v27 }
  0x9b   :  { %1922 = vmatpush1.bf16.msra.mxu0 %v2828_v28  ;;  %1941 = vmatprep.mubr.bf16.mxu0 %v3108_v52  ;;  %v2848_v52 = vld [vmem:[%s4029_s1 + $0x3cc] ss:$16 sps:$4 sm:$0xff]  }
  0x9c   :  { %1865 = vmatpush2.bf16.msra.mxu1 %v2824_v26  ;;  %1923 = vmatprep.subr.bf16.mxu0 %v2836_v33  ;;  %v2897_v26 = vld [vmem:[%s4029_s1 + $0x688] ss:$16 sps:$4 sm:$0xff]   ;;  %v2896_v28 = vld [vmem:[%s4029_s1 + $0x5ac] ss:$16 sps:$4 sm:$0xff]  }
  0x9d   :  { %1866 = vmatprep.subr.bf16.mxu1 %v2833_v32  ;;  %v2894_v32 = vld [vmem:[%s4029_s1 + $0x5a8] ss:$16 sps:$4 sm:$0xff]  }
  0x9e   :  { %v2903_v33 = vld [vmem:[%s4029_s1 + $0x668] ss:$16 sps:$4 sm:$0xff]  }
  0x9f   :  { %1924 = vmatpush1.bf16.msra.mxu0 %v2834_v37  ;;  %v2900_v37 = vld [vmem:[%s4029_s1 + $0x588] ss:$16 sps:$4 sm:$0xff]  }
  0xa0   :  { %1867 = vmatpush2.bf16.msra.mxu1 %v2831_v36  ;;  %1925 = vmatprep.subr.bf16.mxu0 %v2842_v39  ;;  %v2911_v36 = vld [vmem:[%s4029_s1 + $0x64c] ss:$16 sps:$4 sm:$0xff]  }
  0xa1   :  { %1982 = vmatprep.subr.bf16.mxu1 %v2839_v38  ;;  %v2909_v38 = vld [vmem:[%s4029_s1 + $0x648] ss:$16 sps:$4 sm:$0xff]   ;;  %v2908_v39 = vld [vmem:[%s4029_s1 + $0x56c] ss:$16 sps:$4 sm:$0xff]  }
  0xa3   :  { %1869 = vmatmul.mubr.bf16.vlgmr.msra.gmra.mxu1 %v3160_v5  ;;  %1926 = vmatpush2.bf16.msra.mxu0 %v2840_v44  ;;  %v2854_v5 = vld [vmem:[%s4029_s1 + $0x3ac] ss:$16 sps:$4 sm:$0xff]   ;;  %v2918_v44 = vld [vmem:[%s4029_s1 + $0x628] ss:$16 sps:$4 sm:$0xff]  }
  0xa4   :  { %1983 = vmatpush1.bf16.msra.mxu1 %v2837_v43  ;;  %1927 = vmatprep.subr.bf16.mxu0 %v2848_v52  ;;  %v2906_v43 = vld [vmem:[%s4029_s1 + $0x568] ss:$16 sps:$4 sm:$0xff]  }
  0xa5   :  { %1984 = vmatprep.subr.bf16.mxu1 %v2845_v45  ;;  %1878 = vmatprep.mubr.bf16.mxu1 %v3185_v12  ;;  %v2860_v12 = vld [vmem:[%s4029_s1 + $0x38c] ss:$16 sps:$4 sm:$0xff]   ;;  %v2912_v52 = vld [vmem:[%s4029_s1 + $0x548] ss:$16 sps:$4 sm:$0xff]  }
  0xa6   :  { %v2926_v45 = vld [vmem:[%s4029_s1 + $0x60c] ss:$16 sps:$4 sm:$0xff]  }
  0xa7   :  { %1928 = vmatpush2.bf16.msra.mxu0 %v2846_v47  ;;  %v2924_v47 = vld [vmem:[%s4029_s1 + $0x608] ss:$16 sps:$4 sm:$0xff]  }
  0xa8   :  { %1985 = vmatpush1.bf16.msra.mxu1 %v2843_v46  ;;  %1929 = vmatprep.subr.bf16.mxu0 %v2854_v5  ;;  %v2917_v46 = vld [vmem:[%s4029_s1 + $0x52c] ss:$16 sps:$4 sm:$0xff]  }
  0xa9   :  { %1986 = vmatprep.subr.bf16.mxu1 %v2851_v48  ;;  %v2921_v48 = vld [vmem:[%s4029_s1 + $0x508] ss:$16 sps:$4 sm:$0xff]  }
  0xab   :  { %1879 = vmatmul.mubr.bf16.gmra.mxu1 %v3211_v18  ;;  %1930 = vmatpush2.bf16.msra.mxu0 %v2852_v50  ;;  %v2866_v18 = vld [vmem:[%s4029_s1 + $0x36c] ss:$16 sps:$4 sm:$0xff]  }
  0xac   :  { %1987 = vmatpush1.bf16.msra.mxu1 %v2849_v53  ;;  %1931 = vmatprep.subr.bf16.mxu0 %v2860_v12 }
  0xad   :  { %1988 = vmatprep.subr.bf16.mxu1 %v2857_v55  ;;  %1888 = vmatprep.mubr.bf16.mxu1 %v3230_v23  ;;  %v2872_v23 = vld [vmem:[%s4029_s1 + $0x34c] ss:$16 sps:$4 sm:$0xff]  }
  0xaf   :  { %1932 = vmatpush2.bf16.msra.mxu0 %v2858_v57 }
  0xb0   :  { %1989 = vmatpush1.bf16.msra.mxu1 %v2855_v56  ;;  %1933 = vmatprep.subr.bf16.mxu0 %v2866_v18 }
  0xb1   :  { %1990 = vmatprep.subr.bf16.mxu1 %v2863_v58 }
  0xb3   :  { %1889 = vmatmul.mubr.bf16.gmra.mxu1 %v3259_v30  ;;  %1934 = vmatpush2.bf16.msra.mxu0 %v2864_v62  ;;  %v2878_v30 = vld [vmem:[%s4029_s1 + $0x32c] ss:$16 sps:$4 sm:$0xff]  }
  0xb4   :  { %1991 = vmatpush1.bf16.msra.mxu1 %v2861_v59  ;;  %1935 = vmatprep.subr.bf16.mxu0 %v2872_v23 }
  0xb5   :  { %1992 = vmatprep.subr.bf16.mxu1 %v2869_v63  ;;  %1898 = vmatprep.mubr.bf16.mxu1 %v3275_v34  ;;  %v2884_v34 = vld [vmem:[%s4029_s1 + $0x30c] ss:$16 sps:$4 sm:$0xff]  }
  0xb7   :  { %1936 = vmatpush2.bf16.msra.mxu0 %v2870_v3 }
  0xb8   :  { %1993 = vmatpush1.bf16.msra.mxu1 %v2867_v0  ;;  %1937 = vmatprep.subr.bf16.mxu0 %v2878_v30 }
  0xb9   :  { %1994 = vmatprep.subr.bf16.mxu1 %v2875_v4 }
  0xbb   :  { %1899 = vmatmul.mubr.bf16.gmra.mxu1 %v3304_v41  ;;  %1938 = vmatpush2.bf16.msra.mxu0 %v2876_v8  ;;  %v2890_v41 = vld [vmem:[%s4029_s1 + $0x6ac] ss:$16 sps:$4 sm:$0xff]  }
  0xbc   :  { %1995 = vmatpush1.bf16.msra.mxu1 %v2873_v6  ;;  %1939 = vmatprep.subr.bf16.mxu0 %v2884_v34 }
  0xbd   :  { %1996 = vmatprep.subr.bf16.mxu1 %v2881_v9  ;;  %2014 = vmatprep.mubr.bf16.mxu1 %v3340_v51  ;;  %v2899_v51 = vld [vmem:[%s4029_s1 + $0x68c] ss:$16 sps:$4 sm:$0xff]  }
  0xbf   :  { %1940 = vmatpush2.bf16.msra.mxu0 %v2882_v15 }
  0xc0   :  { %1997 = vmatpush1.bf16.msra.mxu1 %v2879_v11  ;;  %2059 = vmatprep.subr.bf16.mxu0 %v2890_v41  ;;  %v3864_v11 = vpop.permute.xlu0 %273 }
  0xc1   :  { %1998 = vmatprep.subr.bf16.mxu1 %v2887_v16 }
  0xc2   :  { %1942 = vmatmul.mubr.bf16.vlgmr.msra.gmra.mxu0 %v3168_v7  ;;  %v2905_v7 = vld [vmem:[%s4029_s1 + $0x66c] ss:$16 sps:$4 sm:$0xff]  }
  0xc3   :  { %2060 = vmatpush1.bf16.msra.mxu0 %v2888_v21  ;;  %1951 = vmatprep.mubr.bf16.mxu0 %v3190_v13  ;;  %v2902_v13 = vld [vmem:[%s4029_s1 + $0x58c] ss:$16 sps:$4 sm:$0xff]  }
  0xc4   :  { %1999 = vmatpush2.bf16.msra.mxu1 %v2885_v20  ;;  %2061 = vmatprep.subr.bf16.mxu0 %v2899_v51  ;;  %v3871_v21 = vpop.permute.xlu0 %278 }
  0xc5   :  { %2000 = vmatprep.subr.bf16.mxu1 %v2893_v22 }
  0xc7   :  { %2062 = vmatpush1.bf16.msra.mxu0 %v2897_v26 }
  0xc8   :  { %2001 = vmatpush2.bf16.msra.mxu1 %v2891_v25  ;;  %2063 = vmatprep.subr.bf16.mxu0 %v2905_v7  ;;  %v3874_v25 = vpop.permute.xlu1 %283 }
  0xc9   :  { %2002 = vmatprep.subr.bf16.mxu1 %v2896_v28 }
  0xca   :  { %1952 = vmatmul.mubr.bf16.gmra.mxu0 %v3216_v19  ;;  %v2920_v19 = vld [vmem:[%s4029_s1 + $0x62c] ss:$16 sps:$4 sm:$0xff]  }
  0xcb   :  { %2064 = vmatpush1.bf16.msra.mxu0 %v2903_v33  ;;  %1961 = vmatprep.mubr.bf16.mxu0 %v3235_v24  ;;  %v2914_v24 = vld [vmem:[%s4029_s1 + $0x54c] ss:$16 sps:$4 sm:$0xff]  }
  0xcc   :  { %2003 = vmatpush2.bf16.msra.mxu1 %v2894_v32  ;;  %2065 = vmatprep.subr.bf16.mxu0 %v2911_v36 }
  0xcd   :  { %2004 = vmatprep.subr.bf16.mxu1 %v2902_v13 }
  0xcf   :  { %2066 = vmatpush1.bf16.msra.mxu0 %v2909_v38 }
  0xd0   :  { %2005 = vmatpush2.bf16.msra.mxu1 %v2900_v37  ;;  %2067 = vmatprep.subr.bf16.mxu0 %v2920_v19 }
  0xd1   :  { %2006 = vmatprep.subr.bf16.mxu1 %v2908_v39 }
  0xd2   :  { %1962 = vmatmul.mubr.bf16.gmra.mxu0 %v3264_v31  ;;  %v2915_v31 = vld [vmem:[%s4029_s1 + $0x528] ss:$16 sps:$4 sm:$0xff]  }
  0xd3   :  { %1971 = vmatprep.mubr.bf16.mxu0 %v3280_v35  ;;  %2068 = vmatpush1.bf16.msra.mxu0 %v2918_v44  ;;  %v2923_v35 = vld [vmem:[%s4029_s1 + $0x50c] ss:$16 sps:$4 sm:$0xff]  }
  0xd4   :  { %2007 = vmatpush2.bf16.msra.mxu1 %v2906_v43  ;;  %2069 = vmatprep.subr.bf16.mxu0 %v2926_v45  ;;  %v3881_v43 = vpop.permute.xlu1 %288 }
  0xd5   :  { %2008 = vmatprep.subr.bf16.mxu1 %v2914_v24 }
  0xd7   :  { %2070 = vmatpush1.bf16.msra.mxu0 %v2924_v47 }
  0xd8   :  { %2009 = vmatpush2.bf16.msra.mxu1 %v2912_v52 }
  0xd9   :  { %2010 = vmatprep.subr.bf16.mxu1 %v2917_v46 }
  0xda   :  { %1972 = vmatmul.mubr.bf16.gmra.mxu0 %v3309_v42 }
  0xdb   :  { %2087 = vmatprep.mubr.bf16.mxu0 %v2927_v1 }
  0xdc   :  { %2011 = vmatpush2.bf16.msra.mxu1 %v2915_v31 }
  0xdd   :  { %2012 = vmatprep.subr.bf16.mxu1 %v2923_v35 }
  0xe0   :  { %2013 = vmatpush2.bf16.msra.mxu1 %v2921_v48 }
  0xe2   :  { %2524 = vmatmul.mubr.msk.bf16.vlgmr.msra.gmra.mxu0 %vm1531_vm0, %v3335_v49 }
  0xe3   :  { %2015 = vmatmul.mubr.bf16.vlgmr.msra.gmra.mxu1 %v3477_v40  ;;  %2097 = vmatprep.mubr.bf16.mxu0 %v2927_v1 }
  0xe4   :  { %2024 = vmatprep.mubr.bf16.mxu1 %v3507_v54 }
  0xea   :  { %2525 = vmatmul.mubr.msk.bf16.gmra.mxu0 %vm1531_vm0, %v3373_v61 }
  0xeb   :  { %2025 = vmatmul.mubr.bf16.gmra.mxu1 %v3529_v60  ;;  %2107 = vmatprep.mubr.bf16.mxu0 %v2927_v1 }
  0xec   :  { %2034 = vmatprep.mubr.bf16.mxu1 %v3543_v2 }
  0xf2   :  { %2526 = vmatmul.mubr.msk.bf16.gmra.mxu0 %vm1531_vm0, %v3414_v14 }
  0xf3   :  { %2035 = vmatmul.mubr.bf16.gmra.mxu1 %v3565_v10  ;;  %2117 = vmatprep.mubr.bf16.mxu0 %v2927_v1 }
  0xf4   :  { %2044 = vmatprep.mubr.bf16.mxu1 %v3579_v17 }
  0xfa   :  { %2527 = vmatmul.mubr.msk.bf16.gmra.mxu0 %vm1531_vm0, %v3452_v29 }
  0xfb   :  { %2045 = vmatmul.mubr.bf16.gmra.mxu1 %v3601_v27 }
 0x102   :  { %v1578_v49 = vpop.f32.mrf.mxu0 }
 0x103   :  { %v1651_v42 = vpop.f32.mrf.mxu1  ;;  %v1579_v20 = vadd.f32 %v1578_v49, %v3864_v11 }
 0x104   :  { %v1580_v54 = vpop.f32.mrf.mxu0 }
 0x105   :  { %v1653_v61 = vpop.f32.mrf.mxu1  ;;  %v1581_v51 = vadd.f32 %v1580_v54, %v3864_v11  ;;  %v1652_v28 = vadd.f32 %v1651_v42, %v1579_v20 }
 0x106   :  { %v1582_v10 = vpop.f32.mrf.mxu0 }
 0x107   :  { %v1655_v40 = vpop.f32.mrf.mxu1  ;;  %v1583_v7 = vadd.f32 %v1582_v10, %v3871_v21  ;;  %v1654_v13 = vadd.f32 %v1653_v61, %v1581_v51  ;;  %v3885_v61 = vpop.permute.xlu0 %293 }
 0x108   :  { %v1584_v17 = vpop.f32.mrf.mxu0 }
 0x109   :  { %v1657_v60 = vpop.f32.mrf.mxu1  ;;  %v1585_v36 = vadd.f32 %v1584_v17, %v3871_v21  ;;  %v1656_v19 = vadd.f32 %v1655_v40, %v1583_v7  ;;  %v3891_v7 = vpop.permute.xlu1 %298 }
 0x10a   :  { %v1588_v27 = vpop.f32.mrf.mxu0 }
 0x10b   :  { %v1661_v2 = vpop.f32.mrf.mxu1  ;;  %v1589_v38 = vadd.f32 %v1588_v27, %v3874_v25  ;;  %v1658_v47 = vadd.f32 %v1657_v60, %v1585_v36 }
 0x10c   :  { %v1590_v55 = vpop.f32.mrf.mxu0 }
 0x10d   :  { %v3834_v5 = vpop.f32.mrf.mxu1  ;;  %v1591_v45 = vadd.f32 %v1590_v55, %v3874_v25  ;;  %v1662_v48 = vadd.f32 %v1661_v2, %v1589_v38 }
 0x10e   :  { %v1592_v57 = vpop.f32.mrf.mxu0 }
 0x10f   :  { %v3836_v14 = vpop.f32.mrf.mxu1  ;;  %v1593_v42 = vadd.f32 %v1592_v57, %v3881_v43  ;;  %v1664_v27 = vadd.f32 %v3834_v5, %v1591_v45 }
 0x110   :  { %v1594_v18 = vpop.f32.mrf.mxu0 }
 0x111   :  { %v3838_v53 = vpop.f32.mrf.mxu1  ;;  %v1595_v55 = vadd.f32 %v1594_v18, %v3881_v43  ;;  %v1666_v2 = vadd.f32 %v3836_v14, %v1593_v42 }
 0x112   :  { %v1598_v62 = vpop.f32.mrf.mxu0 }
 0x113   :  { %v3840_v1 = vpop.f32.mrf.mxu1  ;;  %v1599_v57 = vadd.f32 %v1598_v62, %v3885_v61  ;;  %v1668_v14 = vadd.f32 %v3838_v53, %v1595_v55 }
 0x114   :  { %v3856_v23 = vpop.f32.mrf.mxu0 }
 0x115   :  { %v3842_v50 = vpop.f32.mrf.mxu1  ;;  %v1601_v18 = vadd.f32 %v3856_v23, %v3885_v61 }
 0x116   :  { %v3858_v3 = vpop.f32.mrf.mxu0 }
 0x117   :  { %v3844_v29 = vpop.f32.mrf.mxu1  ;;  %v1674_v53 = vadd.f32 %v3842_v50, %v1601_v18 }
 0x118   :  { %v3860_v30 = vpop.f32.mrf.mxu0 }
 0x119   :  { %v3846_v12 = vpop.f32.mrf.mxu1 }
 0x11a   :  { %v3862_v8 = vpop.f32.mrf.mxu0 }
 0x11b   :  { %v3848_v56 = vpop.f32.mrf.mxu1 }
 0x11c   :  { %v3866_v15 = vpop.f32.mrf.mxu0 }
 0x11d   :  { %v3850_v58 = vpop.f32.mrf.mxu1 }
 0x11e   :  { %v3868_v41 = vpop.f32.mrf.mxu0 }
 0x11f   :  { %v3852_v59 = vpop.f32.mrf.mxu1 }
 0x120   :  { %v3876_v26 = vpop.f32.mrf.mxu0 }
 0x121   :  { %v3854_v63 = vpop.f32.mrf.mxu1 }
 0x123   :  { %v1797_v0 = vpop.f32.mrf.mxu1 }
 0x125   :  { %v1799_v4 = vpop.f32.mrf.mxu1 }
 0x127   :  { %v1801_v6 = vpop.f32.mrf.mxu1 }
 0x129   :  { %v1803_v9 = vpop.f32.mrf.mxu1 }
 0x12b   :  { %v1807_v34 = vpop.f32.mrf.mxu1 }
 0x12d   :  { %v1809_v16 = vpop.f32.mrf.mxu1 }
 0x12f   :  { %v1811_v22 = vpop.f32.mrf.mxu1 }
 0x131   :  { %v1813_v33 = vpop.f32.mrf.mxu1 }
 0x133   :  { %v1817_v46 = vpop.f32.mrf.mxu1 }
 0x135   :  { %v1819_v20 = vpop.f32.mrf.mxu1 }
 0x137   :  { %v1821_v36 = vpop.f32.mrf.mxu1 }
 0x142   :  { %v1724_v32 = vpop.f32.mrf.mxu0 }
 0x143   :  { %v1725_v37 = vadd.f32 %v1724_v32, %v1652_v28 }
 0x144   :  { %v1726_v39 = vpop.f32.mrf.mxu0 }
 0x145   :  { %v1798_v24 = vadd.f32 %v1797_v0, %v1725_v37  ;;  %v1727_v44 = vadd.f32 %v1726_v39, %v1654_v13  ;;  %v1672_v39 = vadd.f32 %v3840_v1, %v1599_v57  ;;  %v1605_v1 = vadd.f32 %v3860_v30, %v3891_v7 }
 0x146   :  { %v1728_v52 = vpop.f32.mrf.mxu0 }
 0x147   :  { %v1800_v31 = vadd.f32 %v1799_v4, %v1727_v44  ;;  %v1729_v35 = vadd.f32 %v1728_v52, %v1656_v19  ;;  %v2128_v54 = vmax.f32 %v1798_v24, 0.0  ;;  %v1603_v19 = vadd.f32 %v3858_v3, %v3891_v7  ;;  %v3902_v44 = vpop.permute.xlu0 %303 }
 0x148   :  { %v1730_v49 = vpop.f32.mrf.mxu0  ;;  %v1609_v42 = vadd.f32 %v3862_v8, %v3902_v44  ;;  %v1611_v30 = vadd.f32 %v3866_v15, %v3902_v44 }
 0x149   :  { %v2129_v10 = vmax.f32 %v1800_v31, 0.0  ;;  %v1802_v40 = vadd.f32 %v1801_v6, %v1729_v35  ;;  %v1731_v17 = vadd.f32 %v1730_v49, %v1658_v47  ;;  %v1823_v47 = vpop.f32.mrf.mxu1 }
 0x14a   :  { %v1734_v0 = vpop.f32.mrf.mxu0  ;;  %v1682_v55 = vadd.f32 %v3848_v56, %v1609_v42  ;;  %v1684_v57 = vadd.f32 %v3850_v58, %v1611_v30 }
 0x14b   :  { %v2544_v51 = vpack.c.bf16 %v2129_v10, %v2128_v54  ;;  %v1804_v60 = vadd.f32 %v1803_v9, %v1731_v17  ;;  %v1735_v4 = vadd.f32 %v1734_v0, %v1662_v48  ;;  %v2132_v6 = vmax.f32 %v1802_v40, 0.0  ;;  %v3913_v54 = vpop.permute.xlu1 %308 }
 0x14c   :  { %v1736_v28 = vpop.f32.mrf.mxu0  ;;  %v1676_v48 = vadd.f32 %v3844_v29, %v1603_v19  ;;  %v1678_v29 = vadd.f32 %v3846_v12, %v1605_v1 }
 0x14d   :  { %2256 = vst [vmem:[%s4032_s3] sm:$0xff] %v2544_v51  ;;  %v2133_v5 = vmax.f32 %v1804_v60, 0.0  ;;  %v1808_v32 = vadd.f32 %v1807_v34, %v1735_v4  ;;  %v1737_v13 = vadd.f32 %v1736_v28, %v1664_v27  ;;  %v1613_v51 = vadd.f32 %v3868_v41, %v3913_v54 }
 0x14e   :  { %v1738_v9 = vpop.f32.mrf.mxu0 }
 0x14f   :  { %v2546_v37 = vpack.c.bf16 %v2133_v5, %v2132_v6  ;;  %v1810_v62 = vadd.f32 %v1809_v16, %v1737_v13  ;;  %v1739_v38 = vadd.f32 %v1738_v9, %v1666_v2  ;;  %v2136_v23 = vmax.f32 %v1808_v32, 0.0 }
 0x150   :  { %v1740_v24 = vpop.f32.mrf.mxu0  ;;  %v1686_v41 = vadd.f32 %v3852_v59, %v1613_v51 }
 0x151   :  { %2258 = vst [vmem:[%s4032_s3 + $0x10] sm:$0xff] %v2546_v37  ;;  %v2137_v34 = vmax.f32 %v1810_v62, 0.0  ;;  %v1812_v45 = vadd.f32 %v1811_v22, %v1739_v38  ;;  %v1741_v52 = vadd.f32 %v1740_v24, %v1668_v14 }
 0x152   :  { %v1744_v16 = vpop.f32.mrf.mxu0 }
 0x153   :  { %v2548_v31 = vpack.c.bf16 %v2137_v34, %v2136_v23  ;;  %v1814_v3 = vadd.f32 %v1813_v33, %v1741_v52  ;;  %v1745_v35 = vadd.f32 %v1744_v16, %v1672_v39  ;;  %v2140_v50 = vmax.f32 %v1812_v45, 0.0  ;;  %v1827_v33 = vpop.f32.mrf.mxu1 }
 0x154   :  { %v1746_v49 = vpop.f32.mrf.mxu0 }
 0x155   :  { %2260 = vst [vmem:[%s4032_s3 + $0x20] sm:$0xff] %v2548_v31  ;;  %v2141_v22 = vmax.f32 %v1814_v3, 0.0  ;;  %v1818_v10 = vadd.f32 %v1817_v46, %v1745_v35  ;;  %v1747_v40 = vadd.f32 %v1746_v49, %v1674_v53  ;;  %v1829_v12 = vpop.f32.mrf.mxu1 }
 0x156   :  { %v1748_v17 = vpop.f32.mrf.mxu0 }
 0x157   :  { %v2550_v27 = vpack.c.bf16 %v2141_v22, %v2140_v50  ;;  %v1820_v8 = vadd.f32 %v1819_v20, %v1747_v40  ;;  %v1749_v0 = vadd.f32 %v1748_v17, %v1676_v48  ;;  %v2144_v46 = vmax.f32 %v1818_v10, 0.0  ;;  %v1831_v58 = vpop.f32.mrf.mxu1 }
 0x158   :  { %v1750_v60 = vpop.f32.mrf.mxu0  ;;  %v1615_v20 = vadd.f32 %v3876_v26, %v3913_v54 }
 0x159   :  { %2262 = vst [vmem:[%s4032_s3 + $0x30] sm:$0xff] %v2550_v27  ;;  %v2145_v4 = vmax.f32 %v1820_v8, 0.0  ;;  %v1822_v15 = vadd.f32 %v1821_v36, %v1749_v0  ;;  %v1751_v2 = vadd.f32 %v1750_v60, %v1678_v29  ;;  %v1833_v34 = vpop.f32.mrf.mxu1 }
 0x15a   :  { %v1754_v28 = vpop.f32.mrf.mxu0  ;;  %v1688_v37 = vadd.f32 %v3854_v63, %v1615_v20 }
 0x15b   :  { %v2552_v56 = vpack.c.bf16 %v2145_v4, %v2144_v46  ;;  %v1824_v6 = vadd.f32 %v1823_v47, %v1751_v2  ;;  %v1755_v5 = vadd.f32 %v1754_v28, %v1682_v55  ;;  %v2148_v13 = vmax.f32 %v1822_v15, 0.0 }
 0x15c   :  { %v1756_v32 = vpop.f32.mrf.mxu0 }
 0x15d   :  { %2264 = vst [vmem:[%s4032_s3 + $0x40] sm:$0xff] %v2552_v56  ;;  %v2149_v18 = vmax.f32 %v1824_v6, 0.0  ;;  %v1828_v9 = vadd.f32 %v1827_v33, %v1755_v5  ;;  %v1757_v36 = vadd.f32 %v1756_v32, %v1684_v57 }
 0x15e   :  { %v1758_v14 = vpop.f32.mrf.mxu0 }
 0x15f   :  { %v2554_v62 = vpack.c.bf16 %v2149_v18, %v2148_v13  ;;  %v1830_v26 = vadd.f32 %v1829_v12, %v1757_v36  ;;  %v1759_v38 = vadd.f32 %v1758_v14, %v1686_v41  ;;  %v2152_v59 = vmax.f32 %v1828_v9, 0.0 }
 0x160   :  { %v1760_v39 = vpop.f32.mrf.mxu0 }
 0x161   :  { %2266 = vst [vmem:[%s4032_s3 + $0x50] sm:$0xff] %v2554_v62  ;;  %v2153_v19 = vmax.f32 %v1830_v26, 0.0  ;;  %v1832_v24 = vadd.f32 %v1831_v58, %v1759_v38  ;;  %v1761_v23 = vadd.f32 %v1760_v39, %v1688_v37 }
 0x163   :  { %v2556_v45 = vpack.c.bf16 %v2153_v19, %v2152_v59  ;;  %v1834_v52 = vadd.f32 %v1833_v34, %v1761_v23  ;;  %v2156_v63 = vmax.f32 %v1832_v24, 0.0  ;;  %v1870_v16 = vpop.f32.mrf.mxu1 }
 0x164   :  { %v1871_v56 = vadd.f32 %v1870_v16, %v3864_v11 }
 0x165   :  { %2268 = vst [vmem:[%s4032_s3 + $0x60] sm:$0xff] %v2556_v45  ;;  %v2157_v53 = vmax.f32 %v1834_v52, 0.0  ;;  %v1872_v1 = vpop.f32.mrf.mxu1 }
 0x166   :  { %v1873_v41 = vadd.f32 %v1872_v1, %v3864_v11 }
 0x167   :  { %v2558_v47 = vpack.c.bf16 %v2157_v53, %v2156_v63  ;;  %v1874_v31 = vpop.f32.mrf.mxu1 }
 0x168   :  { %v1875_v9 = vadd.f32 %v1874_v31, %v3871_v21 }
 0x169   :  { %2270 = vst [vmem:[%s4032_s3 + $0x70] sm:$0xff] %v2558_v47  ;;  %v1876_v3 = vpop.f32.mrf.mxu1 }
 0x16a   :  { %v1877_v26 = vadd.f32 %v1876_v3, %v3871_v21 }
 0x16b   :  { %v1880_v35 = vpop.f32.mrf.mxu1 }
 0x16c   :  { %v1881_v14 = vadd.f32 %v1880_v35, %v3874_v25 }
 0x16d   :  { %v1882_v48 = vpop.f32.mrf.mxu1 }
 0x16e   :  { %v1883_v11 = vadd.f32 %v1882_v48, %v3874_v25 }
 0x16f   :  { %v1884_v42 = vpop.f32.mrf.mxu1 }
 0x170   :  { %v1885_v35 = vadd.f32 %v1884_v42, %v3881_v43 }
 0x171   :  { %v1886_v49 = vpop.f32.mrf.mxu1 }
 0x172   :  { %v1887_v25 = vadd.f32 %v1886_v49, %v3881_v43 }
 0x173   :  { %v1890_v10 = vpop.f32.mrf.mxu1 }
 0x174   :  { %v1891_v48 = vadd.f32 %v1890_v10, %v3885_v61 }
 0x175   :  { %v3944_v33 = vpop.f32.mrf.mxu1 }
 0x177   :  { %v3946_v27 = vpop.f32.mrf.mxu1 }
 0x179   :  { %v3948_v55 = vpop.f32.mrf.mxu1 }
 0x17b   :  { %v3952_v60 = vpop.f32.mrf.mxu1 }
 0x17d   :  { %v3958_v15 = vpop.f32.mrf.mxu1 }
 0x17f   :  { %v3964_v12 = vpop.f32.mrf.mxu1 }
 0x181   :  { %v3971_v6 = vpop.f32.mrf.mxu1 }
 0x182   :  { %v1943_v50 = vpop.f32.mrf.mxu0 }
 0x183   :  { %v1944_v32 = vadd.f32 %v1943_v50, %v1871_v56 }
 0x184   :  { %v1945_v22 = vpop.f32.mrf.mxu0 }
 0x185   :  { %v1946_v36 = vadd.f32 %v1945_v22, %v1873_v41 }
 0x186   :  { %v1947_v40 = vpop.f32.mrf.mxu0 }
 0x187   :  { %v1948_v38 = vadd.f32 %v1947_v40, %v1875_v9 }
 0x188   :  { %v1949_v30 = vpop.f32.mrf.mxu0 }
 0x189   :  { %v1950_v23 = vadd.f32 %v1949_v30, %v1877_v26 }
 0x18a   :  { %v1953_v17 = vpop.f32.mrf.mxu0 }
 0x18b   :  { %v1954_v52 = vadd.f32 %v1953_v17, %v1881_v14 }
 0x18c   :  { %v1955_v29 = vpop.f32.mrf.mxu0 }
 0x18d   :  { %v1956_v50 = vadd.f32 %v1955_v29, %v1883_v11  ;;  %v1893_v29 = vadd.f32 %v3944_v33, %v3885_v61  ;;  %v1895_v61 = vadd.f32 %v3946_v27, %v3891_v7  ;;  %v1897_v11 = vadd.f32 %v3948_v55, %v3891_v7 }
 0x18e   :  { %v1957_v8 = vpop.f32.mrf.mxu0 }
 0x18f   :  { %v1958_v30 = vadd.f32 %v1957_v8, %v1885_v35 }
 0x190   :  { %v1959_v0 = vpop.f32.mrf.mxu0 }
 0x192   :  { %v3950_v51 = vpop.f32.mrf.mxu0 }
 0x193   :  { %v1964_v8 = vadd.f32 %v3950_v51, %v1891_v48 }
 0x194   :  { %v3954_v46 = vpop.f32.mrf.mxu0 }
 0x196   :  { %v3956_v4 = vpop.f32.mrf.mxu0 }
 0x198   :  { %v3960_v2 = vpop.f32.mrf.mxu0 }
 0x199   :  { %v1970_v55 = vadd.f32 %v3960_v2, %v1897_v11 }
 0x19a   :  { %v3962_v57 = vpop.f32.mrf.mxu0 }
 0x19c   :  { %v3966_v28 = vpop.f32.mrf.mxu0 }
 0x19e   :  { %v3968_v20 = vpop.f32.mrf.mxu0 }
 0x1a0   :  { %v3973_v5 = vpop.f32.mrf.mxu0 }
 0x1a2   :  { %v2089_v18 = vpop.f32.mrf.mxu0 }
 0x1a3   :  { %v2016_v13 = vpop.f32.mrf.mxu1 }
 0x1a4   :  { %v2017_v58 = vadd.f32 %v2016_v13, %v1944_v32  ;;  %v2091_v62 = vpop.f32.mrf.mxu0 }
 0x1a5   :  { %v2018_v37 = vpop.f32.mrf.mxu1 }
 0x1a6   :  { %v2090_v39 = vadd.f32 %v2089_v18, %v2017_v58  ;;  %v2019_v59 = vadd.f32 %v2018_v37, %v1946_v36  ;;  %v2093_v24 = vpop.f32.mrf.mxu0  ;;  %v1960_v58 = vadd.f32 %v1959_v0, %v1887_v25 }
 0x1a7   :  { %v2020_v19 = vpop.f32.mrf.mxu1 }
 0x1a8   :  { %v2092_v34 = vadd.f32 %v2091_v62, %v2019_v59  ;;  %v2021_v45 = vadd.f32 %v2020_v19, %v1948_v38  ;;  %v2095_v53 = vpop.f32.mrf.mxu0  ;;  %v2130_v16 = vmax.f32 %v2090_v39, 0.0  ;;  %v1966_v59 = vadd.f32 %v3954_v46, %v1893_v29 }
 0x1a9   :  { %v2022_v63 = vpop.f32.mrf.mxu1 }
 0x1aa   :  { %v2131_v47 = vmax.f32 %v2092_v34, 0.0  ;;  %v2094_v1 = vadd.f32 %v2093_v24, %v2021_v45  ;;  %v2023_v31 = vadd.f32 %v2022_v63, %v1950_v23  ;;  %v2099_v3 = vpop.f32.mrf.mxu0  ;;  %v1901_v23 = vadd.f32 %v3952_v60, %v3902_v44 }
 0x1ab   :  { %v2026_v21 = vpop.f32.mrf.mxu1  ;;  %v1968_v34 = vadd.f32 %v3956_v4, %v1895_v61 }
 0x1ac   :  { %v2545_v22 = vpack.c.bf16 %v2131_v47, %v2130_v16  ;;  %v2096_v40 = vadd.f32 %v2095_v53, %v2023_v31  ;;  %v2027_v56 = vadd.f32 %v2026_v21, %v1954_v52  ;;  %v2101_v41 = vpop.f32.mrf.mxu0  ;;  %v2134_v32 = vmax.f32 %v2094_v1, 0.0 }
 0x1ad   :  { %v2028_v17 = vpop.f32.mrf.mxu1  ;;  %v1903_v16 = vadd.f32 %v3958_v15, %v3902_v44  ;;  %v1974_v31 = vadd.f32 %v3962_v57, %v1901_v23  ;;  %v1905_v44 = vadd.f32 %v3964_v12, %v3913_v54 }
 0x1ae   :  { %2257 = vst [vmem:[%s4032_s3 + $0x8] sm:$0xff] %v2545_v22  ;;  %v2135_v13 = vmax.f32 %v2096_v40, 0.0  ;;  %v2100_v42 = vadd.f32 %v2099_v3, %v2027_v56  ;;  %v2029_v18 = vadd.f32 %v2028_v17, %v1956_v50  ;;  %v2103_v36 = vpop.f32.mrf.mxu0 }
 0x1af   :  { %v2030_v9 = vpop.f32.mrf.mxu1  ;;  %v1976_v56 = vadd.f32 %v3966_v28, %v1903_v16  ;;  %v1978_v17 = vadd.f32 %v3968_v20, %v1905_v44 }
 0x1b0   :  { %v2547_v43 = vpack.c.bf16 %v2135_v13, %v2134_v32  ;;  %v2102_v49 = vadd.f32 %v2101_v41, %v2029_v18  ;;  %v2031_v10 = vadd.f32 %v2030_v9, %v1958_v30  ;;  %v2105_v37 = vpop.f32.mrf.mxu0  ;;  %v2138_v62 = vmax.f32 %v2100_v42, 0.0 }
 0x1b1   :  { %v2032_v14 = vpop.f32.mrf.mxu1  ;;  %v1907_v30 = vadd.f32 %v3971_v6, %v3913_v54 }
 0x1b2   :  { %2259 = vst [vmem:[%s4032_s3 + $0x18] sm:$0xff] %v2547_v43  ;;  %v2139_v26 = vmax.f32 %v2102_v49, 0.0  ;;  %v2104_v38 = vadd.f32 %v2103_v36, %v2031_v10  ;;  %v2033_v39 = vadd.f32 %v2032_v14, %v1960_v58  ;;  %v2109_v0 = vpop.f32.mrf.mxu0 }
 0x1b3   :  { %v2036_v33 = vpop.f32.mrf.mxu1  ;;  %v1980_v9 = vadd.f32 %v3973_v5, %v1907_v30 }
 0x1b4   :  { %v2549_v19 = vpack.c.bf16 %v2139_v26, %v2138_v62  ;;  %v2106_v24 = vadd.f32 %v2105_v37, %v2033_v39  ;;  %v2037_v51 = vadd.f32 %v2036_v33, %v1964_v8  ;;  %v2111_v52 = vpop.f32.mrf.mxu0  ;;  %v2142_v27 = vmax.f32 %v2104_v38, 0.0 }
 0x1b5   :  { %v2038_v45 = vpop.f32.mrf.mxu1 }
 0x1b6   :  { %2261 = vst [vmem:[%s4032_s3 + $0x28] sm:$0xff] %v2549_v19  ;;  %v2143_v63 = vmax.f32 %v2106_v24, 0.0  ;;  %v2110_v46 = vadd.f32 %v2109_v0, %v2037_v51  ;;  %v2039_v53 = vadd.f32 %v2038_v45, %v1966_v59  ;;  %v2113_v7 = vpop.f32.mrf.mxu0 }
 0x1b7   :  { %v2040_v47 = vpop.f32.mrf.mxu1 }
 0x1b8   :  { %v2551_v60 = vpack.c.bf16 %v2143_v63, %v2142_v27  ;;  %v2112_v1 = vadd.f32 %v2111_v52, %v2039_v53  ;;  %v2041_v4 = vadd.f32 %v2040_v47, %v1968_v34  ;;  %v2115_v21 = vpop.f32.mrf.mxu0  ;;  %v2146_v3 = vmax.f32 %v2110_v46, 0.0 }
 0x1b9   :  { %v2042_v35 = vpop.f32.mrf.mxu1 }
 0x1ba   :  { %2263 = vst [vmem:[%s4032_s3 + $0x38] sm:$0xff] %v2551_v60  ;;  %v2147_v50 = vmax.f32 %v2112_v1, 0.0  ;;  %v2114_v22 = vadd.f32 %v2113_v7, %v2041_v4  ;;  %v2043_v40 = vadd.f32 %v2042_v35, %v1970_v55  ;;  %v2119_v2 = vpop.f32.mrf.mxu0 }
 0x1bb   :  { %v2046_v15 = vpop.f32.mrf.mxu1 }
 0x1bc   :  { %v2553_v25 = vpack.c.bf16 %v2147_v50, %v2146_v3  ;;  %v2116_v48 = vadd.f32 %v2115_v21, %v2043_v40  ;;  %v2047_v57 = vadd.f32 %v2046_v15, %v1974_v31  ;;  %v2121_v32 = vpop.f32.mrf.mxu0  ;;  %v2150_v13 = vmax.f32 %v2114_v22, 0.0 }
 0x1bd   :  { %v2048_v41 = vpop.f32.mrf.mxu1 }
 0x1be   :  { %2265 = vst [vmem:[%s4032_s3 + $0x48] sm:$0xff] %v2553_v25  ;;  %v2151_v12 = vmax.f32 %v2116_v48, 0.0  ;;  %v2120_v42 = vadd.f32 %v2119_v2, %v2047_v57  ;;  %v2049_v18 = vadd.f32 %v2048_v41, %v1976_v56  ;;  %v2123_v28 = vpop.f32.mrf.mxu0 }
 0x1bf   :  { %v2050_v29 = vpop.f32.mrf.mxu1 }
 0x1c0   :  { %v2555_v36 = vpack.c.bf16 %v2151_v12, %v2150_v13  ;;  %v2122_v58 = vadd.f32 %v2121_v32, %v2049_v18  ;;  %v2051_v43 = vadd.f32 %v2050_v29, %v1978_v17  ;;  %v2125_v6 = vpop.f32.mrf.mxu0  ;;  %v2154_v20 = vmax.f32 %v2120_v42, 0.0 }
 0x1c1   :  { %v2052_v54 = vpop.f32.mrf.mxu1 }
 0x1c2   :  { %2267 = vst [vmem:[%s4032_s3 + $0x58] sm:$0xff] %v2555_v36  ;;  %v2155_v49 = vmax.f32 %v2122_v58, 0.0  ;;  %v2124_v10 = vadd.f32 %v2123_v28, %v2051_v43  ;;  %v2053_v8 = vadd.f32 %v2052_v54, %v1980_v9 }
 0x1c4   :  { %v2557_v14 = vpack.c.bf16 %v2155_v49, %v2154_v20  ;;  %v2126_v37 = vadd.f32 %v2125_v6, %v2053_v8  ;;  %v2158_v5 = vmax.f32 %v2124_v10, 0.0 }
 0x1c6   :  { %2269 = vst [vmem:[%s4032_s3 + $0x68] sm:$0xff] %v2557_v14  ;;  %v2159_v62 = vmax.f32 %v2126_v37, 0.0 }
 0x1c8   :  { %v2559_v26 = vpack.c.bf16 %v2159_v62, %v2158_v5 }
 0x1ca   :  { %2271 = vst [vmem:[%s4032_s3 + $0x78] sm:$0xff] %v2559_v26 }

// kernel: d2_forward.8
= control target key start
LH: loop header
LB: loop body
LE: loop exit
PB: predicated region body
PF: predicated region fallthrough
CT: control target
= control target key end

     0   :  { %v3429_v1 = vmov 0   ;;  %vm1639_vm0 = vcmask 523264   ;;  %s4348_s1 = inlined_call_operand.vmem [shape: bf16[1728,128], index: 1, kind: input, shape index: {}]   ;;  %s4349_s0 = inlined_call_operand.vmem [shape: bf16[128,1728], index: 0, kind: input, shape index: {}]   ;;  %s4350_s2 = inlined_call_operand.vmem [shape: f32[128,1], index: 2, kind: input, shape index: {}]   ;;  %s4351_s3 = inlined_call_operand.vmem [shape: bf16[128,128], index: 3, kind: output, shape index: {}]  }
   0x1   :  { %v3153_v0 = vld [vmem:[%s4348_s1 + $0x78] sm:$0xff]   ;;  %3151 = vset.pattern.permute.xlu0 %v3429_v1  ;;  %3152 = vset.pattern.permute.xlu1 %v3429_v1  ;;  %v3155_v3 = vld [vmem:[%s4348_s1 + $0x70] sm:$0xff]   ;;  %v3157_v5 = vld [vmem:[%s4348_s1 + $0x68] sm:$0xff]  }
   0x2   :  { %v3154_v2 = vld [vmem:[%s4348_s1 + $0x38] sm:$0xff]   ;;  %3134 = vmatprep.subr.bf16.mxu1 %v3153_v0  ;;  %2750 = vmatprep.subr.bf16.mxu0 %v3153_v0  ;;  %v3156_v4 = vld [vmem:[%s4348_s1 + $0x30] sm:$0xff]   ;;  %v3158_v6 = vld [vmem:[%s4348_s1 + $0x28] sm:$0xff]  }
   0x3   :  { %3142 = vmatpush3.bf16.msra.mxu1 %v3154_v2  ;;  %2751 = vmatpush3.bf16.msra.mxu0 %v3154_v2  ;;  %v3159_v7 = vld [vmem:[%s4348_s1 + $0x60] sm:$0xff]   ;;  %v3161_v9 = vld [vmem:[%s4348_s1 + $0x58] sm:$0xff]   ;;  %v3163_v11 = vld [vmem:[%s4348_s1 + $0x50] sm:$0xff]  }
   0x4   :  { %3135 = vmatprep.subr.bf16.mxu1 %v3155_v3  ;;  %2752 = vmatprep.subr.bf16.mxu0 %v3155_v3  ;;  %v3160_v8 = vld [vmem:[%s4348_s1 + $0x20] sm:$0xff]   ;;  %v3162_v10 = vld [vmem:[%s4348_s1 + $0x18] sm:$0xff]   ;;  %v3164_v14 = vld [vmem:[%s4348_s1 + $0x10] sm:$0xff]  }
   0x5   :  { %v3171_v12 = vld [vmem:[%s4349_s0 + $0x1c4] ss:$56 sps:$4 sm:$0xff]   ;;  %v3165_v15 = vld [vmem:[%s4348_s1 + $0x48] sm:$0xff]   ;;  %v3169_v19 = vld [vmem:[%s4349_s0 + $0x1c0] ss:$56 sps:$4 sm:$0xff]  }
   0x6   :  { %v3174_v13 = vld [vmem:[%s4349_s0 + $0x4] ss:$56 sps:$4 sm:$0xff]   ;;  %1728 = vmatprep.mubr.bf16.mxu1 %v3171_v12  ;;  %v3166_v16 = vld [vmem:[%s4348_s1 + $0x8] sm:$0xff]   ;;  %v3172_v20 = vld [vmem:[%s4349_s0] ss:$56 sps:$4 sm:$0xff]  }
   0x7   :  { %3143 = vmatpush3.bf16.msra.mxu1 %v3156_v4  ;;  %2753 = vmatpush3.bf16.msra.mxu0 %v3156_v4  ;;  %v3167_v17 = vld [vmem:[%s4348_s1 + $0x40] sm:$0xff]   ;;  %v3175_v21 = vld [vmem:[%s4348_s1 + $0xf8] sm:$0xff]   ;;  %v3179_v25 = vld [vmem:[%s4348_s1 + $0xf0] sm:$0xff]  }
   0x8   :  { %3136 = vmatprep.subr.bf16.mxu1 %v3157_v5  ;;  %2754 = vmatprep.subr.bf16.mxu0 %v3157_v5  ;;  %v3168_v18 = vld [vmem:[%s4348_s1] sm:$0xff]   ;;  %v3177_v22 = vld [vmem:[%s4348_s1 + $0x178] sm:$0xff]   ;;  %v3181_v26 = vld [vmem:[%s4348_s1 + $0x170] sm:$0xff]  }
   0x9   :  { %1696 = vmatprep.mubr.bf16.mxu0 %v3174_v13  ;;  %v3176_v23 = vld [vmem:[%s4348_s1 + $0xb8] sm:$0xff]   ;;  %v3183_v27 = vld [vmem:[%s4349_s0 + $0x234] ss:$56 sps:$4 sm:$0xff]   ;;  %v3187_v32 = vld [vmem:[%s4349_s0 + $0x230] ss:$56 sps:$4 sm:$0xff]  }
   0xa   :  { %v3178_v24 = vld [vmem:[%s4348_s1 + $0x138] sm:$0xff]   ;;  %v3180_v28 = vld [vmem:[%s4348_s1 + $0xb0] sm:$0xff]   ;;  %v3188_v31 = vld [vmem:[%s4348_s1 + $0xe8] sm:$0xff]  }
   0xb   :  { %3144 = vmatpush3.bf16.msra.mxu1 %v3158_v6  ;;  %2755 = vmatpush3.bf16.msra.mxu0 %v3158_v6  ;;  %v3185_v29 = vld [vmem:[%s4349_s0 + $0x74] ss:$56 sps:$4 sm:$0xff]   ;;  %v3189_v34 = vld [vmem:[%s4349_s0 + $0x70] ss:$56 sps:$4 sm:$0xff]   ;;  %v3193_v37 = vld [vmem:[%s4348_s1 + $0xe0] sm:$0xff]  }
   0xc   :  { %3137 = vmatprep.subr.bf16.mxu1 %v3159_v7  ;;  %2756 = vmatprep.subr.bf16.mxu0 %v3159_v7  ;;  %v3182_v30 = vld [vmem:[%s4348_s1 + $0x130] sm:$0xff]   ;;  %v3191_v33 = vld [vmem:[%s4348_s1 + $0x168] sm:$0xff]   ;;  %v3195_v38 = vld [vmem:[%s4348_s1 + $0x160] sm:$0xff]  }
   0xd   :  { %v3190_v35 = vld [vmem:[%s4348_s1 + $0xa8] sm:$0xff]   ;;  %v3197_v39 = vld [vmem:[%s4349_s0 + $0x2a4] ss:$56 sps:$4 sm:$0xff]   ;;  %v3201_v44 = vld [vmem:[%s4349_s0 + $0x2a0] ss:$56 sps:$4 sm:$0xff]  }
   0xe   :  { %v3192_v36 = vld [vmem:[%s4348_s1 + $0x128] sm:$0xff]   ;;  %v3194_v40 = vld [vmem:[%s4348_s1 + $0xa0] sm:$0xff]   ;;  %v3202_v43 = vld [vmem:[%s4348_s1 + $0xd8] sm:$0xff]  }
   0xf   :  { %3145 = vmatpush3.bf16.msra.mxu1 %v3160_v8  ;;  %2757 = vmatpush3.bf16.msra.mxu0 %v3160_v8  ;;  %v3199_v41 = vld [vmem:[%s4349_s0 + $0xe4] ss:$56 sps:$4 sm:$0xff]   ;;  %v3203_v45 = vld [vmem:[%s4349_s0 + $0xe0] ss:$56 sps:$4 sm:$0xff]   ;;  %v3207_v49 = vld [vmem:[%s4348_s1 + $0xd0] sm:$0xff]  }
  0x10   :  { %3138 = vmatprep.subr.bf16.mxu1 %v3161_v9  ;;  %2758 = vmatprep.subr.bf16.mxu0 %v3161_v9  ;;  %v3196_v42 = vld [vmem:[%s4348_s1 + $0x120] sm:$0xff]   ;;  %v3205_v46 = vld [vmem:[%s4348_s1 + $0x158] sm:$0xff]   ;;  %v3209_v50 = vld [vmem:[%s4348_s1 + $0x150] sm:$0xff]  }
  0x11   :  { %v3204_v47 = vld [vmem:[%s4348_s1 + $0x98] sm:$0xff]   ;;  %v3211_v51 = vld [vmem:[%s4349_s0 + $0x314] ss:$56 sps:$4 sm:$0xff]   ;;  %v3215_v56 = vld [vmem:[%s4349_s0 + $0x310] ss:$56 sps:$4 sm:$0xff]  }
  0x12   :  { %v3206_v48 = vld [vmem:[%s4348_s1 + $0x118] sm:$0xff]   ;;  %v3213_v52 = vld [vmem:[%s4349_s0 + $0x154] ss:$56 sps:$4 sm:$0xff]   ;;  %v3217_v57 = vld [vmem:[%s4349_s0 + $0x150] ss:$56 sps:$4 sm:$0xff]  }
  0x13   :  { %3146 = vmatpush3.bf16.msra.mxu1 %v3162_v10  ;;  %2759 = vmatpush3.bf16.msra.mxu0 %v3162_v10  ;;  %v3208_v53 = vld [vmem:[%s4348_s1 + $0x90] sm:$0xff]   ;;  %v3216_v55 = vld [vmem:[%s4348_s1 + $0xc8] sm:$0xff]   ;;  %v3221_v61 = vld [vmem:[%s4348_s1 + $0xc0] sm:$0xff]  }
  0x14   :  { %3139 = vmatprep.subr.bf16.mxu1 %v3163_v11  ;;  %2760 = vmatprep.subr.bf16.mxu0 %v3163_v11  ;;  %v3210_v54 = vld [vmem:[%s4348_s1 + $0x110] sm:$0xff]   ;;  %v3219_v58 = vld [vmem:[%s4348_s1 + $0x148] sm:$0xff]   ;;  %v3223_v62 = vld [vmem:[%s4348_s1 + $0x140] sm:$0xff]  }
  0x15   :  { %v3218_v59 = vld [vmem:[%s4348_s1 + $0x88] sm:$0xff]   ;;  %v3222_v63 = vld [vmem:[%s4348_s1 + $0x80] sm:$0xff]   ;;  %v3231_v6 = vld [vmem:[%s4348_s1 + $0x1f8] sm:$0xff]  }
  0x16   :  { %v3220_v60 = vld [vmem:[%s4348_s1 + $0x108] sm:$0xff]   ;;  %v3224_v0 = vld [vmem:[%s4348_s1 + $0x100] sm:$0xff]   ;;  %v3232_v7 = vld [vmem:[%s4348_s1 + $0x1b8] sm:$0xff]  }
  0x17   :  { %3147 = vmatpush3.bf16.msra.mxu1 %v3164_v14  ;;  %2761 = vmatpush3.bf16.msra.mxu0 %v3164_v14  ;;  %v3227_v2 = vld [vmem:[%s4349_s0 + $0xc] ss:$56 sps:$4 sm:$0xff]   ;;  %v3225_v3 = vld [vmem:[%s4349_s0 + $0x8] ss:$56 sps:$4 sm:$0xff]   ;;  %v3233_v8 = vld [vmem:[%s4348_s1 + $0x278] sm:$0xff]  }
  0x18   :  { %3140 = vmatprep.subr.bf16.mxu1 %v3165_v15  ;;  %2762 = vmatprep.subr.bf16.mxu0 %v3165_v15  ;;  %v3228_v4 = vld [vmem:[%s4349_s0 + $0x10] ss:$56 sps:$4 sm:$0xff]   ;;  %v3230_v5 = vld [vmem:[%s4349_s0 + $0x14] ss:$56 sps:$4 sm:$0xff]   ;;  %v3236_v10 = vld [vmem:[%s4348_s1 + $0x238] sm:$0xff]  }
  0x19   :  { %v3234_v9 = vld [vmem:[%s4349_s0 + $0x7c] ss:$56 sps:$4 sm:$0xff]   ;;  %v3237_v12 = vld [vmem:[%s4349_s0 + $0x78] ss:$56 sps:$4 sm:$0xff]  }
  0x1a   :  { %v3238_v11 = vld [vmem:[%s4349_s0 + $0x84] ss:$56 sps:$4 sm:$0xff]   ;;  %v3240_v13 = vld [vmem:[%s4348_s1 + $0x1f0] sm:$0xff]   ;;  %v3241_v14 = vld [vmem:[%s4349_s0 + $0x80] ss:$56 sps:$4 sm:$0xff]  }
  0x1b   :  { %3148 = vmatpush3.bf16.msra.mxu1 %v3166_v16  ;;  %2763 = vmatpush3.bf16.msra.mxu0 %v3166_v16  ;;  %v3242_v15 = vld [vmem:[%s4348_s1 + $0x1b0] sm:$0xff]  }
  0x1c   :  { %3141 = vmatprep.subr.bf16.mxu1 %v3167_v17  ;;  %2764 = vmatprep.subr.bf16.mxu0 %v3167_v17  ;;  %v3243_v16 = vld [vmem:[%s4348_s1 + $0x270] sm:$0xff]   ;;  %v3244_v17 = vld [vmem:[%s4349_s0 + $0xec] ss:$56 sps:$4 sm:$0xff]  }
  0x1f   :  { %3149 = vmatpush3.bf16.msra.mxu1 %v3168_v18  ;;  %2765 = vmatpush3.bf16.msra.mxu0 %v3168_v18  ;;  %v3246_v18 = vld [vmem:[%s4348_s1 + $0x230] sm:$0xff]  }
  0x20   :  { %2814 = vmatprep.subr.bf16.mxu1 %v3175_v21  ;;  %2878 = vmatprep.subr.bf16.mxu0 %v3177_v22  ;;  %v3247_v21 = vld [vmem:[%s4349_s0 + $0xe8] ss:$56 sps:$4 sm:$0xff]  }
  0x21   :  { %v3252_v22 = vld [vmem:[%s4348_s1 + $0x1a8] sm:$0xff]  }
  0x22   :  { %1729 = vmatmul.mubr.bf16.vlgmr.msra.gmra.mxu1 %v3169_v19  ;;  %1697 = vmatmul.mubr.bf16.vlgmr.msra.gmra.mxu0 %v3172_v20  ;;  %v3248_v19 = vld [vmem:[%s4349_s0 + $0xf4] ss:$56 sps:$4 sm:$0xff]  }
  0x23   :  { %2815 = vmatpush3.bf16.msra.mxu1 %v3176_v23  ;;  %2879 = vmatpush3.bf16.msra.mxu0 %v3178_v24  ;;  %v3250_v20 = vld [vmem:[%s4348_s1 + $0x1e8] sm:$0xff]  }
  0x24   :  { %2816 = vmatprep.subr.bf16.mxu1 %v3179_v25  ;;  %2880 = vmatprep.subr.bf16.mxu0 %v3181_v26  ;;  %v3253_v23 = vld [vmem:[%s4348_s1 + $0x268] sm:$0xff]   ;;  %v3254_v25 = vld [vmem:[%s4349_s0 + $0x15c] ss:$56 sps:$4 sm:$0xff]  }
  0x25   :  { %1736 = vmatprep.mubr.bf16.mxu1 %v3183_v27  ;;  %1704 = vmatprep.mubr.bf16.mxu0 %v3185_v29  ;;  %v3251_v24 = vld [vmem:[%s4349_s0 + $0xf0] ss:$56 sps:$4 sm:$0xff]   ;;  %v3258_v27 = vld [vmem:[%s4349_s0 + $0x164] ss:$56 sps:$4 sm:$0xff]  }
  0x26   :  { %v3256_v26 = vld [vmem:[%s4348_s1 + $0x228] sm:$0xff]   ;;  %v343_v29 = vld [vmem:[%s4350_s2] sm:$0xff] }
  0x27   :  { %2817 = vmatpush3.bf16.msra.mxu1 %v3180_v28  ;;  %2881 = vmatpush3.bf16.msra.mxu0 %v3182_v30  ;;  %v3260_v28 = vld [vmem:[%s4348_s1 + $0x1e0] sm:$0xff]  }
  0x28   :  { %2818 = vmatprep.subr.bf16.mxu1 %v3188_v31  ;;  %2882 = vmatprep.subr.bf16.mxu0 %v3191_v33  ;;  %v3262_v30 = vld [vmem:[%s4348_s1 + $0x1a0] sm:$0xff]   ;;  %v345_v31 = vld [vmem:[%s4350_s2 + $0x10] sm:$0xff]  ;;  %v344_v33 = vld [vmem:[%s4350_s2 + $0x8] sm:$0xff] }
  0x29   :  { %361 = vperm.xlu0 %3151, %v343_v29   ;;  %371 = vperm.xlu1 %3152, %v345_v31   ;;  %v3321_v29 = vld [vmem:[%s4348_s1 + $0x2b0] sm:$0xff]   ;;  %v3316_v31 = vld [vmem:[%s4349_s0 + $0x88] ss:$56 sps:$4 sm:$0xff]  }
  0x2a   :  { %1737 = vmatmul.mubr.bf16.gmra.mxu1 %v3187_v32  ;;  %1705 = vmatmul.mubr.bf16.gmra.mxu0 %v3189_v34  ;;  %v3257_v32 = vld [vmem:[%s4349_s0 + $0x158] ss:$56 sps:$4 sm:$0xff]   ;;  %v3263_v34 = vld [vmem:[%s4348_s1 + $0x260] sm:$0xff]  }
  0x2b   :  { %2819 = vmatpush3.bf16.msra.mxu1 %v3190_v35  ;;  %2883 = vmatpush3.bf16.msra.mxu0 %v3192_v36  ;;  %v3261_v35 = vld [vmem:[%s4349_s0 + $0x160] ss:$56 sps:$4 sm:$0xff]   ;;  %v3264_v36 = vld [vmem:[%s4349_s0 + $0x1cc] ss:$56 sps:$4 sm:$0xff]  }
  0x2c   :  { %2820 = vmatprep.subr.bf16.mxu1 %v3193_v37  ;;  %2884 = vmatprep.subr.bf16.mxu0 %v3195_v38  ;;  %v3266_v37 = vld [vmem:[%s4348_s1 + $0x220] sm:$0xff]   ;;  %v3268_v38 = vld [vmem:[%s4349_s0 + $0x1d4] ss:$56 sps:$4 sm:$0xff]  }
  0x2d   :  { %1744 = vmatprep.mubr.bf16.mxu1 %v3197_v39  ;;  %1712 = vmatprep.mubr.bf16.mxu0 %v3199_v41  ;;  %v3270_v39 = vld [vmem:[%s4348_s1 + $0x1d8] sm:$0xff]   ;;  %v347_v41 = vld [vmem:[%s4350_s2 + $0x20] sm:$0xff] }
  0x2e   :  { %366 = vperm.xlu0 %3151, %v344_v33   ;;  %v3320_v33 = vld [vmem:[%s4349_s0 + $0x90] ss:$56 sps:$4 sm:$0xff]  }
  0x2f   :  { %2821 = vmatpush3.bf16.msra.mxu1 %v3194_v40  ;;  %2885 = vmatpush3.bf16.msra.mxu0 %v3196_v42  ;;  %v346_v40 = vld [vmem:[%s4350_s2 + $0x18] sm:$0xff] }
  0x30   :  { %2822 = vmatprep.subr.bf16.mxu1 %v3202_v43  ;;  %2886 = vmatprep.subr.bf16.mxu0 %v3205_v46  ;;  %v3272_v42 = vld [vmem:[%s4348_s1 + $0x198] sm:$0xff]   ;;  %v3267_v43 = vld [vmem:[%s4349_s0 + $0x1c8] ss:$56 sps:$4 sm:$0xff]  }
  0x31   :  { %376 = vperm.xlu1 %3152, %v346_v40   ;;  %v3273_v46 = vld [vmem:[%s4348_s1 + $0x258] sm:$0xff]  }
  0x32   :  { %1745 = vmatmul.mubr.bf16.gmra.mxu1 %v3201_v44  ;;  %1713 = vmatmul.mubr.bf16.gmra.mxu0 %v3203_v45  ;;  %v3271_v44 = vld [vmem:[%s4349_s0 + $0x1d0] ss:$56 sps:$4 sm:$0xff]  }
  0x33   :  { %2823 = vmatpush3.bf16.msra.mxu1 %v3204_v47  ;;  %2887 = vmatpush3.bf16.msra.mxu0 %v3206_v48  ;;  %v348_v45 = vld [vmem:[%s4350_s2 + $0x28] sm:$0xff]  ;;  %v349_v47 = vld [vmem:[%s4350_s2 + $0x30] sm:$0xff] }
  0x34   :  { %2824 = vmatprep.subr.bf16.mxu1 %v3207_v49  ;;  %2888 = vmatprep.subr.bf16.mxu0 %v3209_v50  ;;  %v3274_v48 = vld [vmem:[%s4349_s0 + $0x23c] ss:$56 sps:$4 sm:$0xff]   ;;  %v3325_v40 = vld [vmem:[%s4349_s0 + $0xf8] ss:$56 sps:$4 sm:$0xff]  }
  0x35   :  { %1752 = vmatprep.mubr.bf16.mxu1 %v3211_v51  ;;  %1720 = vmatprep.mubr.bf16.mxu0 %v3213_v52  ;;  %v3276_v49 = vld [vmem:[%s4348_s1 + $0x218] sm:$0xff]   ;;  %v3280_v51 = vld [vmem:[%s4348_s1 + $0x1d0] sm:$0xff]  }
  0x36   :  { %381 = vperm.xlu0 %3151, %v347_v41   ;;  %386 = vperm.xlu1 %3152, %v348_v45   ;;  %v3278_v50 = vld [vmem:[%s4349_s0 + $0x244] ss:$56 sps:$4 sm:$0xff]  }
  0x37   :  { %2825 = vmatpush3.bf16.msra.mxu1 %v3208_v53  ;;  %2889 = vmatpush3.bf16.msra.mxu0 %v3210_v54  ;;  %v350_v52 = vld [vmem:[%s4350_s2 + $0x38] sm:$0xff]  ;;  %v351_v53 = vld [vmem:[%s4350_s2 + $0x40] sm:$0xff]  ;;  %v3282_v54 = vld [vmem:[%s4348_s1 + $0x190] sm:$0xff]  }
  0x38   :  { %2826 = vmatprep.subr.bf16.mxu1 %v3216_v55  ;;  %2890 = vmatprep.subr.bf16.mxu0 %v3219_v58  ;;  %v3277_v55 = vld [vmem:[%s4349_s0 + $0x238] ss:$56 sps:$4 sm:$0xff]   ;;  %v352_v58 = vld [vmem:[%s4350_s2 + $0x48] sm:$0xff]  ;;  %v3340_v41 = vld [vmem:[%s4348_s1 + $0x2a0] sm:$0xff]  }
  0x39   :  { %v3341_v45 = vld [vmem:[%s4348_s1 + $0x318] sm:$0xff]  }
  0x3a   :  { %1753 = vmatmul.mubr.bf16.gmra.mxu1 %v3215_v56  ;;  %1721 = vmatmul.mubr.bf16.gmra.mxu0 %v3217_v57  ;;  %v3281_v56 = vld [vmem:[%s4349_s0 + $0x240] ss:$56 sps:$4 sm:$0xff]   ;;  %v3283_v57 = vld [vmem:[%s4348_s1 + $0x250] sm:$0xff]  }
  0x3b   :  { %2827 = vmatpush3.bf16.msra.mxu1 %v3218_v59  ;;  %2891 = vmatpush3.bf16.msra.mxu0 %v3220_v60  ;;  %v3286_v59 = vld [vmem:[%s4348_s1 + $0x210] sm:$0xff]   ;;  %v3284_v60 = vld [vmem:[%s4349_s0 + $0x2ac] ss:$56 sps:$4 sm:$0xff]  }
  0x3c   :  { %2828 = vmatprep.subr.bf16.mxu1 %v3221_v61  ;;  %2892 = vmatprep.subr.bf16.mxu0 %v3223_v62  ;;  %v3288_v61 = vld [vmem:[%s4349_s0 + $0x2b4] ss:$56 sps:$4 sm:$0xff]  }
  0x3d   :  { %1793 = vmatprep.mubr.bf16.mxu1 %v3227_v2  ;;  %1890 = vmatprep.mubr.bf16.mxu0 %v3230_v5  ;;  %v3290_v62 = vld [vmem:[%s4348_s1 + $0x1c8] sm:$0xff]   ;;  %v354_v2 = vld [vmem:[%s4350_s2 + $0x58] sm:$0xff] }
  0x3e   :  { %391 = vperm.xlu0 %3151, %v349_v47   ;;  %396 = vperm.xlu1 %3152, %v350_v52   ;;  %v3291_v5 = vld [vmem:[%s4349_s0 + $0x2b0] ss:$56 sps:$4 sm:$0xff]   ;;  %v3349_v47 = vld [vmem:[%s4348_s1 + $0x298] sm:$0xff]  }
  0x3f   :  { %2829 = vmatpush3.bf16.msra.mxu1 %v3222_v63  ;;  %2893 = vmatpush3.bf16.msra.mxu0 %v3224_v0  ;;  %v353_v63 = vld [vmem:[%s4350_s2 + $0x50] sm:$0xff]  ;;  %v3292_v0 = vld [vmem:[%s4348_s1 + $0x188] sm:$0xff]   ;;  %v3345_v52 = vld [vmem:[%s4349_s0 + $0x1e4] ss:$56 sps:$4 sm:$0xff]  }
  0x40   :  { %2942 = vmatprep.subr.bf16.mxu1 %v3231_v6  ;;  %3006 = vmatprep.subr.bf16.mxu0 %v3233_v8  ;;  %v3294_v6 = vld [vmem:[%s4349_s0 + $0x31c] ss:$56 sps:$4 sm:$0xff]  }
  0x41   :  { %v3298_v8 = vld [vmem:[%s4349_s0 + $0x324] ss:$56 sps:$4 sm:$0xff]  }
  0x42   :  { %1794 = vmatmul.mubr.bf16.vlgmr.msra.gmra.mxu1 %v3225_v3  ;;  %1891 = vmatmul.mubr.bf16.vlgmr.msra.gmra.mxu0 %v3228_v4  ;;  %v3287_v3 = vld [vmem:[%s4349_s0 + $0x2a8] ss:$56 sps:$4 sm:$0xff]  }
  0x43   :  { %2943 = vmatpush3.bf16.msra.mxu1 %v3232_v7  ;;  %1801 = vmatprep.mubr.bf16.mxu1 %v3234_v9  ;;  %v3293_v4 = vld [vmem:[%s4348_s1 + $0x248] sm:$0xff]   ;;  %v3300_v9 = vld [vmem:[%s4348_s1 + $0x1c0] sm:$0xff]  }
  0x44   :  { %3007 = vmatpush3.bf16.msra.mxu0 %v3236_v10  ;;  %1898 = vmatprep.mubr.bf16.mxu0 %v3238_v11  ;;  %v3296_v7 = vld [vmem:[%s4348_s1 + $0x208] sm:$0xff]   ;;  %v355_v10 = vld [vmem:[%s4350_s2 + $0x60] sm:$0xff] }
  0x45   :  { %2944 = vmatprep.subr.bf16.mxu1 %v3240_v13  ;;  %3008 = vmatprep.subr.bf16.mxu0 %v3243_v16  ;;  %v3302_v11 = vld [vmem:[%s4348_s1 + $0x180] sm:$0xff]  }
  0x46   :  { %401 = vperm.xlu0 %3151, %v351_v53   ;;  %406 = vperm.xlu1 %3152, %v352_v58   ;;  %v3303_v13 = vld [vmem:[%s4348_s1 + $0x240] sm:$0xff]   ;;  %v3357_v53 = vld [vmem:[%s4348_s1 + $0x2d0] sm:$0xff]  }
  0x47   :  { %2945 = vmatpush3.bf16.msra.mxu1 %v3242_v15  ;;  %v3297_v15 = vld [vmem:[%s4349_s0 + $0x318] ss:$56 sps:$4 sm:$0xff]   ;;  %v3360_v58 = vld [vmem:[%s4348_s1 + $0x300] sm:$0xff]  }
  0x48   :  { %3009 = vmatpush3.bf16.msra.mxu0 %v3246_v18  ;;  %2946 = vmatprep.subr.bf16.mxu1 %v3250_v20  ;;  %v3301_v16 = vld [vmem:[%s4349_s0 + $0x320] ss:$56 sps:$4 sm:$0xff]   ;;  %v3310_v18 = vld [vmem:[%s4349_s0 + $0x24] ss:$56 sps:$4 sm:$0xff]   ;;  %v357_v20 = vld [vmem:[%s4350_s2 + $0x70] sm:$0xff] }
  0x49   :  { %3010 = vmatprep.subr.bf16.mxu0 %v3253_v23  ;;  %v3308_v23 = vld [vmem:[%s4349_s0 + $0x20] ss:$56 sps:$4 sm:$0xff]  }
  0x4a   :  { %1802 = vmatmul.mubr.bf16.gmra.mxu1 %v3237_v12  ;;  %1899 = vmatmul.mubr.bf16.gmra.mxu0 %v3241_v14  ;;  %v356_v12 = vld [vmem:[%s4350_s2 + $0x68] sm:$0xff]  ;;  %v3304_v14 = vld [vmem:[%s4348_s1 + $0x200] sm:$0xff]  }
  0x4b   :  { %1809 = vmatprep.mubr.bf16.mxu1 %v3244_v17  ;;  %1906 = vmatprep.mubr.bf16.mxu0 %v3248_v19  ;;  %v3307_v17 = vld [vmem:[%s4349_s0 + $0x1c] ss:$56 sps:$4 sm:$0xff]  }
  0x4c   :  { %2947 = vmatpush3.bf16.msra.mxu1 %v3252_v22  ;;  %3011 = vmatpush3.bf16.msra.mxu0 %v3256_v26  ;;  %v3311_v19 = vld [vmem:[%s4348_s1 + $0x2f8] sm:$0xff]  }
  0x4d   :  { %2948 = vmatprep.subr.bf16.mxu1 %v3260_v28  ;;  %3012 = vmatprep.subr.bf16.mxu0 %v3263_v34  ;;  %v3305_v22 = vld [vmem:[%s4349_s0 + $0x18] ss:$56 sps:$4 sm:$0xff]   ;;  %v3323_v34 = vld [vmem:[%s4349_s0 + $0xfc] ss:$56 sps:$4 sm:$0xff]  }
  0x4e   :  { %411 = vperm.xlu0 %3151, %v353_v63   ;;  %416 = vperm.xlu1 %3152, %v354_v2   ;;  %v3315_v26 = vld [vmem:[%s4348_s1 + $0x338] sm:$0xff]   ;;  %v3319_v28 = vld [vmem:[%s4348_s1 + $0x2f0] sm:$0xff]   ;;  %v3376_v2 = vld [vmem:[%s4348_s1 + $0x2c0] sm:$0xff]  }
  0x4f   :  { %v3369_v63 = vld [vmem:[%s4348_s1 + $0x358] sm:$0xff]  }
  0x50   :  { %2949 = vmatpush3.bf16.msra.mxu1 %v3262_v30  ;;  %3013 = vmatpush3.bf16.msra.mxu0 %v3266_v37  ;;  %v3322_v30 = vld [vmem:[%s4348_s1 + $0x330] sm:$0xff]   ;;  %v3331_v37 = vld [vmem:[%s4348_s1 + $0x328] sm:$0xff]  }
  0x51   :  { %2950 = vmatprep.subr.bf16.mxu1 %v3270_v39  ;;  %3014 = vmatprep.subr.bf16.mxu0 %v3273_v46  ;;  %v3334_v39 = vld [vmem:[%s4348_s1 + $0x320] sm:$0xff]   ;;  %v3347_v46 = vld [vmem:[%s4348_s1 + $0x2d8] sm:$0xff]  }
  0x52   :  { %1810 = vmatmul.mubr.bf16.gmra.mxu1 %v3247_v21  ;;  %1907 = vmatmul.mubr.bf16.gmra.mxu0 %v3251_v24  ;;  %v358_v21 = vld [vmem:[%s4350_s2 + $0x78] sm:$0xff] }
  0x53   :  { %1817 = vmatprep.mubr.bf16.mxu1 %v3254_v25  ;;  %1914 = vmatprep.mubr.bf16.mxu0 %v3258_v27  ;;  %v3312_v24 = vld [vmem:[%s4348_s1 + $0x2b8] sm:$0xff]   ;;  %v3313_v25 = vld [vmem:[%s4349_s0 + $0x8c] ss:$56 sps:$4 sm:$0xff]  }
  0x54   :  { %2951 = vmatpush3.bf16.msra.mxu1 %v3272_v42  ;;  %3015 = vmatpush3.bf16.msra.mxu0 %v3276_v49  ;;  %v3317_v27 = vld [vmem:[%s4349_s0 + $0x94] ss:$56 sps:$4 sm:$0xff]   ;;  %v3329_v42 = vld [vmem:[%s4349_s0 + $0x100] ss:$56 sps:$4 sm:$0xff]   ;;  %v3339_v49 = vld [vmem:[%s4349_s0 + $0x170] ss:$56 sps:$4 sm:$0xff]  }
  0x55   :  { %2952 = vmatprep.subr.bf16.mxu1 %v3280_v51  ;;  %3016 = vmatprep.subr.bf16.mxu0 %v3283_v57  ;;  %v3342_v51 = vld [vmem:[%s4349_s0 + $0x1dc] ss:$56 sps:$4 sm:$0xff]   ;;  %v3348_v57 = vld [vmem:[%s4349_s0 + $0x1e0] ss:$56 sps:$4 sm:$0xff]  }
  0x56   :  { %421 = vperm.xlu0 %3151, %v355_v10   ;;  %426 = vperm.xlu1 %3152, %v356_v12   ;;  %v3363_v10 = vld [vmem:[%s4349_s0 + $0x2b8] ss:$56 sps:$4 sm:$0xff]   ;;  %v3371_v12 = vld [vmem:[%s4349_s0 + $0x32c] ss:$56 sps:$4 sm:$0xff]  }
  0x58   :  { %2953 = vmatpush3.bf16.msra.mxu1 %v3282_v54  ;;  %3017 = vmatpush3.bf16.msra.mxu0 %v3286_v59  ;;  %v3353_v54 = vld [vmem:[%s4348_s1 + $0x308] sm:$0xff]  }
  0x59   :  { %2954 = vmatprep.subr.bf16.mxu1 %v3290_v62  ;;  %3018 = vmatprep.subr.bf16.mxu0 %v3293_v4  ;;  %v3366_v59 = vld [vmem:[%s4348_s1 + $0x2c8] sm:$0xff]  }
  0x5a   :  { %1818 = vmatmul.mubr.bf16.gmra.mxu1 %v3257_v32  ;;  %1915 = vmatmul.mubr.bf16.gmra.mxu0 %v3261_v35  ;;  %v3328_v32 = vld [vmem:[%s4348_s1 + $0x2e8] sm:$0xff]   ;;  %v3326_v35 = vld [vmem:[%s4349_s0 + $0x104] ss:$56 sps:$4 sm:$0xff]  }
  0x5b   :  { %1825 = vmatprep.mubr.bf16.mxu1 %v3264_v36  ;;  %1922 = vmatprep.mubr.bf16.mxu0 %v3268_v38  ;;  %v3330_v36 = vld [vmem:[%s4348_s1 + $0x2a8] sm:$0xff]   ;;  %v3338_v38 = vld [vmem:[%s4348_s1 + $0x2e0] sm:$0xff]  }
  0x5c   :  { %2955 = vmatpush3.bf16.msra.mxu1 %v3292_v0  ;;  %3019 = vmatpush3.bf16.msra.mxu0 %v3296_v7  ;;  %v3355_v62 = vld [vmem:[%s4349_s0 + $0x254] ss:$56 sps:$4 sm:$0xff]   ;;  %v3354_v4 = vld [vmem:[%s4349_s0 + $0x248] ss:$56 sps:$4 sm:$0xff]   ;;  %v3364_v7 = vld [vmem:[%s4349_s0 + $0x2c4] ss:$56 sps:$4 sm:$0xff]  }
  0x5d   :  { %2956 = vmatprep.subr.bf16.mxu1 %v3300_v9  ;;  %3020 = vmatprep.subr.bf16.mxu0 %v3303_v13  ;;  %v3370_v0 = vld [vmem:[%s4348_s1 + $0x350] sm:$0xff]   ;;  %v3380_v9 = vld [vmem:[%s4348_s1 + $0x340] sm:$0xff]  }
  0x5e   :  { %431 = vperm.xlu0 %3151, %v357_v20   ;;  %436 = vperm.xlu1 %3152, %v358_v21   ;;  %v3374_v13 = vld [vmem:[%s4349_s0 + $0x334] ss:$56 sps:$4 sm:$0xff]   ;;  %v3390_v20 = vld [vmem:[%s4349_s0 + $0xa4] ss:$56 sps:$4 sm:$0xff]   ;;  %v3389_v21 = vld [vmem:[%s4349_s0 + $0x98] ss:$56 sps:$4 sm:$0xff]  }
  0x60   :  { %2957 = vmatpush3.bf16.msra.mxu1 %v3302_v11  ;;  %3021 = vmatpush3.bf16.msra.mxu0 %v3304_v14  ;;  %v3367_v11 = vld [vmem:[%s4349_s0 + $0x2c0] ss:$56 sps:$4 sm:$0xff]   ;;  %v3377_v14 = vld [vmem:[%s4349_s0 + $0x330] ss:$56 sps:$4 sm:$0xff]  }
  0x61   :  { %2246 = vmatprep.subr.bf16.mxu0 %v3429_v1  ;;  %3070 = vmatprep.subr.bf16.mxu1 %v3311_v19  ;;  %v3387_v19 = vld [vmem:[%s4349_s0 + $0x9c] ss:$56 sps:$4 sm:$0xff]  }
  0x62   :  { %1826 = vmatmul.mubr.bf16.gmra.mxu1 %v3267_v43  ;;  %1923 = vmatmul.mubr.bf16.gmra.mxu0 %v3271_v44  ;;  %v3332_v43 = vld [vmem:[%s4349_s0 + $0x16c] ss:$56 sps:$4 sm:$0xff]  }
  0x63   :  { %1833 = vmatprep.mubr.bf16.mxu1 %v3274_v48  ;;  %1930 = vmatprep.mubr.bf16.mxu0 %v3278_v50  ;;  %v3336_v44 = vld [vmem:[%s4349_s0 + $0x174] ss:$56 sps:$4 sm:$0xff]   ;;  %v3335_v48 = vld [vmem:[%s4349_s0 + $0x168] ss:$56 sps:$4 sm:$0xff]  }
  0x64   :  { %v3350_v50 = vld [vmem:[%s4348_s1 + $0x310] sm:$0xff]  }
  0x6a   :  { %1834 = vmatmul.mubr.bf16.gmra.mxu1 %v3277_v55  ;;  %1931 = vmatmul.mubr.bf16.gmra.mxu0 %v3281_v56  ;;  %v3359_v55 = vld [vmem:[%s4348_s1 + $0x290] sm:$0xff]  }
  0x6b   :  { %1841 = vmatprep.mubr.bf16.mxu1 %v3284_v60  ;;  %1938 = vmatprep.mubr.bf16.mxu0 %v3288_v61  ;;  %v3344_v56 = vld [vmem:[%s4349_s0 + $0x1d8] ss:$56 sps:$4 sm:$0xff]   ;;  %v3368_v60 = vld [vmem:[%s4348_s1 + $0x288] sm:$0xff]  }
  0x6c   :  { %v3351_v61 = vld [vmem:[%s4349_s0 + $0x24c] ss:$56 sps:$4 sm:$0xff]  }
  0x72   :  { %1842 = vmatmul.mubr.bf16.gmra.mxu1 %v3287_v3  ;;  %1939 = vmatmul.mubr.bf16.gmra.mxu0 %v3291_v5  ;;  %v3378_v3 = vld [vmem:[%s4348_s1 + $0x280] sm:$0xff]   ;;  %v3358_v5 = vld [vmem:[%s4349_s0 + $0x250] ss:$56 sps:$4 sm:$0xff]  }
  0x73   :  { %1849 = vmatprep.mubr.bf16.mxu1 %v3294_v6  ;;  %1946 = vmatprep.mubr.bf16.mxu0 %v3298_v8  ;;  %v3361_v6 = vld [vmem:[%s4349_s0 + $0x2bc] ss:$56 sps:$4 sm:$0xff]   ;;  %v3379_v8 = vld [vmem:[%s4348_s1 + $0x348] sm:$0xff]  }
  0x7a   :  { %1850 = vmatmul.mubr.bf16.gmra.mxu1 %v3297_v15  ;;  %1947 = vmatmul.mubr.bf16.gmra.mxu0 %v3301_v16  ;;  %v3383_v15 = vld [vmem:[%s4349_s0 + $0x2c] ss:$56 sps:$4 sm:$0xff]  }
  0x7b   :  { %1987 = vmatprep.mubr.bf16.mxu1 %v3307_v17  ;;  %2084 = vmatprep.mubr.bf16.mxu0 %v3310_v18  ;;  %v3386_v16 = vld [vmem:[%s4349_s0 + $0x34] ss:$56 sps:$4 sm:$0xff]   ;;  %v3381_v17 = vld [vmem:[%s4349_s0 + $0x28] ss:$56 sps:$4 sm:$0xff]  }
  0x7c   :  { %v3384_v18 = vld [vmem:[%s4349_s0 + $0x30] ss:$56 sps:$4 sm:$0xff]  }
  0x82   :  { %1988 = vmatmul.mubr.bf16.vlgmr.msra.gmra.mxu1 %v3305_v22  ;;  %2085 = vmatmul.mubr.bf16.vlgmr.msra.gmra.mxu0 %v3308_v23  ;;  %v3392_v22 = vld [vmem:[%s4349_s0 + $0xa0] ss:$56 sps:$4 sm:$0xff]   ;;  %v3393_v23 = vld [vmem:[%s4349_s0 + $0x10c] ss:$56 sps:$4 sm:$0xff]  }
  0x83   :  { %3071 = vmatpush3.bf16.msra.mxu1 %v3312_v24  ;;  %1995 = vmatprep.mubr.bf16.mxu1 %v3313_v25  ;;  %v3396_v24 = vld [vmem:[%s4349_s0 + $0x114] ss:$56 sps:$4 sm:$0xff]   ;;  %v3395_v25 = vld [vmem:[%s4349_s0 + $0x108] ss:$56 sps:$4 sm:$0xff]  }
  0x84   :  { %2247 = vmatpush1.bf16.msra.mxu0 %v3315_v26  ;;  %2092 = vmatprep.mubr.bf16.mxu0 %v3317_v27  ;;  %v3398_v26 = vld [vmem:[%s4349_s0 + $0x110] ss:$56 sps:$4 sm:$0xff]   ;;  %v3399_v27 = vld [vmem:[%s4349_s0 + $0x17c] ss:$56 sps:$4 sm:$0xff]  }
  0x85   :  { %3072 = vmatprep.subr.bf16.mxu1 %v3319_v28  ;;  %2248 = vmatprep.subr.bf16.mxu0 %v3429_v1  ;;  %v3402_v28 = vld [vmem:[%s4349_s0 + $0x184] ss:$56 sps:$4 sm:$0xff]  }
  0x87   :  { %3073 = vmatpush3.bf16.msra.mxu1 %v3321_v29  ;;  %v3401_v29 = vld [vmem:[%s4349_s0 + $0x178] ss:$56 sps:$4 sm:$0xff]  }
  0x88   :  { %2249 = vmatpush1.bf16.msra.mxu0 %v3322_v30  ;;  %3074 = vmatprep.subr.bf16.mxu1 %v3328_v32  ;;  %v3404_v30 = vld [vmem:[%s4349_s0 + $0x180] ss:$56 sps:$4 sm:$0xff]   ;;  %v3408_v32 = vld [vmem:[%s4349_s0 + $0x1f4] ss:$56 sps:$4 sm:$0xff]  }
  0x89   :  { %2250 = vmatprep.subr.bf16.mxu0 %v3429_v1 }
  0x8a   :  { %1996 = vmatmul.mubr.bf16.gmra.mxu1 %v3316_v31  ;;  %2093 = vmatmul.mubr.bf16.gmra.mxu0 %v3320_v33  ;;  %v3405_v31 = vld [vmem:[%s4349_s0 + $0x1ec] ss:$56 sps:$4 sm:$0xff]   ;;  %v3407_v33 = vld [vmem:[%s4349_s0 + $0x1e8] ss:$56 sps:$4 sm:$0xff]  }
  0x8b   :  { %2003 = vmatprep.mubr.bf16.mxu1 %v3323_v34  ;;  %2100 = vmatprep.mubr.bf16.mxu0 %v3326_v35  ;;  %v3410_v34 = vld [vmem:[%s4349_s0 + $0x1f0] ss:$56 sps:$4 sm:$0xff]   ;;  %v3411_v35 = vld [vmem:[%s4349_s0 + $0x25c] ss:$56 sps:$4 sm:$0xff]  }
  0x8c   :  { %3075 = vmatpush3.bf16.msra.mxu1 %v3330_v36  ;;  %2251 = vmatpush1.bf16.msra.mxu0 %v3331_v37  ;;  %v3414_v36 = vld [vmem:[%s4349_s0 + $0x264] ss:$56 sps:$4 sm:$0xff]  }
  0x8d   :  { %2252 = vmatprep.subr.bf16.mxu0 %v3429_v1  ;;  %3076 = vmatprep.subr.bf16.mxu1 %v3338_v38 }
  0x90   :  { %2253 = vmatpush1.bf16.msra.mxu0 %v3334_v39  ;;  %3077 = vmatpush3.bf16.msra.mxu1 %v3340_v41 }
  0x91   :  { %2254 = vmatprep.subr.bf16.mxu0 %v3429_v1  ;;  %3078 = vmatprep.subr.bf16.mxu1 %v3347_v46  ;;  %v3416_v46 = vld [vmem:[%s4349_s0 + $0x260] ss:$56 sps:$4 sm:$0xff]  }
  0x92   :  { %2004 = vmatmul.mubr.bf16.gmra.mxu1 %v3325_v40  ;;  %2101 = vmatmul.mubr.bf16.gmra.mxu0 %v3329_v42 }
  0x93   :  { %2011 = vmatprep.mubr.bf16.mxu1 %v3332_v43  ;;  %2108 = vmatprep.mubr.bf16.mxu0 %v3336_v44 }
  0x94   :  { %2255 = vmatpush1.bf16.msra.mxu0 %v3341_v45  ;;  %3079 = vmatpush3.bf16.msra.mxu1 %v3349_v47  ;;  %v3413_v45 = vld [vmem:[%s4349_s0 + $0x258] ss:$56 sps:$4 sm:$0xff]   ;;  %v3417_v47 = vld [vmem:[%s4349_s0 + $0x2cc] ss:$56 sps:$4 sm:$0xff]  }
  0x95   :  { %2256 = vmatprep.subr.bf16.mxu0 %v3429_v1  ;;  %3080 = vmatprep.subr.bf16.mxu1 %v3357_v53 }
  0x98   :  { %2257 = vmatpush1.bf16.msra.mxu0 %v3350_v50  ;;  %3081 = vmatpush3.bf16.msra.mxu1 %v3359_v55 }
  0x99   :  { %2258 = vmatprep.subr.bf16.mxu0 %v3429_v1  ;;  %3082 = vmatprep.subr.bf16.mxu1 %v3366_v59 }
  0x9a   :  { %2012 = vmatmul.mubr.bf16.gmra.mxu1 %v3335_v48  ;;  %2109 = vmatmul.mubr.bf16.gmra.mxu0 %v3339_v49  ;;  %v3420_v48 = vld [vmem:[%s4349_s0 + $0x2d4] ss:$56 sps:$4 sm:$0xff]  }
  0x9b   :  { %2019 = vmatprep.mubr.bf16.mxu1 %v3342_v51  ;;  %2116 = vmatprep.mubr.bf16.mxu0 %v3345_v52 }
  0x9c   :  { %2259 = vmatpush1.bf16.msra.mxu0 %v3353_v54  ;;  %3083 = vmatpush3.bf16.msra.mxu1 %v3368_v60 }
  0x9d   :  { %2260 = vmatprep.subr.bf16.mxu0 %v3429_v1  ;;  %3084 = vmatprep.subr.bf16.mxu1 %v3376_v2 }
  0xa0   :  { %2261 = vmatpush1.bf16.msra.mxu0 %v3360_v58  ;;  %3085 = vmatpush3.bf16.msra.mxu1 %v3378_v3 }
  0xa1   :  { %2270 = vmatprep.subr.bf16.mxu0 %v3429_v1 }
  0xa2   :  { %2020 = vmatmul.mubr.bf16.gmra.mxu1 %v3344_v56  ;;  %2117 = vmatmul.mubr.bf16.gmra.mxu0 %v3348_v57 }
  0xa3   :  { %2027 = vmatprep.mubr.bf16.mxu1 %v3351_v61  ;;  %2124 = vmatprep.mubr.bf16.mxu0 %v3355_v62  ;;  %v3419_v61 = vld [vmem:[%s4349_s0 + $0x2c8] ss:$56 sps:$4 sm:$0xff]  }
  0xa4   :  { %2271 = vmatpush2.bf16.msra.mxu0 %v3369_v63  ;;  %v3422_v62 = vld [vmem:[%s4349_s0 + $0x2d0] ss:$56 sps:$4 sm:$0xff]   ;;  %v3423_v63 = vld [vmem:[%s4349_s0 + $0x33c] ss:$56 sps:$4 sm:$0xff]  }
  0xa5   :  { %2272 = vmatprep.subr.bf16.mxu0 %v3429_v1 }
  0xa8   :  { %2273 = vmatpush2.bf16.msra.mxu0 %v3370_v0  ;;  %v3426_v0 = vld [vmem:[%s4349_s0 + $0x344] ss:$56 sps:$4 sm:$0xff]  }
  0xa9   :  { %2274 = vmatprep.subr.bf16.mxu0 %v3429_v1 }
  0xaa   :  { %2028 = vmatmul.mubr.bf16.gmra.mxu1 %v3354_v4  ;;  %2125 = vmatmul.mubr.bf16.gmra.mxu0 %v3358_v5 }
  0xab   :  { %2035 = vmatprep.mubr.bf16.mxu1 %v3361_v6  ;;  %2132 = vmatprep.mubr.bf16.mxu0 %v3364_v7 }
  0xac   :  { %2275 = vmatpush2.bf16.msra.mxu0 %v3379_v8 }
  0xad   :  { %2276 = vmatprep.subr.bf16.mxu0 %v3429_v1  ;;  %v3373_v1 = vld [vmem:[%s4349_s0 + $0x328] ss:$56 sps:$4 sm:$0xff]  }
  0xb0   :  { %2277 = vmatpush2.bf16.msra.mxu0 %v3380_v9 }
  0xb2   :  { %2036 = vmatmul.mubr.bf16.gmra.mxu1 %v3363_v10  ;;  %2133 = vmatmul.mubr.bf16.gmra.mxu0 %v3367_v11 }
  0xb3   :  { %2043 = vmatprep.mubr.bf16.mxu1 %v3371_v12  ;;  %2140 = vmatprep.mubr.bf16.mxu0 %v3374_v13 }
  0xba   :  { %2044 = vmatmul.mubr.bf16.gmra.mxu1 %v3373_v1  ;;  %2141 = vmatmul.mubr.bf16.gmra.mxu0 %v3377_v14  ;;  %v3425_v1 = vld [vmem:[%s4349_s0 + $0x338] ss:$56 sps:$4 sm:$0xff]  }
  0xbb   :  { %2181 = vmatprep.mubr.bf16.mxu1 %v3383_v15  ;;  %2663 = vmatprep.mubr.msk.bf16.mxu0 %vm1639_vm0, %v3386_v16  ;;  %v3428_v14 = vld [vmem:[%s4349_s0 + $0x340] ss:$56 sps:$4 sm:$0xff]  }
  0xc2   :  { %2182 = vmatmul.mubr.bf16.vlgmr.msra.gmra.mxu1 %v3381_v17  ;;  %2279 = vmatmul.mubr.bf16.vlgmr.msra.gmra.mxu0 %v3384_v18 }
  0xc3   :  { %2189 = vmatprep.mubr.bf16.mxu1 %v3387_v19  ;;  %2664 = vmatprep.mubr.msk.bf16.mxu0 %vm1639_vm0, %v3390_v20 }
  0xca   :  { %2190 = vmatmul.mubr.bf16.gmra.mxu1 %v3389_v21  ;;  %2287 = vmatmul.mubr.bf16.gmra.mxu0 %v3392_v22 }
  0xcb   :  { %2197 = vmatprep.mubr.bf16.mxu1 %v3393_v23  ;;  %2665 = vmatprep.mubr.msk.bf16.mxu0 %vm1639_vm0, %v3396_v24 }
  0xd2   :  { %2198 = vmatmul.mubr.bf16.gmra.mxu1 %v3395_v25  ;;  %2295 = vmatmul.mubr.bf16.gmra.mxu0 %v3398_v26 }
  0xd3   :  { %2205 = vmatprep.mubr.bf16.mxu1 %v3399_v27  ;;  %2666 = vmatprep.mubr.msk.bf16.mxu0 %vm1639_vm0, %v3402_v28 }
  0xda   :  { %2206 = vmatmul.mubr.bf16.gmra.mxu1 %v3401_v29  ;;  %2303 = vmatmul.mubr.bf16.gmra.mxu0 %v3404_v30  ;;  %v362_v29 = vpop.permute.xlu0 %361 }
  0xdb   :  { %2213 = vmatprep.mubr.bf16.mxu1 %v3405_v31  ;;  %2667 = vmatprep.mubr.msk.bf16.mxu0 %vm1639_vm0, %v3408_v32 }
  0xe2   :  { %v2790_v37 = vpop.f32.mrf.mxu1  ;;  %2214 = vmatmul.mubr.bf16.gmra.mxu1 %v3407_v33  ;;  %v2766_v38 = vpop.f32.mrf.mxu0  ;;  %2311 = vmatmul.mubr.bf16.gmra.mxu0 %v3410_v34 }
  0xe3   :  { %2221 = vmatprep.mubr.bf16.mxu1 %v3411_v35  ;;  %2668 = vmatprep.mubr.msk.bf16.mxu0 %vm1639_vm0, %v3414_v36 }
  0xe4   :  { %v2791_v39 = vpop.f32.mrf.mxu1  ;;  %v2767_v40 = vpop.f32.mrf.mxu0 }
  0xe5   :  { %v4148_v41 = vadd.f32 %v2791_v39, %v2790_v37  ;;  %v4150_v42 = vadd.f32 %v2767_v40, %v2766_v38 }
  0xe6   :  { %v2793_v43 = vpop.f32.mrf.mxu1  ;;  %v2769_v44 = vpop.f32.mrf.mxu0 }
  0xe7   :  { %v1699_v36 = vadd.f32 %v4150_v42, %v362_v29 }
  0xe8   :  { %v2794_v49 = vpop.f32.mrf.mxu1  ;;  %v2770_v50 = vpop.f32.mrf.mxu0 }
  0xe9   :  { %v4164_v51 = vadd.f32 %v2794_v49, %v2793_v43  ;;  %v4166_v52 = vadd.f32 %v2770_v50, %v2769_v44  ;;  %v367_v43 = vpop.permute.xlu0 %366 }
  0xea   :  { %v2796_v53 = vpop.f32.mrf.mxu1  ;;  %2222 = vmatmul.mubr.bf16.gmra.mxu1 %v3413_v45  ;;  %v2772_v54 = vpop.f32.mrf.mxu0  ;;  %2319 = vmatmul.mubr.bf16.gmra.mxu0 %v3416_v46 }
  0xeb   :  { %2229 = vmatprep.mubr.bf16.mxu1 %v3417_v47  ;;  %2669 = vmatprep.mubr.msk.bf16.mxu0 %vm1639_vm0, %v3420_v48  ;;  %v372_v47 = vpop.permute.xlu1 %371  ;;  %v1702_v48 = vadd.f32 %v4166_v52, %v367_v43 }
  0xec   :  { %v2797_v55 = vpop.f32.mrf.mxu1  ;;  %v2773_v56 = vpop.f32.mrf.mxu0 }
  0xed   :  { %v4169_v57 = vadd.f32 %v2797_v55, %v2796_v53  ;;  %v4171_v58 = vadd.f32 %v2773_v56, %v2772_v54 }
  0xee   :  { %v2799_v59 = vpop.f32.mrf.mxu1  ;;  %v2775_v60 = vpop.f32.mrf.mxu0 }
  0xf0   :  { %v2800_v2 = vpop.f32.mrf.mxu1  ;;  %v2776_v3 = vpop.f32.mrf.mxu0 }
  0xf1   :  { %v4185_v4 = vadd.f32 %v2800_v2, %v2799_v59  ;;  %v4187_v5 = vadd.f32 %v2776_v3, %v2775_v60  ;;  %v1707_v60 = vadd.f32 %v4171_v58, %v372_v47  ;;  %v377_v3 = vpop.permute.xlu1 %376 }
  0xf2   :  { %v2802_v6 = vpop.f32.mrf.mxu1  ;;  %2230 = vmatmul.mubr.bf16.gmra.mxu1 %v3419_v61  ;;  %v2778_v7 = vpop.f32.mrf.mxu0  ;;  %2327 = vmatmul.mubr.bf16.gmra.mxu0 %v3422_v62 }
  0xf3   :  { %2237 = vmatprep.mubr.bf16.mxu1 %v3423_v63  ;;  %2670 = vmatprep.mubr.msk.bf16.mxu0 %vm1639_vm0, %v3426_v0 }
  0xf4   :  { %v2803_v8 = vpop.f32.mrf.mxu1  ;;  %v2779_v9 = vpop.f32.mrf.mxu0 }
  0xf5   :  { %v4190_v10 = vadd.f32 %v2803_v8, %v2802_v6  ;;  %v4192_v11 = vadd.f32 %v2779_v9, %v2778_v7  ;;  %v1710_v8 = vadd.f32 %v4187_v5, %v377_v3 }
  0xf6   :  { %v2805_v12 = vpop.f32.mrf.mxu1  ;;  %v2781_v13 = vpop.f32.mrf.mxu0 }
  0xf8   :  { %v2806_v15 = vpop.f32.mrf.mxu1  ;;  %v2782_v16 = vpop.f32.mrf.mxu0 }
  0xf9   :  { %v4200_v17 = vadd.f32 %v2806_v15, %v2805_v12  ;;  %v4202_v18 = vadd.f32 %v2782_v16, %v2781_v13  ;;  %v382_v15 = vpop.permute.xlu0 %381 }
  0xfa   :  { %v2808_v19 = vpop.f32.mrf.mxu1  ;;  %2238 = vmatmul.mubr.bf16.gmra.mxu1 %v3425_v1  ;;  %v2784_v20 = vpop.f32.mrf.mxu0  ;;  %2335 = vmatmul.mubr.bf16.gmra.mxu0 %v3428_v14 }
  0xfc   :  { %v2809_v21 = vpop.f32.mrf.mxu1  ;;  %v2785_v22 = vpop.f32.mrf.mxu0 }
  0xfd   :  { %v4204_v23 = vadd.f32 %v2809_v21, %v2808_v19  ;;  %v4206_v24 = vadd.f32 %v2785_v22, %v2784_v20  ;;  %v1715_v20 = vadd.f32 %v4192_v11, %v382_v15 }
  0xfe   :  { %v2811_v25 = vpop.f32.mrf.mxu1  ;;  %v2787_v26 = vpop.f32.mrf.mxu0 }
 0x100   :  { %v2812_v27 = vpop.f32.mrf.mxu1  ;;  %v2788_v28 = vpop.f32.mrf.mxu0 }
 0x101   :  { %v4208_v30 = vadd.f32 %v2812_v27, %v2811_v25  ;;  %v4210_v31 = vadd.f32 %v2788_v28, %v2787_v26  ;;  %v387_v28 = vpop.permute.xlu1 %386 }
 0x102   :  { %v2830_v32 = vpop.f32.mrf.mxu1  ;;  %v2894_v33 = vpop.f32.mrf.mxu0 }
 0x104   :  { %v2831_v34 = vpop.f32.mrf.mxu1  ;;  %v2895_v35 = vpop.f32.mrf.mxu0 }
 0x105   :  { %v2832_v37 = vadd.f32 %v2831_v34, %v2830_v32  ;;  %v2896_v38 = vadd.f32 %v2895_v35, %v2894_v33  ;;  %v1718_v33 = vadd.f32 %v4202_v18, %v387_v28 }
 0x106   :  { %v2833_v39 = vpop.f32.mrf.mxu1  ;;  %v2897_v40 = vpop.f32.mrf.mxu0 }
 0x107   :  { %v1796_v44 = vadd.f32 %v2832_v37, %v1699_v36 }
 0x108   :  { %v2834_v45 = vpop.f32.mrf.mxu1  ;;  %v2898_v46 = vpop.f32.mrf.mxu0 }
 0x109   :  { %v4214_v49 = vadd.f32 %v2896_v38, %v1796_v44  ;;  %v2835_v50 = vadd.f32 %v2834_v45, %v2833_v39  ;;  %v2899_v53 = vadd.f32 %v2898_v46, %v2897_v40  ;;  %v392_v39 = vpop.permute.xlu0 %391 }
 0x10a   :  { %v2836_v54 = vpop.f32.mrf.mxu1  ;;  %v2900_v55 = vpop.f32.mrf.mxu0  ;;  %v1723_v44 = vadd.f32 %v4206_v24, %v392_v39 }
 0x10b   :  { %v1799_v56 = vadd.f32 %v2835_v50, %v1702_v48 }
 0x10c   :  { %v2837_v59 = vpop.f32.mrf.mxu1  ;;  %v2901_v42 = vpop.f32.mrf.mxu0 }
 0x10d   :  { %v4217_v61 = vadd.f32 %v2899_v53, %v1799_v56  ;;  %v2838_v62 = vadd.f32 %v2837_v59, %v2836_v54  ;;  %v2902_v63 = vadd.f32 %v2901_v42, %v2900_v55  ;;  %v397_v53 = vpop.permute.xlu1 %396  ;;  %v402_v56 = vpop.permute.xlu0 %401 }
 0x10e   :  { %v2839_v0 = vpop.f32.mrf.mxu1  ;;  %v2903_v2 = vpop.f32.mrf.mxu0  ;;  %v1726_v59 = vadd.f32 %v4210_v31, %v397_v53 }
 0x10f   :  { %v1804_v6 = vadd.f32 %v2838_v62, %v1707_v60 }
 0x110   :  { %v2840_v52 = vpop.f32.mrf.mxu1  ;;  %v2904_v7 = vpop.f32.mrf.mxu0 }
 0x111   :  { %v4220_v9 = vadd.f32 %v2902_v63, %v1804_v6  ;;  %v2841_v12 = vadd.f32 %v2840_v52, %v2839_v0  ;;  %v2905_v13 = vadd.f32 %v2904_v7, %v2903_v2  ;;  %v1731_v6 = vadd.f32 %v4148_v41, %v402_v56  ;;  %v407_v52 = vpop.permute.xlu1 %406 }
 0x112   :  { %v2842_v1 = vpop.f32.mrf.mxu1  ;;  %v2906_v14 = vpop.f32.mrf.mxu0 }
 0x113   :  { %v1807_v58 = vadd.f32 %v2841_v12, %v1710_v8 }
 0x114   :  { %v2843_v16 = vpop.f32.mrf.mxu1  ;;  %v2907_v19 = vpop.f32.mrf.mxu0 }
 0x115   :  { %v4223_v21 = vadd.f32 %v2905_v13, %v1807_v58  ;;  %v2844_v22 = vadd.f32 %v2843_v16, %v2842_v1  ;;  %v2908_v25 = vadd.f32 %v2907_v19, %v2906_v14  ;;  %v1734_v58 = vadd.f32 %v4164_v51, %v407_v52  ;;  %v412_v16 = vpop.permute.xlu0 %411 }
 0x116   :  { %v2845_v26 = vpop.f32.mrf.mxu1  ;;  %v2909_v27 = vpop.f32.mrf.mxu0 }
 0x117   :  { %v1812_v5 = vadd.f32 %v2844_v22, %v1715_v20 }
 0x118   :  { %v2846_v29 = vpop.f32.mrf.mxu1  ;;  %v2910_v32 = vpop.f32.mrf.mxu0 }
 0x119   :  { %v4226_v34 = vadd.f32 %v2908_v25, %v1812_v5  ;;  %v2847_v35 = vadd.f32 %v2846_v29, %v2845_v26  ;;  %v2911_v36 = vadd.f32 %v2910_v32, %v2909_v27  ;;  %v1739_v5 = vadd.f32 %v4169_v57, %v412_v16  ;;  %v417_v29 = vpop.permute.xlu1 %416 }
 0x11a   :  { %v2848_v37 = vpop.f32.mrf.mxu1  ;;  %v2912_v38 = vpop.f32.mrf.mxu0 }
 0x11b   :  { %v1815_v11 = vadd.f32 %v2847_v35, %v1718_v33 }
 0x11c   :  { %v2849_v40 = vpop.f32.mrf.mxu1  ;;  %v2913_v43 = vpop.f32.mrf.mxu0 }
 0x11d   :  { %v4229_v45 = vadd.f32 %v2911_v36, %v1815_v11  ;;  %v2850_v46 = vadd.f32 %v2849_v40, %v2848_v37  ;;  %v2914_v47 = vadd.f32 %v2913_v43, %v2912_v38  ;;  %v1742_v11 = vadd.f32 %v4185_v4, %v417_v29  ;;  %v422_v40 = vpop.permute.xlu0 %421 }
 0x11e   :  { %v2851_v48 = vpop.f32.mrf.mxu1  ;;  %v2915_v50 = vpop.f32.mrf.mxu0 }
 0x11f   :  { %v1820_v18 = vadd.f32 %v2850_v46, %v1723_v44 }
 0x120   :  { %v2852_v54 = vpop.f32.mrf.mxu1  ;;  %v2916_v55 = vpop.f32.mrf.mxu0 }
 0x121   :  { %v4232_v42 = vadd.f32 %v2914_v47, %v1820_v18  ;;  %v2853_v60 = vadd.f32 %v2852_v54, %v2851_v48  ;;  %v2917_v62 = vadd.f32 %v2916_v55, %v2915_v50  ;;  %v1747_v18 = vadd.f32 %v4190_v10, %v422_v40  ;;  %v427_v54 = vpop.permute.xlu1 %426 }
 0x122   :  { %v2854_v63 = vpop.f32.mrf.mxu1  ;;  %v2918_v0 = vpop.f32.mrf.mxu0 }
 0x123   :  { %v1823_v24 = vadd.f32 %v2853_v60, %v1726_v59 }
 0x124   :  { %v2855_v2 = vpop.f32.mrf.mxu1  ;;  %v2919_v3 = vpop.f32.mrf.mxu0 }
 0x125   :  { %v4235_v7 = vadd.f32 %v2917_v62, %v1823_v24  ;;  %v2856_v8 = vadd.f32 %v2855_v2, %v2854_v63  ;;  %v2920_v12 = vadd.f32 %v2919_v3, %v2918_v0  ;;  %v1750_v24 = vadd.f32 %v4200_v17, %v427_v54  ;;  %v432_v2 = vpop.permute.xlu0 %431 }
 0x126   :  { %v2857_v13 = vpop.f32.mrf.mxu1  ;;  %v2921_v1 = vpop.f32.mrf.mxu0 }
 0x127   :  { %v1828_v14 = vadd.f32 %v2856_v8, %v1731_v6 }
 0x128   :  { %v2858_v31 = vpop.f32.mrf.mxu1  ;;  %v2922_v15 = vpop.f32.mrf.mxu0 }
 0x129   :  { %v4238_v19 = vadd.f32 %v2920_v12, %v1828_v14  ;;  %v2859_v20 = vadd.f32 %v2858_v31, %v2857_v13  ;;  %v2923_v22 = vadd.f32 %v2922_v15, %v2921_v1  ;;  %v1755_v14 = vadd.f32 %v4204_v23, %v432_v2  ;;  %v437_v31 = vpop.permute.xlu1 %436 }
 0x12a   :  { %v2860_v25 = vpop.f32.mrf.mxu1  ;;  %v2924_v26 = vpop.f32.mrf.mxu0 }
 0x12b   :  { %v1831_v41 = vadd.f32 %v2859_v20, %v1734_v58 }
 0x12c   :  { %v2861_v27 = vpop.f32.mrf.mxu1  ;;  %v2925_v28 = vpop.f32.mrf.mxu0 }
 0x12d   :  { %v4241_v32 = vadd.f32 %v2923_v22, %v1831_v41  ;;  %v2862_v33 = vadd.f32 %v2861_v27, %v2860_v25  ;;  %v2926_v35 = vadd.f32 %v2925_v28, %v2924_v26  ;;  %v1758_v41 = vadd.f32 %v4208_v30, %v437_v31 }
 0x12e   :  { %v2863_v36 = vpop.f32.mrf.mxu1  ;;  %v2927_v37 = vpop.f32.mrf.mxu0 }
 0x12f   :  { %v1836_v51 = vadd.f32 %v2862_v33, %v1739_v5 }
 0x130   :  { %v2864_v38 = vpop.f32.mrf.mxu1  ;;  %v2928_v39 = vpop.f32.mrf.mxu0 }
 0x131   :  { %v4244_v43 = vadd.f32 %v2926_v35, %v1836_v51  ;;  %v2865_v44 = vadd.f32 %v2864_v38, %v2863_v36  ;;  %v2929_v46 = vadd.f32 %v2928_v39, %v2927_v37 }
 0x132   :  { %v2866_v47 = vpop.f32.mrf.mxu1  ;;  %v2930_v48 = vpop.f32.mrf.mxu0 }
 0x133   :  { %v1839_v57 = vadd.f32 %v2865_v44, %v1742_v11 }
 0x134   :  { %v2867_v50 = vpop.f32.mrf.mxu1  ;;  %v2931_v53 = vpop.f32.mrf.mxu0 }
 0x135   :  { %v4247_v55 = vadd.f32 %v2929_v46, %v1839_v57  ;;  %v2868_v56 = vadd.f32 %v2867_v50, %v2866_v47  ;;  %v2932_v59 = vadd.f32 %v2931_v53, %v2930_v48 }
 0x136   :  { %v2869_v60 = vpop.f32.mrf.mxu1  ;;  %v2933_v62 = vpop.f32.mrf.mxu0 }
 0x137   :  { %v1844_v4 = vadd.f32 %v2868_v56, %v1747_v18 }
 0x138   :  { %v2870_v63 = vpop.f32.mrf.mxu1  ;;  %v2934_v0 = vpop.f32.mrf.mxu0 }
 0x139   :  { %v4250_v3 = vadd.f32 %v2932_v59, %v1844_v4  ;;  %v2871_v6 = vadd.f32 %v2870_v63, %v2869_v60  ;;  %v2935_v52 = vadd.f32 %v2934_v0, %v2933_v62 }
 0x13a   :  { %v2872_v8 = vpop.f32.mrf.mxu1  ;;  %v2936_v12 = vpop.f32.mrf.mxu0 }
 0x13b   :  { %v1847_v10 = vadd.f32 %v2871_v6, %v1750_v24 }
 0x13c   :  { %v2873_v13 = vpop.f32.mrf.mxu1  ;;  %v2937_v1 = vpop.f32.mrf.mxu0 }
 0x13d   :  { %v4253_v15 = vadd.f32 %v2935_v52, %v1847_v10  ;;  %v2874_v58 = vadd.f32 %v2873_v13, %v2872_v8  ;;  %v2938_v16 = vadd.f32 %v2937_v1, %v2936_v12 }
 0x13e   :  { %v2875_v20 = vpop.f32.mrf.mxu1  ;;  %v2939_v22 = vpop.f32.mrf.mxu0 }
 0x13f   :  { %v1852_v17 = vadd.f32 %v2874_v58, %v1755_v14 }
 0x140   :  { %v2876_v25 = vpop.f32.mrf.mxu1  ;;  %v2940_v26 = vpop.f32.mrf.mxu0 }
 0x141   :  { %v4256_v27 = vadd.f32 %v2938_v16, %v1852_v17  ;;  %v2877_v28 = vadd.f32 %v2876_v25, %v2875_v20  ;;  %v2941_v5 = vadd.f32 %v2940_v26, %v2939_v22 }
 0x142   :  { %v2958_v29 = vpop.f32.mrf.mxu1  ;;  %v3022_v33 = vpop.f32.mrf.mxu0 }
 0x143   :  { %v1855_v35 = vadd.f32 %v2877_v28, %v1758_v41 }
 0x144   :  { %v2959_v23 = vpop.f32.mrf.mxu1  ;;  %v3023_v36 = vpop.f32.mrf.mxu0 }
 0x145   :  { %v4258_v37 = vadd.f32 %v2941_v5, %v1855_v35  ;;  %v2960_v51 = vadd.f32 %v2959_v23, %v2958_v29  ;;  %v3024_v38 = vadd.f32 %v3023_v36, %v3022_v33 }
 0x146   :  { %v2961_v39 = vpop.f32.mrf.mxu1  ;;  %v3025_v11 = vpop.f32.mrf.mxu0 }
 0x147   :  { %v1990_v40 = vadd.f32 %v2960_v51, %v4214_v49 }
 0x148   :  { %v2962_v44 = vpop.f32.mrf.mxu1  ;;  %v3026_v46 = vpop.f32.mrf.mxu0 }
 0x149   :  { %v4261_v30 = vadd.f32 %v3024_v38, %v1990_v40  ;;  %v2963_v47 = vadd.f32 %v2962_v44, %v2961_v39  ;;  %v3027_v53 = vadd.f32 %v3026_v46, %v3025_v11 }
 0x14a   :  { %v2964_v48 = vpop.f32.mrf.mxu1  ;;  %v3028_v57 = vpop.f32.mrf.mxu0 }
 0x14b   :  { %v1993_v50 = vadd.f32 %v2963_v47, %v4217_v61 }
 0x14c   :  { %v2965_v18 = vpop.f32.mrf.mxu1  ;;  %v3029_v54 = vpop.f32.mrf.mxu0 }
 0x14d   :  { %v4264_v56 = vadd.f32 %v3027_v53, %v1993_v50  ;;  %v2966_v59 = vadd.f32 %v2965_v18, %v2964_v48  ;;  %v3030_v60 = vadd.f32 %v3029_v54, %v3028_v57 }
 0x14e   :  { %v2967_v62 = vpop.f32.mrf.mxu1  ;;  %v3031_v4 = vpop.f32.mrf.mxu0 }
 0x14f   :  { %v1998_v49 = vadd.f32 %v2966_v59, %v4220_v9 }
 0x150   :  { %v2968_v63 = vpop.f32.mrf.mxu1  ;;  %v3032_v0 = vpop.f32.mrf.mxu0 }
 0x151   :  { %v4267_v24 = vadd.f32 %v3030_v60, %v1998_v49  ;;  %v2969_v2 = vadd.f32 %v2968_v63, %v2967_v62  ;;  %v3033_v8 = vadd.f32 %v3032_v0, %v3031_v4 }
 0x152   :  { %v2970_v6 = vpop.f32.mrf.mxu1  ;;  %v3034_v52 = vpop.f32.mrf.mxu0 }
 0x153   :  { %v2001_v61 = vadd.f32 %v2969_v2, %v4223_v21 }
 0x154   :  { %v2971_v12 = vpop.f32.mrf.mxu1  ;;  %v3035_v10 = vpop.f32.mrf.mxu0 }
 0x155   :  { %v4270_v13 = vadd.f32 %v3033_v8, %v2001_v61  ;;  %v2972_v1 = vadd.f32 %v2971_v12, %v2970_v6  ;;  %v3036_v14 = vadd.f32 %v3035_v10, %v3034_v52 }
 0x156   :  { %v2973_v31 = vpop.f32.mrf.mxu1  ;;  %v3037_v58 = vpop.f32.mrf.mxu0 }
 0x157   :  { %v2006_v9 = vadd.f32 %v2972_v1, %v4226_v34 }
 0x158   :  { %v2974_v16 = vpop.f32.mrf.mxu1  ;;  %v3038_v20 = vpop.f32.mrf.mxu0 }
 0x159   :  { %v4273_v22 = vadd.f32 %v3036_v14, %v2006_v9  ;;  %v2975_v17 = vadd.f32 %v2974_v16, %v2973_v31  ;;  %v3039_v41 = vadd.f32 %v3038_v20, %v3037_v58 }
 0x15a   :  { %v2976_v25 = vpop.f32.mrf.mxu1  ;;  %v3040_v26 = vpop.f32.mrf.mxu0 }
 0x15b   :  { %v2009_v21 = vadd.f32 %v2975_v17, %v4229_v45 }
 0x15c   :  { %v2977_v28 = vpop.f32.mrf.mxu1  ;;  %v3041_v5 = vpop.f32.mrf.mxu0 }
 0x15d   :  { %v4276_v29 = vadd.f32 %v3039_v41, %v2009_v21  ;;  %v2978_v33 = vadd.f32 %v2977_v28, %v2976_v25  ;;  %v3042_v35 = vadd.f32 %v3041_v5, %v3040_v26 }
 0x15e   :  { %v2979_v23 = vpop.f32.mrf.mxu1  ;;  %v3043_v36 = vpop.f32.mrf.mxu0 }
 0x15f   :  { %v2014_v34 = vadd.f32 %v2978_v33, %v4232_v42 }
 0x160   :  { %v2980_v51 = vpop.f32.mrf.mxu1  ;;  %v3044_v38 = vpop.f32.mrf.mxu0 }
 0x161   :  { %v4279_v39 = vadd.f32 %v3042_v35, %v2014_v34  ;;  %v2981_v11 = vadd.f32 %v2980_v51, %v2979_v23  ;;  %v3045_v46 = vadd.f32 %v3044_v38, %v3043_v36 }
 0x162   :  { %v2982_v40 = vpop.f32.mrf.mxu1  ;;  %v3046_v44 = vpop.f32.mrf.mxu0 }
 0x163   :  { %v2017_v45 = vadd.f32 %v2981_v11, %v4235_v7 }
 0x164   :  { %v2983_v47 = vpop.f32.mrf.mxu1  ;;  %v3047_v48 = vpop.f32.mrf.mxu0 }
 0x165   :  { %v4282_v57 = vadd.f32 %v3045_v46, %v2017_v45  ;;  %v2984_v50 = vadd.f32 %v2983_v47, %v2982_v40  ;;  %v3048_v53 = vadd.f32 %v3047_v48, %v3046_v44 }
 0x166   :  { %v2985_v18 = vpop.f32.mrf.mxu1  ;;  %v3049_v54 = vpop.f32.mrf.mxu0 }
 0x167   :  { %v2022_v42 = vadd.f32 %v2984_v50, %v4238_v19 }
 0x168   :  { %v2986_v59 = vpop.f32.mrf.mxu1  ;;  %v3050_v60 = vpop.f32.mrf.mxu0 }
 0x169   :  { %v4285_v62 = vadd.f32 %v3048_v53, %v2022_v42  ;;  %v2987_v4 = vadd.f32 %v2986_v59, %v2985_v18  ;;  %v3051_v0 = vadd.f32 %v3050_v60, %v3049_v54 }
 0x16a   :  { %v2988_v49 = vpop.f32.mrf.mxu1  ;;  %v3052_v63 = vpop.f32.mrf.mxu0 }
 0x16b   :  { %v2025_v7 = vadd.f32 %v2987_v4, %v4241_v32 }
 0x16c   :  { %v2989_v2 = vpop.f32.mrf.mxu1  ;;  %v3053_v6 = vpop.f32.mrf.mxu0 }
 0x16d   :  { %v4288_v52 = vadd.f32 %v3051_v0, %v2025_v7  ;;  %v2990_v61 = vadd.f32 %v2989_v2, %v2988_v49  ;;  %v3054_v8 = vadd.f32 %v3053_v6, %v3052_v63 }
 0x16e   :  { %v2991_v12 = vpop.f32.mrf.mxu1  ;;  %v3055_v10 = vpop.f32.mrf.mxu0 }
 0x16f   :  { %v2030_v19 = vadd.f32 %v2990_v61, %v4244_v43 }
 0x170   :  { %v2992_v1 = vpop.f32.mrf.mxu1  ;;  %v3056_v14 = vpop.f32.mrf.mxu0 }
 0x171   :  { %v4291_v31 = vadd.f32 %v3054_v8, %v2030_v19  ;;  %v2993_v58 = vadd.f32 %v2992_v1, %v2991_v12  ;;  %v3057_v20 = vadd.f32 %v3056_v14, %v3055_v10 }
 0x172   :  { %v2994_v9 = vpop.f32.mrf.mxu1  ;;  %v3058_v16 = vpop.f32.mrf.mxu0 }
 0x173   :  { %v2033_v32 = vadd.f32 %v2993_v58, %v4247_v55 }
 0x174   :  { %v2995_v17 = vpop.f32.mrf.mxu1  ;;  %v3059_v25 = vpop.f32.mrf.mxu0 }
 0x175   :  { %v4294_v26 = vadd.f32 %v3057_v20, %v2033_v32  ;;  %v2996_v21 = vadd.f32 %v2995_v17, %v2994_v9  ;;  %v3060_v41 = vadd.f32 %v3059_v25, %v3058_v16 }
 0x176   :  { %v2997_v28 = vpop.f32.mrf.mxu1  ;;  %v3061_v5 = vpop.f32.mrf.mxu0 }
 0x177   :  { %v2038_v43 = vadd.f32 %v2996_v21, %v4250_v3 }
 0x178   :  { %v2998_v33 = vpop.f32.mrf.mxu1  ;;  %v3062_v35 = vpop.f32.mrf.mxu0 }
 0x179   :  { %v4297_v23 = vadd.f32 %v3060_v41, %v2038_v43  ;;  %v2999_v36 = vadd.f32 %v2998_v33, %v2997_v28  ;;  %v3063_v38 = vadd.f32 %v3062_v35, %v3061_v5 }
 0x17a   :  { %v3000_v34 = vpop.f32.mrf.mxu1  ;;  %v3064_v51 = vpop.f32.mrf.mxu0 }
 0x17b   :  { %v2041_v55 = vadd.f32 %v2999_v36, %v4253_v15 }
 0x17c   :  { %v3001_v11 = vpop.f32.mrf.mxu1  ;;  %v3065_v40 = vpop.f32.mrf.mxu0 }
 0x17d   :  { %v4300_v44 = vadd.f32 %v3063_v38, %v2041_v55  ;;  %v3002_v45 = vadd.f32 %v3001_v11, %v3000_v34  ;;  %v3066_v46 = vadd.f32 %v3065_v40, %v3064_v51 }
 0x17e   :  { %v3003_v47 = vpop.f32.mrf.mxu1  ;;  %v3067_v48 = vpop.f32.mrf.mxu0 }
 0x17f   :  { %v2046_v3 = vadd.f32 %v3002_v45, %v4256_v27 }
 0x180   :  { %v3004_v50 = vpop.f32.mrf.mxu1  ;;  %v3068_v53 = vpop.f32.mrf.mxu0 }
 0x181   :  { %v4303_v18 = vadd.f32 %v3066_v46, %v2046_v3  ;;  %v3005_v54 = vadd.f32 %v3004_v50, %v3003_v47  ;;  %v3069_v60 = vadd.f32 %v3068_v53, %v3067_v48 }
 0x182   :  { %v3086_v42 = vpop.f32.mrf.mxu1  ;;  %v2280_v59 = vpop.f32.mrf.mxu0 }
 0x183   :  { %v2049_v15 = vadd.f32 %v3005_v54, %v4258_v37 }
 0x184   :  { %v3087_v4 = vpop.f32.mrf.mxu1  ;;  %v2282_v49 = vpop.f32.mrf.mxu0 }
 0x185   :  { %v4306_v63 = vadd.f32 %v3069_v60, %v2049_v15  ;;  %v3088_v7 = vadd.f32 %v3087_v4, %v3086_v42 }
 0x186   :  { %v3089_v0 = vpop.f32.mrf.mxu1  ;;  %v2283_v2 = vpop.f32.mrf.mxu0 }
 0x187   :  { %v2184_v6 = vadd.f32 %v3088_v7, %v4261_v30 }
 0x188   :  { %v3090_v27 = vpop.f32.mrf.mxu1  ;;  %v2285_v61 = vpop.f32.mrf.mxu0 }
 0x189   :  { %v3091_v8 = vadd.f32 %v3090_v27, %v3089_v0  ;;  %v2281_v19 = vadd.f32 %v2280_v59, %v2184_v6 }
 0x18a   :  { %v3092_v12 = vpop.f32.mrf.mxu1  ;;  %v2288_v10 = vpop.f32.mrf.mxu0 }
 0x18b   :  { %v2187_v1 = vadd.f32 %v3091_v8, %v4264_v56  ;;  %v2343_v20 = vmax.f32 %v2281_v19, 0.0 }
 0x18c   :  { %v3093_v14 = vpop.f32.mrf.mxu1  ;;  %v2290_v37 = vpop.f32.mrf.mxu0 }
 0x18d   :  { %v2284_v58 = vadd.f32 %v2283_v2, %v2187_v1  ;;  %v3094_v9 = vadd.f32 %v3093_v14, %v3092_v12 }
 0x18e   :  { %v3095_v16 = vpop.f32.mrf.mxu1  ;;  %v2291_v32 = vpop.f32.mrf.mxu0 }
 0x18f   :  { %v2344_v17 = vmax.f32 %v2284_v58, 0.0  ;;  %v2192_v25 = vadd.f32 %v3094_v9, %v4267_v24 }
 0x190   :  { %v3096_v21 = vpop.f32.mrf.mxu1  ;;  %v2293_v30 = vpop.f32.mrf.mxu0 }
 0x191   :  { %v2706_v41 = vpack.c.bf16 %v2344_v17, %v2343_v20  ;;  %v3097_v28 = vadd.f32 %v3096_v21, %v3095_v16  ;;  %v2289_v56 = vadd.f32 %v2288_v10, %v2192_v25 }
 0x192   :  { %v3098_v5 = vpop.f32.mrf.mxu1  ;;  %v2296_v43 = vpop.f32.mrf.mxu0 }
 0x193   :  { %2707 = vst [vmem:[%s4351_s3] sm:$0xff] %v2706_v41   ;;  %v2195_v33 = vadd.f32 %v3097_v28, %v4270_v13  ;;  %v2345_v24 = vmax.f32 %v2289_v56, 0.0 }
 0x194   :  { %v3099_v35 = vpop.f32.mrf.mxu1  ;;  %v2298_v36 = vpop.f32.mrf.mxu0 }
 0x195   :  { %v2292_v34 = vadd.f32 %v2291_v32, %v2195_v33  ;;  %v3100_v51 = vadd.f32 %v3099_v35, %v3098_v5 }
 0x196   :  { %v3101_v55 = vpop.f32.mrf.mxu1  ;;  %v2299_v38 = vpop.f32.mrf.mxu0 }
 0x197   :  { %v2346_v11 = vmax.f32 %v2292_v34, 0.0  ;;  %v2200_v40 = vadd.f32 %v3100_v51, %v4273_v22 }
 0x198   :  { %v3102_v45 = vpop.f32.mrf.mxu1  ;;  %v2301_v46 = vpop.f32.mrf.mxu0 }
 0x199   :  { %v2711_v47 = vpack.c.bf16 %v2346_v11, %v2345_v24  ;;  %v3103_v48 = vadd.f32 %v3102_v45, %v3101_v55  ;;  %v2297_v13 = vadd.f32 %v2296_v43, %v2200_v40 }
 0x19a   :  { %v3104_v3 = vpop.f32.mrf.mxu1  ;;  %v2304_v50 = vpop.f32.mrf.mxu0 }
 0x19b   :  { %2743 = vst [vmem:[%s4351_s3 + $0x8] sm:$0xff] %v2711_v47   ;;  %v2203_v53 = vadd.f32 %v3103_v48, %v4276_v29  ;;  %v2347_v22 = vmax.f32 %v2297_v13, 0.0 }
 0x19c   :  { %v3105_v54 = vpop.f32.mrf.mxu1  ;;  %v2306_v42 = vpop.f32.mrf.mxu0 }
 0x19d   :  { %v2300_v59 = vadd.f32 %v2299_v38, %v2203_v53  ;;  %v3106_v15 = vadd.f32 %v3105_v54, %v3104_v3 }
 0x19e   :  { %v3107_v60 = vpop.f32.mrf.mxu1  ;;  %v2307_v4 = vpop.f32.mrf.mxu0 }
 0x19f   :  { %v2348_v49 = vmax.f32 %v2300_v59, 0.0  ;;  %v2208_v7 = vadd.f32 %v3106_v15, %v4279_v39 }
 0x1a0   :  { %v3108_v0 = vpop.f32.mrf.mxu1  ;;  %v2309_v2 = vpop.f32.mrf.mxu0 }
 0x1a1   :  { %v2716_v6 = vpack.c.bf16 %v2348_v49, %v2347_v22  ;;  %v3109_v27 = vadd.f32 %v3108_v0, %v3107_v60  ;;  %v2305_v29 = vadd.f32 %v2304_v50, %v2208_v7 }
 0x1a2   :  { %v3110_v61 = vpop.f32.mrf.mxu1  ;;  %v2312_v8 = vpop.f32.mrf.mxu0 }
 0x1a3   :  { %2744 = vst [vmem:[%s4351_s3 + $0x10] sm:$0xff] %v2716_v6   ;;  %v2211_v12 = vadd.f32 %v3109_v27, %v4282_v57  ;;  %v2349_v39 = vmax.f32 %v2305_v29, 0.0 }
 0x1a4   :  { %v3111_v10 = vpop.f32.mrf.mxu1  ;;  %v2314_v19 = vpop.f32.mrf.mxu0 }
 0x1a5   :  { %v2308_v1 = vadd.f32 %v2307_v4, %v2211_v12  ;;  %v3112_v14 = vadd.f32 %v3111_v10, %v3110_v61 }
 0x1a6   :  { %v3113_v37 = vpop.f32.mrf.mxu1  ;;  %v2315_v58 = vpop.f32.mrf.mxu0 }
 0x1a7   :  { %v2350_v9 = vmax.f32 %v2308_v1, 0.0  ;;  %v2216_v16 = vadd.f32 %v3112_v14, %v4285_v62 }
 0x1a8   :  { %v3114_v32 = vpop.f32.mrf.mxu1  ;;  %v2317_v20 = vpop.f32.mrf.mxu0 }
 0x1a9   :  { %v2721_v17 = vpack.c.bf16 %v2350_v9, %v2349_v39  ;;  %v3115_v25 = vadd.f32 %v3114_v32, %v3113_v37  ;;  %v2313_v57 = vadd.f32 %v2312_v8, %v2216_v16 }
 0x1aa   :  { %v3116_v21 = vpop.f32.mrf.mxu1  ;;  %v2320_v30 = vpop.f32.mrf.mxu0 }
 0x1ab   :  { %2745 = vst [vmem:[%s4351_s3 + $0x18] sm:$0xff] %v2721_v17   ;;  %v2219_v41 = vadd.f32 %v3115_v25, %v4288_v52  ;;  %v2351_v62 = vmax.f32 %v2313_v57, 0.0 }
 0x1ac   :  { %v3117_v28 = vpop.f32.mrf.mxu1  ;;  %v2322_v5 = vpop.f32.mrf.mxu0 }
 0x1ad   :  { %v2316_v43 = vadd.f32 %v2315_v58, %v2219_v41  ;;  %v3118_v56 = vadd.f32 %v3117_v28, %v3116_v21 }
 0x1ae   :  { %v3119_v33 = vpop.f32.mrf.mxu1  ;;  %v2323_v35 = vpop.f32.mrf.mxu0 }
 0x1af   :  { %v2352_v36 = vmax.f32 %v2316_v43, 0.0  ;;  %v2224_v34 = vadd.f32 %v3118_v56, %v4291_v31 }
 0x1b0   :  { %v3120_v51 = vpop.f32.mrf.mxu1  ;;  %v2325_v55 = vpop.f32.mrf.mxu0 }
 0x1b1   :  { %v2726_v38 = vpack.c.bf16 %v2352_v36, %v2351_v62  ;;  %v3121_v24 = vadd.f32 %v3120_v51, %v3119_v33  ;;  %v2321_v52 = vadd.f32 %v2320_v30, %v2224_v34 }
 0x1b2   :  { %v3122_v11 = vpop.f32.mrf.mxu1  ;;  %v2328_v40 = vpop.f32.mrf.mxu0 }
 0x1b3   :  { %2746 = vst [vmem:[%s4351_s3 + $0x20] sm:$0xff] %v2726_v38   ;;  %v2227_v45 = vadd.f32 %v3121_v24, %v4294_v26  ;;  %v2353_v31 = vmax.f32 %v2321_v52, 0.0 }
 0x1b4   :  { %v3123_v46 = vpop.f32.mrf.mxu1  ;;  %v2330_v47 = vpop.f32.mrf.mxu0 }
 0x1b5   :  { %v2324_v48 = vadd.f32 %v2323_v35, %v2227_v45  ;;  %v3124_v3 = vadd.f32 %v3123_v46, %v3122_v11 }
 0x1b6   :  { %v3125_v50 = vpop.f32.mrf.mxu1  ;;  %v2331_v13 = vpop.f32.mrf.mxu0 }
 0x1b7   :  { %v2354_v53 = vmax.f32 %v2324_v48, 0.0  ;;  %v2232_v54 = vadd.f32 %v3124_v3, %v4297_v23 }
 0x1b8   :  { %v3126_v42 = vpop.f32.mrf.mxu1  ;;  %v2333_v59 = vpop.f32.mrf.mxu0 }
 0x1b9   :  { %v2731_v15 = vpack.c.bf16 %v2354_v53, %v2353_v31  ;;  %v3127_v60 = vadd.f32 %v3126_v42, %v3125_v50  ;;  %v2329_v26 = vadd.f32 %v2328_v40, %v2232_v54 }
 0x1ba   :  { %v3128_v4 = vpop.f32.mrf.mxu1  ;;  %v2336_v22 = vpop.f32.mrf.mxu0 }
 0x1bb   :  { %2747 = vst [vmem:[%s4351_s3 + $0x28] sm:$0xff] %v2731_v15   ;;  %v2235_v49 = vadd.f32 %v3127_v60, %v4300_v44  ;;  %v2355_v23 = vmax.f32 %v2329_v26, 0.0 }
 0x1bc   :  { %v3129_v7 = vpop.f32.mrf.mxu1  ;;  %v2338_v0 = vpop.f32.mrf.mxu0 }
 0x1bd   :  { %v2332_v2 = vadd.f32 %v2331_v13, %v2235_v49  ;;  %v3130_v6 = vadd.f32 %v3129_v7, %v3128_v4 }
 0x1be   :  { %v3131_v27 = vpop.f32.mrf.mxu1  ;;  %v2339_v61 = vpop.f32.mrf.mxu0 }
 0x1bf   :  { %v2356_v8 = vmax.f32 %v2332_v2, 0.0  ;;  %v2240_v29 = vadd.f32 %v3130_v6, %v4303_v18 }
 0x1c0   :  { %v3132_v12 = vpop.f32.mrf.mxu1  ;;  %v2341_v10 = vpop.f32.mrf.mxu0 }
 0x1c1   :  { %v2736_v19 = vpack.c.bf16 %v2356_v8, %v2355_v23  ;;  %v3133_v1 = vadd.f32 %v3132_v12, %v3131_v27  ;;  %v2337_v14 = vadd.f32 %v2336_v22, %v2240_v29 }
 0x1c3   :  { %2748 = vst [vmem:[%s4351_s3 + $0x30] sm:$0xff] %v2736_v19   ;;  %v2243_v44 = vadd.f32 %v3133_v1, %v4306_v63  ;;  %v2357_v58 = vmax.f32 %v2337_v14, 0.0 }
 0x1c5   :  { %v2340_v37 = vadd.f32 %v2339_v61, %v2243_v44 }
 0x1c7   :  { %v2358_v39 = vmax.f32 %v2340_v37, 0.0 }
 0x1c9   :  { %v2741_v9 = vpack.c.bf16 %v2358_v39, %v2357_v58 }
 0x1cb   :  { %2749 = vst [vmem:[%s4351_s3 + $0x38] sm:$0xff] %v2741_v9  }

// kernel: d2_forward.9
= control target key start
LH: loop header
LB: loop body
LE: loop exit
PB: predicated region body
PF: predicated region fallthrough
CT: control target
= control target key end

     0   :  { %s8465_s0 = inlined_call_operand.vmem [shape: bf16[128,3456], index: 0, kind: input, shape index: {}]   ;;  %s8466_s1 = inlined_call_operand.vmem [shape: bf16[3456,32], index: 1, kind: input, shape index: {}]   ;;  %s8467_s2 = inlined_call_operand.vmem [shape: f32[128,1], index: 2, kind: input, shape index: {}]   ;;  %s8468_s3 = inlined_call_operand.vmem [shape: f32[128,32], index: 3, kind: input, shape index: {}]   ;;  %s8469_s4 = inlined_call_operand.vmem [shape: f32[32,2], index: 4, kind: input, shape index: {}]   ;;  %s8470_s5 = inlined_call_operand.<no memory space> [shape: f32[1,1], index: 5, kind: input, shape index: {}]   ;;  %s8471_s6 = inlined_call_operand.hbm [shape: f32[1,2], index: 6, kind: output, shape index: {}]  }
   0x1   :  { %v11_v0 = vstv %s8470_s5 }
   0x2   :  { %12 = vst [vmem:[#allocation2] sm:$0x1] %v11_v0 }
   0x3   :  { %v6052_v1 = vld [vmem:[%s8466_s1 + $0x78] sm:$0xff]   ;;  %v6614_v3 = vmov 0   ;;  %v6056_v6 = vld [vmem:[%s8466_s1 + $0x70] sm:$0xff]   ;;  %v6060_v10 = vld [vmem:[%s8466_s1 + $0x68] sm:$0xff]  }
   0x4   :  { %v6053_v2 = vld [vmem:[%s8466_s1 + $0x38] sm:$0xff]   ;;  %6050 = vset.pattern.permute.xlu0 %v6614_v3  ;;  %6051 = vset.pattern.permute.xlu1 %v6614_v3  ;;  %v6057_v7 = vld [vmem:[%s8466_s1 + $0x30] sm:$0xff]   ;;  %v6061_v11 = vld [vmem:[%s8466_s1 + $0x28] sm:$0xff]  }
   0x5   :  { %5150 = vmatprep.subr.bf16.mxu0 %v6052_v1  ;;  %v6054_v4 = vld [vmem:[%s8466_s1 + $0xf8] sm:$0xff]   ;;  %v6058_v8 = vld [vmem:[%s8466_s1 + $0xf0] sm:$0xff]   ;;  %v6062_v12 = vld [vmem:[%s8466_s1 + $0xe8] sm:$0xff]  }
   0x6   :  { %5151 = vmatpush3.bf16.msra.mxu0 %v6053_v2  ;;  %v6055_v5 = vld [vmem:[%s8466_s1 + $0xb8] sm:$0xff]   ;;  %5214 = vmatprep.subr.bf16.mxu1 %v6054_v4  ;;  %v6059_v9 = vld [vmem:[%s8466_s1 + $0xb0] sm:$0xff]   ;;  %v6063_v13 = vld [vmem:[%s8466_s1 + $0xa8] sm:$0xff]  }
   0x7   :  { %5215 = vmatpush3.bf16.msra.mxu1 %v6055_v5  ;;  %5152 = vmatprep.subr.bf16.mxu0 %v6056_v6  ;;  %v6064_v14 = vld [vmem:[%s8466_s1 + $0x60] sm:$0xff]   ;;  %v6068_v18 = vld [vmem:[%s8466_s1 + $0x58] sm:$0xff]   ;;  %v6072_v22 = vld [vmem:[%s8466_s1 + $0x50] sm:$0xff]  }
   0x8   :  { %5216 = vmatprep.subr.bf16.mxu1 %v6058_v8  ;;  %v6065_v15 = vld [vmem:[%s8466_s1 + $0x20] sm:$0xff]   ;;  %v6069_v19 = vld [vmem:[%s8466_s1 + $0x18] sm:$0xff]   ;;  %v6073_v23 = vld [vmem:[%s8466_s1 + $0x10] sm:$0xff]  }
   0x9   :  { %v6066_v16 = vld [vmem:[%s8466_s1 + $0xe0] sm:$0xff]   ;;  %v6070_v20 = vld [vmem:[%s8466_s1 + $0xd8] sm:$0xff]   ;;  %v6074_v24 = vld [vmem:[%s8466_s1 + $0xd0] sm:$0xff]  }
   0xa   :  { %5153 = vmatpush3.bf16.msra.mxu0 %v6057_v7  ;;  %v6067_v17 = vld [vmem:[%s8466_s1 + $0xa0] sm:$0xff]   ;;  %v6071_v21 = vld [vmem:[%s8466_s1 + $0x98] sm:$0xff]   ;;  %v6075_v25 = vld [vmem:[%s8466_s1 + $0x90] sm:$0xff]  }
   0xb   :  { %5217 = vmatpush3.bf16.msra.mxu1 %v6059_v9  ;;  %5154 = vmatprep.subr.bf16.mxu0 %v6060_v10  ;;  %v6076_v26 = vld [vmem:[%s8466_s1 + $0x48] sm:$0xff]   ;;  %v6080_v30 = vld [vmem:[%s8466_s1 + $0x40] sm:$0xff]   ;;  %v6087_v36 = vld [vmem:[%s8466_s1 + $0x178] sm:$0xff]  }
   0xc   :  { %5218 = vmatprep.subr.bf16.mxu1 %v6062_v12  ;;  %v6077_v27 = vld [vmem:[%s8466_s1 + $0x8] sm:$0xff]   ;;  %v6081_v31 = vld [vmem:[%s8466_s1] sm:$0xff]   ;;  %v6091_v39 = vld [vmem:[%s8466_s1 + $0x138] sm:$0xff]  }
   0xd   :  { %v6078_v28 = vld [vmem:[%s8466_s1 + $0xc8] sm:$0xff]   ;;  %v6082_v32 = vld [vmem:[%s8466_s1 + $0xc0] sm:$0xff]   ;;  %v6095_v42 = vld [vmem:[%s8466_s1 + $0x170] sm:$0xff]  }
   0xe   :  { %5155 = vmatpush3.bf16.msra.mxu0 %v6061_v11  ;;  %v6079_v29 = vld [vmem:[%s8466_s1 + $0x88] sm:$0xff]   ;;  %v6085_v34 = vld [vmem:[%s8465_s0 + $0x4] ss:$108 sps:$4 sm:$0xff]   ;;  %v6100_v46 = vld [vmem:[%s8465_s0 + $0x1b4] ss:$108 sps:$4 sm:$0xff]  }
   0xf   :  { %5219 = vmatpush3.bf16.msra.mxu1 %v6063_v13  ;;  %5156 = vmatprep.subr.bf16.mxu0 %v6064_v14  ;;  %v6083_v33 = vld [vmem:[%s8465_s0] ss:$108 sps:$4 sm:$0xff]   ;;  %v6088_v37 = vld [vmem:[%s8465_s0 + $0x8] ss:$108 sps:$4 sm:$0xff]   ;;  %v6094_v41 = vld [vmem:[%s8465_s0 + $0xd8] ss:$108 sps:$4 sm:$0xff]  }
  0x10   :  { %5220 = vmatprep.subr.bf16.mxu1 %v6066_v16  ;;  %v6086_v35 = vld [vmem:[%s8466_s1 + $0x80] sm:$0xff]   ;;  %3195 = vmatprep.mubr.bf16.mxu0 %v6085_v34  ;;  %v6090_v38 = vld [vmem:[%s8465_s0 + $0xc] ss:$108 sps:$4 sm:$0xff]   ;;  %v6092_v40 = vld [vmem:[%s8465_s0 + $0xdc] ss:$108 sps:$4 sm:$0xff]  }
  0x11   :  { %3292 = vmatprep.mubr.bf16.mxu1 %v6090_v38  ;;  %v6096_v43 = vld [vmem:[%s8465_s0 + $0xe4] ss:$108 sps:$4 sm:$0xff]   ;;  %v6099_v45 = vld [vmem:[%s8465_s0 + $0xe0] ss:$108 sps:$4 sm:$0xff]   ;;  %v6104_v48 = vld [vmem:[%s8465_s0 + $0x1bc] ss:$108 sps:$4 sm:$0xff]  }
  0x12   :  { %5157 = vmatpush3.bf16.msra.mxu0 %v6065_v15  ;;  %v6098_v44 = vld [vmem:[%s8466_s1 + $0x130] sm:$0xff]   ;;  %v6103_v47 = vld [vmem:[%s8466_s1 + $0x168] sm:$0xff]   ;;  %v6111_v52 = vld [vmem:[%s8466_s1 + $0x160] sm:$0xff]  }
  0x13   :  { %5221 = vmatpush3.bf16.msra.mxu1 %v6067_v17  ;;  %5158 = vmatprep.subr.bf16.mxu0 %v6068_v18  ;;  %v6106_v49 = vld [vmem:[%s8466_s1 + $0x128] sm:$0xff]   ;;  %v6102_v50 = vld [vmem:[%s8465_s0 + $0x1b0] ss:$108 sps:$4 sm:$0xff]   ;;  %v6107_v53 = vld [vmem:[%s8465_s0 + $0x1b8] ss:$108 sps:$4 sm:$0xff]  }
  0x14   :  { %5222 = vmatprep.subr.bf16.mxu1 %v6070_v20  ;;  %v6108_v51 = vld [vmem:[%s8465_s0 + $0x28c] ss:$108 sps:$4 sm:$0xff]   ;;  %v6114_v54 = vld [vmem:[%s8466_s1 + $0x120] sm:$0xff]   ;;  %v6110_v57 = vld [vmem:[%s8465_s0 + $0x288] ss:$108 sps:$4 sm:$0xff]  }
  0x15   :  { %v6112_v55 = vld [vmem:[%s8465_s0 + $0x294] ss:$108 sps:$4 sm:$0xff]   ;;  %v6119_v56 = vld [vmem:[%s8466_s1 + $0x158] sm:$0xff]   ;;  %v6116_v59 = vld [vmem:[%s8465_s0 + $0x364] ss:$108 sps:$4 sm:$0xff]  }
  0x16   :  { %5159 = vmatpush3.bf16.msra.mxu0 %v6069_v19  ;;  %v6120_v58 = vld [vmem:[%s8466_s1 + $0x1f8] sm:$0xff]   ;;  %v6126_v63 = vld [vmem:[%s8466_s1 + $0x1f0] sm:$0xff]   ;;  %v6118_v3 = vld [vmem:[%s8465_s0 + $0x360] ss:$108 sps:$4 sm:$0xff]  }
  0x17   :  { %5223 = vmatpush3.bf16.msra.mxu1 %v6071_v21  ;;  %5160 = vmatprep.subr.bf16.mxu0 %v6072_v22  ;;  %v6123_v60 = vld [vmem:[%s8466_s1 + $0x118] sm:$0xff]   ;;  %v6129_v1 = vld [vmem:[%s8466_s1 + $0x1b0] sm:$0xff]   ;;  %v6136_v7 = vld [vmem:[%s8466_s1 + $0x1e8] sm:$0xff]  }
  0x18   :  { %5224 = vmatprep.subr.bf16.mxu1 %v6074_v24  ;;  %v6124_v61 = vld [vmem:[%s8466_s1 + $0x1b8] sm:$0xff]   ;;  %v6131_v2 = vld [vmem:[%s8466_s1 + $0x150] sm:$0xff]   ;;  %v6137_v8 = vld [vmem:[%s8466_s1 + $0x1a8] sm:$0xff]  }
  0x19   :  { %v6115_v62 = vld [vmem:[%s8465_s0 + $0x290] ss:$108 sps:$4 sm:$0xff]   ;;  %v6121_v0 = vld [vmem:[%s8465_s0 + $0x36c] ss:$108 sps:$4 sm:$0xff]   ;;  %v6125_v6 = vld [vmem:[%s8465_s0 + $0x368] ss:$108 sps:$4 sm:$0xff]  }
  0x1a   :  { %5161 = vmatpush3.bf16.msra.mxu0 %v6073_v23  ;;  %v6127_v4 = vld [vmem:[%s8465_s0 + $0x43c] ss:$108 sps:$4 sm:$0xff]   ;;  %v6134_v5 = vld [vmem:[%s8466_s1 + $0x110] sm:$0xff]   ;;  %v6138_v9 = vld [vmem:[%s8466_s1 + $0x1e0] sm:$0xff]  }
  0x1b   :  { %5225 = vmatpush3.bf16.msra.mxu1 %v6075_v25  ;;  %5162 = vmatprep.subr.bf16.mxu0 %v6076_v26  ;;  %v6132_v10 = vld [vmem:[%s8465_s0 + $0x444] ss:$108 sps:$4 sm:$0xff]   ;;  %v6143_v12 = vld [vmem:[%s8466_s1 + $0x148] sm:$0xff]   ;;  %v6139_v15 = vld [vmem:[%s8465_s0 + $0x514] ss:$108 sps:$4 sm:$0xff]  }
  0x1c   :  { %5226 = vmatprep.subr.bf16.mxu1 %v6078_v28  ;;  %v6141_v11 = vld [vmem:[%s8466_s1 + $0x1a0] sm:$0xff]   ;;  %v6146_v16 = vld [vmem:[%s8466_s1 + $0x108] sm:$0xff]   ;;  %v6148_v18 = vld [vmem:[%s8466_s1 + $0x1d8] sm:$0xff]  }
  0x1d   :  { %v6130_v13 = vld [vmem:[%s8465_s0 + $0x438] ss:$108 sps:$4 sm:$0xff]   ;;  %v6135_v14 = vld [vmem:[%s8465_s0 + $0x440] ss:$108 sps:$4 sm:$0xff]   ;;  %v6144_v17 = vld [vmem:[%s8465_s0 + $0x51c] ss:$108 sps:$4 sm:$0xff]  }
  0x1e   :  { %5163 = vmatpush3.bf16.msra.mxu0 %v6077_v27  ;;  %v6149_v19 = vld [vmem:[%s8466_s1 + $0x198] sm:$0xff]   ;;  %v6150_v20 = vld [vmem:[%s8466_s1 + $0x1d0] sm:$0xff]   ;;  %v6155_v23 = vld [vmem:[%s8466_s1 + $0x140] sm:$0xff]  }
  0x1f   :  { %5227 = vmatpush3.bf16.msra.mxu1 %v6079_v29  ;;  %5164 = vmatprep.subr.bf16.mxu0 %v6080_v30  ;;  %v6142_v21 = vld [vmem:[%s8465_s0 + $0x510] ss:$108 sps:$4 sm:$0xff]   ;;  %v6151_v24 = vld [vmem:[%s8465_s0 + $0x5ec] ss:$108 sps:$4 sm:$0xff]   ;;  %v6158_v26 = vld [vmem:[%s8466_s1 + $0x100] sm:$0xff]  }
  0x20   :  { %5228 = vmatprep.subr.bf16.mxu1 %v6082_v32  ;;  %v6153_v22 = vld [vmem:[%s8466_s1 + $0x190] sm:$0xff]   ;;  %v6147_v25 = vld [vmem:[%s8465_s0 + $0x518] ss:$108 sps:$4 sm:$0xff]   ;;  %v6160_v28 = vld [vmem:[%s8466_s1 + $0x1c8] sm:$0xff]  }
  0x21   :  { %v6156_v27 = vld [vmem:[%s8465_s0 + $0x5f4] ss:$108 sps:$4 sm:$0xff]   ;;  %v6161_v29 = vld [vmem:[%s8466_s1 + $0x188] sm:$0xff]   ;;  %v6163_v38 = vld [vmem:[%s8465_s0 + $0x10] ss:$108 sps:$4 sm:$0xff]  }
  0x22   :  { %5165 = vmatpush3.bf16.msra.mxu0 %v6081_v31  ;;  %v6162_v30 = vld [vmem:[%s8466_s1 + $0x1c0] sm:$0xff]   ;;  %v6154_v31 = vld [vmem:[%s8465_s0 + $0x5e8] ss:$108 sps:$4 sm:$0xff]  }
  0x23   :  { %5229 = vmatpush3.bf16.msra.mxu1 %v6086_v35  ;;  %5278 = vmatprep.subr.bf16.mxu0 %v6087_v36  ;;  %v6166_v32 = vld [vmem:[%s8466_s1 + $0x180] sm:$0xff]   ;;  %v6159_v35 = vld [vmem:[%s8465_s0 + $0x5f0] ss:$108 sps:$4 sm:$0xff]  }
  0x24   :  { %5342 = vmatprep.subr.bf16.mxu1 %v6120_v58  ;;  %v6165_v34 = vld [vmem:[%s8465_s0 + $0x14] ss:$108 sps:$4 sm:$0xff]   ;;  %v6170_v36 = vld [vmem:[%s8465_s0 + $0x1c] ss:$108 sps:$4 sm:$0xff]  }
  0x25   :  { %3196 = vmatmul.mubr.bf16.vlgmr.msra.gmra.mxu0 %v6083_v33  ;;  %v6167_v33 = vld [vmem:[%s8466_s1 + $0x278] sm:$0xff]  }
  0x26   :  { %5279 = vmatpush3.bf16.msra.mxu0 %v6091_v39  ;;  %3293 = vmatmul.mubr.bf16.vlgmr.msra.gmra.mxu1 %v6088_v37  ;;  %v683_v37 = vld [vmem:[%s8467_s2] sm:$0xff]  ;;  %v684_v39 = vld [vmem:[%s8467_s2 + $0x8] sm:$0xff]  ;;  %v6199_v58 = vld [vmem:[%s8466_s1 + $0x258] sm:$0xff]  }
  0x27   :  { %3203 = vmatprep.mubr.bf16.mxu0 %v6092_v40  ;;  %5280 = vmatprep.subr.bf16.mxu0 %v6095_v42  ;;  %v6171_v40 = vld [vmem:[%s8466_s1 + $0x238] sm:$0xff]   ;;  %v6175_v42 = vld [vmem:[%s8466_s1 + $0x270] sm:$0xff]  }
  0x28   :  { %3300 = vmatprep.mubr.bf16.mxu1 %v6096_v43  ;;  %5343 = vmatpush3.bf16.msra.mxu1 %v6124_v61  ;;  %v685_v43 = vld [vmem:[%s8467_s2 + $0x10] sm:$0xff]  ;;  %v6182_v61 = vld [vmem:[%s8465_s0 + $0x1c0] ss:$108 sps:$4 sm:$0xff]  }
  0x29   :  { %5344 = vmatprep.subr.bf16.mxu1 %v6126_v63  ;;  %701 = vperm.xlu0 %6050, %v683_v37   ;;  %v6187_v63 = vld [vmem:[%s8465_s0 + $0x1c8] ss:$108 sps:$4 sm:$0xff]  }
  0x2a   :  { %5281 = vmatpush3.bf16.msra.mxu0 %v6098_v44  ;;  %v6168_v44 = vld [vmem:[%s8465_s0 + $0x18] ss:$108 sps:$4 sm:$0xff]   ;;  %711 = vperm.xlu1 %6051, %v685_v43   ;;  %v6240_v37 = vld [vmem:[%s8466_s1 + $0x2c8] sm:$0xff]  }
  0x2b   :  { %5282 = vmatprep.subr.bf16.mxu0 %v6103_v47  ;;  %v686_v47 = vld [vmem:[%s8467_s2 + $0x18] sm:$0xff]  ;;  %v6246_v43 = vld [vmem:[%s8466_s1 + $0x280] sm:$0xff]  }
  0x2c   :  { %5345 = vmatpush3.bf16.msra.mxu1 %v6129_v1  ;;  %v6204_v1 = vld [vmem:[%s8466_s1 + $0x2b8] sm:$0xff]  }
  0x2d   :  { %3204 = vmatmul.mubr.bf16.gmra.mxu0 %v6094_v41  ;;  %5346 = vmatprep.subr.bf16.mxu1 %v6136_v7  ;;  %v6172_v41 = vld [vmem:[%s8465_s0 + $0xec] ss:$108 sps:$4 sm:$0xff]   ;;  %v691_v7 = vld [vmem:[%s8467_s2 + $0x40] sm:$0xff] }
  0x2e   :  { %3211 = vmatprep.mubr.bf16.mxu0 %v6100_v46  ;;  %3301 = vmatmul.mubr.bf16.gmra.mxu1 %v6099_v45  ;;  %v6176_v45 = vld [vmem:[%s8465_s0 + $0xf4] ss:$108 sps:$4 sm:$0xff]  }
  0x2f   :  { %3308 = vmatprep.mubr.bf16.mxu1 %v6104_v48  ;;  %5283 = vmatpush3.bf16.msra.mxu0 %v6106_v49  ;;  %v6178_v46 = vld [vmem:[%s8466_s1 + $0x230] sm:$0xff]   ;;  %v6183_v49 = vld [vmem:[%s8466_s1 + $0x268] sm:$0xff]  }
  0x30   :  { %5284 = vmatprep.subr.bf16.mxu0 %v6111_v52  ;;  %5347 = vmatpush3.bf16.msra.mxu1 %v6137_v8  ;;  %v6174_v48 = vld [vmem:[%s8465_s0 + $0xe8] ss:$108 sps:$4 sm:$0xff]   ;;  %v6190_v8 = vld [vmem:[%s8465_s0 + $0x298] ss:$108 sps:$4 sm:$0xff]  }
  0x31   :  { %5348 = vmatprep.subr.bf16.mxu1 %v6138_v9  ;;  %706 = vperm.xlu0 %6050, %v684_v39   ;;  %v6186_v52 = vld [vmem:[%s8466_s1 + $0x228] sm:$0xff]   ;;  %v6214_v9 = vld [vmem:[%s8466_s1 + $0x210] sm:$0xff]  }
  0x32   :  { %716 = vperm.xlu1 %6051, %v686_v47   ;;  %v696_v39 = vld [vmem:[%s8467_s2 + $0x68] sm:$0xff]  ;;  %v6236_v47 = vld [vmem:[%s8465_s0 + $0x604] ss:$108 sps:$4 sm:$0xff]  }
  0x33   :  { %5285 = vmatpush3.bf16.msra.mxu0 %v6114_v54  ;;  %v6191_v54 = vld [vmem:[%s8466_s1 + $0x260] sm:$0xff]  }
  0x34   :  { %5286 = vmatprep.subr.bf16.mxu0 %v6119_v56  ;;  %5349 = vmatpush3.bf16.msra.mxu1 %v6141_v11  ;;  %v6184_v56 = vld [vmem:[%s8465_s0 + $0x1cc] ss:$108 sps:$4 sm:$0xff]   ;;  %v6196_v11 = vld [vmem:[%s8465_s0 + $0x374] ss:$108 sps:$4 sm:$0xff]  }
  0x35   :  { %3212 = vmatmul.mubr.bf16.gmra.mxu0 %v6102_v50  ;;  %5350 = vmatprep.subr.bf16.mxu1 %v6148_v18  ;;  %v6180_v50 = vld [vmem:[%s8465_s0 + $0x1c4] ss:$108 sps:$4 sm:$0xff]  }
  0x36   :  { %3219 = vmatprep.mubr.bf16.mxu0 %v6108_v51  ;;  %3309 = vmatmul.mubr.bf16.gmra.mxu1 %v6107_v53  ;;  %v687_v51 = vld [vmem:[%s8467_s2 + $0x20] sm:$0xff]  ;;  %v6179_v53 = vld [vmem:[%s8465_s0 + $0xf0] ss:$108 sps:$4 sm:$0xff]  }
  0x37   :  { %3316 = vmatprep.mubr.bf16.mxu1 %v6112_v55  ;;  %5287 = vmatpush3.bf16.msra.mxu0 %v6123_v60  ;;  %v688_v55 = vld [vmem:[%s8467_s2 + $0x28] sm:$0xff]  ;;  %v689_v60 = vld [vmem:[%s8467_s2 + $0x30] sm:$0xff]  ;;  %v6221_v18 = vld [vmem:[%s8466_s1 + $0x2a0] sm:$0xff]  }
  0x38   :  { %5288 = vmatprep.subr.bf16.mxu0 %v6131_v2  ;;  %5351 = vmatpush3.bf16.msra.mxu1 %v6149_v19  ;;  %v690_v2 = vld [vmem:[%s8467_s2 + $0x38] sm:$0xff]  ;;  %v6223_v19 = vld [vmem:[%s8466_s1 + $0x248] sm:$0xff]  }
  0x39   :  { %5352 = vmatprep.subr.bf16.mxu1 %v6150_v20  ;;  %721 = vperm.xlu0 %6050, %v687_v51   ;;  %v693_v20 = vld [vmem:[%s8467_s2 + $0x50] sm:$0xff]  ;;  %v6239_v51 = vld [vmem:[%s8465_s0 + $0x600] ss:$108 sps:$4 sm:$0xff]  }
  0x3a   :  { %726 = vperm.xlu1 %6051, %v688_v55   ;;  %v6252_v55 = vld [vmem:[%s8465_s0 + $0xfc] ss:$108 sps:$4 sm:$0xff]  }
  0x3b   :  { %5289 = vmatpush3.bf16.msra.mxu0 %v6134_v5  ;;  %v6209_v5 = vld [vmem:[%s8466_s1 + $0x2b0] sm:$0xff]  }
  0x3c   :  { %5290 = vmatprep.subr.bf16.mxu0 %v6143_v12  ;;  %5353 = vmatpush3.bf16.msra.mxu1 %v6153_v22  ;;  %v6201_v12 = vld [vmem:[%s8465_s0 + $0x37c] ss:$108 sps:$4 sm:$0xff]   ;;  %v6207_v22 = vld [vmem:[%s8465_s0 + $0x44c] ss:$108 sps:$4 sm:$0xff]  }
  0x3d   :  { %3220 = vmatmul.mubr.bf16.gmra.mxu0 %v6110_v57  ;;  %5354 = vmatprep.subr.bf16.mxu1 %v6160_v28  ;;  %v6194_v57 = vld [vmem:[%s8466_s1 + $0x220] sm:$0xff]   ;;  %v6230_v28 = vld [vmem:[%s8466_s1 + $0x2d0] sm:$0xff]  }
  0x3e   :  { %3227 = vmatprep.mubr.bf16.mxu0 %v6116_v59  ;;  %3317 = vmatmul.mubr.bf16.gmra.mxu1 %v6115_v62  ;;  %v6200_v59 = vld [vmem:[%s8466_s1 + $0x2f8] sm:$0xff]  }
  0x3f   :  { %3324 = vmatprep.mubr.bf16.mxu1 %v6121_v0  ;;  %5291 = vmatpush3.bf16.msra.mxu0 %v6146_v16  ;;  %v6188_v62 = vld [vmem:[%s8465_s0 + $0x29c] ss:$108 sps:$4 sm:$0xff]   ;;  %v6218_v16 = vld [vmem:[%s8466_s1 + $0x2e0] sm:$0xff]  }
  0x40   :  { %5292 = vmatprep.subr.bf16.mxu0 %v6155_v23  ;;  %5355 = vmatpush3.bf16.msra.mxu1 %v6161_v29  ;;  %v6203_v0 = vld [vmem:[%s8466_s1 + $0x218] sm:$0xff]   ;;  %v6212_v23 = vld [vmem:[%s8465_s0 + $0x454] ss:$108 sps:$4 sm:$0xff]  }
  0x41   :  { %5356 = vmatprep.subr.bf16.mxu1 %v6162_v30  ;;  %731 = vperm.xlu0 %6050, %v689_v60   ;;  %v6210_v29 = vld [vmem:[%s8465_s0 + $0x448] ss:$108 sps:$4 sm:$0xff]   ;;  %v6219_v30 = vld [vmem:[%s8465_s0 + $0x524] ss:$108 sps:$4 sm:$0xff]  }
  0x42   :  { %736 = vperm.xlu1 %6051, %v690_v2   ;;  %v6263_v60 = vld [vmem:[%s8466_s1 + $0x368] sm:$0xff]   ;;  %v6284_v2 = vld [vmem:[%s8466_s1 + $0x3b8] sm:$0xff]  }
  0x43   :  { %5293 = vmatpush3.bf16.msra.mxu0 %v6158_v26  ;;  %v6229_v26 = vld [vmem:[%s8466_s1 + $0x298] sm:$0xff]  }
  0x44   :  { %5357 = vmatpush3.bf16.msra.mxu1 %v6166_v32  ;;  %5406 = vmatprep.subr.bf16.mxu0 %v6167_v33  ;;  %v6235_v32 = vld [vmem:[%s8466_s1 + $0x240] sm:$0xff]  }
  0x45   :  { %3228 = vmatmul.mubr.bf16.gmra.mxu0 %v6118_v3  ;;  %5470 = vmatprep.subr.bf16.mxu1 %v6200_v59  ;;  %v6206_v3 = vld [vmem:[%s8466_s1 + $0x2f0] sm:$0xff]   ;;  %v695_v33 = vld [vmem:[%s8467_s2 + $0x60] sm:$0xff] }
  0x46   :  { %3235 = vmatprep.mubr.bf16.mxu0 %v6127_v4  ;;  %3325 = vmatmul.mubr.bf16.gmra.mxu1 %v6125_v6  ;;  %v6192_v4 = vld [vmem:[%s8465_s0 + $0x2a4] ss:$108 sps:$4 sm:$0xff]  }
  0x47   :  { %3332 = vmatprep.mubr.bf16.mxu1 %v6132_v10  ;;  %v6211_v6 = vld [vmem:[%s8466_s1 + $0x250] sm:$0xff]   ;;  %741 = vperm.xlu0 %6050, %v691_v7   ;;  %v6195_v10 = vld [vmem:[%s8465_s0 + $0x2a0] ss:$108 sps:$4 sm:$0xff]  }
  0x48   :  { %v6258_v59 = vld [vmem:[%s8466_s1 + $0x330] sm:$0xff]  }
  0x49   :  { %v6289_v7 = vld [vmem:[%s8466_s1 + $0x3b0] sm:$0xff]  }
  0x4b   :  { %751 = vperm.xlu0 %6050, %v693_v20   ;;  %v6303_v20 = vld [vmem:[%s8466_s1 + $0x348] sm:$0xff]  }
  0x4d   :  { %3236 = vmatmul.mubr.bf16.gmra.mxu0 %v6130_v13  ;;  %v6216_v13 = vld [vmem:[%s8466_s1 + $0x2e8] sm:$0xff]  }
  0x4e   :  { %3243 = vmatprep.mubr.bf16.mxu0 %v6139_v15  ;;  %3333 = vmatmul.mubr.bf16.gmra.mxu1 %v6135_v14  ;;  %v6217_v14 = vld [vmem:[%s8466_s1 + $0x2a8] sm:$0xff]  }
  0x4f   :  { %3340 = vmatprep.mubr.bf16.mxu1 %v6144_v17  ;;  %v692_v15 = vld [vmem:[%s8467_s2 + $0x48] sm:$0xff]  ;;  %v6198_v17 = vld [vmem:[%s8465_s0 + $0x370] ss:$108 sps:$4 sm:$0xff]   ;;  %761 = vperm.xlu0 %6050, %v695_v33  }
  0x50   :  { %746 = vperm.xlu1 %6051, %v692_v15   ;;  %v6272_v15 = vld [vmem:[%s8465_s0 + $0x2b4] ss:$108 sps:$4 sm:$0xff]  }
  0x51   :  { %v6285_v33 = vld [vmem:[%s8465_s0 + $0x388] ss:$108 sps:$4 sm:$0xff]  }
  0x55   :  { %3244 = vmatmul.mubr.bf16.gmra.mxu0 %v6142_v21  ;;  %v6205_v21 = vld [vmem:[%s8465_s0 + $0x378] ss:$108 sps:$4 sm:$0xff]  }
  0x56   :  { %3251 = vmatprep.mubr.bf16.mxu0 %v6151_v24  ;;  %3341 = vmatmul.mubr.bf16.gmra.mxu1 %v6147_v25  ;;  %v6226_v24 = vld [vmem:[%s8466_s1 + $0x208] sm:$0xff]   ;;  %v6228_v25 = vld [vmem:[%s8466_s1 + $0x2d8] sm:$0xff]  }
  0x57   :  { %3348 = vmatprep.mubr.bf16.mxu1 %v6156_v27  ;;  %v694_v27 = vld [vmem:[%s8467_s2 + $0x58] sm:$0xff] }
  0x58   :  { %756 = vperm.xlu1 %6051, %v694_v27   ;;  %v6309_v27 = vld [vmem:[%s8466_s1 + $0x398] sm:$0xff]  }
  0x5c   :  { %766 = vperm.xlu1 %6051, %v696_v39   ;;  %v6290_v39 = vld [vmem:[%s8465_s0 + $0x458] ss:$108 sps:$4 sm:$0xff]  }
  0x5d   :  { %3252 = vmatmul.mubr.bf16.gmra.mxu0 %v6154_v31  ;;  %v6233_v31 = vld [vmem:[%s8466_s1 + $0x290] sm:$0xff]  }
  0x5e   :  { %3389 = vmatprep.mubr.bf16.mxu0 %v6165_v34  ;;  %3349 = vmatmul.mubr.bf16.gmra.mxu1 %v6159_v35  ;;  %v6215_v34 = vld [vmem:[%s8465_s0 + $0x450] ss:$108 sps:$4 sm:$0xff]   ;;  %v6224_v35 = vld [vmem:[%s8465_s0 + $0x52c] ss:$108 sps:$4 sm:$0xff]  }
  0x5f   :  { %3486 = vmatprep.mubr.bf16.mxu1 %v6170_v36  ;;  %v6238_v36 = vld [vmem:[%s8466_s1 + $0x200] sm:$0xff]  }
  0x65   :  { %3390 = vmatmul.mubr.bf16.vlgmr.msra.gmra.mxu0 %v6163_v38  ;;  %v6241_v38 = vld [vmem:[%s8466_s1 + $0x288] sm:$0xff]  }
  0x66   :  { %5407 = vmatpush3.bf16.msra.mxu0 %v6171_v40  ;;  %3397 = vmatprep.mubr.bf16.mxu0 %v6172_v41  ;;  %v6242_v40 = vld [vmem:[%s8466_s1 + $0x2c0] sm:$0xff]  }
  0x67   :  { %5408 = vmatprep.subr.bf16.mxu0 %v6175_v42  ;;  %3487 = vmatmul.mubr.bf16.vlgmr.msra.gmra.mxu1 %v6168_v44  ;;  %v6222_v41 = vld [vmem:[%s8465_s0 + $0x520] ss:$108 sps:$4 sm:$0xff]   ;;  %v6231_v42 = vld [vmem:[%s8465_s0 + $0x5fc] ss:$108 sps:$4 sm:$0xff]  }
  0x68   :  { %3494 = vmatprep.mubr.bf16.mxu1 %v6176_v45  ;;  %5471 = vmatpush3.bf16.msra.mxu1 %v6204_v1  ;;  %v6247_v44 = vld [vmem:[%s8466_s1 + $0x378] sm:$0xff]   ;;  %v697_v45 = vld [vmem:[%s8467_s2 + $0x70] sm:$0xff]  ;;  %v6259_v1 = vld [vmem:[%s8465_s0 + $0x100] ss:$108 sps:$4 sm:$0xff]  }
  0x69   :  { %5472 = vmatprep.subr.bf16.mxu1 %v6206_v3  ;;  %771 = vperm.xlu0 %6050, %v697_v45   ;;  %v6271_v3 = vld [vmem:[%s8466_s1 + $0x360] sm:$0xff]   ;;  %v6302_v45 = vld [vmem:[%s8465_s0 + $0x530] ss:$108 sps:$4 sm:$0xff]  }
  0x6a   :  { %5409 = vmatpush3.bf16.msra.mxu0 %v6178_v46  ;;  %v6227_v46 = vld [vmem:[%s8465_s0 + $0x528] ss:$108 sps:$4 sm:$0xff]  }
  0x6b   :  { %5410 = vmatprep.subr.bf16.mxu0 %v6183_v49  ;;  %v6234_v49 = vld [vmem:[%s8465_s0 + $0x5f8] ss:$108 sps:$4 sm:$0xff]  }
  0x6c   :  { %5473 = vmatpush3.bf16.msra.mxu1 %v6209_v5  ;;  %v6264_v5 = vld [vmem:[%s8465_s0 + $0x1dc] ss:$108 sps:$4 sm:$0xff]  }
  0x6d   :  { %3398 = vmatmul.mubr.bf16.gmra.mxu0 %v6174_v48  ;;  %5474 = vmatprep.subr.bf16.mxu1 %v6216_v13  ;;  %v698_v48 = vld [vmem:[%s8467_s2 + $0x78] sm:$0xff] }
  0x6e   :  { %3405 = vmatprep.mubr.bf16.mxu0 %v6180_v50  ;;  %5411 = vmatpush3.bf16.msra.mxu0 %v6186_v52  ;;  %v6245_v50 = vld [vmem:[%s8465_s0 + $0x24] ss:$108 sps:$4 sm:$0xff]   ;;  %v6250_v52 = vld [vmem:[%s8465_s0 + $0x2c] ss:$108 sps:$4 sm:$0xff]  }
  0x6f   :  { %5412 = vmatprep.subr.bf16.mxu0 %v6191_v54  ;;  %3495 = vmatmul.mubr.bf16.gmra.mxu1 %v6179_v53  ;;  %v6243_v53 = vld [vmem:[%s8465_s0 + $0x20] ss:$108 sps:$4 sm:$0xff]   ;;  %v6251_v54 = vld [vmem:[%s8466_s1 + $0x338] sm:$0xff]  }
  0x70   :  { %3502 = vmatprep.mubr.bf16.mxu1 %v6184_v56  ;;  %5475 = vmatpush3.bf16.msra.mxu1 %v6217_v14  ;;  %v6255_v56 = vld [vmem:[%s8466_s1 + $0x370] sm:$0xff]   ;;  %v6267_v13 = vld [vmem:[%s8465_s0 + $0x1d8] ss:$108 sps:$4 sm:$0xff]   ;;  %v6296_v14 = vld [vmem:[%s8466_s1 + $0x3e8] sm:$0xff]  }
  0x71   :  { %5476 = vmatprep.subr.bf16.mxu1 %v6218_v16  ;;  %776 = vperm.xlu1 %6051, %v698_v48   ;;  %v6297_v16 = vld [vmem:[%s8466_s1 + $0x3a8] sm:$0xff]   ;;  %v6316_v48 = vld [vmem:[%s8465_s0 + $0x614] ss:$108 sps:$4 sm:$0xff]  }
  0x72   :  { %5413 = vmatpush3.bf16.msra.mxu0 %v6194_v57  ;;  %v6248_v57 = vld [vmem:[%s8465_s0 + $0x28] ss:$108 sps:$4 sm:$0xff]  }
  0x73   :  { %5414 = vmatprep.subr.bf16.mxu0 %v6199_v58  ;;  %v6256_v58 = vld [vmem:[%s8465_s0 + $0x104] ss:$108 sps:$4 sm:$0xff]  }
  0x74   :  { %5477 = vmatpush3.bf16.msra.mxu1 %v6221_v18  ;;  %v6294_v18 = vld [vmem:[%s8466_s1 + $0x310] sm:$0xff]  }
  0x75   :  { %3406 = vmatmul.mubr.bf16.gmra.mxu0 %v6182_v61  ;;  %5478 = vmatprep.subr.bf16.mxu1 %v6228_v25  ;;  %v6254_v61 = vld [vmem:[%s8465_s0 + $0xf8] ss:$108 sps:$4 sm:$0xff]  }
  0x76   :  { %3413 = vmatprep.mubr.bf16.mxu0 %v6188_v62  ;;  %5415 = vmatpush3.bf16.msra.mxu0 %v6203_v0  ;;  %v6280_v62 = vld [vmem:[%s8466_s1 + $0x3f8] sm:$0xff]   ;;  %v6266_v0 = vld [vmem:[%s8466_s1 + $0x328] sm:$0xff]  }
  0x77   :  { %3503 = vmatmul.mubr.bf16.gmra.mxu1 %v6187_v63  ;;  %5416 = vmatprep.subr.bf16.mxu0 %v6211_v6  ;;  %v6260_v63 = vld [vmem:[%s8465_s0 + $0x1d4] ss:$108 sps:$4 sm:$0xff]   ;;  %v6281_v25 = vld [vmem:[%s8465_s0 + $0x38c] ss:$108 sps:$4 sm:$0xff]  }
  0x78   :  { %3510 = vmatprep.mubr.bf16.mxu1 %v6192_v4  ;;  %5479 = vmatpush3.bf16.msra.mxu1 %v6229_v26  ;;  %v6286_v4 = vld [vmem:[%s8466_s1 + $0x3f0] sm:$0xff]   ;;  %v6274_v6 = vld [vmem:[%s8466_s1 + $0x320] sm:$0xff]   ;;  %v6308_v26 = vld [vmem:[%s8466_s1 + $0x3d8] sm:$0xff]  }
  0x79   :  { %5480 = vmatprep.subr.bf16.mxu1 %v6230_v28  ;;  %v6310_v28 = vld [vmem:[%s8466_s1 + $0x3d0] sm:$0xff]  }
  0x7a   :  { %5417 = vmatpush3.bf16.msra.mxu0 %v6214_v9  ;;  %v6279_v9 = vld [vmem:[%s8466_s1 + $0x358] sm:$0xff]  }
  0x7b   :  { %5418 = vmatprep.subr.bf16.mxu0 %v6223_v19  ;;  %v6301_v19 = vld [vmem:[%s8466_s1 + $0x3a0] sm:$0xff]  }
  0x7c   :  { %5481 = vmatpush3.bf16.msra.mxu1 %v6233_v31  ;;  %v6315_v31 = vld [vmem:[%s8466_s1 + $0x340] sm:$0xff]  }
  0x7d   :  { %3414 = vmatmul.mubr.bf16.gmra.mxu0 %v6190_v8  ;;  %5482 = vmatprep.subr.bf16.mxu1 %v6240_v37  ;;  %v6262_v8 = vld [vmem:[%s8465_s0 + $0x1d0] ss:$108 sps:$4 sm:$0xff]   ;;  %v6321_v37 = vld [vmem:[%s8466_s1 + $0x388] sm:$0xff]  }
  0x7e   :  { %3421 = vmatprep.mubr.bf16.mxu0 %v6196_v11  ;;  %5419 = vmatpush3.bf16.msra.mxu0 %v6226_v24  ;;  %v6283_v11 = vld [vmem:[%s8466_s1 + $0x318] sm:$0xff]   ;;  %v6306_v24 = vld [vmem:[%s8466_s1 + $0x308] sm:$0xff]  }
  0x7f   :  { %3511 = vmatmul.mubr.bf16.gmra.mxu1 %v6195_v10  ;;  %5420 = vmatprep.subr.bf16.mxu0 %v6235_v32  ;;  %v6268_v10 = vld [vmem:[%s8465_s0 + $0x2ac] ss:$108 sps:$4 sm:$0xff]   ;;  %v6287_v32 = vld [vmem:[%s8465_s0 + $0x45c] ss:$108 sps:$4 sm:$0xff]  }
  0x80   :  { %3518 = vmatprep.mubr.bf16.mxu1 %v6201_v12  ;;  %5483 = vmatpush3.bf16.msra.mxu1 %v6241_v38  ;;  %v6291_v12 = vld [vmem:[%s8466_s1 + $0x350] sm:$0xff]   ;;  %v6322_v38 = vld [vmem:[%s8466_s1 + $0x3c0] sm:$0xff]  }
  0x81   :  { %5484 = vmatprep.subr.bf16.mxu1 %v6242_v40  ;;  %v6326_v40 = vld [vmem:[%s8466_s1 + $0x380] sm:$0xff]  }
  0x82   :  { %5421 = vmatpush3.bf16.msra.mxu0 %v6238_v36  ;;  %v6320_v36 = vld [vmem:[%s8466_s1 + $0x3c8] sm:$0xff]  }
  0x83   :  { %5534 = vmatprep.subr.bf16.mxu0 %v6247_v44  ;;  %v6304_v44 = vld [vmem:[%s8465_s0 + $0x53c] ss:$108 sps:$4 sm:$0xff]  }
  0x84   :  { %5485 = vmatpush3.bf16.msra.mxu1 %v6246_v43  ;;  %v6295_v43 = vld [vmem:[%s8465_s0 + $0x460] ss:$108 sps:$4 sm:$0xff]  }
  0x85   :  { %3422 = vmatmul.mubr.bf16.gmra.mxu0 %v6198_v17  ;;  %5598 = vmatprep.subr.bf16.mxu1 %v6280_v62  ;;  %v6298_v17 = vld [vmem:[%s8466_s1 + $0x3e0] sm:$0xff]  }
  0x86   :  { %3429 = vmatprep.mubr.bf16.mxu0 %v6207_v22  ;;  %v6275_v22 = vld [vmem:[%s8465_s0 + $0x2b0] ss:$108 sps:$4 sm:$0xff]  }
  0x87   :  { %3519 = vmatmul.mubr.bf16.gmra.mxu1 %v6205_v21  ;;  %v6270_v21 = vld [vmem:[%s8465_s0 + $0x2a8] ss:$108 sps:$4 sm:$0xff]  }
  0x88   :  { %3526 = vmatprep.mubr.bf16.mxu1 %v6212_v23  ;;  %v6276_v23 = vld [vmem:[%s8465_s0 + $0x384] ss:$108 sps:$4 sm:$0xff]  }
  0x8d   :  { %3430 = vmatmul.mubr.bf16.gmra.mxu0 %v6210_v29  ;;  %v6278_v29 = vld [vmem:[%s8465_s0 + $0x380] ss:$108 sps:$4 sm:$0xff]  }
  0x8e   :  { %3437 = vmatprep.mubr.bf16.mxu0 %v6219_v30  ;;  %v6313_v30 = vld [vmem:[%s8466_s1 + $0x390] sm:$0xff]  }
  0x8f   :  { %3527 = vmatmul.mubr.bf16.gmra.mxu1 %v6215_v34  ;;  %v6318_v34 = vld [vmem:[%s8466_s1 + $0x300] sm:$0xff]  }
  0x90   :  { %3534 = vmatprep.mubr.bf16.mxu1 %v6224_v35  ;;  %v6292_v35 = vld [vmem:[%s8465_s0 + $0x464] ss:$108 sps:$4 sm:$0xff]  }
  0x95   :  { %3438 = vmatmul.mubr.bf16.gmra.mxu0 %v6222_v41  ;;  %v6327_v41 = vld [vmem:[%s8466_s1 + $0x478] sm:$0xff]  }
  0x96   :  { %3445 = vmatprep.mubr.bf16.mxu0 %v6231_v42  ;;  %v6299_v42 = vld [vmem:[%s8465_s0 + $0x534] ss:$108 sps:$4 sm:$0xff]  }
  0x97   :  { %3535 = vmatmul.mubr.bf16.gmra.mxu1 %v6227_v46  ;;  %v6311_v46 = vld [vmem:[%s8465_s0 + $0x60c] ss:$108 sps:$4 sm:$0xff]  }
  0x98   :  { %3542 = vmatprep.mubr.bf16.mxu1 %v6236_v47  ;;  %v6307_v47 = vld [vmem:[%s8465_s0 + $0x538] ss:$108 sps:$4 sm:$0xff]  }
  0x9d   :  { %3446 = vmatmul.mubr.bf16.gmra.mxu0 %v6234_v49  ;;  %v6314_v49 = vld [vmem:[%s8465_s0 + $0x608] ss:$108 sps:$4 sm:$0xff]  }
  0x9e   :  { %3583 = vmatprep.mubr.bf16.mxu0 %v6245_v50  ;;  %v6325_v50 = vld [vmem:[%s8465_s0 + $0x34] ss:$108 sps:$4 sm:$0xff]  }
  0x9f   :  { %3543 = vmatmul.mubr.bf16.gmra.mxu1 %v6239_v51  ;;  %v6319_v51 = vld [vmem:[%s8465_s0 + $0x610] ss:$108 sps:$4 sm:$0xff]  }
  0xa0   :  { %3680 = vmatprep.mubr.bf16.mxu1 %v6250_v52  ;;  %v6330_v52 = vld [vmem:[%s8465_s0 + $0x3c] ss:$108 sps:$4 sm:$0xff]  }
  0xa4   :  { %v702_v62 = vpop.permute.xlu0 %701 }
  0xa5   :  { %3584 = vmatmul.mubr.bf16.vlgmr.msra.gmra.mxu0 %v6243_v53  ;;  %v6360_v53 = vld [vmem:[%s8466_s1 + $0x4f8] sm:$0xff]  }
  0xa6   :  { %5535 = vmatpush3.bf16.msra.mxu0 %v6251_v54  ;;  %3591 = vmatprep.mubr.bf16.mxu0 %v6252_v55  ;;  %v6323_v54 = vld [vmem:[%s8465_s0 + $0x30] ss:$108 sps:$4 sm:$0xff]  }
  0xa7   :  { %5536 = vmatprep.subr.bf16.mxu0 %v6255_v56  ;;  %3681 = vmatmul.mubr.bf16.vlgmr.msra.gmra.mxu1 %v6248_v57  ;;  %v6331_v55 = vld [vmem:[%s8466_s1 + $0x438] sm:$0xff]  }
  0xa8   :  { %3688 = vmatprep.mubr.bf16.mxu1 %v6256_v58  ;;  %5599 = vmatpush3.bf16.msra.mxu1 %v6284_v2  ;;  %v6328_v56 = vld [vmem:[%s8465_s0 + $0x38] ss:$108 sps:$4 sm:$0xff]   ;;  %v6335_v58 = vld [vmem:[%s8466_s1 + $0x470] sm:$0xff]  }
  0xa9   :  { %5600 = vmatprep.subr.bf16.mxu1 %v6286_v4  ;;  %v6332_v57 = vld [vmem:[%s8465_s0 + $0x10c] ss:$108 sps:$4 sm:$0xff]   ;;  %v6334_v2 = vld [vmem:[%s8465_s0 + $0x108] ss:$108 sps:$4 sm:$0xff]  }
  0xaa   :  { %5537 = vmatpush3.bf16.msra.mxu0 %v6258_v59  ;;  %v6336_v59 = vld [vmem:[%s8465_s0 + $0x114] ss:$108 sps:$4 sm:$0xff]  }
  0xab   :  { %5538 = vmatprep.subr.bf16.mxu0 %v6263_v60  ;;  %v6338_v60 = vld [vmem:[%s8466_s1 + $0x430] sm:$0xff]  }
  0xac   :  { %5601 = vmatpush3.bf16.msra.mxu1 %v6289_v7 }
  0xad   :  { %3592 = vmatmul.mubr.bf16.gmra.mxu0 %v6254_v61  ;;  %5602 = vmatprep.subr.bf16.mxu1 %v6296_v14 }
  0xae   :  { %3599 = vmatprep.mubr.bf16.mxu0 %v6260_v63  ;;  %5539 = vmatpush3.bf16.msra.mxu0 %v6266_v0  ;;  %v6365_v63 = vld [vmem:[%s8466_s1 + $0x4b8] sm:$0xff]   ;;  %v6366_v0 = vld [vmem:[%s8466_s1 + $0x4f0] sm:$0xff]  }
  0xaf   :  { %5540 = vmatprep.subr.bf16.mxu0 %v6271_v3  ;;  %3689 = vmatmul.mubr.bf16.gmra.mxu1 %v6259_v1  ;;  %v6343_v3 = vld [vmem:[%s8466_s1 + $0x468] sm:$0xff]  }
  0xb0   :  { %3696 = vmatprep.mubr.bf16.mxu1 %v6264_v5  ;;  %5603 = vmatpush3.bf16.msra.mxu1 %v6297_v16  ;;  %v6351_v16 = vld [vmem:[%s8466_s1 + $0x460] sm:$0xff]  }
  0xb1   :  { %5604 = vmatprep.subr.bf16.mxu1 %v6298_v17  ;;  %v6376_v17 = vld [vmem:[%s8466_s1 + $0x4e8] sm:$0xff]  }
  0xb2   :  { %5541 = vmatpush3.bf16.msra.mxu0 %v6274_v6  ;;  %v6340_v6 = vld [vmem:[%s8465_s0 + $0x1e4] ss:$108 sps:$4 sm:$0xff]  }
  0xb3   :  { %5542 = vmatprep.subr.bf16.mxu0 %v6279_v9 }
  0xb4   :  { %5605 = vmatpush3.bf16.msra.mxu1 %v6301_v19 }
  0xb5   :  { %3600 = vmatmul.mubr.bf16.gmra.mxu0 %v6262_v8  ;;  %5606 = vmatprep.subr.bf16.mxu1 %v6308_v26  ;;  %v6370_v8 = vld [vmem:[%s8466_s1 + $0x4b0] sm:$0xff]  }
  0xb6   :  { %3607 = vmatprep.mubr.bf16.mxu0 %v6268_v10  ;;  %5543 = vmatpush3.bf16.msra.mxu0 %v6283_v11  ;;  %v6339_v11 = vld [vmem:[%s8465_s0 + $0x110] ss:$108 sps:$4 sm:$0xff]  }
  0xb7   :  { %5544 = vmatprep.subr.bf16.mxu0 %v6291_v12  ;;  %3697 = vmatmul.mubr.bf16.gmra.mxu1 %v6267_v13  ;;  %v6346_v12 = vld [vmem:[%s8466_s1 + $0x428] sm:$0xff]  }
  0xb8   :  { %3704 = vmatprep.mubr.bf16.mxu1 %v6272_v15  ;;  %5607 = vmatpush3.bf16.msra.mxu1 %v6309_v27  ;;  %v707_v15 = vpop.permute.xlu0 %706  ;;  %v6354_v27 = vld [vmem:[%s8466_s1 + $0x420] sm:$0xff]  }
  0xb9   :  { %5608 = vmatprep.subr.bf16.mxu1 %v6310_v28  ;;  %v6378_v28 = vld [vmem:[%s8466_s1 + $0x4e0] sm:$0xff]  }
  0xba   :  { %5545 = vmatpush3.bf16.msra.mxu0 %v6294_v18 }
  0xbb   :  { %5546 = vmatprep.subr.bf16.mxu0 %v6303_v20  ;;  %v6344_v20 = vld [vmem:[%s8465_s0 + $0x1ec] ss:$108 sps:$4 sm:$0xff]  }
  0xbc   :  { %5609 = vmatpush3.bf16.msra.mxu1 %v6313_v30 }
  0xbd   :  { %3608 = vmatmul.mubr.bf16.gmra.mxu0 %v6270_v21  ;;  %5610 = vmatprep.subr.bf16.mxu1 %v6320_v36  ;;  %v6364_v36 = vld [vmem:[%s8466_s1 + $0x418] sm:$0xff]  }
  0xbe   :  { %3615 = vmatprep.mubr.bf16.mxu0 %v6276_v23  ;;  %5547 = vmatpush3.bf16.msra.mxu0 %v6306_v24  ;;  %v712_v23 = vpop.permute.xlu1 %711  ;;  %v6377_v24 = vld [vmem:[%s8466_s1 + $0x4a8] sm:$0xff]  }
  0xbf   :  { %3705 = vmatmul.mubr.bf16.gmra.mxu1 %v6275_v22  ;;  %5548 = vmatprep.subr.bf16.mxu0 %v6315_v31  ;;  %v6342_v31 = vld [vmem:[%s8465_s0 + $0x1e0] ss:$108 sps:$4 sm:$0xff]  }
  0xc0   :  { %3712 = vmatprep.mubr.bf16.mxu1 %v6281_v25  ;;  %5611 = vmatpush3.bf16.msra.mxu1 %v6321_v37 }
  0xc1   :  { %5612 = vmatprep.subr.bf16.mxu1 %v6322_v38 }
  0xc2   :  { %5549 = vmatpush3.bf16.msra.mxu0 %v6318_v34 }
  0xc3   :  { %5662 = vmatprep.subr.bf16.mxu0 %v6327_v41 }
  0xc4   :  { %5613 = vmatpush3.bf16.msra.mxu1 %v6326_v40 }
  0xc5   :  { %3616 = vmatmul.mubr.bf16.gmra.mxu0 %v6278_v29  ;;  %5726 = vmatprep.subr.bf16.mxu1 %v6360_v53 }
  0xc6   :  { %3623 = vmatprep.mubr.bf16.mxu0 %v6287_v32  ;;  %v6359_v32 = vld [vmem:[%s8466_s1 + $0x458] sm:$0xff]  }
  0xc7   :  { %3713 = vmatmul.mubr.bf16.gmra.mxu1 %v6285_v33 }
  0xc8   :  { %3720 = vmatprep.mubr.bf16.mxu1 %v6292_v35  ;;  %v6348_v35 = vld [vmem:[%s8465_s0 + $0x2bc] ss:$108 sps:$4 sm:$0xff]  }
  0xcd   :  { %3624 = vmatmul.mubr.bf16.gmra.mxu0 %v6290_v39  ;;  %v6382_v39 = vld [vmem:[%s8466_s1 + $0x4a0] sm:$0xff]  }
  0xce   :  { %3631 = vmatprep.mubr.bf16.mxu0 %v6299_v42  ;;  %v6347_v42 = vld [vmem:[%s8465_s0 + $0x1e8] ss:$108 sps:$4 sm:$0xff]  }
  0xcf   :  { %3721 = vmatmul.mubr.bf16.gmra.mxu1 %v6295_v43  ;;  %v6371_v43 = vld [vmem:[%s8466_s1 + $0x450] sm:$0xff]  }
  0xd0   :  { %3728 = vmatprep.mubr.bf16.mxu1 %v6304_v44 }
  0xd5   :  { %3632 = vmatmul.mubr.bf16.gmra.mxu0 %v6302_v45 }
  0xd6   :  { %3639 = vmatprep.mubr.bf16.mxu0 %v6311_v46  ;;  %v717_v46 = vpop.permute.xlu1 %716 }
  0xd7   :  { %3729 = vmatmul.mubr.bf16.gmra.mxu1 %v6307_v47  ;;  %v6352_v47 = vld [vmem:[%s8465_s0 + $0x2c4] ss:$108 sps:$4 sm:$0xff]  }
  0xd8   :  { %3736 = vmatprep.mubr.bf16.mxu1 %v6316_v48  ;;  %v6388_v48 = vld [vmem:[%s8466_s1 + $0x4d8] sm:$0xff]  }
  0xdd   :  { %3640 = vmatmul.mubr.bf16.gmra.mxu0 %v6314_v49 }
  0xde   :  { %3777 = vmatprep.mubr.bf16.mxu0 %v6325_v50 }
  0xdf   :  { %3737 = vmatmul.mubr.bf16.gmra.mxu1 %v6319_v51  ;;  %v6375_v51 = vld [vmem:[%s8466_s1 + $0x410] sm:$0xff]  }
  0xe0   :  { %3874 = vmatprep.mubr.bf16.mxu1 %v6330_v52 }
  0xe5   :  { %v5166_v61 = vpop.f32.mrf.mxu0  ;;  %3778 = vmatmul.mubr.bf16.vlgmr.msra.gmra.mxu0 %v6323_v54  ;;  %v6389_v54 = vld [vmem:[%s8466_s1 + $0x498] sm:$0xff]  }
  0xe6   :  { %5663 = vmatpush3.bf16.msra.mxu0 %v6331_v55  ;;  %3785 = vmatprep.mubr.bf16.mxu0 %v6332_v57  ;;  %v5230_v5 = vpop.f32.mrf.mxu1  ;;  %v6390_v57 = vld [vmem:[%s8466_s1 + $0x4d0] sm:$0xff]  }
  0xe7   :  { %v5167_v1 = vpop.f32.mrf.mxu0  ;;  %5664 = vmatprep.subr.bf16.mxu0 %v6335_v58  ;;  %3875 = vmatmul.mubr.bf16.vlgmr.msra.gmra.mxu1 %v6328_v56 }
  0xe8   :  { %v5168_v4 = vadd.f32 %v5167_v1, %v5166_v61  ;;  %3882 = vmatprep.mubr.bf16.mxu1 %v6336_v59  ;;  %5727 = vmatpush3.bf16.msra.mxu1 %v6365_v63  ;;  %v5231_v10 = vpop.f32.mrf.mxu1  ;;  %v6350_v61 = vld [vmem:[%s8465_s0 + $0x2b8] ss:$108 sps:$4 sm:$0xff]   ;;  %v6358_v1 = vld [vmem:[%s8465_s0 + $0x394] ss:$108 sps:$4 sm:$0xff]  }
  0xe9   :  { %v5169_v7 = vpop.f32.mrf.mxu0  ;;  %5728 = vmatprep.subr.bf16.mxu1 %v6366_v0  ;;  %v5232_v13 = vadd.f32 %v5231_v10, %v5230_v5  ;;  %v6394_v5 = vld [vmem:[%s8466_s1 + $0x490] sm:$0xff]  }
  0xea   :  { %v3198_v9 = vadd.f32 %v5168_v4, %v702_v62  ;;  %5665 = vmatpush3.bf16.msra.mxu0 %v6338_v60  ;;  %v5233_v19 = vpop.f32.mrf.mxu1  ;;  %v722_v60 = vpop.permute.xlu0 %721  ;;  %v6383_v62 = vld [vmem:[%s8466_s1 + $0x448] sm:$0xff]  }
  0xeb   :  { %v5170_v14 = vpop.f32.mrf.mxu0  ;;  %5666 = vmatprep.subr.bf16.mxu0 %v6343_v3 }
  0xec   :  { %v5171_v18 = vadd.f32 %v5170_v14, %v5169_v7  ;;  %v7442_v21 = vadd.f32 %v5232_v13, %v3198_v9  ;;  %5729 = vmatpush3.bf16.msra.mxu1 %v6370_v8  ;;  %v5234_v26 = vpop.f32.mrf.mxu1  ;;  %v6355_v8 = vld [vmem:[%s8465_s0 + $0x2c0] ss:$108 sps:$4 sm:$0xff]  }
  0xed   :  { %v5172_v22 = vpop.f32.mrf.mxu0  ;;  %3786 = vmatmul.mubr.bf16.gmra.mxu0 %v6334_v2  ;;  %v5235_v29 = vadd.f32 %v5234_v26, %v5233_v19  ;;  %5730 = vmatprep.subr.bf16.mxu1 %v6376_v17  ;;  %v6387_v2 = vld [vmem:[%s8466_s1 + $0x408] sm:$0xff]   ;;  %v6395_v9 = vld [vmem:[%s8466_s1 + $0x440] sm:$0xff]  }
  0xee   :  { %v3201_v25 = vadd.f32 %v5171_v18, %v707_v15  ;;  %3793 = vmatprep.mubr.bf16.mxu0 %v6340_v6  ;;  %5667 = vmatpush3.bf16.msra.mxu0 %v6346_v12  ;;  %v5236_v34 = vpop.f32.mrf.mxu1  ;;  %v727_v12 = vpop.permute.xlu1 %726  ;;  %v6400_v13 = vld [vmem:[%s8466_s1 + $0x4c8] sm:$0xff]   ;;  %v6399_v17 = vld [vmem:[%s8466_s1 + $0x400] sm:$0xff]  }
  0xef   :  { %v5173_v30 = vpop.f32.mrf.mxu0  ;;  %5668 = vmatprep.subr.bf16.mxu0 %v6351_v16  ;;  %3883 = vmatmul.mubr.bf16.gmra.mxu1 %v6339_v11  ;;  %v6363_v16 = vld [vmem:[%s8465_s0 + $0x39c] ss:$108 sps:$4 sm:$0xff]  }
  0xf0   :  { %v5174_v33 = vadd.f32 %v5173_v30, %v5172_v22  ;;  %v7465_v37 = vadd.f32 %v5235_v29, %v3201_v25  ;;  %3890 = vmatprep.mubr.bf16.mxu1 %v6344_v20  ;;  %5731 = vmatpush3.bf16.msra.mxu1 %v6377_v24  ;;  %v5237_v41 = vpop.f32.mrf.mxu1  ;;  %v6401_v20 = vld [vmem:[%s8466_s1 + $0x488] sm:$0xff]   ;;  %v6402_v24 = vld [vmem:[%s8466_s1 + $0x4c0] sm:$0xff]  }
  0xf1   :  { %v5175_v38 = vpop.f32.mrf.mxu0  ;;  %5732 = vmatprep.subr.bf16.mxu1 %v6378_v28  ;;  %v5238_v44 = vadd.f32 %v5237_v41, %v5236_v34  ;;  %v6407_v28 = vld [vmem:[%s8466_s1 + $0x578] sm:$0xff]   ;;  %v6406_v34 = vld [vmem:[%s8466_s1 + $0x480] sm:$0xff]  }
  0xf2   :  { %v3206_v40 = vadd.f32 %v5174_v33, %v712_v23  ;;  %5669 = vmatpush3.bf16.msra.mxu0 %v6354_v27  ;;  %v5239_v50 = vpop.f32.mrf.mxu1  ;;  %v732_v27 = vpop.permute.xlu0 %731 }
  0xf3   :  { %v5176_v45 = vpop.f32.mrf.mxu0  ;;  %5670 = vmatprep.subr.bf16.mxu0 %v6359_v32  ;;  %v737_v41 = vpop.permute.xlu1 %736 }
  0xf4   :  { %v5177_v49 = vadd.f32 %v5176_v45, %v5175_v38  ;;  %v7485_v52 = vadd.f32 %v5238_v44, %v3206_v40  ;;  %5733 = vmatpush3.bf16.msra.mxu1 %v6382_v39  ;;  %v5240_v56 = vpop.f32.mrf.mxu1  ;;  %v6369_v38 = vld [vmem:[%s8465_s0 + $0x46c] ss:$108 sps:$4 sm:$0xff]  }
  0xf5   :  { %v5178_v53 = vpop.f32.mrf.mxu0  ;;  %3794 = vmatmul.mubr.bf16.gmra.mxu0 %v6342_v31  ;;  %v5241_v58 = vadd.f32 %v5240_v56, %v5239_v50  ;;  %5734 = vmatprep.subr.bf16.mxu1 %v6388_v48  ;;  %v6356_v31 = vld [vmem:[%s8465_s0 + $0x390] ss:$108 sps:$4 sm:$0xff]   ;;  %v6361_v44 = vld [vmem:[%s8465_s0 + $0x398] ss:$108 sps:$4 sm:$0xff]  }
  0xf6   :  { %v3209_v55 = vadd.f32 %v5177_v49, %v717_v46  ;;  %3801 = vmatprep.mubr.bf16.mxu0 %v6348_v35  ;;  %5671 = vmatpush3.bf16.msra.mxu0 %v6364_v36  ;;  %v5242_v0 = vpop.f32.mrf.mxu1 }
  0xf7   :  { %v5179_v59 = vpop.f32.mrf.mxu0  ;;  %5672 = vmatprep.subr.bf16.mxu0 %v6371_v43  ;;  %3891 = vmatmul.mubr.bf16.gmra.mxu1 %v6347_v42 }
  0xf8   :  { %v5180_v63 = vadd.f32 %v5179_v59, %v5178_v53  ;;  %v7505_v3 = vadd.f32 %v5241_v58, %v3209_v55  ;;  %3898 = vmatprep.mubr.bf16.mxu1 %v6352_v47  ;;  %5735 = vmatpush3.bf16.msra.mxu1 %v6389_v54  ;;  %v5243_v7 = vpop.f32.mrf.mxu1  ;;  %v6374_v47 = vld [vmem:[%s8465_s0 + $0x474] ss:$108 sps:$4 sm:$0xff]   ;;  %v742_v53 = vpop.permute.xlu0 %741 }
  0xf9   :  { %v5181_v4 = vpop.f32.mrf.mxu0  ;;  %5736 = vmatprep.subr.bf16.mxu1 %v6390_v57  ;;  %v5244_v10 = vadd.f32 %v5243_v7, %v5242_v0  ;;  %v6367_v58 = vld [vmem:[%s8465_s0 + $0x468] ss:$108 sps:$4 sm:$0xff]   ;;  %v747_v0 = vpop.permute.xlu1 %746  ;;  %v6386_v7 = vld [vmem:[%s8465_s0 + $0x54c] ss:$108 sps:$4 sm:$0xff]  }
  0xfa   :  { %v3214_v6 = vadd.f32 %v5180_v63, %v722_v60  ;;  %5673 = vmatpush3.bf16.msra.mxu0 %v6375_v51  ;;  %v5245_v15 = vpop.f32.mrf.mxu1 }
  0xfb   :  { %v5182_v11 = vpop.f32.mrf.mxu0  ;;  %5674 = vmatprep.subr.bf16.mxu0 %v6383_v62 }
  0xfc   :  { %v5183_v14 = vadd.f32 %v5182_v11, %v5181_v4  ;;  %v7525_v18 = vadd.f32 %v5244_v10, %v3214_v6  ;;  %5737 = vmatpush3.bf16.msra.mxu1 %v6394_v5  ;;  %v5246_v23 = vpop.f32.mrf.mxu1  ;;  %v6372_v4 = vld [vmem:[%s8465_s0 + $0x470] ss:$108 sps:$4 sm:$0xff]  }
  0xfd   :  { %v5184_v19 = vpop.f32.mrf.mxu0  ;;  %3802 = vmatmul.mubr.bf16.gmra.mxu0 %v6350_v61  ;;  %v5247_v25 = vadd.f32 %v5246_v23, %v5245_v15  ;;  %5738 = vmatprep.subr.bf16.mxu1 %v6400_v13  ;;  %v6381_v61 = vld [vmem:[%s8465_s0 + $0x544] ss:$108 sps:$4 sm:$0xff]   ;;  %v6379_v15 = vld [vmem:[%s8465_s0 + $0x540] ss:$108 sps:$4 sm:$0xff]   ;;  %v6440_v23 = vld [vmem:[%s8466_s1 + $0x5f8] sm:$0xff]  }
  0xfe   :  { %v3217_v22 = vadd.f32 %v5183_v14, %v727_v12  ;;  %3809 = vmatprep.mubr.bf16.mxu0 %v6358_v1  ;;  %5675 = vmatpush3.bf16.msra.mxu0 %v6387_v2  ;;  %v5248_v30 = vpop.f32.mrf.mxu1  ;;  %v752_v12 = vpop.permute.xlu0 %751 }
  0xff   :  { %v5185_v26 = vpop.f32.mrf.mxu0  ;;  %5676 = vmatprep.subr.bf16.mxu0 %v6395_v9  ;;  %3899 = vmatmul.mubr.bf16.gmra.mxu1 %v6355_v8 }
 0x100   :  { %v5186_v29 = vadd.f32 %v5185_v26, %v5184_v19  ;;  %v7539_v32 = vadd.f32 %v5247_v25, %v3217_v22  ;;  %3906 = vmatprep.mubr.bf16.mxu1 %v6363_v16  ;;  %5739 = vmatpush3.bf16.msra.mxu1 %v6401_v20  ;;  %v5249_v36 = vpop.f32.mrf.mxu1  ;;  %v6393_v19 = vld [vmem:[%s8465_s0 + $0x61c] ss:$108 sps:$4 sm:$0xff]   ;;  %v757_v26 = vpop.permute.xlu1 %756 }
 0x101   :  { %v5187_v33 = vpop.f32.mrf.mxu0  ;;  %5740 = vmatprep.subr.bf16.mxu1 %v6402_v24  ;;  %v5250_v39 = vadd.f32 %v5249_v36, %v5248_v30 }
 0x102   :  { %v3222_v35 = vadd.f32 %v5186_v29, %v732_v27  ;;  %5677 = vmatpush3.bf16.msra.mxu0 %v6399_v17  ;;  %v5251_v43 = vpop.f32.mrf.mxu1  ;;  %v6384_v29 = vld [vmem:[%s8465_s0 + $0x548] ss:$108 sps:$4 sm:$0xff]  }
 0x103   :  { %v5188_v40 = vpop.f32.mrf.mxu0  ;;  %5790 = vmatprep.subr.bf16.mxu0 %v6407_v28 }
 0x104   :  { %v5189_v42 = vadd.f32 %v5188_v40, %v5187_v33  ;;  %v7550_v45 = vadd.f32 %v5250_v39, %v3222_v35  ;;  %5741 = vmatpush3.bf16.msra.mxu1 %v6406_v34  ;;  %v5252_v49 = vpop.f32.mrf.mxu1  ;;  %v6398_v33 = vld [vmem:[%s8465_s0 + $0x624] ss:$108 sps:$4 sm:$0xff]   ;;  %v762_v39 = vpop.permute.xlu0 %761 }
 0x105   :  { %v5190_v46 = vpop.f32.mrf.mxu0  ;;  %3810 = vmatmul.mubr.bf16.gmra.mxu0 %v6356_v31  ;;  %v5253_v50 = vadd.f32 %v5252_v49, %v5251_v43  ;;  %5854 = vmatprep.subr.bf16.mxu1 %v6440_v23  ;;  %v6419_v23 = vld [vmem:[%s8466_s1 + $0x530] sm:$0xff]  }
 0x106   :  { %v3225_v48 = vadd.f32 %v5189_v42, %v737_v41  ;;  %3817 = vmatprep.mubr.bf16.mxu0 %v6369_v38  ;;  %v5254_v55 = vpop.f32.mrf.mxu1 }
 0x107   :  { %v5191_v51 = vpop.f32.mrf.mxu0  ;;  %3907 = vmatmul.mubr.bf16.gmra.mxu1 %v6361_v44  ;;  %v6391_v44 = vld [vmem:[%s8465_s0 + $0x618] ss:$108 sps:$4 sm:$0xff]  }
 0x108   :  { %v5192_v54 = vadd.f32 %v5191_v51, %v5190_v46  ;;  %v7555_v56 = vadd.f32 %v5253_v50, %v3225_v48  ;;  %3914 = vmatprep.mubr.bf16.mxu1 %v6374_v47  ;;  %v5255_v60 = vpop.f32.mrf.mxu1  ;;  %v6405_v48 = vld [vmem:[%s8465_s0 + $0x44] ss:$108 sps:$4 sm:$0xff]   ;;  %v767_v51 = vpop.permute.xlu1 %766 }
 0x109   :  { %v5193_v57 = vpop.f32.mrf.mxu0  ;;  %v5256_v62 = vadd.f32 %v5255_v60, %v5254_v55  ;;  %v6396_v55 = vld [vmem:[%s8465_s0 + $0x620] ss:$108 sps:$4 sm:$0xff]  }
 0x10a   :  { %v3230_v59 = vadd.f32 %v5192_v54, %v742_v53  ;;  %v5257_v2 = vpop.f32.mrf.mxu1 }
 0x10b   :  { %v5194_v63 = vpop.f32.mrf.mxu0 }
 0x10c   :  { %v5195_v1 = vadd.f32 %v5194_v63, %v5193_v57  ;;  %v7566_v5 = vadd.f32 %v5256_v62, %v3230_v59  ;;  %v5258_v9 = vpop.f32.mrf.mxu1  ;;  %v6410_v59 = vld [vmem:[%s8465_s0 + $0x4c] ss:$108 sps:$4 sm:$0xff]  }
 0x10d   :  { %v5196_v6 = vpop.f32.mrf.mxu0  ;;  %3818 = vmatmul.mubr.bf16.gmra.mxu0 %v6367_v58  ;;  %v5259_v10 = vadd.f32 %v5258_v9, %v5257_v2  ;;  %v6414_v9 = vld [vmem:[%s8465_s0 + $0x11c] ss:$108 sps:$4 sm:$0xff]  }
 0x10e   :  { %v3233_v8 = vadd.f32 %v5195_v1, %v747_v0  ;;  %3825 = vmatprep.mubr.bf16.mxu0 %v6381_v61  ;;  %v5260_v14 = vpop.f32.mrf.mxu1  ;;  %v772_v0 = vpop.permute.xlu0 %771 }
 0x10f   :  { %v5197_v11 = vpop.f32.mrf.mxu0  ;;  %3915 = vmatmul.mubr.bf16.gmra.mxu1 %v6372_v4  ;;  %v6403_v4 = vld [vmem:[%s8465_s0 + $0x40] ss:$108 sps:$4 sm:$0xff]  }
 0x110   :  { %v5198_v13 = vadd.f32 %v5197_v11, %v5196_v6  ;;  %v7574_v16 = vadd.f32 %v5259_v10, %v3233_v8  ;;  %3922 = vmatprep.mubr.bf16.mxu1 %v6386_v7  ;;  %v5261_v22 = vpop.f32.mrf.mxu1  ;;  %v6411_v6 = vld [vmem:[%s8466_s1 + $0x538] sm:$0xff]  }
 0x111   :  { %v5199_v17 = vpop.f32.mrf.mxu0  ;;  %v5262_v24 = vadd.f32 %v5261_v22, %v5260_v14 }
 0x112   :  { %v3238_v20 = vadd.f32 %v5198_v13, %v752_v12  ;;  %v5263_v28 = vpop.f32.mrf.mxu1  ;;  %v6408_v12 = vld [vmem:[%s8465_s0 + $0x48] ss:$108 sps:$4 sm:$0xff]  }
 0x113   :  { %v5200_v25 = vpop.f32.mrf.mxu0  ;;  %v6415_v13 = vld [vmem:[%s8466_s1 + $0x570] sm:$0xff]  }
 0x114   :  { %v5201_v27 = vadd.f32 %v5200_v25, %v5199_v17  ;;  %v7585_v30 = vadd.f32 %v5262_v24, %v3238_v20  ;;  %v5264_v35 = vpop.f32.mrf.mxu1  ;;  %v777_v17 = vpop.permute.xlu1 %776 }
 0x115   :  { %v5202_v31 = vpop.f32.mrf.mxu0  ;;  %3826 = vmatmul.mubr.bf16.gmra.mxu0 %v6379_v15  ;;  %v5265_v36 = vadd.f32 %v5264_v35, %v5263_v28  ;;  %v6423_v35 = vld [vmem:[%s8466_s1 + $0x568] sm:$0xff]  }
 0x116   :  { %v3241_v34 = vadd.f32 %v5201_v27, %v757_v26  ;;  %3833 = vmatprep.mubr.bf16.mxu0 %v6393_v19  ;;  %v5266_v41 = vpop.f32.mrf.mxu1  ;;  %v6418_v19 = vld [vmem:[%s8465_s0 + $0x124] ss:$108 sps:$4 sm:$0xff]   ;;  %v6445_v26 = vld [vmem:[%s8466_s1 + $0x5b8] sm:$0xff]  }
 0x117   :  { %v5203_v38 = vpop.f32.mrf.mxu0  ;;  %3923 = vmatmul.mubr.bf16.gmra.mxu1 %v6384_v29  ;;  %v6446_v29 = vld [vmem:[%s8466_s1 + $0x5f0] sm:$0xff]  }
 0x118   :  { %v5204_v40 = vadd.f32 %v5203_v38, %v5202_v31  ;;  %v7590_v42 = vadd.f32 %v5265_v36, %v3241_v34  ;;  %3930 = vmatprep.mubr.bf16.mxu1 %v6398_v33  ;;  %v5267_v47 = vpop.f32.mrf.mxu1  ;;  %v6412_v34 = vld [vmem:[%s8465_s0 + $0x118] ss:$108 sps:$4 sm:$0xff]  }
 0x119   :  { %v5205_v43 = vpop.f32.mrf.mxu0  ;;  %v5268_v49 = vadd.f32 %v5267_v47, %v5266_v41 }
 0x11a   :  { %v3246_v46 = vadd.f32 %v5204_v40, %v762_v39  ;;  %v5269_v54 = vpop.f32.mrf.mxu1  ;;  %v6422_v39 = vld [vmem:[%s8465_s0 + $0x1f4] ss:$108 sps:$4 sm:$0xff]  }
 0x11b   :  { %v5206_v50 = vpop.f32.mrf.mxu0 }
 0x11c   :  { %v5207_v53 = vadd.f32 %v5206_v50, %v5205_v43  ;;  %v7601_v57 = vadd.f32 %v5268_v49, %v3246_v46  ;;  %v5270_v61 = vpop.f32.mrf.mxu1  ;;  %v6427_v43 = vld [vmem:[%s8466_s1 + $0x528] sm:$0xff]   ;;  %v6431_v49 = vld [vmem:[%s8466_s1 + $0x560] sm:$0xff]  }
 0x11d   :  { %v5208_v58 = vpop.f32.mrf.mxu0  ;;  %3834 = vmatmul.mubr.bf16.gmra.mxu0 %v6391_v44  ;;  %v5271_v62 = vadd.f32 %v5270_v61, %v5269_v54  ;;  %v6450_v44 = vld [vmem:[%s8466_s1 + $0x5b0] sm:$0xff]   ;;  %v6457_v61 = vld [vmem:[%s8466_s1 + $0x5a8] sm:$0xff]  }
 0x11e   :  { %v3249_v60 = vadd.f32 %v5207_v53, %v767_v51  ;;  %3971 = vmatprep.mubr.bf16.mxu0 %v6405_v48  ;;  %v5272_v2 = vpop.f32.mrf.mxu1  ;;  %v6416_v48 = vld [vmem:[%s8465_s0 + $0x120] ss:$108 sps:$4 sm:$0xff]  }
 0x11f   :  { %v5209_v63 = vpop.f32.mrf.mxu0  ;;  %3931 = vmatmul.mubr.bf16.gmra.mxu1 %v6396_v55  ;;  %v6456_v53 = vld [vmem:[%s8466_s1 + $0x5e8] sm:$0xff]  }
 0x120   :  { %v5210_v1 = vadd.f32 %v5209_v63, %v5208_v58  ;;  %v7612_v7 = vadd.f32 %v5271_v62, %v3249_v60  ;;  %4068 = vmatprep.mubr.bf16.mxu1 %v6410_v59  ;;  %v5273_v11 = vpop.f32.mrf.mxu1  ;;  %v6426_v55 = vld [vmem:[%s8465_s0 + $0x1fc] ss:$108 sps:$4 sm:$0xff]   ;;  %v6435_v58 = vld [vmem:[%s8466_s1 + $0x520] sm:$0xff]  }
 0x121   :  { %v5211_v8 = vpop.f32.mrf.mxu0  ;;  %v5274_v14 = vadd.f32 %v5273_v11, %v5272_v2 }
 0x122   :  { %v3254_v10 = vadd.f32 %v5210_v1, %v772_v0  ;;  %v5275_v22 = vpop.f32.mrf.mxu1  ;;  %v6458_v0 = vld [vmem:[%s8466_s1 + $0x5e0] sm:$0xff]  }
 0x123   :  { %v5212_v15 = vpop.f32.mrf.mxu0 }
 0x124   :  { %v5213_v20 = vadd.f32 %v5212_v15, %v5211_v8  ;;  %v7629_v24 = vadd.f32 %v5274_v14, %v3254_v10  ;;  %v5276_v28 = vpop.f32.mrf.mxu1  ;;  %v6444_v10 = vld [vmem:[%s8466_s1 + $0x518] sm:$0xff]  }
 0x125   :  { %v5294_v25 = vpop.f32.mrf.mxu0  ;;  %3972 = vmatmul.mubr.bf16.vlgmr.msra.gmra.mxu0 %v6403_v4  ;;  %v5277_v31 = vadd.f32 %v5276_v28, %v5275_v22  ;;  %v6420_v4 = vld [vmem:[%s8465_s0 + $0x1f0] ss:$108 sps:$4 sm:$0xff]  }
 0x126   :  { %v3257_v27 = vadd.f32 %v5213_v20, %v777_v17  ;;  %5791 = vmatpush3.bf16.msra.mxu0 %v6411_v6  ;;  %3979 = vmatprep.mubr.bf16.mxu0 %v6414_v9  ;;  %v6439_v6 = vld [vmem:[%s8466_s1 + $0x558] sm:$0xff]  }
 0x127   :  { %v5295_v33 = vpop.f32.mrf.mxu0  ;;  %5792 = vmatprep.subr.bf16.mxu0 %v6415_v13  ;;  %v5358_v38 = vpop.f32.mrf.mxu1  ;;  %4069 = vmatmul.mubr.bf16.vlgmr.msra.gmra.mxu1 %v6408_v12  ;;  %v6430_v9 = vld [vmem:[%s8465_s0 + $0x2cc] ss:$108 sps:$4 sm:$0xff]   ;;  %v6462_v13 = vld [vmem:[%s8466_s1 + $0x5a0] sm:$0xff]  }
 0x128   :  { %v5296_v36 = vadd.f32 %v5295_v33, %v5294_v25  ;;  %v7646_v40 = vadd.f32 %v5277_v31, %v3257_v27  ;;  %4076 = vmatprep.mubr.bf16.mxu1 %v6418_v19  ;;  %5855 = vmatpush3.bf16.msra.mxu1 %v6445_v26  ;;  %v6424_v17 = vld [vmem:[%s8465_s0 + $0x1f8] ss:$108 sps:$4 sm:$0xff]   ;;  %v6451_v19 = vld [vmem:[%s8466_s1 + $0x550] sm:$0xff]  }
 0x129   :  { %v5297_v41 = vpop.f32.mrf.mxu0  ;;  %v5359_v47 = vpop.f32.mrf.mxu1  ;;  %5856 = vmatprep.subr.bf16.mxu1 %v6446_v29  ;;  %v6434_v26 = vld [vmem:[%s8465_s0 + $0x2d4] ss:$108 sps:$4 sm:$0xff]   ;;  %v6469_v31 = vld [vmem:[%s8466_s1 + $0x598] sm:$0xff]  }
 0x12a   :  { %v3392_v46 = vadd.f32 %v5296_v36, %v7442_v21  ;;  %5793 = vmatpush3.bf16.msra.mxu0 %v6419_v23  ;;  %v5360_v50 = vadd.f32 %v5359_v47, %v5358_v38  ;;  %v6468_v23 = vld [vmem:[%s8466_s1 + $0x5d8] sm:$0xff]   ;;  %v6455_v29 = vld [vmem:[%s8466_s1 + $0x510] sm:$0xff]  }
 0x12b   :  { %v5298_v51 = vpop.f32.mrf.mxu0  ;;  %5794 = vmatprep.subr.bf16.mxu0 %v6423_v35  ;;  %v5361_v21 = vpop.f32.mrf.mxu1  ;;  %v6470_v35 = vld [vmem:[%s8466_s1 + $0x5d0] sm:$0xff]  }
 0x12c   :  { %v5299_v54 = vadd.f32 %v5298_v51, %v5297_v41  ;;  %v7670_v59 = vadd.f32 %v5360_v50, %v3392_v46  ;;  %5857 = vmatpush3.bf16.msra.mxu1 %v6450_v44  ;;  %v6463_v41 = vld [vmem:[%s8466_s1 + $0x548] sm:$0xff]   ;;  %v6438_v44 = vld [vmem:[%s8465_s0 + $0x3a4] ss:$108 sps:$4 sm:$0xff]  }
 0x12d   :  { %v5300_v60 = vpop.f32.mrf.mxu0  ;;  %3980 = vmatmul.mubr.bf16.gmra.mxu0 %v6412_v34  ;;  %v5362_v63 = vpop.f32.mrf.mxu1  ;;  %5858 = vmatprep.subr.bf16.mxu1 %v6456_v53  ;;  %v6467_v46 = vld [vmem:[%s8466_s1 + $0x508] sm:$0xff]   ;;  %v6475_v53 = vld [vmem:[%s8466_s1 + $0x540] sm:$0xff]  }
 0x12e   :  { %v3395_v62 = vadd.f32 %v5299_v54, %v7465_v37  ;;  %3987 = vmatprep.mubr.bf16.mxu0 %v6422_v39  ;;  %5795 = vmatpush3.bf16.msra.mxu0 %v6427_v43  ;;  %v5363_v1 = vadd.f32 %v5362_v63, %v5361_v21  ;;  %v6428_v39 = vld [vmem:[%s8465_s0 + $0x2c8] ss:$108 sps:$4 sm:$0xff]  }
 0x12f   :  { %v5301_v2 = vpop.f32.mrf.mxu0  ;;  %5796 = vmatprep.subr.bf16.mxu0 %v6431_v49  ;;  %v5364_v8 = vpop.f32.mrf.mxu1  ;;  %4077 = vmatmul.mubr.bf16.gmra.mxu1 %v6416_v48  ;;  %v6474_v49 = vld [vmem:[%s8466_s1 + $0x590] sm:$0xff]  }
 0x130   :  { %v5302_v37 = vadd.f32 %v5301_v2, %v5300_v60  ;;  %v7691_v11 = vadd.f32 %v5363_v1, %v3395_v62  ;;  %4084 = vmatprep.mubr.bf16.mxu1 %v6426_v55  ;;  %5859 = vmatpush3.bf16.msra.mxu1 %v6457_v61  ;;  %v6480_v55 = vld [vmem:[%s8466_s1 + $0x5c8] sm:$0xff]  }
 0x131   :  { %v5303_v12 = vpop.f32.mrf.mxu0  ;;  %v5365_v15 = vpop.f32.mrf.mxu1  ;;  %5860 = vmatprep.subr.bf16.mxu1 %v6458_v0  ;;  %v6443_v61 = vld [vmem:[%s8465_s0 + $0x3ac] ss:$108 sps:$4 sm:$0xff]  }
 0x132   :  { %v3400_v14 = vadd.f32 %v5302_v37, %v7485_v52  ;;  %5797 = vmatpush3.bf16.msra.mxu0 %v6435_v58  ;;  %v5366_v20 = vadd.f32 %v5365_v15, %v5364_v8  ;;  %v6481_v0 = vld [vmem:[%s8466_s1 + $0x588] sm:$0xff]   ;;  %v6486_v15 = vld [vmem:[%s8466_s1 + $0x580] sm:$0xff]  }
 0x133   :  { %v5304_v22 = vpop.f32.mrf.mxu0  ;;  %5798 = vmatprep.subr.bf16.mxu0 %v6439_v6  ;;  %v5367_v52 = vpop.f32.mrf.mxu1  ;;  %v6482_v6 = vld [vmem:[%s8466_s1 + $0x5c0] sm:$0xff]  }
 0x134   :  { %v5305_v25 = vadd.f32 %v5304_v22, %v5303_v12  ;;  %v7709_v27 = vadd.f32 %v5366_v20, %v3400_v14  ;;  %5861 = vmatpush3.bf16.msra.mxu1 %v6462_v13  ;;  %v6436_v12 = vld [vmem:[%s8465_s0 + $0x3a0] ss:$108 sps:$4 sm:$0xff]   ;;  %v6449_v20 = vld [vmem:[%s8465_s0 + $0x47c] ss:$108 sps:$4 sm:$0xff]  }
 0x135   :  { %v5306_v28 = vpop.f32.mrf.mxu0  ;;  %3988 = vmatmul.mubr.bf16.gmra.mxu0 %v6420_v4  ;;  %v5368_v34 = vpop.f32.mrf.mxu1  ;;  %5862 = vmatprep.subr.bf16.mxu1 %v6468_v23  ;;  %v6479_v4 = vld [vmem:[%s8466_s1 + $0x500] sm:$0xff]  }
 0x136   :  { %v3403_v33 = vadd.f32 %v5305_v25, %v7505_v3  ;;  %3995 = vmatprep.mubr.bf16.mxu0 %v6430_v9  ;;  %5799 = vmatpush3.bf16.msra.mxu0 %v6444_v10  ;;  %v5369_v36 = vadd.f32 %v5368_v34, %v5367_v52  ;;  %v6487_v9 = vld [vmem:[%s8466_s1 + $0x678] sm:$0xff]  }
 0x137   :  { %v5307_v38 = vpop.f32.mrf.mxu0  ;;  %5800 = vmatprep.subr.bf16.mxu0 %v6451_v19  ;;  %v5370_v43 = vpop.f32.mrf.mxu1  ;;  %4085 = vmatmul.mubr.bf16.gmra.mxu1 %v6424_v17 }
 0x138   :  { %v5308_v3 = vadd.f32 %v5307_v38, %v5306_v28  ;;  %v7733_v47 = vadd.f32 %v5369_v36, %v3403_v33  ;;  %4092 = vmatprep.mubr.bf16.mxu1 %v6434_v26  ;;  %5863 = vmatpush3.bf16.msra.mxu1 %v6469_v31  ;;  %v6441_v26 = vld [vmem:[%s8465_s0 + $0x3a8] ss:$108 sps:$4 sm:$0xff]   ;;  %v7790_v36 = vld [vmem:[%s8466_s1 + $0x6b8] sm:$0xff]  }
 0x139   :  { %v5309_v48 = vpop.f32.mrf.mxu0  ;;  %v5371_v51 = vpop.f32.mrf.mxu1  ;;  %5864 = vmatprep.subr.bf16.mxu1 %v6470_v35 }
 0x13a   :  { %v3408_v50 = vadd.f32 %v5308_v3, %v7525_v18  ;;  %5801 = vmatpush3.bf16.msra.mxu0 %v6455_v29  ;;  %v5372_v54 = vadd.f32 %v5371_v51, %v5370_v43  ;;  %v6432_v18 = vld [vmem:[%s8465_s0 + $0x2d0] ss:$108 sps:$4 sm:$0xff]   ;;  %v6447_v43 = vld [vmem:[%s8465_s0 + $0x478] ss:$108 sps:$4 sm:$0xff]  }
 0x13b   :  { %v5310_v21 = vpop.f32.mrf.mxu0  ;;  %5802 = vmatprep.subr.bf16.mxu0 %v6463_v41  ;;  %v5373_v60 = vpop.f32.mrf.mxu1 }
 0x13c   :  { %v5311_v58 = vadd.f32 %v5310_v21, %v5309_v48  ;;  %v7751_v62 = vadd.f32 %v5372_v54, %v3408_v50  ;;  %5865 = vmatpush3.bf16.msra.mxu1 %v6474_v49 }
 0x13d   :  { %v5312_v63 = vpop.f32.mrf.mxu0  ;;  %3996 = vmatmul.mubr.bf16.gmra.mxu0 %v6428_v39  ;;  %v5374_v2 = vpop.f32.mrf.mxu1  ;;  %5866 = vmatprep.subr.bf16.mxu1 %v6480_v55 }
 0x13e   :  { %v3411_v1 = vadd.f32 %v5311_v58, %v7539_v32  ;;  %4003 = vmatprep.mubr.bf16.mxu0 %v6438_v44  ;;  %5803 = vmatpush3.bf16.msra.mxu0 %v6467_v46  ;;  %v5375_v37 = vadd.f32 %v5374_v2, %v5373_v60  ;;  %v6461_v46 = vld [vmem:[%s8465_s0 + $0x554] ss:$108 sps:$4 sm:$0xff]   ;;  %v6459_v2 = vld [vmem:[%s8465_s0 + $0x550] ss:$108 sps:$4 sm:$0xff]  }
 0x13f   :  { %v5313_v8 = vpop.f32.mrf.mxu0  ;;  %5804 = vmatprep.subr.bf16.mxu0 %v6475_v53  ;;  %v5376_v10 = vpop.f32.mrf.mxu1  ;;  %4093 = vmatmul.mubr.bf16.gmra.mxu1 %v6432_v18  ;;  %v6452_v53 = vld [vmem:[%s8465_s0 + $0x480] ss:$108 sps:$4 sm:$0xff]  }
 0x140   :  { %v5314_v32 = vadd.f32 %v5313_v8, %v5312_v63  ;;  %v7769_v13 = vadd.f32 %v5375_v37, %v3411_v1  ;;  %4100 = vmatprep.mubr.bf16.mxu1 %v6443_v61  ;;  %5867 = vmatpush3.bf16.msra.mxu1 %v6481_v0 }
 0x141   :  { %v5315_v14 = vpop.f32.mrf.mxu0  ;;  %v5377_v19 = vpop.f32.mrf.mxu1  ;;  %5868 = vmatprep.subr.bf16.mxu1 %v6482_v6 }
 0x142   :  { %v3416_v17 = vadd.f32 %v5314_v32, %v7550_v45  ;;  %5805 = vmatpush3.bf16.msra.mxu0 %v6479_v4  ;;  %v5378_v22 = vadd.f32 %v5377_v19, %v5376_v10  ;;  %v6454_v45 = vld [vmem:[%s8465_s0 + $0x484] ss:$108 sps:$4 sm:$0xff]  }
 0x143   :  { %v5316_v23 = vpop.f32.mrf.mxu0  ;;  %5918 = vmatprep.subr.bf16.mxu0 %v6487_v9  ;;  %v5379_v52 = vpop.f32.mrf.mxu1  ;;  %v6464_v10 = vld [vmem:[%s8465_s0 + $0x558] ss:$108 sps:$4 sm:$0xff]  }
 0x144   :  { %v5317_v25 = vadd.f32 %v5316_v23, %v5315_v14  ;;  %v7781_v28 = vadd.f32 %v5378_v22, %v3416_v17  ;;  %5869 = vmatpush3.bf16.msra.mxu1 %v6486_v15 }
 0x145   :  { %v5318_v29 = vpop.f32.mrf.mxu0  ;;  %4004 = vmatmul.mubr.bf16.gmra.mxu0 %v6436_v12  ;;  %v5380_v33 = vpop.f32.mrf.mxu1  ;;  %6003 = vmatprep.subr.bf16.mxu1 %v7790_v36 }
 0x146   :  { %v3419_v31 = vadd.f32 %v5317_v25, %v7555_v56  ;;  %4011 = vmatprep.mubr.bf16.mxu0 %v6449_v20  ;;  %v5381_v34 = vadd.f32 %v5380_v33, %v5379_v52 }
 0x147   :  { %v5319_v35 = vpop.f32.mrf.mxu0  ;;  %v5382_v39 = vpop.f32.mrf.mxu1  ;;  %4101 = vmatmul.mubr.bf16.gmra.mxu1 %v6441_v26  ;;  %v6471_v26 = vld [vmem:[%s8465_s0 + $0x628] ss:$108 sps:$4 sm:$0xff]  }
 0x148   :  { %v5320_v38 = vadd.f32 %v5319_v35, %v5318_v29  ;;  %v7792_v41 = vadd.f32 %v5381_v34, %v3419_v31  ;;  %4108 = vmatprep.mubr.bf16.mxu1 %v6454_v45 }
 0x149   :  { %v5321_v3 = vpop.f32.mrf.mxu0  ;;  %v5383_v44 = vpop.f32.mrf.mxu1 }
 0x14a   :  { %v3424_v56 = vadd.f32 %v5320_v38, %v7566_v5  ;;  %v5384_v48 = vadd.f32 %v5383_v44, %v5382_v39  ;;  %v6466_v5 = vld [vmem:[%s8465_s0 + $0x55c] ss:$108 sps:$4 sm:$0xff]  }
 0x14b   :  { %v5322_v49 = vpop.f32.mrf.mxu0  ;;  %v5385_v51 = vpop.f32.mrf.mxu1  ;;  %v6476_v38 = vld [vmem:[%s8465_s0 + $0x630] ss:$108 sps:$4 sm:$0xff]  }
 0x14c   :  { %v5323_v50 = vadd.f32 %v5322_v49, %v5321_v3  ;;  %v7805_v54 = vadd.f32 %v5384_v48, %v3424_v56 }
 0x14d   :  { %v5324_v21 = vpop.f32.mrf.mxu0  ;;  %4012 = vmatmul.mubr.bf16.gmra.mxu0 %v6447_v43  ;;  %v5386_v58 = vpop.f32.mrf.mxu1 }
 0x14e   :  { %v3427_v55 = vadd.f32 %v5323_v50, %v7574_v16  ;;  %4019 = vmatprep.mubr.bf16.mxu0 %v6461_v46  ;;  %v5387_v60 = vadd.f32 %v5386_v58, %v5385_v51  ;;  %v6473_v16 = vld [vmem:[%s8465_s0 + $0x62c] ss:$108 sps:$4 sm:$0xff]   ;;  %v6483_v50 = vld [vmem:[%s8465_s0 + $0x50] ss:$108 sps:$4 sm:$0xff]  }
 0x14f   :  { %v5325_v18 = vpop.f32.mrf.mxu0  ;;  %v5388_v63 = vpop.f32.mrf.mxu1  ;;  %4109 = vmatmul.mubr.bf16.gmra.mxu1 %v6452_v53 }
 0x150   :  { %v5326_v61 = vadd.f32 %v5325_v18, %v5324_v21  ;;  %v7811_v0 = vadd.f32 %v5387_v60, %v3427_v55  ;;  %4116 = vmatprep.mubr.bf16.mxu1 %v6466_v5  ;;  %v6491_v21 = vld [vmem:[%s8466_s1 + $0x638] sm:$0xff]  }
 0x151   :  { %v5327_v1 = vpop.f32.mrf.mxu0  ;;  %v5389_v6 = vpop.f32.mrf.mxu1  ;;  %v6494_v55 = vld [vmem:[%s8465_s0 + $0x12c] ss:$108 sps:$4 sm:$0xff]  }
 0x152   :  { %v3432_v4 = vadd.f32 %v5326_v61, %v7585_v30  ;;  %v5390_v37 = vadd.f32 %v5389_v6, %v5388_v63  ;;  %v6478_v30 = vld [vmem:[%s8465_s0 + $0x634] ss:$108 sps:$4 sm:$0xff]   ;;  %v6488_v18 = vld [vmem:[%s8465_s0 + $0x58] ss:$108 sps:$4 sm:$0xff]  }
 0x153   :  { %v5328_v8 = vpop.f32.mrf.mxu0  ;;  %v5391_v32 = vpop.f32.mrf.mxu1  ;;  %v6495_v61 = vld [vmem:[%s8466_s1 + $0x670] sm:$0xff]  }
 0x154   :  { %v5329_v9 = vadd.f32 %v5328_v8, %v5327_v1  ;;  %v7823_v12 = vadd.f32 %v5390_v37, %v3432_v4  ;;  %v6499_v6 = vld [vmem:[%s8466_s1 + $0x630] sm:$0xff]  }
 0x155   :  { %v5330_v14 = vpop.f32.mrf.mxu0  ;;  %4020 = vmatmul.mubr.bf16.gmra.mxu0 %v6459_v2  ;;  %v5392_v17 = vpop.f32.mrf.mxu1  ;;  %v6529_v8 = vld [vmem:[%s8466_s1 + $0x6b0] sm:$0xff]  }
 0x156   :  { %v3435_v15 = vadd.f32 %v5329_v9, %v7590_v42  ;;  %4027 = vmatprep.mubr.bf16.mxu0 %v6473_v16  ;;  %v5393_v19 = vadd.f32 %v5392_v17, %v5391_v32  ;;  %v6485_v42 = vld [vmem:[%s8465_s0 + $0x54] ss:$108 sps:$4 sm:$0xff]  }
 0x157   :  { %v5331_v20 = vpop.f32.mrf.mxu0  ;;  %v5394_v23 = vpop.f32.mrf.mxu1  ;;  %4117 = vmatmul.mubr.bf16.gmra.mxu1 %v6464_v10  ;;  %v6503_v10 = vld [vmem:[%s8466_s1 + $0x668] sm:$0xff]  }
 0x158   :  { %v5332_v22 = vadd.f32 %v5331_v20, %v5330_v14  ;;  %v7829_v25 = vadd.f32 %v5393_v19, %v3435_v15  ;;  %4124 = vmatprep.mubr.bf16.mxu1 %v6478_v30  ;;  %v6502_v19 = vld [vmem:[%s8465_s0 + $0x204] ss:$108 sps:$4 sm:$0xff]   ;;  %v6507_v20 = vld [vmem:[%s8466_s1 + $0x628] sm:$0xff]  }
 0x159   :  { %v5333_v52 = vpop.f32.mrf.mxu0  ;;  %v5395_v45 = vpop.f32.mrf.mxu1 }
 0x15a   :  { %v3440_v29 = vadd.f32 %v5332_v22, %v7601_v57  ;;  %v5396_v31 = vadd.f32 %v5395_v45, %v5394_v23  ;;  %v6490_v57 = vld [vmem:[%s8465_s0 + $0x5c] ss:$108 sps:$4 sm:$0xff]  }
 0x15b   :  { %v5334_v33 = vpop.f32.mrf.mxu0  ;;  %v5397_v35 = vpop.f32.mrf.mxu1  ;;  %v6534_v45 = vld [vmem:[%s8466_s1 + $0x6a8] sm:$0xff]  }
 0x15c   :  { %v5335_v34 = vadd.f32 %v5334_v33, %v5333_v52  ;;  %v7841_v39 = vadd.f32 %v5396_v31, %v3440_v29  ;;  %v6511_v52 = vld [vmem:[%s8466_s1 + $0x660] sm:$0xff]  }
 0x15d   :  { %v5336_v3 = vpop.f32.mrf.mxu0  ;;  %4028 = vmatmul.mubr.bf16.gmra.mxu0 %v6471_v26  ;;  %v5398_v56 = vpop.f32.mrf.mxu1 }
 0x15e   :  { %v3443_v43 = vadd.f32 %v5335_v34, %v7612_v7  ;;  %4165 = vmatprep.mubr.bf16.mxu0 %v6485_v42  ;;  %v5399_v44 = vadd.f32 %v5398_v56, %v5397_v35  ;;  %v6506_v34 = vld [vmem:[%s8465_s0 + $0x20c] ss:$108 sps:$4 sm:$0xff]  }
 0x15f   :  { %v5337_v46 = vpop.f32.mrf.mxu0  ;;  %v5400_v49 = vpop.f32.mrf.mxu1  ;;  %4125 = vmatmul.mubr.bf16.gmra.mxu1 %v6476_v38 }
 0x160   :  { %v5338_v48 = vadd.f32 %v5337_v46, %v5336_v3  ;;  %v7850_v51 = vadd.f32 %v5399_v44, %v3443_v43  ;;  %4262 = vmatprep.mubr.bf16.mxu1 %v6490_v57  ;;  %v6515_v3 = vld [vmem:[%s8466_s1 + $0x620] sm:$0xff]   ;;  %v6519_v44 = vld [vmem:[%s8466_s1 + $0x658] sm:$0xff]  }
 0x161   :  { %v5339_v53 = vpop.f32.mrf.mxu0  ;;  %v5401_v5 = vpop.f32.mrf.mxu1  ;;  %v6539_v57 = vld [vmem:[%s8466_s1 + $0x6a0] sm:$0xff]  }
 0x162   :  { %v3448_v7 = vadd.f32 %v5338_v48, %v7629_v24  ;;  %v5402_v58 = vadd.f32 %v5401_v5, %v5400_v49  ;;  %v6498_v24 = vld [vmem:[%s8465_s0 + $0x134] ss:$108 sps:$4 sm:$0xff]   ;;  %v6524_v5 = vld [vmem:[%s8466_s1 + $0x618] sm:$0xff]  }
 0x163   :  { %v5340_v60 = vpop.f32.mrf.mxu0  ;;  %v5403_v1 = vpop.f32.mrf.mxu1 }
 0x164   :  { %v5341_v63 = vadd.f32 %v5340_v60, %v5339_v53  ;;  %v7868_v2 = vadd.f32 %v5402_v58, %v3448_v7  ;;  %v6510_v53 = vld [vmem:[%s8465_s0 + $0x2dc] ss:$108 sps:$4 sm:$0xff]  }
 0x165   :  { %v5422_v4 = vpop.f32.mrf.mxu0  ;;  %4166 = vmatmul.mubr.bf16.vlgmr.msra.gmra.mxu0 %v6483_v50  ;;  %v5404_v37 = vpop.f32.mrf.mxu1  ;;  %v6500_v50 = vld [vmem:[%s8465_s0 + $0x200] ss:$108 sps:$4 sm:$0xff]  }
 0x166   :  { %v3451_v16 = vadd.f32 %v5341_v63, %v7646_v40  ;;  %5919 = vmatpush3.bf16.msra.mxu0 %v6491_v21  ;;  %4173 = vmatprep.mubr.bf16.mxu0 %v6494_v55  ;;  %v5405_v9 = vadd.f32 %v5404_v37, %v5403_v1  ;;  %v6492_v40 = vld [vmem:[%s8465_s0 + $0x128] ss:$108 sps:$4 sm:$0xff]   ;;  %v4611_v55 = vld [vmem:[#allocation2] sm:$0x1] }
 0x167   :  { %v5423_v32 = vpop.f32.mrf.mxu0  ;;  %5920 = vmatprep.subr.bf16.mxu0 %v6495_v61  ;;  %v5486_v30 = vpop.f32.mrf.mxu1  ;;  %4263 = vmatmul.mubr.bf16.vlgmr.msra.gmra.mxu1 %v6488_v18 }
 0x168   :  { %v5424_v14 = vadd.f32 %v5423_v32, %v5422_v4  ;;  %v7883_v15 = vadd.f32 %v5405_v9, %v3451_v16  ;;  %4270 = vmatprep.mubr.bf16.mxu1 %v6498_v24  ;;  %6004 = vmatpush3.bf16.msra.mxu1 %v7790_v36 }
 0x169   :  { %v5425_v17 = vpop.f32.mrf.mxu0  ;;  %v5487_v23 = vpop.f32.mrf.mxu1  ;;  %6005 = vmatprep.subr.bf16.mxu1 %v6529_v8 }
 0x16a   :  { %v3586_v22 = vadd.f32 %v5424_v14, %v7670_v59  ;;  %5921 = vmatpush3.bf16.msra.mxu0 %v6499_v6  ;;  %v5488_v26 = vadd.f32 %v5487_v23, %v5486_v30  ;;  %v6496_v59 = vld [vmem:[%s8465_s0 + $0x130] ss:$108 sps:$4 sm:$0xff]  }
 0x16b   :  { %v5426_v29 = vpop.f32.mrf.mxu0  ;;  %5922 = vmatprep.subr.bf16.mxu0 %v6503_v10  ;;  %v5489_v31 = vpop.f32.mrf.mxu1 }
 0x16c   :  { %v5427_v42 = vadd.f32 %v5426_v29, %v5425_v17  ;;  %v7902_v36 = vadd.f32 %v5488_v26, %v3586_v22  ;;  %6006 = vmatpush3.bf16.msra.mxu1 %v6529_v8 }
 0x16d   :  { %v5428_v33 = vpop.f32.mrf.mxu0  ;;  %4174 = vmatmul.mubr.bf16.gmra.mxu0 %v6492_v40  ;;  %v5490_v38 = vpop.f32.mrf.mxu1  ;;  %6007 = vmatprep.subr.bf16.mxu1 %v6534_v45 }
 0x16e   :  { %v3589_v35 = vadd.f32 %v5427_v42, %v7691_v11  ;;  %4181 = vmatprep.mubr.bf16.mxu0 %v6502_v19  ;;  %5923 = vmatpush3.bf16.msra.mxu0 %v6507_v20  ;;  %v5491_v43 = vadd.f32 %v5490_v38, %v5489_v31 }
 0x16f   :  { %v5429_v56 = vpop.f32.mrf.mxu0  ;;  %5924 = vmatprep.subr.bf16.mxu0 %v6511_v52  ;;  %v5492_v46 = vpop.f32.mrf.mxu1  ;;  %4271 = vmatmul.mubr.bf16.gmra.mxu1 %v6496_v59 }
 0x170   :  { %v5430_v11 = vadd.f32 %v5429_v56, %v5428_v33  ;;  %v7917_v48 = vadd.f32 %v5491_v43, %v3589_v35  ;;  %4278 = vmatprep.mubr.bf16.mxu1 %v6506_v34  ;;  %6008 = vmatpush3.bf16.msra.mxu1 %v6534_v45 }
 0x171   :  { %v5431_v49 = vpop.f32.mrf.mxu0  ;;  %v5493_v7 = vpop.f32.mrf.mxu1  ;;  %6009 = vmatprep.subr.bf16.mxu1 %v6539_v57 }
 0x172   :  { %v3594_v21 = vadd.f32 %v5430_v11, %v7709_v27  ;;  %5925 = vmatpush3.bf16.msra.mxu0 %v6515_v3 }
 0x173   :  { %13 = vsyncpa [#allocation4], 0  ;;  %v5494_v58 = vadd.f32 %v5493_v7, %v5492_v46  ;;  %v5432_v60 = vpop.f32.mrf.mxu0  ;;  %5926 = vmatprep.subr.bf16.mxu0 %v6519_v44  ;;  %v6528_v18 = vld [vmem:[%s8466_s1 + $0x650] sm:$0xff]   ;;  %v6544_v27 = vld [vmem:[%s8466_s1 + $0x698] sm:$0xff]   ;;  %4614 = vperm.xlu0 %6050, %v4611_v55   ;;  %v5495_v63 = vpop.f32.mrf.mxu1  ;;  %vm6616_vm0 = vmmov 0   ;;  %vm4569_vm1 = vcmask 261120  }
 0x174   :  { %v5433_v61 = vadd.f32 %v5432_v60, %v5431_v49  ;;  %v6504_v1 = vld [vmem:[%s8465_s0 + $0x208] ss:$108 sps:$4 sm:$0xff]   ;;  %v6514_v6 = vld [vmem:[%s8465_s0 + $0x2e4] ss:$108 sps:$4 sm:$0xff]   ;;  %6010 = vmatpush3.bf16.msra.mxu1 %v6539_v57  ;;  %v6512_v59 = vld [vmem:[%s8465_s0 + $0x2e0] ss:$108 sps:$4 sm:$0xff]  }
 0x175   :  { %v7938_v24 = vadd.f32 %v5494_v58, %v3594_v21  ;;  %v5434_v4 = vpop.f32.mrf.mxu0  ;;  %4182 = vmatmul.mubr.bf16.gmra.mxu0 %v6500_v50  ;;  %v5496_v37 = vpop.f32.mrf.mxu1  ;;  %v6533_v8 = vld [vmem:[%s8466_s1 + $0x610] sm:$0xff]   ;;  %v6538_v14 = vld [vmem:[%s8466_s1 + $0x648] sm:$0xff]   ;;  %6011 = vmatprep.subr.bf16.mxu1 %v6544_v27  ;;  %v6508_v19 = vld [vmem:[%s8465_s0 + $0x2d8] ss:$108 sps:$4 sm:$0xff]   ;;  %vm4700_vm2 = vcmask 8192  }
 0x176   :  { %v3597_v16 = vadd.f32 %v5433_v61, %v7733_v47  ;;  %4189 = vmatprep.mubr.bf16.mxu0 %v6510_v53  ;;  %5927 = vmatpush3.bf16.msra.mxu0 %v6524_v5  ;;  %v6549_v9 = vld [vmem:[%s8466_s1 + $0x690] sm:$0xff]   ;;  %v5497_v32 = vadd.f32 %v5496_v37, %v5495_v63  ;;  %v6543_v52 = vld [vmem:[%s8466_s1 + $0x608] sm:$0xff]   ;;  %v6548_v45 = vld [vmem:[%s8466_s1 + $0x640] sm:$0xff]  }
 0x177   :  { %v5435_v10 = vpop.f32.mrf.mxu0  ;;  %5928 = vmatprep.subr.bf16.mxu0 %v6528_v18  ;;  %v5498_v30 = vpop.f32.mrf.mxu1  ;;  %4279 = vmatmul.mubr.bf16.gmra.mxu1 %v6504_v1  ;;  %v6518_v23 = vld [vmem:[%s8465_s0 + $0x3b4] ss:$108 sps:$4 sm:$0xff]   ;;  %v6523_v35 = vld [vmem:[%s8465_s0 + $0x3bc] ss:$108 sps:$4 sm:$0xff]   ;;  %v6527_v7 = vld [vmem:[%s8465_s0 + $0x48c] ss:$108 sps:$4 sm:$0xff]  }
 0x178   :  { %v5436_v47 = vadd.f32 %v5435_v10, %v5434_v4  ;;  %v7953_v40 = vadd.f32 %v5497_v32, %v3597_v16  ;;  %4286 = vmatprep.mubr.bf16.mxu1 %v6514_v6  ;;  %6012 = vmatpush3.bf16.msra.mxu1 %v6544_v27  ;;  %v6553_v57 = vld [vmem:[%s8466_s1 + $0x600] sm:$0xff]   ;;  %v6516_v50 = vld [vmem:[%s8465_s0 + $0x3b0] ss:$108 sps:$4 sm:$0xff]   ;;  %v6525_v32 = vld [vmem:[%s8465_s0 + $0x488] ss:$108 sps:$4 sm:$0xff]  }
 0x179   :  { %v5437_v17 = vpop.f32.mrf.mxu0  ;;  %v5499_v22 = vpop.f32.mrf.mxu1  ;;  %6013 = vmatprep.subr.bf16.mxu1 %v6549_v9  ;;  %v6558_v43 = vld [vmem:[%s8466_s1 + $0x680] sm:$0xff]  }
 0x17a   :  { %v3602_v20 = vadd.f32 %v5436_v47, %v7751_v62  ;;  %5929 = vmatpush3.bf16.msra.mxu0 %v6533_v8  ;;  %v5500_v26 = vadd.f32 %v5499_v22, %v5498_v30  ;;  %v6554_v62 = vld [vmem:[%s8466_s1 + $0x688] sm:$0xff]   ;;  %v6521_v18 = vld [vmem:[%s8465_s0 + $0x3b8] ss:$108 sps:$4 sm:$0xff]  }
 0x17b   :  { %v5438_v29 = vpop.f32.mrf.mxu0  ;;  %5930 = vmatprep.subr.bf16.mxu0 %v6538_v14  ;;  %v5501_v31 = vpop.f32.mrf.mxu1 }
 0x17c   :  { %v5439_v42 = vadd.f32 %v5438_v29, %v5437_v17  ;;  %v7974_v33 = vadd.f32 %v5500_v26, %v3602_v20  ;;  %6014 = vmatpush3.bf16.msra.mxu1 %v6549_v9  ;;  %v6530_v20 = vld [vmem:[%s8465_s0 + $0x490] ss:$108 sps:$4 sm:$0xff]  }
 0x17d   :  { %v5440_v34 = vpop.f32.mrf.mxu0  ;;  %4190 = vmatmul.mubr.bf16.gmra.mxu0 %v6508_v19  ;;  %v5502_v3 = vpop.f32.mrf.mxu1  ;;  %6015 = vmatprep.subr.bf16.mxu1 %v6554_v62 }
 0x17e   :  { %v3605_v38 = vadd.f32 %v5439_v42, %v7769_v13  ;;  %4197 = vmatprep.mubr.bf16.mxu0 %v6518_v23  ;;  %5931 = vmatpush3.bf16.msra.mxu0 %v6543_v52  ;;  %v5503_v56 = vadd.f32 %v5502_v3, %v5501_v31 }
 0x17f   :  { %v5441_v44 = vpop.f32.mrf.mxu0  ;;  %5932 = vmatprep.subr.bf16.mxu0 %v6548_v45  ;;  %v5504_v46 = vpop.f32.mrf.mxu1  ;;  %4287 = vmatmul.mubr.bf16.gmra.mxu1 %v6512_v59 }
 0x180   :  { %v5442_v11 = vadd.f32 %v5441_v44, %v5440_v34  ;;  %v7986_v49 = vadd.f32 %v5503_v56, %v3605_v38  ;;  %4294 = vmatprep.mubr.bf16.mxu1 %v6523_v35  ;;  %6016 = vmatpush3.bf16.msra.mxu1 %v6554_v62  ;;  %v6535_v34 = vld [vmem:[%s8465_s0 + $0x560] ss:$108 sps:$4 sm:$0xff]   ;;  %v6540_v44 = vld [vmem:[%s8465_s0 + $0x568] ss:$108 sps:$4 sm:$0xff]  }
 0x181   :  { %v5443_v13 = vpop.f32.mrf.mxu0  ;;  %v5505_v21 = vpop.f32.mrf.mxu1  ;;  %6017 = vmatprep.subr.bf16.mxu1 %v6558_v43 }
 0x182   :  { %v3610_v53 = vadd.f32 %v5442_v11, %v7781_v28  ;;  %5933 = vmatpush3.bf16.msra.mxu0 %v6553_v57  ;;  %v5506_v5 = vadd.f32 %v5505_v21, %v5504_v46  ;;  %v6532_v28 = vld [vmem:[%s8465_s0 + $0x494] ss:$108 sps:$4 sm:$0xff]  }
 0x183   :  { %v5444_v55 = vpop.f32.mrf.mxu0  ;;  %v5507_v60 = vpop.f32.mrf.mxu1 }
 0x184   :  { %v5445_v58 = vadd.f32 %v5444_v55, %v5443_v13  ;;  %v7998_v27 = vadd.f32 %v5506_v5, %v3610_v53  ;;  %6018 = vmatpush3.bf16.msra.mxu1 %v6558_v43 }
 0x185   :  { %v5446_v61 = vpop.f32.mrf.mxu0  ;;  %4198 = vmatmul.mubr.bf16.gmra.mxu0 %v6516_v50  ;;  %v5508_v1 = vpop.f32.mrf.mxu1 }
 0x186   :  { %v3613_v63 = vadd.f32 %v5445_v58, %v7792_v41  ;;  %4205 = vmatprep.mubr.bf16.mxu0 %v6527_v7  ;;  %v5509_v4 = vadd.f32 %v5508_v1, %v5507_v60  ;;  %v6537_v41 = vld [vmem:[%s8465_s0 + $0x564] ss:$108 sps:$4 sm:$0xff]  }
 0x187   :  { %v5447_v6 = vpop.f32.mrf.mxu0  ;;  %v5510_v37 = vpop.f32.mrf.mxu1  ;;  %4295 = vmatmul.mubr.bf16.gmra.mxu1 %v6521_v18  ;;  %v6545_v60 = vld [vmem:[%s8465_s0 + $0x638] ss:$108 sps:$4 sm:$0xff]  }
 0x188   :  { %v5448_v16 = vadd.f32 %v5447_v6, %v5446_v61  ;;  %v8004_v8 = vadd.f32 %v5509_v4, %v3613_v63  ;;  %4302 = vmatprep.mubr.bf16.mxu1 %v6532_v28  ;;  %v6550_v6 = vld [vmem:[%s8465_s0 + $0x640] ss:$108 sps:$4 sm:$0xff]  }
 0x189   :  { %v5449_v9 = vpop.f32.mrf.mxu0  ;;  %v5511_v14 = vpop.f32.mrf.mxu1 }
 0x18a   :  { %v3618_v10 = vadd.f32 %v5448_v16, %v7805_v54  ;;  %v5512_v47 = vadd.f32 %v5511_v14, %v5510_v37  ;;  %v6542_v54 = vld [vmem:[%s8465_s0 + $0x56c] ss:$108 sps:$4 sm:$0xff]  }
 0x18b   :  { %v5450_v30 = vpop.f32.mrf.mxu0  ;;  %v5513_v19 = vpop.f32.mrf.mxu1 }
 0x18c   :  { %v5451_v17 = vadd.f32 %v5450_v30, %v5449_v9  ;;  %v8016_v22 = vadd.f32 %v5512_v47, %v3618_v10 }
 0x18d   :  { %v5452_v23 = vpop.f32.mrf.mxu0  ;;  %4206 = vmatmul.mubr.bf16.gmra.mxu0 %v6525_v32  ;;  %v5514_v26 = vpop.f32.mrf.mxu1 }
 0x18e   :  { %v3621_v52 = vadd.f32 %v5451_v17, %v7811_v0  ;;  %4213 = vmatprep.mubr.bf16.mxu0 %v6537_v41  ;;  %v5515_v29 = vadd.f32 %v5514_v26, %v5513_v19  ;;  %v6547_v0 = vld [vmem:[%s8465_s0 + $0x63c] ss:$108 sps:$4 sm:$0xff]   ;;  %v6555_v19 = vld [vmem:[%s8465_s0 + $0x60] ss:$108 sps:$4 sm:$0xff]  }
 0x18f   :  { %v5453_v45 = vpop.f32.mrf.mxu0  ;;  %v5516_v42 = vpop.f32.mrf.mxu1  ;;  %4303 = vmatmul.mubr.bf16.gmra.mxu1 %v6530_v20 }
 0x190   :  { %v5454_v62 = vadd.f32 %v5453_v45, %v5452_v23  ;;  %v8022_v31 = vadd.f32 %v5515_v29, %v3621_v52  ;;  %4310 = vmatprep.mubr.bf16.mxu1 %v6542_v54  ;;  %v6560_v45 = vld [vmem:[%s8465_s0 + $0x140] ss:$108 sps:$4 sm:$0xff]  }
 0x191   :  { %v5455_v59 = vpop.f32.mrf.mxu0  ;;  %v5517_v38 = vpop.f32.mrf.mxu1 }
 0x192   :  { %v3626_v35 = vadd.f32 %v5454_v62, %v7823_v12  ;;  %v5518_v3 = vadd.f32 %v5517_v38, %v5516_v42  ;;  %v6552_v12 = vld [vmem:[%s8465_s0 + $0x644] ss:$108 sps:$4 sm:$0xff]  }
 0x193   :  { %v5456_v57 = vpop.f32.mrf.mxu0  ;;  %v5519_v56 = vpop.f32.mrf.mxu1 }
 0x194   :  { %v5457_v43 = vadd.f32 %v5456_v57, %v5455_v59  ;;  %v8034_v11 = vadd.f32 %v5518_v3, %v3626_v35 }
 0x195   :  { %v5458_v46 = vpop.f32.mrf.mxu0  ;;  %4214 = vmatmul.mubr.bf16.gmra.mxu0 %v6535_v34  ;;  %v5520_v50 = vpop.f32.mrf.mxu1 }
 0x196   :  { %v3629_v13 = vadd.f32 %v5457_v43, %v7829_v25  ;;  %4221 = vmatprep.mubr.bf16.mxu0 %v6547_v0  ;;  %v5521_v53 = vadd.f32 %v5520_v50, %v5519_v56  ;;  %v6557_v25 = vld [vmem:[%s8465_s0 + $0x64] ss:$108 sps:$4 sm:$0xff]  }
 0x197   :  { %v5459_v21 = vpop.f32.mrf.mxu0  ;;  %v5522_v5 = vpop.f32.mrf.mxu1  ;;  %4311 = vmatmul.mubr.bf16.gmra.mxu1 %v6540_v44  ;;  %v6561_v56 = vld [vmem:[%s8465_s0 + $0x138] ss:$108 sps:$4 sm:$0xff]  }
 0x198   :  { %v5460_v7 = vadd.f32 %v5459_v21, %v5458_v46  ;;  %v8040_v55 = vadd.f32 %v5521_v53, %v3629_v13  ;;  %4318 = vmatprep.mubr.bf16.mxu1 %v6552_v12  ;;  %v6568_v21 = vld [vmem:[%s8465_s0 + $0x2f0] ss:$108 sps:$4 sm:$0xff]  }
 0x199   :  { %v5461_v58 = vpop.f32.mrf.mxu0  ;;  %v5523_v61 = vpop.f32.mrf.mxu1 }
 0x19a   :  { %v3634_v18 = vadd.f32 %v5460_v7, %v7841_v39  ;;  %v5524_v28 = vadd.f32 %v5523_v61, %v5522_v5  ;;  %v6559_v39 = vld [vmem:[%s8465_s0 + $0x68] ss:$108 sps:$4 sm:$0xff]  }
 0x19b   :  { %v5462_v63 = vpop.f32.mrf.mxu0  ;;  %v5525_v4 = vpop.f32.mrf.mxu1 }
 0x19c   :  { %v5463_v1 = vadd.f32 %v5462_v63, %v5461_v58  ;;  %v8052_v16 = vadd.f32 %v5524_v28, %v3634_v18 }
 0x19d   :  { %v5464_v37 = vpop.f32.mrf.mxu0  ;;  %4222 = vmatmul.mubr.bf16.gmra.mxu0 %v6545_v60  ;;  %v5526_v32 = vpop.f32.mrf.mxu1 }
 0x19e   :  { %v3637_v9 = vadd.f32 %v5463_v1, %v7850_v51  ;;  %4359 = vmatprep.mubr.bf16.mxu0 %v6557_v25  ;;  %v5527_v10 = vadd.f32 %v5526_v32, %v5525_v4  ;;  %v6563_v51 = vld [vmem:[%s8465_s0 + $0x13c] ss:$108 sps:$4 sm:$0xff]  }
 0x19f   :  { %v5465_v14 = vpop.f32.mrf.mxu0  ;;  %v5528_v47 = vpop.f32.mrf.mxu1  ;;  %4319 = vmatmul.mubr.bf16.gmra.mxu1 %v6550_v6  ;;  %v6564_v4 = vld [vmem:[%s8465_s0 + $0x210] ss:$108 sps:$4 sm:$0xff]  }
 0x1a0   :  { %v5466_v41 = vadd.f32 %v5465_v14, %v5464_v37  ;;  %v8058_v30 = vadd.f32 %v5527_v10, %v3637_v9  ;;  %6019 = vmatprep.mubr.bf16.mxu1 %v6559_v39  ;;  %v6576_v14 = vld [vmem:[%s8465_s0 + $0x4a0] ss:$108 sps:$4 sm:$0xff]  }
 0x1a1   :  { %v5467_v17 = vpop.f32.mrf.mxu0  ;;  %v5529_v23 = vpop.f32.mrf.mxu1 }
 0x1a2   :  { %v3642_v20 = vadd.f32 %v5466_v41, %v7868_v2  ;;  %v5530_v54 = vadd.f32 %v5529_v23, %v5528_v47  ;;  %v6567_v2 = vld [vmem:[%s8465_s0 + $0x218] ss:$108 sps:$4 sm:$0xff]  }
 0x1a3   :  { %v5468_v52 = vpop.f32.mrf.mxu0  ;;  %v5531_v29 = vpop.f32.mrf.mxu1 }
 0x1a4   :  { %v5469_v26 = vadd.f32 %v5468_v52, %v5467_v17  ;;  %v8070_v62 = vadd.f32 %v5530_v54, %v3642_v20 }
 0x1a5   :  { %v5550_v42 = vpop.f32.mrf.mxu0  ;;  %4360 = vmatmul.mubr.bf16.vlgmr.msra.gmra.mxu0 %v6555_v19  ;;  %v5532_v34 = vpop.f32.mrf.mxu1 }
 0x1a6   :  { %v3645_v59 = vadd.f32 %v5469_v26, %v7883_v15  ;;  %4367 = vmatprep.mubr.bf16.mxu0 %v6563_v51  ;;  %v5533_v35 = vadd.f32 %v5532_v34, %v5531_v29  ;;  %v6566_v15 = vld [vmem:[%s8465_s0 + $0x214] ss:$108 sps:$4 sm:$0xff]  }
 0x1a7   :  { %v5551_v38 = vpop.f32.mrf.mxu0  ;;  %v5614_v3 = vpop.f32.mrf.mxu1  ;;  %6020 = vmatmul.mubr.bf16.vlgmr.msra.gmra.mxu1 %v6560_v45  ;;  %v6569_v29 = vld [vmem:[%s8465_s0 + $0x2e8] ss:$108 sps:$4 sm:$0xff]  }
 0x1a8   :  { %v5552_v0 = vadd.f32 %v5551_v38, %v5550_v42  ;;  %v8076_v57 = vadd.f32 %v5533_v35, %v3645_v59  ;;  %6023 = vmatprep.mubr.bf16.mxu1 %v6567_v2  ;;  %v6584_v38 = vld [vmem:[%s8465_s0 + $0x650] ss:$108 sps:$4 sm:$0xff]  }
 0x1a9   :  { %v5553_v43 = vpop.f32.mrf.mxu0  ;;  %v5615_v46 = vpop.f32.mrf.mxu1 }
 0x1aa   :  { %v3780_v44 = vadd.f32 %v5552_v0, %v7902_v36  ;;  %v5616_v12 = vadd.f32 %v5615_v46, %v5614_v3  ;;  %v6575_v36 = vld [vmem:[%s8465_s0 + $0x3c8] ss:$108 sps:$4 sm:$0xff]  }
 0x1ab   :  { %v5554_v13 = vpop.f32.mrf.mxu0  ;;  %v5617_v53 = vpop.f32.mrf.mxu1 }
 0x1ac   :  { %v5555_v50 = vadd.f32 %v5554_v13, %v5553_v43  ;;  %v8088_v7 = vadd.f32 %v5616_v12, %v3780_v44 }
 0x1ad   :  { %v5556_v5 = vpop.f32.mrf.mxu0  ;;  %4368 = vmatmul.mubr.bf16.gmra.mxu0 %v6561_v56  ;;  %v5618_v60 = vpop.f32.mrf.mxu1 }
 0x1ae   :  { %v3783_v58 = vadd.f32 %v5555_v50, %v7917_v48  ;;  %4375 = vmatprep.mubr.bf16.mxu0 %v6566_v15  ;;  %v5619_v18 = vadd.f32 %v5618_v60, %v5617_v53  ;;  %v6571_v48 = vld [vmem:[%s8465_s0 + $0x2ec] ss:$108 sps:$4 sm:$0xff]  }
 0x1af   :  { %v5557_v61 = vpop.f32.mrf.mxu0  ;;  %v5620_v28 = vpop.f32.mrf.mxu1  ;;  %6024 = vmatmul.mubr.bf16.gmra.mxu1 %v6568_v21  ;;  %v6572_v50 = vld [vmem:[%s8465_s0 + $0x3c0] ss:$108 sps:$4 sm:$0xff]  }
 0x1b0   :  { %v5558_v25 = vadd.f32 %v5557_v61, %v5556_v5  ;;  %v8094_v63 = vadd.f32 %v5619_v18, %v3783_v58  ;;  %6027 = vmatprep.mubr.bf16.mxu1 %v6575_v36 }
 0x1b1   :  { %v5559_v1 = vpop.f32.mrf.mxu0  ;;  %v5621_v37 = vpop.f32.mrf.mxu1 }
 0x1b2   :  { %v3788_v6 = vadd.f32 %v5558_v25, %v7938_v24  ;;  %v5622_v39 = vadd.f32 %v5621_v37, %v5620_v28  ;;  %v6583_v24 = vld [vmem:[%s8465_s0 + $0x578] ss:$108 sps:$4 sm:$0xff]  }
 0x1b3   :  { %v5560_v9 = vpop.f32.mrf.mxu0  ;;  %v5623_v10 = vpop.f32.mrf.mxu1 }
 0x1b4   :  { %v5561_v32 = vadd.f32 %v5560_v9, %v5559_v1  ;;  %v8106_v41 = vadd.f32 %v5622_v39, %v3788_v6  ;;  %v6577_v39 = vld [vmem:[%s8465_s0 + $0x498] ss:$108 sps:$4 sm:$0xff]  }
 0x1b5   :  { %v5562_v47 = vpop.f32.mrf.mxu0  ;;  %4376 = vmatmul.mubr.bf16.gmra.mxu0 %v6564_v4  ;;  %v5624_v19 = vpop.f32.mrf.mxu1 }
 0x1b6   :  { %v3791_v17 = vadd.f32 %v5561_v32, %v7953_v40  ;;  %4383 = vmatprep.mubr.bf16.mxu0 %v6571_v48  ;;  %v5625_v20 = vadd.f32 %v5624_v19, %v5623_v10  ;;  %v6574_v40 = vld [vmem:[%s8465_s0 + $0x3c4] ss:$108 sps:$4 sm:$0xff]  }
 0x1b7   :  { %v5563_v23 = vpop.f32.mrf.mxu0  ;;  %v5626_v54 = vpop.f32.mrf.mxu1  ;;  %6028 = vmatmul.mubr.bf16.gmra.mxu1 %v6576_v14 }
 0x1b8   :  { %v5564_v51 = vadd.f32 %v5563_v23, %v5562_v47  ;;  %v8112_v52 = vadd.f32 %v5625_v20, %v3791_v17  ;;  %6031 = vmatprep.mubr.bf16.mxu1 %v6583_v24 }
 0x1b9   :  { %v5565_v26 = vpop.f32.mrf.mxu0  ;;  %v5627_v42 = vpop.f32.mrf.mxu1 }
 0x1ba   :  { %v3796_v45 = vadd.f32 %v5564_v51, %v7974_v33  ;;  %v5628_v2 = vadd.f32 %v5627_v42, %v5626_v54  ;;  %v6580_v42 = vld [vmem:[%s8465_s0 + $0x570] ss:$108 sps:$4 sm:$0xff]  }
 0x1bb   :  { %v5566_v59 = vpop.f32.mrf.mxu0  ;;  %v5629_v35 = vpop.f32.mrf.mxu1 }
 0x1bc   :  { %v5567_v34 = vadd.f32 %v5566_v59, %v5565_v26  ;;  %v8124_v0 = vadd.f32 %v5628_v2, %v3796_v45 }
 0x1bd   :  { %v5568_v3 = vpop.f32.mrf.mxu0  ;;  %4384 = vmatmul.mubr.bf16.gmra.mxu0 %v6569_v29  ;;  %v5630_v33 = vpop.f32.mrf.mxu1 }
 0x1be   :  { %v3799_v43 = vadd.f32 %v5567_v34, %v7986_v49  ;;  %4391 = vmatprep.mubr.bf16.mxu0 %v6574_v40  ;;  %v5631_v56 = vadd.f32 %v5630_v33, %v5629_v35  ;;  %v6579_v49 = vld [vmem:[%s8465_s0 + $0x49c] ss:$108 sps:$4 sm:$0xff]  }
 0x1bf   :  { %v5569_v44 = vpop.f32.mrf.mxu0  ;;  %v5632_v15 = vpop.f32.mrf.mxu1  ;;  %6032 = vmatmul.mubr.bf16.gmra.mxu1 %v6584_v38 }
 0x1c0   :  { %v5570_v46 = vadd.f32 %v5569_v44, %v5568_v3  ;;  %v8127_v12 = vadd.f32 %v5631_v56, %v3799_v43 }
 0x1c1   :  { %v5571_v13 = vpop.f32.mrf.mxu0  ;;  %v5633_v21 = vpop.f32.mrf.mxu1 }
 0x1c2   :  { %v3804_v53 = vadd.f32 %v5570_v46, %v7998_v27  ;;  %v5634_v5 = vadd.f32 %v5633_v21, %v5632_v15 }
 0x1c3   :  { %v5572_v36 = vpop.f32.mrf.mxu0  ;;  %v5635_v60 = vpop.f32.mrf.mxu1 }
 0x1c4   :  { %v5573_v58 = vadd.f32 %v5572_v36, %v5571_v13  ;;  %v8136_v18 = vadd.f32 %v5634_v5, %v3804_v53  ;;  %v6585_v53 = vld [vmem:[%s8465_s0 + $0x648] ss:$108 sps:$4 sm:$0xff]  }
 0x1c5   :  { %v5574_v61 = vpop.f32.mrf.mxu0  ;;  %4392 = vmatmul.mubr.bf16.gmra.mxu0 %v6572_v50  ;;  %v5636_v28 = vpop.f32.mrf.mxu1 }
 0x1c6   :  { %v3807_v25 = vadd.f32 %v5573_v58, %v8004_v8  ;;  %4399 = vmatprep.mubr.bf16.mxu0 %v6579_v49  ;;  %v5637_v1 = vadd.f32 %v5636_v28, %v5635_v60  ;;  %v6582_v8 = vld [vmem:[%s8465_s0 + $0x574] ss:$108 sps:$4 sm:$0xff]  }
 0x1c7   :  { %v5575_v4 = vpop.f32.mrf.mxu0  ;;  %v5638_v6 = vpop.f32.mrf.mxu1 }
 0x1c8   :  { %v5576_v27 = vadd.f32 %v5575_v4, %v5574_v61  ;;  %v8139_v37 = vadd.f32 %v5637_v1, %v3807_v25 }
 0x1c9   :  { %v5577_v48 = vpop.f32.mrf.mxu0  ;;  %v5639_v32 = vpop.f32.mrf.mxu1 }
 0x1ca   :  { %v3812_v9 = vadd.f32 %v5576_v27, %v8016_v22  ;;  %v5640_v10 = vadd.f32 %v5639_v32, %v5638_v6 }
 0x1cb   :  { %v5578_v14 = vpop.f32.mrf.mxu0  ;;  %v5641_v24 = vpop.f32.mrf.mxu1 }
 0x1cc   :  { %v5579_v47 = vadd.f32 %v5578_v14, %v5577_v48  ;;  %v8148_v17 = vadd.f32 %v5640_v10, %v3812_v9 }
 0x1cd   :  { %v5580_v19 = vpop.f32.mrf.mxu0  ;;  %4400 = vmatmul.mubr.bf16.gmra.mxu0 %v6577_v39  ;;  %v5642_v23 = vpop.f32.mrf.mxu1 }
 0x1ce   :  { %v3815_v20 = vadd.f32 %v5579_v47, %v8022_v31  ;;  %4407 = vmatprep.mubr.bf16.mxu0 %v6582_v8  ;;  %v5643_v51 = vadd.f32 %v5642_v23, %v5641_v24  ;;  %v6587_v31 = vld [vmem:[%s8465_s0 + $0x64c] ss:$108 sps:$4 sm:$0xff]  }
 0x1cf   :  { %v5581_v54 = vpop.f32.mrf.mxu0  ;;  %v5644_v26 = vpop.f32.mrf.mxu1 }
 0x1d0   :  { %v5582_v22 = vadd.f32 %v5581_v54, %v5580_v19  ;;  %v8151_v29 = vadd.f32 %v5643_v51, %v3815_v20 }
 0x1d1   :  { %v5583_v45 = vpop.f32.mrf.mxu0  ;;  %v5645_v2 = vpop.f32.mrf.mxu1 }
 0x1d2   :  { %v3820_v40 = vadd.f32 %v5582_v22, %v8034_v11  ;;  %v5646_v59 = vadd.f32 %v5645_v2, %v5644_v26 }
 0x1d3   :  { %v5584_v34 = vpop.f32.mrf.mxu0  ;;  %v5647_v38 = vpop.f32.mrf.mxu1 }
 0x1d4   :  { %v5585_v35 = vadd.f32 %v5584_v34, %v5583_v45  ;;  %v8160_v3 = vadd.f32 %v5646_v59, %v3820_v40 }
 0x1d5   :  { %v5586_v43 = vpop.f32.mrf.mxu0  ;;  %4408 = vmatmul.mubr.bf16.gmra.mxu0 %v6580_v42  ;;  %v5648_v56 = vpop.f32.mrf.mxu1 }
 0x1d6   :  { %v3823_v33 = vadd.f32 %v5585_v35, %v8040_v55  ;;  %4415 = vmatprep.mubr.bf16.mxu0 %v6587_v31  ;;  %v5649_v44 = vadd.f32 %v5648_v56, %v5647_v38 }
 0x1d7   :  { %v5587_v46 = vpop.f32.mrf.mxu0  ;;  %v5650_v15 = vpop.f32.mrf.mxu1 }
 0x1d8   :  { %v5588_v11 = vadd.f32 %v5587_v46, %v5586_v43  ;;  %v8163_v13 = vadd.f32 %v5649_v44, %v3823_v33 }
 0x1d9   :  { %v5589_v50 = vpop.f32.mrf.mxu0  ;;  %v5651_v49 = vpop.f32.mrf.mxu1 }
 0x1da   :  { %v3828_v21 = vadd.f32 %v5588_v11, %v8052_v16  ;;  %v5652_v5 = vadd.f32 %v5651_v49, %v5650_v15 }
 0x1db   :  { %v5590_v36 = vpop.f32.mrf.mxu0  ;;  %v5653_v55 = vpop.f32.mrf.mxu1 }
 0x1dc   :  { %v5591_v58 = vadd.f32 %v5590_v36, %v5589_v50  ;;  %v8169_v60 = vadd.f32 %v5652_v5, %v3828_v21 }
 0x1dd   :  { %v5592_v61 = vpop.f32.mrf.mxu0  ;;  %4416 = vmatmul.mubr.bf16.gmra.mxu0 %v6585_v53  ;;  %v5654_v28 = vpop.f32.mrf.mxu1 }
 0x1de   :  { %v3831_v25 = vadd.f32 %v5591_v58, %v8058_v30  ;;  %v5655_v1 = vadd.f32 %v5654_v28, %v5653_v55 }
 0x1df   :  { %v5593_v4 = vpop.f32.mrf.mxu0  ;;  %v5656_v6 = vpop.f32.mrf.mxu1 }
 0x1e0   :  { %v5594_v27 = vadd.f32 %v5593_v4, %v5592_v61  ;;  %v8172_v48 = vadd.f32 %v5655_v1, %v3831_v25 }
 0x1e1   :  { %v5595_v39 = vpop.f32.mrf.mxu0  ;;  %v5657_v9 = vpop.f32.mrf.mxu1 }
 0x1e2   :  { %v3836_v16 = vadd.f32 %v5594_v27, %v8070_v62  ;;  %v5658_v32 = vadd.f32 %v5657_v9, %v5656_v6 }
 0x1e3   :  { %v5596_v8 = vpop.f32.mrf.mxu0  ;;  %v5659_v14 = vpop.f32.mrf.mxu1 }
 0x1e4   :  { %v5597_v10 = vadd.f32 %v5596_v8, %v5595_v39  ;;  %v8175_v47 = vadd.f32 %v5658_v32, %v3836_v16 }
 0x1e5   :  { %v5678_v24 = vpop.f32.mrf.mxu0  ;;  %v5660_v19 = vpop.f32.mrf.mxu1 }
 0x1e6   :  { %v3839_v30 = vadd.f32 %v5597_v10, %v8076_v57  ;;  %v5661_v20 = vadd.f32 %v5660_v19, %v5659_v14 }
 0x1e7   :  { %v5679_v23 = vpop.f32.mrf.mxu0  ;;  %v5742_v54 = vpop.f32.mrf.mxu1 }
 0x1e8   :  { %v5680_v51 = vadd.f32 %v5679_v23, %v5678_v24  ;;  %v8178_v22 = vadd.f32 %v5661_v20, %v3839_v30 }
 0x1e9   :  { %v5681_v26 = vpop.f32.mrf.mxu0  ;;  %v5743_v45 = vpop.f32.mrf.mxu1 }
 0x1ea   :  { %v3974_v62 = vadd.f32 %v5680_v51, %v8088_v7  ;;  %v5744_v42 = vadd.f32 %v5743_v45, %v5742_v54 }
 0x1eb   :  { %v5682_v40 = vpop.f32.mrf.mxu0  ;;  %v5745_v31 = vpop.f32.mrf.mxu1 }
 0x1ec   :  { %v5683_v2 = vadd.f32 %v5682_v40, %v5681_v26  ;;  %v8181_v59 = vadd.f32 %v5744_v42, %v3974_v62 }
 0x1ed   :  { %v5684_v34 = vpop.f32.mrf.mxu0  ;;  %v5746_v35 = vpop.f32.mrf.mxu1 }
 0x1ee   :  { %v3977_v57 = vadd.f32 %v5683_v2, %v8094_v63  ;;  %v5747_v38 = vadd.f32 %v5746_v35, %v5745_v31 }
 0x1ef   :  { %v5685_v43 = vpop.f32.mrf.mxu0  ;;  %v5748_v56 = vpop.f32.mrf.mxu1 }
 0x1f0   :  { %v5686_v33 = vadd.f32 %v5685_v43, %v5684_v34  ;;  %v8184_v44 = vadd.f32 %v5747_v38, %v3977_v57 }
 0x1f1   :  { %v5687_v46 = vpop.f32.mrf.mxu0  ;;  %v5749_v11 = vpop.f32.mrf.mxu1 }
 0x1f2   :  { %v3982_v7 = vadd.f32 %v5686_v33, %v8106_v41  ;;  %v5750_v15 = vadd.f32 %v5749_v11, %v5748_v56 }
 0x1f3   :  { %v5688_v50 = vpop.f32.mrf.mxu0  ;;  %v5751_v21 = vpop.f32.mrf.mxu1 }
 0x1f4   :  { %v5689_v53 = vadd.f32 %v5688_v50, %v5687_v46  ;;  %v8187_v49 = vadd.f32 %v5750_v15, %v3982_v7 }
 0x1f5   :  { %v5690_v5 = vpop.f32.mrf.mxu0  ;;  %v5752_v36 = vpop.f32.mrf.mxu1 }
 0x1f6   :  { %v3985_v63 = vadd.f32 %v5689_v53, %v8112_v52  ;;  %v5753_v58 = vadd.f32 %v5752_v36, %v5751_v21 }
 0x1f7   :  { %v5691_v55 = vpop.f32.mrf.mxu0  ;;  %v5754_v25 = vpop.f32.mrf.mxu1 }
 0x1f8   :  { %v5692_v61 = vadd.f32 %v5691_v55, %v5690_v5  ;;  %v8190_v28 = vadd.f32 %v5753_v58, %v3985_v63 }
 0x1f9   :  { %v5693_v1 = vpop.f32.mrf.mxu0  ;;  %v5755_v4 = vpop.f32.mrf.mxu1 }
 0x1fa   :  { %v3990_v41 = vadd.f32 %v5692_v61, %v8124_v0  ;;  %v5756_v27 = vadd.f32 %v5755_v4, %v5754_v25 }
 0x1fb   :  { %v5694_v6 = vpop.f32.mrf.mxu0  ;;  %v5757_v16 = vpop.f32.mrf.mxu1 }
 0x1fc   :  { %v5695_v39 = vadd.f32 %v5694_v6, %v5693_v1  ;;  %v8193_v9 = vadd.f32 %v5756_v27, %v3990_v41 }
 0x1fd   :  { %v5696_v32 = vpop.f32.mrf.mxu0  ;;  %v5758_v8 = vpop.f32.mrf.mxu1 }
 0x1fe   :  { %v3993_v52 = vadd.f32 %v5695_v39, %v8127_v12  ;;  %v5759_v10 = vadd.f32 %v5758_v8, %v5757_v16 }
 0x1ff   :  { %v5697_v14 = vpop.f32.mrf.mxu0  ;;  %v5760_v30 = vpop.f32.mrf.mxu1 }
 0x200   :  { %v5698_v24 = vadd.f32 %v5697_v14, %v5696_v32  ;;  %v8196_v19 = vadd.f32 %v5759_v10, %v3993_v52 }
 0x201   :  { %v5699_v20 = vpop.f32.mrf.mxu0  ;;  %v5761_v23 = vpop.f32.mrf.mxu1 }
 0x202   :  { %v3998_v0 = vadd.f32 %v5698_v24, %v8136_v18  ;;  %v5762_v51 = vadd.f32 %v5761_v23, %v5760_v30 }
 0x203   :  { %v5700_v54 = vpop.f32.mrf.mxu0  ;;  %v5763_v62 = vpop.f32.mrf.mxu1 }
 0x204   :  { %v5701_v26 = vadd.f32 %v5700_v54, %v5699_v20  ;;  %v8199_v45 = vadd.f32 %v5762_v51, %v3998_v0 }
 0x205   :  { %v5702_v42 = vpop.f32.mrf.mxu0  ;;  %v5764_v40 = vpop.f32.mrf.mxu1 }
 0x206   :  { %v4001_v12 = vadd.f32 %v5701_v26, %v8139_v37  ;;  %v5765_v2 = vadd.f32 %v5764_v40, %v5763_v62 }
 0x207   :  { %v5703_v31 = vpop.f32.mrf.mxu0  ;;  %v5766_v57 = vpop.f32.mrf.mxu1 }
 0x208   :  { %v5704_v34 = vadd.f32 %v5703_v31, %v5702_v42  ;;  %v8202_v35 = vadd.f32 %v5765_v2, %v4001_v12 }
 0x209   :  { %v5705_v38 = vpop.f32.mrf.mxu0  ;;  %v5767_v43 = vpop.f32.mrf.mxu1 }
 0x20a   :  { %v4006_v18 = vadd.f32 %v5704_v34, %v8148_v17  ;;  %v5768_v33 = vadd.f32 %v5767_v43, %v5766_v57  ;;  %v6615_v43 = vmov 0.0  }
 0x20b   :  { %v5706_v56 = vpop.f32.mrf.mxu0  ;;  %v5769_v7 = vpop.f32.mrf.mxu1  ;;  %6035 = vmatprep.subr.mxu1 %v6615_v43  ;;  %6043 = vmatprep.mubr.msk.f32.mxu1 %vm6616_vm0, %v6615_v43 }
 0x20c   :  { %v5707_v46 = vadd.f32 %v5706_v56, %v5705_v38  ;;  %v8205_v11 = vadd.f32 %v5768_v33, %v4006_v18 }
 0x20d   :  { %v5708_v15 = vpop.f32.mrf.mxu0  ;;  %v5770_v50 = vpop.f32.mrf.mxu1 }
 0x20e   :  { %v4009_v37 = vadd.f32 %v5707_v46, %v8151_v29  ;;  %v5771_v53 = vadd.f32 %v5770_v50, %v5769_v7 }
 0x20f   :  { %v5709_v21 = vpop.f32.mrf.mxu0  ;;  %v5772_v63 = vpop.f32.mrf.mxu1 }
 0x210   :  { %v5710_v5 = vadd.f32 %v5709_v21, %v5708_v15  ;;  %v8208_v36 = vadd.f32 %v5771_v53, %v4009_v37  ;;  %v4610_v37 = vld [vmem:[%s8469_s4 + $0x18] sm:$0xff] }
 0x211   :  { %v5711_v58 = vpop.f32.mrf.mxu0  ;;  %v5773_v55 = vpop.f32.mrf.mxu1  ;;  %6036 = vmatpush3.msra.mxu1 %v4610_v37 }
 0x212   :  { %v4014_v17 = vadd.f32 %v5710_v5, %v8160_v3  ;;  %v5774_v61 = vadd.f32 %v5773_v55, %v5772_v63  ;;  %6037 = vmatprep.subr.mxu1 %v6615_v43 }
 0x213   :  { %v5712_v25 = vpop.f32.mrf.mxu0  ;;  %v5775_v41 = vpop.f32.mrf.mxu1 }
 0x214   :  { %v5713_v1 = vadd.f32 %v5712_v25, %v5711_v58  ;;  %v8211_v4 = vadd.f32 %v5774_v61, %v4014_v17 }
 0x215   :  { %v5714_v27 = vpop.f32.mrf.mxu0  ;;  %v5776_v6 = vpop.f32.mrf.mxu1 }
 0x216   :  { %v4017_v29 = vadd.f32 %v5713_v1, %v8163_v13  ;;  %v5777_v39 = vadd.f32 %v5776_v6, %v5775_v41 }
 0x217   :  { %v5715_v16 = vpop.f32.mrf.mxu0  ;;  %v5778_v52 = vpop.f32.mrf.mxu1 }
 0x218   :  { %v5716_v32 = vadd.f32 %v5715_v16, %v5714_v27  ;;  %v8214_v8 = vadd.f32 %v5777_v39, %v4017_v29 }
 0x219   :  { %v5717_v10 = vpop.f32.mrf.mxu0  ;;  %v5779_v14 = vpop.f32.mrf.mxu1 }
 0x21a   :  { %v4022_v3 = vadd.f32 %v5716_v32, %v8169_v60  ;;  %v5780_v24 = vadd.f32 %v5779_v14, %v5778_v52 }
 0x21b   :  { %v5718_v30 = vpop.f32.mrf.mxu0  ;;  %v5781_v0 = vpop.f32.mrf.mxu1 }
 0x21c   :  { %v5719_v20 = vadd.f32 %v5718_v30, %v5717_v10  ;;  %v8217_v23 = vadd.f32 %v5780_v24, %v4022_v3 }
 0x21d   :  { %v5720_v51 = vpop.f32.mrf.mxu0  ;;  %v5782_v54 = vpop.f32.mrf.mxu1 }
 0x21e   :  { %v4025_v13 = vadd.f32 %v5719_v20, %v8172_v48  ;;  %v5783_v26 = vadd.f32 %v5782_v54, %v5781_v0 }
 0x21f   :  { %v5721_v62 = vpop.f32.mrf.mxu0  ;;  %v5784_v12 = vpop.f32.mrf.mxu1 }
 0x220   :  { %v5722_v42 = vadd.f32 %v5721_v62, %v5720_v51  ;;  %v8220_v40 = vadd.f32 %v5783_v26, %v4025_v13  ;;  %v4607_v26 = vld [vmem:[%s8469_s4] sm:$0xff] }
 0x221   :  { %v5723_v2 = vpop.f32.mrf.mxu0  ;;  %v5785_v31 = vpop.f32.mrf.mxu1 }
 0x222   :  { %v4030_v60 = vadd.f32 %v5722_v42, %v8175_v47  ;;  %v5786_v34 = vadd.f32 %v5785_v31, %v5784_v12 }
 0x223   :  { %v5724_v57 = vpop.f32.mrf.mxu0  ;;  %v5787_v18 = vpop.f32.mrf.mxu1 }
 0x224   :  { %v5725_v38 = vadd.f32 %v5724_v57, %v5723_v2  ;;  %v8223_v33 = vadd.f32 %v5786_v34, %v4030_v60 }
 0x225   :  { %v5806_v48 = vpop.f32.mrf.mxu0  ;;  %v5788_v46 = vpop.f32.mrf.mxu1 }
 0x226   :  { %v4033_v56 = vadd.f32 %v5725_v38, %v8178_v22  ;;  %v5789_v7 = vadd.f32 %v5788_v46, %v5787_v18 }
 0x227   :  { %v5807_v15 = vpop.f32.mrf.mxu0  ;;  %v5870_v50 = vpop.f32.mrf.mxu1 }
 0x228   :  { %v5808_v47 = vadd.f32 %v5807_v15, %v5806_v48  ;;  %v8229_v53 = vadd.f32 %v5789_v7, %v4033_v56 }
 0x229   :  { %v5809_v21 = vpop.f32.mrf.mxu0  ;;  %v5871_v63 = vpop.f32.mrf.mxu1 }
 0x22a   :  { %v4168_v5 = vadd.f32 %v5808_v47, %v8181_v59  ;;  %v5872_v58 = vadd.f32 %v5871_v63, %v5870_v50 }
 0x22b   :  { %v5810_v17 = vpop.f32.mrf.mxu0  ;;  %v8232_v55 = vpop.f32.mrf.mxu1 }
 0x22c   :  { %v5811_v22 = vadd.f32 %v5810_v17, %v5809_v21  ;;  %v8234_v61 = vadd.f32 %v5872_v58, %v4168_v5 }
 0x22d   :  { %v5812_v25 = vpop.f32.mrf.mxu0  ;;  %v8239_v41 = vpop.f32.mrf.mxu1 }
 0x22e   :  { %v8237_v1 = vadd.f32 %v5811_v22, %v8184_v44 }
 0x22f   :  { %v5813_v27 = vpop.f32.mrf.mxu0  ;;  %v8241_v6 = vpop.f32.mrf.mxu1 }
 0x230   :  { %v5814_v29 = vadd.f32 %v5813_v27, %v5812_v25 }
 0x231   :  { %v5815_v39 = vpop.f32.mrf.mxu0  ;;  %v8246_v16 = vpop.f32.mrf.mxu1 }
 0x232   :  { %v8244_v59 = vadd.f32 %v5814_v29, %v8187_v49  ;;  %v4609_v49 = vld [vmem:[%s8469_s4 + $0x10] sm:$0xff] }
 0x233   :  { %v5816_v32 = vpop.f32.mrf.mxu0  ;;  %v8248_v10 = vpop.f32.mrf.mxu1  ;;  %6038 = vmatpush3.msra.mxu1 %v4609_v49 }
 0x234   :  { %v5817_v52 = vadd.f32 %v5816_v32, %v5815_v39  ;;  %6039 = vmatprep.subr.mxu1 %v6615_v43 }
 0x235   :  { %v5818_v3 = vpop.f32.mrf.mxu0  ;;  %v8253_v14 = vpop.f32.mrf.mxu1 }
 0x236   :  { %v8251_v44 = vadd.f32 %v5817_v52, %v8190_v28  ;;  %v4608_v28 = vld [vmem:[%s8469_s4 + $0x8] sm:$0xff] }
 0x237   :  { %v5819_v24 = vpop.f32.mrf.mxu0  ;;  %v8255_v20 = vpop.f32.mrf.mxu1  ;;  %6040 = vmatpush3.msra.mxu1 %v4608_v28 }
 0x238   :  { %v5820_v30 = vadd.f32 %v5819_v24, %v5818_v3  ;;  %6041 = vmatprep.subr.mxu1 %v6615_v43 }
 0x239   :  { %v5821_v0 = vpop.f32.mrf.mxu0  ;;  %v8263_v13 = vpop.f32.mrf.mxu1  ;;  %6042 = vmatpush3.msra.mxu1 %v4607_v26 }
 0x23a   :  { %v8261_v51 = vadd.f32 %v5820_v30, %v8193_v9 }
 0x23b   :  { %v5822_v54 = vpop.f32.mrf.mxu0  ;;  %v8271_v42 = vpop.f32.mrf.mxu1 }
 0x23c   :  { %v5823_v62 = vadd.f32 %v5822_v54, %v5821_v0 }
 0x23d   :  { %v5824_v9 = vpop.f32.mrf.mxu0  ;;  %v8276_v2 = vpop.f32.mrf.mxu1 }
 0x23e   :  { %v8274_v12 = vadd.f32 %v5823_v62, %v8196_v19 }
 0x23f   :  { %v5825_v60 = vpop.f32.mrf.mxu0  ;;  %v8278_v34 = vpop.f32.mrf.mxu1 }
 0x240   :  { %v5826_v31 = vadd.f32 %v5825_v60, %v5824_v9 }
 0x241   :  { %v5827_v57 = vpop.f32.mrf.mxu0  ;;  %v8283_v18 = vpop.f32.mrf.mxu1 }
 0x242   :  { %v8281_v38 = vadd.f32 %v5826_v31, %v8199_v45 }
 0x243   :  { %v5828_v48 = vpop.f32.mrf.mxu0  ;;  %v8285_v43 = vpop.f32.mrf.mxu1 }
 0x244   :  { %v5829_v56 = vadd.f32 %v5828_v48, %v5827_v57 }
 0x245   :  { %v5830_v46 = vpop.f32.mrf.mxu0  ;;  %v8290_v7 = vpop.f32.mrf.mxu1 }
 0x246   :  { %v8288_v19 = vadd.f32 %v5829_v56, %v8202_v35 }
 0x247   :  { %v5831_v15 = vpop.f32.mrf.mxu0  ;;  %v8292_v47 = vpop.f32.mrf.mxu1 }
 0x248   :  { %v5832_v37 = vadd.f32 %v5831_v15, %v5830_v46 }
 0x249   :  { %v5833_v50 = vpop.f32.mrf.mxu0  ;;  %v8297_v21 = vpop.f32.mrf.mxu1 }
 0x24a   :  { %v8295_v45 = vadd.f32 %v5832_v37, %v8205_v11 }
 0x24b   :  { %v5834_v5 = vpop.f32.mrf.mxu0  ;;  %v8299_v58 = vpop.f32.mrf.mxu1 }
 0x24c   :  { %v5835_v63 = vadd.f32 %v5834_v5, %v5833_v50 }
 0x24d   :  { %v5836_v17 = vpop.f32.mrf.mxu0  ;;  %v8304_v22 = vpop.f32.mrf.mxu1 }
 0x24e   :  { %v8302_v35 = vadd.f32 %v5835_v63, %v8208_v36 }
 0x24f   :  { %v5837_v25 = vpop.f32.mrf.mxu0  ;;  %v8306_v29 = vpop.f32.mrf.mxu1 }
 0x250   :  { %v5838_v27 = vadd.f32 %v5837_v25, %v5836_v17 }
 0x251   :  { %v5839_v39 = vpop.f32.mrf.mxu0  ;;  %v8311_v32 = vpop.f32.mrf.mxu1 }
 0x252   :  { %v8309_v11 = vadd.f32 %v5838_v27, %v8211_v4  ;;  %v5875_v27 = vadd.f32 %v8239_v41, %v8232_v55  ;;  %v4537_v55 = vld [vmem:[%s8468_s3] sm:$0xff] }
 0x253   :  { %v5840_v52 = vpop.f32.mrf.mxu0  ;;  %v8313_v24 = vpop.f32.mrf.mxu1 }
 0x254   :  { %v5841_v3 = vadd.f32 %v5840_v52, %v5839_v39 }
 0x255   :  { %v5842_v30 = vpop.f32.mrf.mxu0  ;;  %v8318_v49 = vpop.f32.mrf.mxu1 }
 0x256   :  { %v8316_v36 = vadd.f32 %v5841_v3, %v8214_v8 }
 0x257   :  { %v5843_v0 = vpop.f32.mrf.mxu0  ;;  %v8320_v54 = vpop.f32.mrf.mxu1 }
 0x258   :  { %v5844_v28 = vadd.f32 %v5843_v0, %v5842_v30 }
 0x259   :  { %v5845_v26 = vpop.f32.mrf.mxu0  ;;  %v8325_v62 = vpop.f32.mrf.mxu1 }
 0x25a   :  { %v8323_v4 = vadd.f32 %v5844_v28, %v8217_v23  ;;  %v4268_v28 = vadd.f32 %v5875_v27, %v8237_v1  ;;  %v5881_v1 = vadd.f32 %v8253_v14, %v8248_v10 }
 0x25b   :  { %v5846_v9 = vpop.f32.mrf.mxu0  ;;  %v8327_v31 = vpop.f32.mrf.mxu1 }
 0x25c   :  { %v5847_v60 = vadd.f32 %v5846_v9, %v5845_v26  ;;  %v5878_v26 = vadd.f32 %v8246_v16, %v8241_v6  ;;  %v4538_v6 = vld [vmem:[%s8468_s3 + $0x8] sm:$0xff] }
 0x25d   :  { %v5848_v57 = vpop.f32.mrf.mxu0  ;;  %v8332_v48 = vpop.f32.mrf.mxu1 }
 0x25e   :  { %v8330_v8 = vadd.f32 %v5847_v60, %v8220_v40 }
 0x25f   :  { %v5849_v56 = vpop.f32.mrf.mxu0  ;;  %v8334_v15 = vpop.f32.mrf.mxu1 }
 0x260   :  { %v5850_v46 = vadd.f32 %v5849_v56, %v5848_v57 }
 0x261   :  { %v8336_v37 = vpop.f32.mrf.mxu0  ;;  %v8341_v50 = vpop.f32.mrf.mxu1 }
 0x262   :  { %v8339_v23 = vadd.f32 %v5850_v46, %v8223_v33 }
 0x263   :  { %v8343_v5 = vpop.f32.mrf.mxu0  ;;  %v8345_v63 = vpop.f32.mrf.mxu1 }
 0x264   :  { %8472 = vst [vmem:[#allocation6_spill] sm:$0xff] %v8345_v63 }
 0x265   :  { %v5934_v17 = vpop.f32.mrf.mxu0  ;;  %v8347_v40 = vpop.f32.mrf.mxu1 }
 0x266   :  { %8473 = vst [vmem:[#allocation7_spill] sm:$0xff] %v8347_v40 }
 0x267   :  { %v5935_v25 = vpop.f32.mrf.mxu0  ;;  %v6021_v52 = vpop.f32.mrf.mxu1 }
 0x268   :  { %v5936_v39 = vadd.f32 %v5935_v25, %v5934_v17 }
 0x269   :  { %v5937_v3 = vpop.f32.mrf.mxu0  ;;  %v4458_v33 = vpop.f32.mrf.mxu1 }
 0x26a   :  { %v4362_v30 = vadd.f32 %v5936_v39, %v8234_v61  ;;  %v4273_v61 = vadd.f32 %v5878_v26, %v8244_v59  ;;  %v4276_v59 = vadd.f32 %v5881_v1, %v8251_v44  ;;  %v5887_v44 = vadd.f32 %v8276_v2, %v8271_v42  ;;  %v4540_v1 = vld [vmem:[%s8468_s3 + $0x18] sm:$0xff] }
 0x26b   :  { %v5938_v0 = vpop.f32.mrf.mxu0  ;;  %v6022_v57 = vpop.f32.mrf.mxu1 }
 0x26c   :  { %v5939_v9 = vadd.f32 %v5938_v0, %v5937_v3  ;;  %v4459_v60 = vadd.f32 %v4458_v33, %v4362_v30  ;;  %v5884_v33 = vadd.f32 %v8263_v13, %v8255_v20  ;;  %v4284_v42 = vadd.f32 %v5887_v44, %v8274_v12 }
 0x26d   :  { %v5940_v56 = vpop.f32.mrf.mxu0  ;;  %v4461_v63 = vpop.f32.mrf.mxu1  ;;  %v5893_v12 = vadd.f32 %v8290_v7, %v8285_v43 }
 0x26e   :  { %v4521_v46 = vmax.f32 %v4459_v60, 0.0  ;;  %v4365_v40 = vadd.f32 %v5939_v9, %v4268_v28  ;;  %v4281_v20 = vadd.f32 %v5884_v33, %v8261_v51  ;;  %v5890_v51 = vadd.f32 %v8283_v18, %v8278_v34 }
 0x26f   :  { %v5941_v41 = vpop.f32.mrf.mxu0  ;;  %v6025_v27 = vpop.f32.mrf.mxu1  ;;  %v4292_v43 = vadd.f32 %v5893_v12, %v8288_v19  ;;  %v5899_v19 = vadd.f32 %v8304_v22, %v8299_v58 }
 0x270   :  { %v5942_v17 = vadd.f32 %v5941_v41, %v5940_v56  ;;  %v4462_v25 = vadd.f32 %v4461_v63, %v4365_v40  ;;  %v4553_v39 = vmul.f32 %v4537_v55, %v4521_v46  ;;  %v4539_v63 = vld [vmem:[%s8468_s3 + $0x10] sm:$0xff] }
 0x271   :  { %v5943_v16 = vpop.f32.mrf.mxu0  ;;  %v4474_v26 = vpop.f32.mrf.mxu1  ;;  %v4300_v58 = vadd.f32 %v5899_v19, %v8302_v35  ;;  %v5905_v35 = vadd.f32 %v8318_v49, %v8313_v24 }
 0x272   :  { %v4370_v3 = vadd.f32 %v5942_v17, %v4273_v61  ;;  %v4522_v30 = vmax.f32 %v4462_v25, 0.0  ;;  %v4570_v9 = vsel %vm4569_vm1, %v4553_v39, 0.0 }
 0x273   :  { %v5944_v0 = vpop.f32.mrf.mxu0  ;;  %v6026_v25 = vpop.f32.mrf.mxu1  ;;  %v4308_v24 = vadd.f32 %v5905_v35, %v8316_v36  ;;  %v5911_v36 = vadd.f32 %v8332_v48, %v8327_v31 }
 0x274   :  { %v4467_v28 = vadd.f32 %v6021_v52, %v4370_v3  ;;  %v4554_v10 = vmul.f32 %v4538_v6, %v4522_v30  ;;  %v5945_v14 = vadd.f32 %v5944_v0, %v5943_v16  ;;  %v4541_v0 = vld [vmem:[%s8468_s3 + $0x20] sm:$0xff] }
 0x275   :  { %v5946_v40 = vpop.f32.mrf.mxu0 }
 0x276   :  { %v4523_v60 = vmax.f32 %v4467_v28, 0.0  ;;  %v4571_v56 = vsel %vm4569_vm1, %v4554_v10, 0.0  ;;  %v4373_v46 = vadd.f32 %v5945_v14, %v4276_v59  ;;  %v4477_v28 = vpop.f32.mrf.mxu1 }
 0x277   :  { %v4572_v13 = vadd.f32 %v4571_v56, %v4570_v9  ;;  %v5947_v55 = vpop.f32.mrf.mxu0  ;;  %v4542_v56 = vld [vmem:[%s8468_s3 + $0x28] sm:$0xff] }
 0x278   :  { %v4555_v52 = vmul.f32 %v4539_v63, %v4523_v60  ;;  %v4470_v41 = vadd.f32 %v6022_v57, %v4373_v46  ;;  %v5948_v61 = vadd.f32 %v5947_v55, %v5946_v40  ;;  %v4289_v40 = vadd.f32 %v5890_v51, %v8281_v38 }
 0x279   :  { %v5949_v17 = vpop.f32.mrf.mxu0  ;;  %v5896_v38 = vadd.f32 %v8297_v21, %v8292_v47 }
 0x27a   :  { %v4573_v6 = vsel %vm4569_vm1, %v4555_v52, 0.0  ;;  %v4524_v16 = vmax.f32 %v4470_v41, 0.0  ;;  %v4378_v39 = vadd.f32 %v5948_v61, %v4281_v20  ;;  %v6029_v20 = vpop.f32.mrf.mxu1 }
 0x27b   :  { %v4574_v3 = vadd.f32 %v4573_v6, %v4572_v13  ;;  %v5950_v30 = vpop.f32.mrf.mxu0 }
 0x27c   :  { %v4556_v2 = vmul.f32 %v4540_v1, %v4524_v16  ;;  %v5951_v57 = vadd.f32 %v5950_v30, %v5949_v17  ;;  %v4475_v33 = vadd.f32 %v4474_v26, %v4378_v39  ;;  %v4543_v17 = vld [vmem:[%s8468_s3 + $0x30] sm:$0xff]  ;;  %v4490_v16 = vpop.f32.mrf.mxu1  ;;  %v4297_v30 = vadd.f32 %v5896_v38, %v8295_v45 }
 0x27d   :  { %v5952_v59 = vpop.f32.mrf.mxu0  ;;  %v5902_v45 = vadd.f32 %v8311_v32, %v8306_v29 }
 0x27e   :  { %v4525_v10 = vmax.f32 %v4475_v33, 0.0  ;;  %v4575_v14 = vsel %vm4569_vm1, %v4556_v2, 0.0  ;;  %v4381_v63 = vadd.f32 %v5951_v57, %v4284_v42  ;;  %v4544_v57 = vld [vmem:[%s8468_s3 + $0x38] sm:$0xff] }
 0x27f   :  { %v4576_v34 = vadd.f32 %v4575_v14, %v4574_v3  ;;  %v5953_v18 = vpop.f32.mrf.mxu0 }
 0x280   :  { %v4557_v9 = vmul.f32 %v4541_v0, %v4525_v10  ;;  %v5954_v60 = vadd.f32 %v5953_v18, %v5952_v59  ;;  %v4478_v26 = vadd.f32 %v4477_v28, %v4381_v63  ;;  %v6030_v0 = vpop.f32.mrf.mxu1 }
 0x281   :  { %v5955_v46 = vpop.f32.mrf.mxu0 }
 0x282   :  { %v4577_v13 = vsel %vm4569_vm1, %v4557_v9, 0.0  ;;  %v4386_v55 = vadd.f32 %v5954_v60, %v4289_v40  ;;  %v4526_v44 = vmax.f32 %v4478_v26, 0.0  ;;  %v4493_v12 = vpop.f32.mrf.mxu1 }
 0x283   :  { %v4578_v52 = vadd.f32 %v4577_v13, %v4576_v34  ;;  %v5956_v41 = vpop.f32.mrf.mxu0  ;;  %v4545_v34 = vld [vmem:[%s8468_s3 + $0x40] sm:$0xff] }
 0x284   :  { %v4483_v7 = vadd.f32 %v6025_v27, %v4386_v55  ;;  %v4558_v61 = vmul.f32 %v4542_v56, %v4526_v44  ;;  %v5957_v1 = vadd.f32 %v5956_v41, %v5955_v46  ;;  %v4305_v56 = vadd.f32 %v5902_v45, %v8309_v11  ;;  %v4546_v44 = vld [vmem:[%s8468_s3 + $0x48] sm:$0xff] }
 0x285   :  { %v5958_v6 = vpop.f32.mrf.mxu0  ;;  %v5908_v11 = vadd.f32 %v8325_v62, %v8320_v54 }
 0x286   :  { %v4527_v39 = vmax.f32 %v4483_v7, 0.0  ;;  %v4579_v51 = vsel %vm4569_vm1, %v4558_v61, 0.0  ;;  %v4389_v3 = vadd.f32 %v5957_v1, %v4292_v43  ;;  %v6033_v1 = vpop.f32.mrf.mxu1 }
 0x287   :  { %v4580_v47 = vadd.f32 %v4579_v51, %v4578_v52  ;;  %v5959_v21 = vpop.f32.mrf.mxu0 }
 0x288   :  { %v4559_v27 = vmul.f32 %v4543_v17, %v4527_v39  ;;  %v4486_v42 = vadd.f32 %v6026_v25, %v4389_v3  ;;  %v5960_v2 = vadd.f32 %v5959_v21, %v5958_v6  ;;  %v4506_v21 = vpop.f32.mrf.mxu1 }
 0x289   :  { %v5961_v33 = vpop.f32.mrf.mxu0 }
 0x28a   :  { %v4581_v59 = vsel %vm4569_vm1, %v4559_v27, 0.0  ;;  %v4528_v28 = vmax.f32 %v4486_v42, 0.0  ;;  %v4394_v10 = vadd.f32 %v5960_v2, %v4297_v30  ;;  %v4548_v42 = vld [vmem:[%s8468_s3 + $0x58] sm:$0xff]  ;;  %v6034_v48 = vpop.f32.mrf.mxu1 }
 0x28b   :  { %v4582_v14 = vadd.f32 %v4581_v59, %v4580_v47  ;;  %v5962_v63 = vpop.f32.mrf.mxu0  ;;  %v4313_v47 = vadd.f32 %v5908_v11, %v8323_v4  ;;  %v5914_v4 = vadd.f32 %v8341_v50, %v8334_v15 }
 0x28c   :  { %v4560_v22 = vmul.f32 %v4544_v57, %v4528_v28  ;;  %v5963_v25 = vadd.f32 %v5962_v63, %v5961_v33  ;;  %v4491_v40 = vadd.f32 %v4490_v16, %v4394_v10  ;;  %v4547_v16 = vld [vmem:[%s8468_s3 + $0x50] sm:$0xff]  ;;  %v5853_v28 = vadd.f32 %v8343_v5, %v8336_v37 }
 0x28d   :  { %v5964_v18 = vpop.f32.mrf.mxu0  ;;  %v4321_v50 = vadd.f32 %v5914_v4, %v8339_v23 }
 0x28e   :  { %v4529_v9 = vmax.f32 %v4491_v40, 0.0  ;;  %v4583_v60 = vsel %vm4569_vm1, %v4560_v22, 0.0  ;;  %v4397_v26 = vadd.f32 %v5963_v25, %v4300_v58  ;;  %v4549_v58 = vld [vmem:[%s8468_s3 + $0x60] sm:$0xff]  ;;  %v4227_v37 = vadd.f32 %v5853_v28, %v8229_v53 }
 0x28f   :  { %v4584_v29 = vadd.f32 %v4583_v60, %v4582_v14  ;;  %v5965_v32 = vpop.f32.mrf.mxu0 }
 0x290   :  { %v4561_v46 = vmul.f32 %v4545_v34, %v4529_v9  ;;  %v5966_v13 = vadd.f32 %v5965_v32, %v5964_v18  ;;  %v4494_v55 = vadd.f32 %v4493_v12, %v4397_v26  ;;  %v4509_v34 = vpop.f32.mrf.mxu1  ;;  %v8475_v12 = vld [vmem:[#allocation7_spill] sm:$0xff] }
 0x291   :  { %v5967_v38 = vpop.f32.mrf.mxu0 }
 0x292   :  { %v4585_v52 = vsel %vm4569_vm1, %v4561_v46, 0.0  ;;  %v4402_v41 = vadd.f32 %v5966_v13, %v4305_v56  ;;  %v4530_v43 = vmax.f32 %v4494_v55, 0.0 }
 0x293   :  { %v4586_v7 = vadd.f32 %v4585_v52, %v4584_v29  ;;  %v5968_v61 = vpop.f32.mrf.mxu0  ;;  %v4550_v29 = vld [vmem:[%s8468_s3 + $0x68] sm:$0xff] }
 0x294   :  { %v4499_v49 = vadd.f32 %v6029_v20, %v4402_v41  ;;  %v4562_v17 = vmul.f32 %v4546_v44, %v4530_v43  ;;  %v5969_v6 = vadd.f32 %v5968_v61, %v5967_v38  ;;  %v4551_v41 = vld [vmem:[%s8468_s3 + $0x70] sm:$0xff] }
 0x295   :  { %v5970_v39 = vpop.f32.mrf.mxu0 }
 0x296   :  { %v4531_v51 = vmax.f32 %v4499_v49, 0.0  ;;  %v4587_v3 = vsel %vm4569_vm1, %v4562_v17, 0.0  ;;  %v4405_v30 = vadd.f32 %v5969_v6, %v4308_v24  ;;  %v4552_v17 = vld [vmem:[%s8468_s3 + $0x78] sm:$0xff]  ;;  %s6617_s3 = smov [#allocation3]  }
 0x297   :  { %v4588_v54 = vadd.f32 %v4587_v3, %v4586_v7  ;;  %v5971_v62 = vpop.f32.mrf.mxu0  ;;  %s4708_s28 = sshll.u32 %s6617_s3, 4  ;;  %s4709_s28 = int_to_ptr.vmem [resolvable:$true] %s4708_s28 }
 0x298   :  { %v4563_v20 = vmul.f32 %v4547_v16, %v4531_v51  ;;  %v4502_v19 = vadd.f32 %v6030_v0, %v4405_v30  ;;  %v5972_v27 = vadd.f32 %v5971_v62, %v5970_v39  ;;  %v4316_v0 = vadd.f32 %v5911_v36, %v8330_v8  ;;  %v8474_v8 = vld [vmem:[#allocation6_spill] sm:$0xff]  ;;  %s6592_s29 = scalar_lea.vmem %s4709_s28, 16  ;;  %s6596_s5 = scalar_lea.vmem %s4709_s28, 32 }
 0x299   :  { %v5973_v2 = vpop.f32.mrf.mxu0  ;;  %v5917_v9 = vadd.f32 %v8475_v12, %v8474_v8  ;;  %p6593_p0 = scmp.ne.s32.totalorder %s4709_s28, %s6592_s29  ;;  %p6597_p1 = scmp.lt.s32.totalorder %s4709_s28, %s4709_s28 }
 0x29a   :  { %v4589_v57 = vsel %vm4569_vm1, %v4563_v20, 0.0  ;;  %v4532_v33 = vmax.f32 %v4502_v19, 0.0  ;;  %v4410_v59 = vadd.f32 %v5972_v27, %v4313_v47  ;;  %v4617_v20 = vlaneseq  ;;  %p6598_p2 = scmp.lt.s32.totalorder %s6596_s5, %s6592_s29 }
 0x29b   :  { %v4590_v10 = vadd.f32 %v4589_v57, %v4588_v54  ;;  %v5974_v31 = vpop.f32.mrf.mxu0  ;;  %v4324_v55 = vadd.f32 %v5917_v9, %v4227_v37 }
 0x29c   :  { %v4564_v45 = vmul.f32 %v4548_v42, %v4532_v33  ;;  %v4507_v14 = vadd.f32 %v4506_v21, %v4410_v59  ;;  %v5975_v63 = vadd.f32 %v5974_v31, %v5973_v2  ;;  %v4618_v19 = vshrl.u32 %v4617_v20, 7  ;;  %v4615_v42 = vpop.permute.xlu0 %4614  ;;  %p6599_p3 = por %p6598_p2, %p6597_p1 }
 0x29d   :  { %v5976_v22 = vpop.f32.mrf.mxu0 }
 0x29e   :  { %v4533_v25 = vmax.f32 %v4507_v14, 0.0  ;;  %v4591_v40 = vsel %vm4569_vm1, %v4564_v45, 0.0  ;;  %v4413_v15 = vadd.f32 %v5975_v63, %v4316_v0  ;;  %v4619_v27 = vsub.s32 0, %v4618_v19  ;;  %p6600_p4 = pnand %p6599_p3, %p6593_p0 }
 0x29f   :  { %v4592_v5 = vadd.f32 %v4591_v40, %v4590_v10  ;;  %v5977_v18 = vpop.f32.mrf.mxu0 }
 0x2a0   :  { %v4565_v60 = vmul.f32 %v4549_v58, %v4533_v25  ;;  %v4510_v26 = vadd.f32 %v4509_v34, %v4413_v15  ;;  %v5978_v56 = vadd.f32 %v5977_v18, %v5976_v22  ;;  %v4620_v2 = vrot.slane %v4615_v42, %v4619_v27 }
 0x2a1   :  { %v5979_v32 = vpop.f32.mrf.mxu0 }
 0x2a2   :  { %v4593_v35 = vsel %vm4569_vm1, %v4565_v60, 0.0  ;;  %v4534_v46 = vmax.f32 %v4510_v26, 0.0  ;;  %v4418_v23 = vadd.f32 %v5978_v56, %v4321_v50 }
 0x2a3   :  { %v4594_v13 = vadd.f32 %v4593_v35, %v4592_v5  ;;  %v5980_v53 = vpop.f32.mrf.mxu0 }
 0x2a4   :  { %v4566_v44 = vmul.f32 %v4550_v29, %v4534_v46  ;;  %v4515_v38 = vadd.f32 %v6033_v1, %v4418_v23  ;;  %v5981_v52 = vadd.f32 %v5980_v53, %v5979_v32 }
 0x2a6   :  { %v4595_v43 = vsel %vm4569_vm1, %v4566_v44, 0.0  ;;  %v4535_v11 = vmax.f32 %v4515_v38, 0.0  ;;  %v4421_v7 = vadd.f32 %v5981_v52, %v4324_v55 }
 0x2a7   :  { %v4596_v61 = vadd.f32 %v4595_v43, %v4594_v13 }
 0x2a8   :  { %v4567_v24 = vmul.f32 %v4551_v41, %v4535_v11  ;;  %v4518_v49 = vadd.f32 %v6034_v48, %v4421_v7 }
 0x2aa   :  { %v4597_v6 = vsel %vm4569_vm1, %v4567_v24, 0.0  ;;  %v4536_v16 = vmax.f32 %v4518_v49, 0.0 }
 0x2ab   :  { %v4598_v1 = vadd.f32 %v4597_v6, %v4596_v61 }
 0x2ac   :  { %v4568_v39 = vmul.f32 %v4552_v17, %v4536_v16 }
 0x2ae   :  { %v4599_v51 = vsel %vm4569_vm1, %v4568_v39, 0.0 }
 0x2af   :  { %v4600_v3 = vadd.f32 %v4599_v51, %v4598_v1 }
 0x2b1   :  { %v4601_v30 = vrot.slane %v4600_v3, 4 }
 0x2b3   :  { %v4602_v47 = vadd.f32 %v4601_v30, %v4600_v3 }
 0x2b5   :  { %v4603_v54 = vrot.slane %v4602_v47, 2 }
 0x2b7   :  { %v4604_v62 = vadd.f32 %v4603_v54, %v4602_v47 }
 0x2b9   :  { %v4605_v21 = vrot.slane %v4604_v62, 1 }
 0x2bb   :  { %v4606_v36 = vadd.f32 %v4605_v21, %v4604_v62 }
 0x2bd   :  { %6044 = vmatmul.mubr.msk.f32.vlgmr.msra.gmra.mxu1 %vm4569_vm1, %v4606_v36 }
 0x37d   :  { %v4690_v57 = vpop.f32.mrf.mxu1 }
 0x37e   :  { %v4691_v33 = vadd.f32 %v4690_v57, %v4620_v2 }
 0x37f   :  { %v6045_v59 = vpop.f32.mrf.mxu1 }
 0x380   :  { %v5149_v4 = vmul.f32 -1.442695, %v4691_v33 }
 0x382   :  { %6588 = vpow2.f32 %v5149_v4 }
 0x38f   :  { %v6589_v28 = vpop.eup %6588 }
 0x390   :  { %v4697_v10 = vadd.f32 1.0, %v6589_v28 }
 0x392   :  { %6590 = vrcp.f32 %v4697_v10 }
 0x39f   :  { %v6591_v31 = vpop.eup %6590 }
 0x3a0   :  { %4701 = vst.msk [vmem:[#allocation3] sm:$0x1] %vm4700_vm2, %v6591_v31 }
 0x3a1   :  { %6603 = shalt.err (!%p6600_p4)
}
 0x3a2   :  { %4711 = dma.vmem_to_hbm [thread:$0]  %s4709_s28, 16, %s8471_s6, [#allocation4]  }
 0x3a3   :  { %6612 = dma.done.wait [#allocation4], 16  }
 0x3a4   :  { %6613 = vsyncadd [#allocation4], 4294967280 }
 0x3a5   :  { %4715 = vsyncpa [#allocation4], 1 }

</bundles_post_ra>
